<compile_context>
chip_gen: v5e
topology: v5e:2x2
jax: 0.10.0
libtpu: 0.0.40
codegen_flags: <defaults>
</compile_context>

<pallas_src>
import math

import jax
import jax.numpy as jnp
from jax.experimental import pallas as pl
from jax.experimental.pallas import tpu as pltpu

# ---- model hyper-parameters (small, but consistent with the module) ---------
TARGET_SIZE = 16          # vocabulary size
D_MODEL = 32              # embed dim (must be divisible by nhead=8)
N_LAYERS = 2
N_HEADS = 8               # fixed by the module (nhead=8)
HEAD_DIM = D_MODEL // N_HEADS
D_FF = 2048               # nn.TransformerDecoderLayer default dim_feedforward
PAD_INDEX = 1
LN_EPS = 1e-5             # nn.LayerNorm default eps
MAX_LEN = 20              # PositionalEncoding max_len
NEG_INF = -1e30           # stand-in for float('-inf') in additive masks
VOCAB_PAD = 128           # lane-dense padded vocab width for the kernel output
NUM_BATCH_CHUNKS = 2      # grid size; 2 keeps both v7x TCs busy, batch folds into sublanes

WEIGHT_NAMES = (
    "wqkv_s", "bqkv_s", "wo_s", "bo_s",                    # self-attn (fused QKV)
    "wq_c", "bq_c", "wkv_c", "bkv_c", "wo_c", "bo_c",      # cross-attn (fused KV)
    "w1", "b1", "w2", "b2",                                # feed-forward
    "ln1_w", "ln1_b", "ln2_w", "ln2_b", "ln3_w", "ln3_b",  # layer norms
    "w_dec", "b_dec",                                      # final vocab projection
)
# weights used only as matmul RHS -> shipped to the kernel in bf16 (halves DMA bytes)
MATMUL_WEIGHTS = frozenset(
    {"wqkv_s", "wo_s", "wq_c", "wkv_c", "wo_c", "w1", "w2", "w_dec"})


# ----------------------------- shared math -----------------------------------
def _dot(a, b, in_kernel):
    """2-D matmul, f32 accumulation; single-pass bf16 MXU operands in-kernel."""
    if in_kernel:
        return jnp.dot(a.astype(jnp.bfloat16), b.astype(jnp.bfloat16),
                       preferred_element_type=jnp.float32)
    return jnp.dot(a, b, preferred_element_type=jnp.float32,
                   precision=jax.lax.Precision.HIGHEST)


def _bmm(eq, a, b, in_kernel):
    """Head-batched contraction (leading batch axis, flash-attention style)."""
    if in_kernel:
        return jnp.einsum(eq, a.astype(jnp.bfloat16), b.astype(jnp.bfloat16),
                          preferred_element_type=jnp.float32)
    return jnp.einsum(eq, a, b, preferred_element_type=jnp.float32,
                      precision=jax.lax.Precision.HIGHEST)


def _split_heads(x, in_kernel):
    """(N, D) -> (H, N, HEAD_DIM)."""
    x = x.reshape(x.shape[0], N_HEADS, HEAD_DIM)
    if in_kernel:
        return pltpu.einshape("nhd->hnd", x)
    return jnp.swapaxes(x, 0, 1)


def _merge_heads(x, in_kernel):
    """(H, N, HEAD_DIM) -> (N, D)."""
    if in_kernel:
        x = pltpu.einshape("hnd->nhd", x)
    else:
        x = jnp.swapaxes(x, 0, 1)
    return x.reshape(x.shape[0], D_MODEL)


def _layernorm(x, w, b):
    mu = jnp.mean(x, axis=-1, keepdims=True)
    var = jnp.mean(jnp.square(x - mu), axis=-1, keepdims=True)
    return (x - mu) * jax.lax.rsqrt(var + LN_EPS) * w + b


def _softmax(s, in_kernel):
    s = s - jnp.max(s, axis=-1, keepdims=True)
    p = jnp.exp(s)
    denom = jnp.sum(p, axis=-1, keepdims=True)
    if in_kernel:
        return p * pl.reciprocal(denom, approx=True)
    return p / denom


def _attention(q, k, v, wo, bo, bias, in_kernel):
    """Multi-head attention core. q/k/v already projected (biases included).

    q: (Nq, D), k/v: (Nk, D), bias: additive mask broadcastable to (Nq, Nk).
    """
    scale = 1.0 / math.sqrt(HEAD_DIM)
    qh = _split_heads(q * scale, in_kernel)         # (H, Nq, hd)
    kh = _split_heads(k, in_kernel)                 # (H, Nk, hd)
    vh = _split_heads(v, in_kernel)                 # (H, Nk, hd)
    s = _bmm("hqd,hkd->hqk", qh, kh, in_kernel)     # (H, Nq, Nk) f32
    p = _softmax(s + bias[None, :, :], in_kernel)
    o = _bmm("hqk,hkd->hqd", p, vh, in_kernel)      # (H, Nq, hd) f32
    return _dot(_merge_heads(o, in_kernel), wo, in_kernel) + bo


def _decoder_forward(x, mem, self_bias, cross_bias, w, in_kernel):
    """N_LAYERS of post-norm TransformerDecoderLayer + final vocab projection.

    x: (N, D) target stream, mem: (M, D) memory, self_bias: (N, N) additive
    (causal + tgt key-padding [+ batch block-diagonal]), cross_bias: additive
    mask broadcastable to (N, M).  `w` maps weight names to stacked arrays OR
    Pallas Refs — both support the indexing used below.
    """
    D = D_MODEL
    for l in range(N_LAYERS):
        # --- self-attention (fused QKV) + residual + LayerNorm (post-norm) ---
        qkv = _dot(x, w["wqkv_s"][l, :, :], in_kernel) + w["bqkv_s"][l:l + 1, :]
        sa = _attention(qkv[:, 0:D], qkv[:, D:2 * D], qkv[:, 2 * D:3 * D],
                        w["wo_s"][l, :, :], w["bo_s"][l:l + 1, :],
                        self_bias, in_kernel)
        x = _layernorm(x + sa, w["ln1_w"][l:l + 1, :], w["ln1_b"][l:l + 1, :])
        # --- cross-attention (fused KV) + residual + LayerNorm ---------------
        q = _dot(x, w["wq_c"][l, :, :], in_kernel) + w["bq_c"][l:l + 1, :]
        kv = _dot(mem, w["wkv_c"][l, :, :], in_kernel) + w["bkv_c"][l:l + 1, :]
        ca = _attention(q, kv[:, 0:D], kv[:, D:2 * D],
                        w["wo_c"][l, :, :], w["bo_c"][l:l + 1, :],
                        cross_bias, in_kernel)
        x = _layernorm(x + ca, w["ln2_w"][l:l + 1, :], w["ln2_b"][l:l + 1, :])
        # --- feed-forward (ReLU) + residual + LayerNorm -----------------------
        h = jnp.maximum(_dot(x, w["w1"][l, :, :], in_kernel)
                        + w["b1"][l:l + 1, :], 0.0)
        ff = _dot(h, w["w2"][l, :, :], in_kernel) + w["b2"][l:l + 1, :]
        x = _layernorm(x + ff, w["ln3_w"][l:l + 1, :], w["ln3_b"][l:l + 1, :])
    # final `decoder` nn.Linear (kernel side is lane-padded to VOCAB_PAD)
    return _dot(x, w["w_dec"][:, :], in_kernel) + w["b_dec"][:, :]


# ----------------------------- Pallas kernel ----------------------------------
def decoder_kernel(x_ref, mem_ref, sbias_ref, cbias_ref, *rest):
    w_refs = rest[:len(WEIGHT_NAMES)]
    out_ref = rest[len(WEIGHT_NAMES)]
    w = dict(zip(WEIGHT_NAMES, w_refs))
    out_ref[0] = _decoder_forward(x_ref[0], mem_ref[0], sbias_ref[0],
                                  cbias_ref[0], w, in_kernel=True)


# ----------------------------- glue (plain JAX) --------------------------------
def _positional_encoding(max_len, d_model):
    pos = jnp.arange(max_len, dtype=jnp.float32)[:, None]
    j = jnp.arange(d_model)[None, :]
    angle = pos / jnp.power(10000.0, (2.0 * (j // 2)) / d_model)
    return jnp.where(j % 2 == 0, jnp.sin(angle), jnp.cos(angle)).astype(jnp.float32)


def _embed_and_masks(target, memory_pad_mask, params):
    """Embedding gather + positional encoding + per-batch additive biases."""
    B, T = target.shape
    x = params["emb"][target].astype(jnp.float32)                # (B, T, D)
    x = x + _positional_encoding(MAX_LEN, D_MODEL)[None, :T, :]
    causal = jnp.where(jnp.arange(T)[:, None] >= jnp.arange(T)[None, :],
                       0.0, NEG_INF).astype(jnp.float32)         # (T, T)
    tpad = jnp.abs(target - PAD_INDEX) < 0.5                     # (B, T)
    tgt_bias = (causal[None, :, :]
                + jnp.where(tpad, NEG_INF, 0.0).astype(jnp.float32)[:, None, :])  # (B,T,T)
    mem_bias = jnp.where(memory_pad_mask, NEG_INF, 0.0).astype(jnp.float32)       # (B,S)
    return x, tgt_bias, mem_bias


@jax.jit
def transformer_decoder_forward(target, memory, memory_pad_mask, params):
    """target: (B, T) int32 token ids; memory: (B, S, D) float32;
    memory_pad_mask: (B, S) bool, True = padded (ignored) memory position."""
    B, T = target.shape
    S = memory.shape[1]
    x, tgt_bias, mem_bias = _embed_and_masks(target, memory_pad_mask, params)

    # --- fold the batch into the sublane axis of a small chunked grid ---------
    C = NUM_BATCH_CHUNKS if (B % NUM_BATCH_CHUNKS == 0) else 1
    BC = B // C
    N, M = BC * T, BC * S
    x_f = x.reshape(C, N, D_MODEL)
    mem_f = memory.astype(jnp.float32).reshape(C, M, D_MODEL)

    # block-diagonal additive biases keep batches within a chunk independent
    rq = jnp.arange(N) // T                      # batch-in-chunk of each query row
    tq = jnp.arange(N) % T                       # position within target sequence
    same_t = rq[:, None] == rq[None, :]          # (N, N)
    tgt_bias_r = tgt_bias.reshape(C, BC, T, T)
    self_bias = jnp.where(
        same_t[None, :, :],
        tgt_bias_r[:, rq[:, None], tq[:, None], tq[None, :]],
        NEG_INF)                                 # (C, N, N)
    rk = jnp.arange(M) // S                      # batch-in-chunk of each memory col
    sk = jnp.arange(M) % S
    same_m = rq[:, None] == rk[None, :]          # (N, M)
    mem_bias_r = mem_bias.reshape(C, BC, S)
    cross_bias = jnp.where(
        same_m[None, :, :],
        mem_bias_r[:, rq[:, None], sk[None, :]],
        NEG_INF)                                 # (C, N, M)

    # --- lane-dense vocab projection + bf16 matmul weights --------------------
    w_dec_p = (jnp.zeros((D_MODEL, VOCAB_PAD), jnp.float32)
               .at[:, :TARGET_SIZE].set(params["w_dec"]))
    b_dec_p = (jnp.zeros((1, VOCAB_PAD), jnp.float32)
               .at[:, :TARGET_SIZE].set(params["b_dec"]))
    prepped = dict(params, w_dec=w_dec_p, b_dec=b_dec_p)
    weights = [prepped[n].astype(jnp.bfloat16) if n in MATMUL_WEIGHTS
               else prepped[n] for n in WEIGHT_NAMES]

    def const_spec(a):
        nd = a.ndim
        return pl.BlockSpec(a.shape, lambda c, _nd=nd: (0,) * _nd)

    in_specs = [
        pl.BlockSpec((1, N, D_MODEL), lambda c: (c, 0, 0)),   # x (per chunk)
        pl.BlockSpec((1, M, D_MODEL), lambda c: (c, 0, 0)),   # memory (per chunk)
        pl.BlockSpec((1, N, N), lambda c: (c, 0, 0)),         # self-attn bias
        pl.BlockSpec((1, N, M), lambda c: (c, 0, 0)),         # cross-attn bias
    ] + [const_spec(wt) for wt in weights]
    out_spec = pl.BlockSpec((1, N, VOCAB_PAD), lambda c: (c, 0, 0))

    out_padded = pl.pallas_call(
        decoder_kernel,
        out_shape=jax.ShapeDtypeStruct((C, N, VOCAB_PAD), jnp.float32),
        grid_spec=pltpu.PrefetchScalarGridSpec(
            num_scalar_prefetch=0,
            grid=(C,),
            in_specs=in_specs,
            out_specs=out_spec,
        ),
        compiler_params=pltpu.CompilerParams(
            dimension_semantics=("parallel",)),
    )(x_f, mem_f, self_bias, cross_bias, *weights)

    # un-fold chunks and strip the lane padding back to the real vocab width
    return out_padded.reshape(B, T, VOCAB_PAD)[:, :, :TARGET_SIZE]


def reference_forward(target, memory, memory_pad_mask, params):
    """Pure-JAX f32 reference (same math, per batch element, no Pallas)."""
    x, tgt_bias, mem_bias = _embed_and_masks(target, memory_pad_mask, params)
    w = {n: params[n] for n in WEIGHT_NAMES}
    outs = []
    for b in range(x.shape[0]):
        outs.append(_decoder_forward(x[b], memory[b].astype(jnp.float32),
                                     tgt_bias[b], mem_bias[b][None, :],
                                     w, in_kernel=False))
    return jnp.stack(outs)


# ----------------------------- parameter init ----------------------------------
def init_params(key):
    keys = jax.random.split(key, 20)
    it = iter(keys)

    def nrm(shape, scale=0.02):
        return (scale * jax.random.normal(next(it), shape)).astype(jnp.float32)

    L, D, F, V = N_LAYERS, D_MODEL, D_FF, TARGET_SIZE
    emb = nrm((V, D), scale=1.0 / math.sqrt(D))
    emb = emb.at[PAD_INDEX].set(0.0)     # nn.Embedding(padding_idx=PAD_INDEX)
    return {
        "emb": emb,
        "wqkv_s": nrm((L, D, 3 * D)), "bqkv_s": nrm((L, 3 * D)),
        "wo_s": nrm((L, D, D)), "bo_s": nrm((L, D)),
        "wq_c": nrm((L, D, D)), "bq_c": nrm((L, D)),
        "wkv_c": nrm((L, D, 2 * D)), "bkv_c": nrm((L, 2 * D)),
        "wo_c": nrm((L, D, D)), "bo_c": nrm((L, D)),
        "w1": nrm((L, D, F)), "b1": nrm((L, F)),
        "w2": nrm((L, F, D)), "b2": nrm((L, D)),
        "ln1_w": jnp.ones((L, D), jnp.float32), "ln1_b": jnp.zeros((L, D), jnp.float32),
        "ln2_w": jnp.ones((L, D), jnp.float32), "ln2_b": jnp.zeros((L, D), jnp.float32),
        "ln3_w": jnp.ones((L, D), jnp.float32), "ln3_b": jnp.zeros((L, D), jnp.float32),
        "w_dec": nrm((D, V)), "b_dec": nrm((1, V)),
    }


if __name__ == "__main__":
    key = jax.random.PRNGKey(0)
    k_par, k_tgt, k_mem = jax.random.split(key, 3)
    params = init_params(k_par)

    B, T, S = 2, 8, 16
    target = jax.random.randint(k_tgt, (B, T), 0, TARGET_SIZE, dtype=jnp.int32)
    target = jnp.where(target == PAD_INDEX, 2, target)   # keep pads explicit
    target = target.at[1, -2:].set(PAD_INDEX)            # padded tail in batch 1
    memory = jax.random.normal(k_mem, (B, S, D_MODEL), dtype=jnp.float32)
    memory_pad_mask = jnp.zeros((B, S), dtype=bool).at[0, -3:].set(True)

    out = jax.block_until_ready(
        transformer_decoder_forward(target, memory, memory_pad_mask, params))
    ref = jax.block_until_ready(
        reference_forward(target, memory, memory_pad_mask, params))

    assert out.shape == (B, T, TARGET_SIZE), out.shape
    assert bool(jnp.isfinite(out).all())
    # kernel uses bf16 MXU operands + approx reciprocal vs f32/HIGHEST reference
    assert bool(jnp.allclose(out, ref, rtol=1e-2, atol=1e-2)), \
        float(jnp.max(jnp.abs(out - ref)))
    print("KERNEL_OK")
</pallas_src>

<mosaic_0001>
module attributes {stable_mosaic.version = 11 : i64} {
  func.func @decoder_kernel(%arg0: i32, %arg1: memref<1x8x32xf32, #tpu.memory_space<vmem>>, %arg2: memref<1x16x32xf32, #tpu.memory_space<vmem>>, %arg3: memref<1x8x8xf32, #tpu.memory_space<vmem>>, %arg4: memref<1x8x16xf32, #tpu.memory_space<vmem>>, %arg5: memref<2x32x96xbf16, #tpu.memory_space<vmem>>, %arg6: memref<2x96xf32, #tpu.memory_space<vmem>>, %arg7: memref<2x32x32xbf16, #tpu.memory_space<vmem>>, %arg8: memref<2x32xf32, #tpu.memory_space<vmem>>, %arg9: memref<2x32x32xbf16, #tpu.memory_space<vmem>>, %arg10: memref<2x32xf32, #tpu.memory_space<vmem>>, %arg11: memref<2x32x64xbf16, #tpu.memory_space<vmem>>, %arg12: memref<2x64xf32, #tpu.memory_space<vmem>>, %arg13: memref<2x32x32xbf16, #tpu.memory_space<vmem>>, %arg14: memref<2x32xf32, #tpu.memory_space<vmem>>, %arg15: memref<2x32x2048xbf16, #tpu.memory_space<vmem>>, %arg16: memref<2x2048xf32, #tpu.memory_space<vmem>>, %arg17: memref<2x2048x32xbf16, #tpu.memory_space<vmem>>, %arg18: memref<2x32xf32, #tpu.memory_space<vmem>>, %arg19: memref<2x32xf32, #tpu.memory_space<vmem>>, %arg20: memref<2x32xf32, #tpu.memory_space<vmem>>, %arg21: memref<2x32xf32, #tpu.memory_space<vmem>>, %arg22: memref<2x32xf32, #tpu.memory_space<vmem>>, %arg23: memref<2x32xf32, #tpu.memory_space<vmem>>, %arg24: memref<2x32xf32, #tpu.memory_space<vmem>>, %arg25: memref<32x128xbf16, #tpu.memory_space<vmem>>, %arg26: memref<1x128xf32, #tpu.memory_space<vmem>>, %arg27: memref<1x8x128xf32, #tpu.memory_space<vmem>>) attributes {dimension_semantics = [#tpu.dimension_semantics<parallel>], iteration_bounds = array<i64: 2>, scalar_prefetch = 0 : i64, scratch_operands = 0 : i64, tpu.core_type = #tpu.core_type<tc>, window_params = [{transform_indices = @transform_0, window_bounds = array<i64: 1, 8, 32>}, {transform_indices = @transform_1, window_bounds = array<i64: 1, 16, 32>}, {transform_indices = @transform_2, window_bounds = array<i64: 1, 8, 8>}, {transform_indices = @transform_3, window_bounds = array<i64: 1, 8, 16>}, {pipeline_mode = #tpu.pipeline_mode<synchronous>, transform_indices = @transform_4, window_bounds = array<i64: 2, 32, 96>}, {pipeline_mode = #tpu.pipeline_mode<synchronous>, transform_indices = @transform_5, window_bounds = array<i64: 2, 96>}, {pipeline_mode = #tpu.pipeline_mode<synchronous>, transform_indices = @transform_6, window_bounds = array<i64: 2, 32, 32>}, {pipeline_mode = #tpu.pipeline_mode<synchronous>, transform_indices = @transform_7, window_bounds = array<i64: 2, 32>}, {pipeline_mode = #tpu.pipeline_mode<synchronous>, transform_indices = @transform_8, window_bounds = array<i64: 2, 32, 32>}, {pipeline_mode = #tpu.pipeline_mode<synchronous>, transform_indices = @transform_9, window_bounds = array<i64: 2, 32>}, {pipeline_mode = #tpu.pipeline_mode<synchronous>, transform_indices = @transform_10, window_bounds = array<i64: 2, 32, 64>}, {pipeline_mode = #tpu.pipeline_mode<synchronous>, transform_indices = @transform_11, window_bounds = array<i64: 2, 64>}, {pipeline_mode = #tpu.pipeline_mode<synchronous>, transform_indices = @transform_12, window_bounds = array<i64: 2, 32, 32>}, {pipeline_mode = #tpu.pipeline_mode<synchronous>, transform_indices = @transform_13, window_bounds = array<i64: 2, 32>}, {pipeline_mode = #tpu.pipeline_mode<synchronous>, transform_indices = @transform_14, window_bounds = array<i64: 2, 32, 2048>}, {pipeline_mode = #tpu.pipeline_mode<synchronous>, transform_indices = @transform_15, window_bounds = array<i64: 2, 2048>}, {pipeline_mode = #tpu.pipeline_mode<synchronous>, transform_indices = @transform_16, window_bounds = array<i64: 2, 2048, 32>}, {pipeline_mode = #tpu.pipeline_mode<synchronous>, transform_indices = @transform_17, window_bounds = array<i64: 2, 32>}, {pipeline_mode = #tpu.pipeline_mode<synchronous>, transform_indices = @transform_18, window_bounds = array<i64: 2, 32>}, {pipeline_mode = #tpu.pipeline_mode<synchronous>, transform_indices = @transform_19, window_bounds = array<i64: 2, 32>}, {pipeline_mode = #tpu.pipeline_mode<synchronous>, transform_indices = @transform_20, window_bounds = array<i64: 2, 32>}, {pipeline_mode = #tpu.pipeline_mode<synchronous>, transform_indices = @transform_21, window_bounds = array<i64: 2, 32>}, {pipeline_mode = #tpu.pipeline_mode<synchronous>, transform_indices = @transform_22, window_bounds = array<i64: 2, 32>}, {pipeline_mode = #tpu.pipeline_mode<synchronous>, transform_indices = @transform_23, window_bounds = array<i64: 2, 32>}, {pipeline_mode = #tpu.pipeline_mode<synchronous>, transform_indices = @transform_24, window_bounds = array<i64: 32, 128>}, {pipeline_mode = #tpu.pipeline_mode<synchronous>, transform_indices = @transform_25, window_bounds = array<i64: 1, 128>}, {transform_indices = @transform_26, window_bounds = array<i64: 1, 8, 128>}]} {
    %c0 = arith.constant 0 : index
    %c0_0 = arith.constant 0 : index
    %c0_1 = arith.constant 0 : index
    %0 = vector.load %arg1[%c0, %c0_0, %c0_1] : memref<1x8x32xf32, #tpu.memory_space<vmem>>, vector<1x8x32xf32>
    %1 = vector.shape_cast %0 : vector<1x8x32xf32> to vector<8x32xf32>
    %c0_2 = arith.constant 0 : index
    %c0_3 = arith.constant 0 : index
    %c0_4 = arith.constant 0 : index
    %2 = vector.load %arg2[%c0_2, %c0_3, %c0_4] : memref<1x16x32xf32, #tpu.memory_space<vmem>>, vector<1x16x32xf32>
    %3 = vector.shape_cast %2 : vector<1x16x32xf32> to vector<16x32xf32>
    %c0_5 = arith.constant 0 : index
    %c0_6 = arith.constant 0 : index
    %c0_7 = arith.constant 0 : index
    %4 = vector.load %arg3[%c0_5, %c0_6, %c0_7] : memref<1x8x8xf32, #tpu.memory_space<vmem>>, vector<1x8x8xf32>
    %5 = vector.shape_cast %4 : vector<1x8x8xf32> to vector<8x8xf32>
    %c0_8 = arith.constant 0 : index
    %c0_9 = arith.constant 0 : index
    %c0_10 = arith.constant 0 : index
    %6 = vector.load %arg4[%c0_8, %c0_9, %c0_10] : memref<1x8x16xf32, #tpu.memory_space<vmem>>, vector<1x8x16xf32>
    %7 = vector.shape_cast %6 : vector<1x8x16xf32> to vector<8x16xf32>
    %c0_11 = arith.constant 0 : index
    %c0_12 = arith.constant 0 : index
    %c0_13 = arith.constant 0 : index
    %8 = vector.load %arg5[%c0_11, %c0_12, %c0_13] : memref<2x32x96xbf16, #tpu.memory_space<vmem>>, vector<1x32x96xbf16>
    %9 = vector.shape_cast %8 : vector<1x32x96xbf16> to vector<32x96xbf16>
    %10 = arith.truncf %1 : vector<8x32xf32> to vector<8x32xbf16>
    %cst = arith.constant dense<0.000000e+00> : vector<8x96xf32>
    %11 = tpu.matmul %10, %9, %cst {dimension_numbers = #tpu.dot_dimension_numbers<[1], [0], [0], [1], [0, 0, 1, 1], [], []>} : vector<8x32xbf16>, vector<32x96xbf16>, vector<8x96xf32> -> vector<8x96xf32>
    %c0_14 = arith.constant 0 : index
    %c0_15 = arith.constant 0 : index
    %12 = vector.load %arg6[%c0_14, %c0_15] : memref<2x96xf32, #tpu.memory_space<vmem>>, vector<1x96xf32>
    %13 = vector.broadcast %12 : vector<1x96xf32> to vector<8x96xf32>
    %14 = arith.addf %11, %13 : vector<8x96xf32>
    %15 = vector.extract_strided_slice %14 {offsets = [0, 0], sizes = [8, 32], strides = [1, 1]} : vector<8x96xf32> to vector<8x32xf32>
    %16 = vector.extract_strided_slice %14 {offsets = [0, 32], sizes = [8, 32], strides = [1, 1]} : vector<8x96xf32> to vector<8x32xf32>
    %17 = vector.extract_strided_slice %14 {offsets = [0, 64], sizes = [8, 32], strides = [1, 1]} : vector<8x96xf32> to vector<8x32xf32>
    %c0_16 = arith.constant 0 : index
    %c0_17 = arith.constant 0 : index
    %c0_18 = arith.constant 0 : index
    %18 = vector.load %arg7[%c0_16, %c0_17, %c0_18] : memref<2x32x32xbf16, #tpu.memory_space<vmem>>, vector<1x32x32xbf16>
    %19 = vector.shape_cast %18 : vector<1x32x32xbf16> to vector<32x32xbf16>
    %c0_19 = arith.constant 0 : index
    %c0_20 = arith.constant 0 : index
    %20 = vector.load %arg8[%c0_19, %c0_20] : memref<2x32xf32, #tpu.memory_space<vmem>>, vector<1x32xf32>
    %cst_21 = arith.constant 5.000000e-01 : f32
    %21 = vector.broadcast %cst_21 : f32 to vector<8x32xf32>
    %22 = arith.mulf %15, %21 : vector<8x32xf32>
    %23 = vector.shape_cast %22 : vector<8x32xf32> to vector<8x8x4xf32>
    %24 = tpu.transpose %23, [1, 0, 2] : vector<8x8x4xf32> -> vector<8x8x4xf32>
    %25 = vector.shape_cast %16 : vector<8x32xf32> to vector<8x8x4xf32>
    %26 = tpu.transpose %25, [1, 0, 2] : vector<8x8x4xf32> -> vector<8x8x4xf32>
    %27 = vector.shape_cast %17 : vector<8x32xf32> to vector<8x8x4xf32>
    %28 = tpu.transpose %27, [1, 0, 2] : vector<8x8x4xf32> -> vector<8x8x4xf32>
    %29 = arith.truncf %24 : vector<8x8x4xf32> to vector<8x8x4xbf16>
    %30 = arith.truncf %26 : vector<8x8x4xf32> to vector<8x8x4xbf16>
    "tpu.trace_start"() <{level = 10 : i32, message = "hqd,hkd->hqk"}> : () -> ()
    %cst_22 = arith.constant dense<0.000000e+00> : vector<8x8x8xf32>
    %31 = tpu.matmul %29, %30, %cst_22 {dimension_numbers = #tpu.dot_dimension_numbers<[2], [2], [1], [1], [0, 0, 0, 1, 1, 1], [0], [0]>} : vector<8x8x4xbf16>, vector<8x8x4xbf16>, vector<8x8x8xf32> -> vector<8x8x8xf32>
    "tpu.trace_stop"() : () -> ()
    %32 = vector.shape_cast %5 : vector<8x8xf32> to vector<1x8x8xf32>
    %33 = vector.broadcast %32 : vector<1x8x8xf32> to vector<8x8x8xf32>
    %34 = arith.addf %31, %33 : vector<8x8x8xf32>
    %cst_23 = arith.constant dense<0xFF800000> : vector<8x8xf32>
    %35 = vector.multi_reduction <maximumf>, %34, %cst_23 [2] : vector<8x8x8xf32> to vector<8x8xf32>
    %36 = vector.shape_cast %35 : vector<8x8xf32> to vector<8x8x1xf32>
    %37 = vector.broadcast %36 : vector<8x8x1xf32> to vector<8x8x8xf32>
    %38 = arith.subf %34, %37 : vector<8x8x8xf32>
    %39 = math.exp %38 : vector<8x8x8xf32>
    %cst_24 = arith.constant dense<0.000000e+00> : vector<8x8xf32>
    %40 = vector.multi_reduction <add>, %39, %cst_24 [2] : vector<8x8x8xf32> to vector<8x8xf32>
    %41 = vector.shape_cast %40 : vector<8x8xf32> to vector<8x8x1xf32>
    %42 = tpu.reciprocal %41 {approx = true} : vector<8x8x1xf32> -> vector<8x8x1xf32>
    %43 = vector.broadcast %42 : vector<8x8x1xf32> to vector<8x8x8xf32>
    %44 = arith.mulf %39, %43 : vector<8x8x8xf32>
    %45 = arith.truncf %44 : vector<8x8x8xf32> to vector<8x8x8xbf16>
    %46 = arith.truncf %28 : vector<8x8x4xf32> to vector<8x8x4xbf16>
    "tpu.trace_start"() <{level = 10 : i32, message = "hqk,hkd->hqd"}> : () -> ()
    %cst_25 = arith.constant dense<0.000000e+00> : vector<8x8x4xf32>
    %47 = tpu.matmul %45, %46, %cst_25 {dimension_numbers = #tpu.dot_dimension_numbers<[2], [1], [1], [2], [0, 0, 0, 1, 1, 2], [0], [0]>} : vector<8x8x8xbf16>, vector<8x8x4xbf16>, vector<8x8x4xf32> -> vector<8x8x4xf32>
    "tpu.trace_stop"() : () -> ()
    %48 = tpu.transpose %47, [1, 0, 2] : vector<8x8x4xf32> -> vector<8x8x4xf32>
    %49 = vector.shape_cast %48 : vector<8x8x4xf32> to vector<8x32xf32>
    %50 = arith.truncf %49 : vector<8x32xf32> to vector<8x32xbf16>
    %cst_26 = arith.constant dense<0.000000e+00> : vector<8x32xf32>
    %51 = tpu.matmul %50, %19, %cst_26 {dimension_numbers = #tpu.dot_dimension_numbers<[1], [0], [0], [1], [0, 0, 1, 1], [], []>} : vector<8x32xbf16>, vector<32x32xbf16>, vector<8x32xf32> -> vector<8x32xf32>
    %52 = vector.broadcast %20 : vector<1x32xf32> to vector<8x32xf32>
    %53 = arith.addf %51, %52 : vector<8x32xf32>
    %54 = arith.addf %1, %53 : vector<8x32xf32>
    %c0_27 = arith.constant 0 : index
    %c0_28 = arith.constant 0 : index
    %55 = vector.load %arg19[%c0_27, %c0_28] : memref<2x32xf32, #tpu.memory_space<vmem>>, vector<1x32xf32>
    %c0_29 = arith.constant 0 : index
    %c0_30 = arith.constant 0 : index
    %56 = vector.load %arg20[%c0_29, %c0_30] : memref<2x32xf32, #tpu.memory_space<vmem>>, vector<1x32xf32>
    %cst_31 = arith.constant dense<0.000000e+00> : vector<8xf32>
    %57 = vector.multi_reduction <add>, %54, %cst_31 [1] : vector<8x32xf32> to vector<8xf32>
    %58 = vector.shape_cast %57 : vector<8xf32> to vector<8x1xf32>
    %cst_32 = arith.constant 3.200000e+01 : f32
    %59 = vector.broadcast %cst_32 : f32 to vector<8x1xf32>
    %60 = arith.divf %58, %59 : vector<8x1xf32>
    %61 = vector.broadcast %60 : vector<8x1xf32> to vector<8x32xf32>
    %62 = arith.subf %54, %61 : vector<8x32xf32>
    %63 = arith.mulf %62, %62 : vector<8x32xf32>
    %cst_33 = arith.constant dense<0.000000e+00> : vector<8xf32>
    %64 = vector.multi_reduction <add>, %63, %cst_33 [1] : vector<8x32xf32> to vector<8xf32>
    %65 = vector.shape_cast %64 : vector<8xf32> to vector<8x1xf32>
    %cst_34 = arith.constant 3.200000e+01 : f32
    %66 = vector.broadcast %cst_34 : f32 to vector<8x1xf32>
    %67 = arith.divf %65, %66 : vector<8x1xf32>
    %68 = vector.broadcast %60 : vector<8x1xf32> to vector<8x32xf32>
    %69 = arith.subf %54, %68 : vector<8x32xf32>
    %cst_35 = arith.constant 9.99999974E-6 : f32
    %70 = vector.broadcast %cst_35 : f32 to vector<8x1xf32>
    %71 = arith.addf %67, %70 : vector<8x1xf32>
    %72 = math.rsqrt %71 : vector<8x1xf32>
    %73 = vector.broadcast %72 : vector<8x1xf32> to vector<8x32xf32>
    %74 = arith.mulf %69, %73 : vector<8x32xf32>
    %75 = vector.broadcast %55 : vector<1x32xf32> to vector<8x32xf32>
    %76 = arith.mulf %74, %75 : vector<8x32xf32>
    %77 = vector.broadcast %56 : vector<1x32xf32> to vector<8x32xf32>
    %78 = arith.addf %76, %77 : vector<8x32xf32>
    %c0_36 = arith.constant 0 : index
    %c0_37 = arith.constant 0 : index
    %c0_38 = arith.constant 0 : index
    %79 = vector.load %arg9[%c0_36, %c0_37, %c0_38] : memref<2x32x32xbf16, #tpu.memory_space<vmem>>, vector<1x32x32xbf16>
    %80 = vector.shape_cast %79 : vector<1x32x32xbf16> to vector<32x32xbf16>
    %81 = arith.truncf %78 : vector<8x32xf32> to vector<8x32xbf16>
    %cst_39 = arith.constant dense<0.000000e+00> : vector<8x32xf32>
    %82 = tpu.matmul %81, %80, %cst_39 {dimension_numbers = #tpu.dot_dimension_numbers<[1], [0], [0], [1], [0, 0, 1, 1], [], []>} : vector<8x32xbf16>, vector<32x32xbf16>, vector<8x32xf32> -> vector<8x32xf32>
    %c0_40 = arith.constant 0 : index
    %c0_41 = arith.constant 0 : index
    %83 = vector.load %arg10[%c0_40, %c0_41] : memref<2x32xf32, #tpu.memory_space<vmem>>, vector<1x32xf32>
    %84 = vector.broadcast %83 : vector<1x32xf32> to vector<8x32xf32>
    %85 = arith.addf %82, %84 : vector<8x32xf32>
    %c0_42 = arith.constant 0 : index
    %c0_43 = arith.constant 0 : index
    %c0_44 = arith.constant 0 : index
    %86 = vector.load %arg11[%c0_42, %c0_43, %c0_44] : memref<2x32x64xbf16, #tpu.memory_space<vmem>>, vector<1x32x64xbf16>
    %87 = vector.shape_cast %86 : vector<1x32x64xbf16> to vector<32x64xbf16>
    %88 = arith.truncf %3 : vector<16x32xf32> to vector<16x32xbf16>
    %cst_45 = arith.constant dense<0.000000e+00> : vector<16x64xf32>
    %89 = tpu.matmul %88, %87, %cst_45 {dimension_numbers = #tpu.dot_dimension_numbers<[1], [0], [0], [1], [0, 0, 1, 1], [], []>} : vector<16x32xbf16>, vector<32x64xbf16>, vector<16x64xf32> -> vector<16x64xf32>
    %c0_46 = arith.constant 0 : index
    %c0_47 = arith.constant 0 : index
    %90 = vector.load %arg12[%c0_46, %c0_47] : memref<2x64xf32, #tpu.memory_space<vmem>>, vector<1x64xf32>
    %91 = vector.broadcast %90 : vector<1x64xf32> to vector<16x64xf32>
    %92 = arith.addf %89, %91 : vector<16x64xf32>
    %93 = vector.extract_strided_slice %92 {offsets = [0, 0], sizes = [16, 32], strides = [1, 1]} : vector<16x64xf32> to vector<16x32xf32>
    %94 = vector.extract_strided_slice %92 {offsets = [0, 32], sizes = [16, 32], strides = [1, 1]} : vector<16x64xf32> to vector<16x32xf32>
    %c0_48 = arith.constant 0 : index
    %c0_49 = arith.constant 0 : index
    %c0_50 = arith.constant 0 : index
    %95 = vector.load %arg13[%c0_48, %c0_49, %c0_50] : memref<2x32x32xbf16, #tpu.memory_space<vmem>>, vector<1x32x32xbf16>
    %96 = vector.shape_cast %95 : vector<1x32x32xbf16> to vector<32x32xbf16>
    %c0_51 = arith.constant 0 : index
    %c0_52 = arith.constant 0 : index
    %97 = vector.load %arg14[%c0_51, %c0_52] : memref<2x32xf32, #tpu.memory_space<vmem>>, vector<1x32xf32>
    %cst_53 = arith.constant 5.000000e-01 : f32
    %98 = vector.broadcast %cst_53 : f32 to vector<8x32xf32>
    %99 = arith.mulf %85, %98 : vector<8x32xf32>
    %100 = vector.shape_cast %99 : vector<8x32xf32> to vector<8x8x4xf32>
    %101 = tpu.transpose %100, [1, 0, 2] : vector<8x8x4xf32> -> vector<8x8x4xf32>
    %102 = vector.shape_cast %93 : vector<16x32xf32> to vector<16x8x4xf32>
    %103 = tpu.transpose %102, [1, 0, 2] : vector<16x8x4xf32> -> vector<8x16x4xf32>
    %104 = vector.shape_cast %94 : vector<16x32xf32> to vector<16x8x4xf32>
    %105 = tpu.transpose %104, [1, 0, 2] : vector<16x8x4xf32> -> vector<8x16x4xf32>
    %106 = arith.truncf %101 : vector<8x8x4xf32> to vector<8x8x4xbf16>
    %107 = arith.truncf %103 : vector<8x16x4xf32> to vector<8x16x4xbf16>
    "tpu.trace_start"() <{level = 10 : i32, message = "hqd,hkd->hqk"}> : () -> ()
    %cst_54 = arith.constant dense<0.000000e+00> : vector<8x8x16xf32>
    %108 = tpu.matmul %106, %107, %cst_54 {dimension_numbers = #tpu.dot_dimension_numbers<[2], [2], [1], [1], [0, 0, 0, 1, 1, 1], [0], [0]>} : vector<8x8x4xbf16>, vector<8x16x4xbf16>, vector<8x8x16xf32> -> vector<8x8x16xf32>
    "tpu.trace_stop"() : () -> ()
    %109 = vector.shape_cast %7 : vector<8x16xf32> to vector<1x8x16xf32>
    %110 = vector.broadcast %109 : vector<1x8x16xf32> to vector<8x8x16xf32>
    %111 = arith.addf %108, %110 : vector<8x8x16xf32>
    %cst_55 = arith.constant dense<0xFF800000> : vector<8x8xf32>
    %112 = vector.multi_reduction <maximumf>, %111, %cst_55 [2] : vector<8x8x16xf32> to vector<8x8xf32>
    %113 = vector.shape_cast %112 : vector<8x8xf32> to vector<8x8x1xf32>
    %114 = vector.broadcast %113 : vector<8x8x1xf32> to vector<8x8x16xf32>
    %115 = arith.subf %111, %114 : vector<8x8x16xf32>
    %116 = math.exp %115 : vector<8x8x16xf32>
    %cst_56 = arith.constant dense<0.000000e+00> : vector<8x8xf32>
    %117 = vector.multi_reduction <add>, %116, %cst_56 [2] : vector<8x8x16xf32> to vector<8x8xf32>
    %118 = vector.shape_cast %117 : vector<8x8xf32> to vector<8x8x1xf32>
    %119 = tpu.reciprocal %118 {approx = true} : vector<8x8x1xf32> -> vector<8x8x1xf32>
    %120 = vector.broadcast %119 : vector<8x8x1xf32> to vector<8x8x16xf32>
    %121 = arith.mulf %116, %120 : vector<8x8x16xf32>
    %122 = arith.truncf %121 : vector<8x8x16xf32> to vector<8x8x16xbf16>
    %123 = arith.truncf %105 : vector<8x16x4xf32> to vector<8x16x4xbf16>
    "tpu.trace_start"() <{level = 10 : i32, message = "hqk,hkd->hqd"}> : () -> ()
    %cst_57 = arith.constant dense<0.000000e+00> : vector<8x8x4xf32>
    %124 = tpu.matmul %122, %123, %cst_57 {dimension_numbers = #tpu.dot_dimension_numbers<[2], [1], [1], [2], [0, 0, 0, 1, 1, 2], [0], [0]>} : vector<8x8x16xbf16>, vector<8x16x4xbf16>, vector<8x8x4xf32> -> vector<8x8x4xf32>
    "tpu.trace_stop"() : () -> ()
    %125 = tpu.transpose %124, [1, 0, 2] : vector<8x8x4xf32> -> vector<8x8x4xf32>
    %126 = vector.shape_cast %125 : vector<8x8x4xf32> to vector<8x32xf32>
    %127 = arith.truncf %126 : vector<8x32xf32> to vector<8x32xbf16>
    %cst_58 = arith.constant dense<0.000000e+00> : vector<8x32xf32>
    %128 = tpu.matmul %127, %96, %cst_58 {dimension_numbers = #tpu.dot_dimension_numbers<[1], [0], [0], [1], [0, 0, 1, 1], [], []>} : vector<8x32xbf16>, vector<32x32xbf16>, vector<8x32xf32> -> vector<8x32xf32>
    %129 = vector.broadcast %97 : vector<1x32xf32> to vector<8x32xf32>
    %130 = arith.addf %128, %129 : vector<8x32xf32>
    %131 = arith.addf %78, %130 : vector<8x32xf32>
    %c0_59 = arith.constant 0 : index
    %c0_60 = arith.constant 0 : index
    %132 = vector.load %arg21[%c0_59, %c0_60] : memref<2x32xf32, #tpu.memory_space<vmem>>, vector<1x32xf32>
    %c0_61 = arith.constant 0 : index
    %c0_62 = arith.constant 0 : index
    %133 = vector.load %arg22[%c0_61, %c0_62] : memref<2x32xf32, #tpu.memory_space<vmem>>, vector<1x32xf32>
    %cst_63 = arith.constant dense<0.000000e+00> : vector<8xf32>
    %134 = vector.multi_reduction <add>, %131, %cst_63 [1] : vector<8x32xf32> to vector<8xf32>
    %135 = vector.shape_cast %134 : vector<8xf32> to vector<8x1xf32>
    %cst_64 = arith.constant 3.200000e+01 : f32
    %136 = vector.broadcast %cst_64 : f32 to vector<8x1xf32>
    %137 = arith.divf %135, %136 : vector<8x1xf32>
    %138 = vector.broadcast %137 : vector<8x1xf32> to vector<8x32xf32>
    %139 = arith.subf %131, %138 : vector<8x32xf32>
    %140 = arith.mulf %139, %139 : vector<8x32xf32>
    %cst_65 = arith.constant dense<0.000000e+00> : vector<8xf32>
    %141 = vector.multi_reduction <add>, %140, %cst_65 [1] : vector<8x32xf32> to vector<8xf32>
    %142 = vector.shape_cast %141 : vector<8xf32> to vector<8x1xf32>
    %cst_66 = arith.constant 3.200000e+01 : f32
    %143 = vector.broadcast %cst_66 : f32 to vector<8x1xf32>
    %144 = arith.divf %142, %143 : vector<8x1xf32>
    %145 = vector.broadcast %137 : vector<8x1xf32> to vector<8x32xf32>
    %146 = arith.subf %131, %145 : vector<8x32xf32>
    %cst_67 = arith.constant 9.99999974E-6 : f32
    %147 = vector.broadcast %cst_67 : f32 to vector<8x1xf32>
    %148 = arith.addf %144, %147 : vector<8x1xf32>
    %149 = math.rsqrt %148 : vector<8x1xf32>
    %150 = vector.broadcast %149 : vector<8x1xf32> to vector<8x32xf32>
    %151 = arith.mulf %146, %150 : vector<8x32xf32>
    %152 = vector.broadcast %132 : vector<1x32xf32> to vector<8x32xf32>
    %153 = arith.mulf %151, %152 : vector<8x32xf32>
    %154 = vector.broadcast %133 : vector<1x32xf32> to vector<8x32xf32>
    %155 = arith.addf %153, %154 : vector<8x32xf32>
    %c0_68 = arith.constant 0 : index
    %c0_69 = arith.constant 0 : index
    %c0_70 = arith.constant 0 : index
    %156 = vector.load %arg15[%c0_68, %c0_69, %c0_70] : memref<2x32x2048xbf16, #tpu.memory_space<vmem>>, vector<1x32x2048xbf16>
    %157 = vector.shape_cast %156 : vector<1x32x2048xbf16> to vector<32x2048xbf16>
    %158 = arith.truncf %155 : vector<8x32xf32> to vector<8x32xbf16>
    %cst_71 = arith.constant dense<0.000000e+00> : vector<8x2048xf32>
    %159 = tpu.matmul %158, %157, %cst_71 {dimension_numbers = #tpu.dot_dimension_numbers<[1], [0], [0], [1], [0, 0, 1, 1], [], []>} : vector<8x32xbf16>, vector<32x2048xbf16>, vector<8x2048xf32> -> vector<8x2048xf32>
    %c0_72 = arith.constant 0 : index
    %c0_73 = arith.constant 0 : index
    %160 = vector.load %arg16[%c0_72, %c0_73] : memref<2x2048xf32, #tpu.memory_space<vmem>>, vector<1x2048xf32>
    %161 = vector.broadcast %160 : vector<1x2048xf32> to vector<8x2048xf32>
    %162 = arith.addf %159, %161 : vector<8x2048xf32>
    %cst_74 = arith.constant 0.000000e+00 : f32
    %163 = vector.broadcast %cst_74 : f32 to vector<8x2048xf32>
    %164 = arith.maximumf %162, %163 : vector<8x2048xf32>
    %c0_75 = arith.constant 0 : index
    %c0_76 = arith.constant 0 : index
    %c0_77 = arith.constant 0 : index
    %165 = vector.load %arg17[%c0_75, %c0_76, %c0_77] : memref<2x2048x32xbf16, #tpu.memory_space<vmem>>, vector<1x2048x32xbf16>
    %166 = vector.shape_cast %165 : vector<1x2048x32xbf16> to vector<2048x32xbf16>
    %167 = arith.truncf %164 : vector<8x2048xf32> to vector<8x2048xbf16>
    %cst_78 = arith.constant dense<0.000000e+00> : vector<8x32xf32>
    %168 = tpu.matmul %167, %166, %cst_78 {dimension_numbers = #tpu.dot_dimension_numbers<[1], [0], [0], [1], [0, 0, 1, 1], [], []>} : vector<8x2048xbf16>, vector<2048x32xbf16>, vector<8x32xf32> -> vector<8x32xf32>
    %c0_79 = arith.constant 0 : index
    %c0_80 = arith.constant 0 : index
    %169 = vector.load %arg18[%c0_79, %c0_80] : memref<2x32xf32, #tpu.memory_space<vmem>>, vector<1x32xf32>
    %170 = vector.broadcast %169 : vector<1x32xf32> to vector<8x32xf32>
    %171 = arith.addf %168, %170 : vector<8x32xf32>
    %172 = arith.addf %155, %171 : vector<8x32xf32>
    %c0_81 = arith.constant 0 : index
    %c0_82 = arith.constant 0 : index
    %173 = vector.load %arg23[%c0_81, %c0_82] : memref<2x32xf32, #tpu.memory_space<vmem>>, vector<1x32xf32>
    %c0_83 = arith.constant 0 : index
    %c0_84 = arith.constant 0 : index
    %174 = vector.load %arg24[%c0_83, %c0_84] : memref<2x32xf32, #tpu.memory_space<vmem>>, vector<1x32xf32>
    %cst_85 = arith.constant dense<0.000000e+00> : vector<8xf32>
    %175 = vector.multi_reduction <add>, %172, %cst_85 [1] : vector<8x32xf32> to vector<8xf32>
    %176 = vector.shape_cast %175 : vector<8xf32> to vector<8x1xf32>
    %cst_86 = arith.constant 3.200000e+01 : f32
    %177 = vector.broadcast %cst_86 : f32 to vector<8x1xf32>
    %178 = arith.divf %176, %177 : vector<8x1xf32>
    %179 = vector.broadcast %178 : vector<8x1xf32> to vector<8x32xf32>
    %180 = arith.subf %172, %179 : vector<8x32xf32>
    %181 = arith.mulf %180, %180 : vector<8x32xf32>
    %cst_87 = arith.constant dense<0.000000e+00> : vector<8xf32>
    %182 = vector.multi_reduction <add>, %181, %cst_87 [1] : vector<8x32xf32> to vector<8xf32>
    %183 = vector.shape_cast %182 : vector<8xf32> to vector<8x1xf32>
    %cst_88 = arith.constant 3.200000e+01 : f32
    %184 = vector.broadcast %cst_88 : f32 to vector<8x1xf32>
    %185 = arith.divf %183, %184 : vector<8x1xf32>
    %186 = vector.broadcast %178 : vector<8x1xf32> to vector<8x32xf32>
    %187 = arith.subf %172, %186 : vector<8x32xf32>
    %cst_89 = arith.constant 9.99999974E-6 : f32
    %188 = vector.broadcast %cst_89 : f32 to vector<8x1xf32>
    %189 = arith.addf %185, %188 : vector<8x1xf32>
    %190 = math.rsqrt %189 : vector<8x1xf32>
    %191 = vector.broadcast %190 : vector<8x1xf32> to vector<8x32xf32>
    %192 = arith.mulf %187, %191 : vector<8x32xf32>
    %193 = vector.broadcast %173 : vector<1x32xf32> to vector<8x32xf32>
    %194 = arith.mulf %192, %193 : vector<8x32xf32>
    %195 = vector.broadcast %174 : vector<1x32xf32> to vector<8x32xf32>
    %196 = arith.addf %194, %195 : vector<8x32xf32>
    %c1 = arith.constant 1 : index
    %c0_90 = arith.constant 0 : index
    %c0_91 = arith.constant 0 : index
    %197 = vector.load %arg5[%c1, %c0_90, %c0_91] : memref<2x32x96xbf16, #tpu.memory_space<vmem>>, vector<1x32x96xbf16>
    %198 = vector.shape_cast %197 : vector<1x32x96xbf16> to vector<32x96xbf16>
    %199 = arith.truncf %196 : vector<8x32xf32> to vector<8x32xbf16>
    %cst_92 = arith.constant dense<0.000000e+00> : vector<8x96xf32>
    %200 = tpu.matmul %199, %198, %cst_92 {dimension_numbers = #tpu.dot_dimension_numbers<[1], [0], [0], [1], [0, 0, 1, 1], [], []>} : vector<8x32xbf16>, vector<32x96xbf16>, vector<8x96xf32> -> vector<8x96xf32>
    %c1_93 = arith.constant 1 : index
    %c0_94 = arith.constant 0 : index
    %201 = vector.load %arg6[%c1_93, %c0_94] : memref<2x96xf32, #tpu.memory_space<vmem>>, vector<1x96xf32>
    %202 = vector.broadcast %201 : vector<1x96xf32> to vector<8x96xf32>
    %203 = arith.addf %200, %202 : vector<8x96xf32>
    %204 = vector.extract_strided_slice %203 {offsets = [0, 0], sizes = [8, 32], strides = [1, 1]} : vector<8x96xf32> to vector<8x32xf32>
    %205 = vector.extract_strided_slice %203 {offsets = [0, 32], sizes = [8, 32], strides = [1, 1]} : vector<8x96xf32> to vector<8x32xf32>
    %206 = vector.extract_strided_slice %203 {offsets = [0, 64], sizes = [8, 32], strides = [1, 1]} : vector<8x96xf32> to vector<8x32xf32>
    %c1_95 = arith.constant 1 : index
    %c0_96 = arith.constant 0 : index
    %c0_97 = arith.constant 0 : index
    %207 = vector.load %arg7[%c1_95, %c0_96, %c0_97] : memref<2x32x32xbf16, #tpu.memory_space<vmem>>, vector<1x32x32xbf16>
    %208 = vector.shape_cast %207 : vector<1x32x32xbf16> to vector<32x32xbf16>
    %c1_98 = arith.constant 1 : index
    %c0_99 = arith.constant 0 : index
    %209 = vector.load %arg8[%c1_98, %c0_99] : memref<2x32xf32, #tpu.memory_space<vmem>>, vector<1x32xf32>
    %cst_100 = arith.constant 5.000000e-01 : f32
    %210 = vector.broadcast %cst_100 : f32 to vector<8x32xf32>
    %211 = arith.mulf %204, %210 : vector<8x32xf32>
    %212 = vector.shape_cast %211 : vector<8x32xf32> to vector<8x8x4xf32>
    %213 = tpu.transpose %212, [1, 0, 2] : vector<8x8x4xf32> -> vector<8x8x4xf32>
    %214 = vector.shape_cast %205 : vector<8x32xf32> to vector<8x8x4xf32>
    %215 = tpu.transpose %214, [1, 0, 2] : vector<8x8x4xf32> -> vector<8x8x4xf32>
    %216 = vector.shape_cast %206 : vector<8x32xf32> to vector<8x8x4xf32>
    %217 = tpu.transpose %216, [1, 0, 2] : vector<8x8x4xf32> -> vector<8x8x4xf32>
    %218 = arith.truncf %213 : vector<8x8x4xf32> to vector<8x8x4xbf16>
    %219 = arith.truncf %215 : vector<8x8x4xf32> to vector<8x8x4xbf16>
    "tpu.trace_start"() <{level = 10 : i32, message = "hqd,hkd->hqk"}> : () -> ()
    %cst_101 = arith.constant dense<0.000000e+00> : vector<8x8x8xf32>
    %220 = tpu.matmul %218, %219, %cst_101 {dimension_numbers = #tpu.dot_dimension_numbers<[2], [2], [1], [1], [0, 0, 0, 1, 1, 1], [0], [0]>} : vector<8x8x4xbf16>, vector<8x8x4xbf16>, vector<8x8x8xf32> -> vector<8x8x8xf32>
    "tpu.trace_stop"() : () -> ()
    %221 = vector.shape_cast %5 : vector<8x8xf32> to vector<1x8x8xf32>
    %222 = vector.broadcast %221 : vector<1x8x8xf32> to vector<8x8x8xf32>
    %223 = arith.addf %220, %222 : vector<8x8x8xf32>
    %cst_102 = arith.constant dense<0xFF800000> : vector<8x8xf32>
    %224 = vector.multi_reduction <maximumf>, %223, %cst_102 [2] : vector<8x8x8xf32> to vector<8x8xf32>
    %225 = vector.shape_cast %224 : vector<8x8xf32> to vector<8x8x1xf32>
    %226 = vector.broadcast %225 : vector<8x8x1xf32> to vector<8x8x8xf32>
    %227 = arith.subf %223, %226 : vector<8x8x8xf32>
    %228 = math.exp %227 : vector<8x8x8xf32>
    %cst_103 = arith.constant dense<0.000000e+00> : vector<8x8xf32>
    %229 = vector.multi_reduction <add>, %228, %cst_103 [2] : vector<8x8x8xf32> to vector<8x8xf32>
    %230 = vector.shape_cast %229 : vector<8x8xf32> to vector<8x8x1xf32>
    %231 = tpu.reciprocal %230 {approx = true} : vector<8x8x1xf32> -> vector<8x8x1xf32>
    %232 = vector.broadcast %231 : vector<8x8x1xf32> to vector<8x8x8xf32>
    %233 = arith.mulf %228, %232 : vector<8x8x8xf32>
    %234 = arith.truncf %233 : vector<8x8x8xf32> to vector<8x8x8xbf16>
    %235 = arith.truncf %217 : vector<8x8x4xf32> to vector<8x8x4xbf16>
    "tpu.trace_start"() <{level = 10 : i32, message = "hqk,hkd->hqd"}> : () -> ()
    %cst_104 = arith.constant dense<0.000000e+00> : vector<8x8x4xf32>
    %236 = tpu.matmul %234, %235, %cst_104 {dimension_numbers = #tpu.dot_dimension_numbers<[2], [1], [1], [2], [0, 0, 0, 1, 1, 2], [0], [0]>} : vector<8x8x8xbf16>, vector<8x8x4xbf16>, vector<8x8x4xf32> -> vector<8x8x4xf32>
    "tpu.trace_stop"() : () -> ()
    %237 = tpu.transpose %236, [1, 0, 2] : vector<8x8x4xf32> -> vector<8x8x4xf32>
    %238 = vector.shape_cast %237 : vector<8x8x4xf32> to vector<8x32xf32>
    %239 = arith.truncf %238 : vector<8x32xf32> to vector<8x32xbf16>
    %cst_105 = arith.constant dense<0.000000e+00> : vector<8x32xf32>
    %240 = tpu.matmul %239, %208, %cst_105 {dimension_numbers = #tpu.dot_dimension_numbers<[1], [0], [0], [1], [0, 0, 1, 1], [], []>} : vector<8x32xbf16>, vector<32x32xbf16>, vector<8x32xf32> -> vector<8x32xf32>
    %241 = vector.broadcast %209 : vector<1x32xf32> to vector<8x32xf32>
    %242 = arith.addf %240, %241 : vector<8x32xf32>
    %243 = arith.addf %196, %242 : vector<8x32xf32>
    %c1_106 = arith.constant 1 : index
    %c0_107 = arith.constant 0 : index
    %244 = vector.load %arg19[%c1_106, %c0_107] : memref<2x32xf32, #tpu.memory_space<vmem>>, vector<1x32xf32>
    %c1_108 = arith.constant 1 : index
    %c0_109 = arith.constant 0 : index
    %245 = vector.load %arg20[%c1_108, %c0_109] : memref<2x32xf32, #tpu.memory_space<vmem>>, vector<1x32xf32>
    %cst_110 = arith.constant dense<0.000000e+00> : vector<8xf32>
    %246 = vector.multi_reduction <add>, %243, %cst_110 [1] : vector<8x32xf32> to vector<8xf32>
    %247 = vector.shape_cast %246 : vector<8xf32> to vector<8x1xf32>
    %cst_111 = arith.constant 3.200000e+01 : f32
    %248 = vector.broadcast %cst_111 : f32 to vector<8x1xf32>
    %249 = arith.divf %247, %248 : vector<8x1xf32>
    %250 = vector.broadcast %249 : vector<8x1xf32> to vector<8x32xf32>
    %251 = arith.subf %243, %250 : vector<8x32xf32>
    %252 = arith.mulf %251, %251 : vector<8x32xf32>
    %cst_112 = arith.constant dense<0.000000e+00> : vector<8xf32>
    %253 = vector.multi_reduction <add>, %252, %cst_112 [1] : vector<8x32xf32> to vector<8xf32>
    %254 = vector.shape_cast %253 : vector<8xf32> to vector<8x1xf32>
    %cst_113 = arith.constant 3.200000e+01 : f32
    %255 = vector.broadcast %cst_113 : f32 to vector<8x1xf32>
    %256 = arith.divf %254, %255 : vector<8x1xf32>
    %257 = vector.broadcast %249 : vector<8x1xf32> to vector<8x32xf32>
    %258 = arith.subf %243, %257 : vector<8x32xf32>
    %cst_114 = arith.constant 9.99999974E-6 : f32
    %259 = vector.broadcast %cst_114 : f32 to vector<8x1xf32>
    %260 = arith.addf %256, %259 : vector<8x1xf32>
    %261 = math.rsqrt %260 : vector<8x1xf32>
    %262 = vector.broadcast %261 : vector<8x1xf32> to vector<8x32xf32>
    %263 = arith.mulf %258, %262 : vector<8x32xf32>
    %264 = vector.broadcast %244 : vector<1x32xf32> to vector<8x32xf32>
    %265 = arith.mulf %263, %264 : vector<8x32xf32>
    %266 = vector.broadcast %245 : vector<1x32xf32> to vector<8x32xf32>
    %267 = arith.addf %265, %266 : vector<8x32xf32>
    %c1_115 = arith.constant 1 : index
    %c0_116 = arith.constant 0 : index
    %c0_117 = arith.constant 0 : index
    %268 = vector.load %arg9[%c1_115, %c0_116, %c0_117] : memref<2x32x32xbf16, #tpu.memory_space<vmem>>, vector<1x32x32xbf16>
    %269 = vector.shape_cast %268 : vector<1x32x32xbf16> to vector<32x32xbf16>
    %270 = arith.truncf %267 : vector<8x32xf32> to vector<8x32xbf16>
    %cst_118 = arith.constant dense<0.000000e+00> : vector<8x32xf32>
    %271 = tpu.matmul %270, %269, %cst_118 {dimension_numbers = #tpu.dot_dimension_numbers<[1], [0], [0], [1], [0, 0, 1, 1], [], []>} : vector<8x32xbf16>, vector<32x32xbf16>, vector<8x32xf32> -> vector<8x32xf32>
    %c1_119 = arith.constant 1 : index
    %c0_120 = arith.constant 0 : index
    %272 = vector.load %arg10[%c1_119, %c0_120] : memref<2x32xf32, #tpu.memory_space<vmem>>, vector<1x32xf32>
    %273 = vector.broadcast %272 : vector<1x32xf32> to vector<8x32xf32>
    %274 = arith.addf %271, %273 : vector<8x32xf32>
    %c1_121 = arith.constant 1 : index
    %c0_122 = arith.constant 0 : index
    %c0_123 = arith.constant 0 : index
    %275 = vector.load %arg11[%c1_121, %c0_122, %c0_123] : memref<2x32x64xbf16, #tpu.memory_space<vmem>>, vector<1x32x64xbf16>
    %276 = vector.shape_cast %275 : vector<1x32x64xbf16> to vector<32x64xbf16>
    %277 = arith.truncf %3 : vector<16x32xf32> to vector<16x32xbf16>
    %cst_124 = arith.constant dense<0.000000e+00> : vector<16x64xf32>
    %278 = tpu.matmul %277, %276, %cst_124 {dimension_numbers = #tpu.dot_dimension_numbers<[1], [0], [0], [1], [0, 0, 1, 1], [], []>} : vector<16x32xbf16>, vector<32x64xbf16>, vector<16x64xf32> -> vector<16x64xf32>
    %c1_125 = arith.constant 1 : index
    %c0_126 = arith.constant 0 : index
    %279 = vector.load %arg12[%c1_125, %c0_126] : memref<2x64xf32, #tpu.memory_space<vmem>>, vector<1x64xf32>
    %280 = vector.broadcast %279 : vector<1x64xf32> to vector<16x64xf32>
    %281 = arith.addf %278, %280 : vector<16x64xf32>
    %282 = vector.extract_strided_slice %281 {offsets = [0, 0], sizes = [16, 32], strides = [1, 1]} : vector<16x64xf32> to vector<16x32xf32>
    %283 = vector.extract_strided_slice %281 {offsets = [0, 32], sizes = [16, 32], strides = [1, 1]} : vector<16x64xf32> to vector<16x32xf32>
    %c1_127 = arith.constant 1 : index
    %c0_128 = arith.constant 0 : index
    %c0_129 = arith.constant 0 : index
    %284 = vector.load %arg13[%c1_127, %c0_128, %c0_129] : memref<2x32x32xbf16, #tpu.memory_space<vmem>>, vector<1x32x32xbf16>
    %285 = vector.shape_cast %284 : vector<1x32x32xbf16> to vector<32x32xbf16>
    %c1_130 = arith.constant 1 : index
    %c0_131 = arith.constant 0 : index
    %286 = vector.load %arg14[%c1_130, %c0_131] : memref<2x32xf32, #tpu.memory_space<vmem>>, vector<1x32xf32>
    %cst_132 = arith.constant 5.000000e-01 : f32
    %287 = vector.broadcast %cst_132 : f32 to vector<8x32xf32>
    %288 = arith.mulf %274, %287 : vector<8x32xf32>
    %289 = vector.shape_cast %288 : vector<8x32xf32> to vector<8x8x4xf32>
    %290 = tpu.transpose %289, [1, 0, 2] : vector<8x8x4xf32> -> vector<8x8x4xf32>
    %291 = vector.shape_cast %282 : vector<16x32xf32> to vector<16x8x4xf32>
    %292 = tpu.transpose %291, [1, 0, 2] : vector<16x8x4xf32> -> vector<8x16x4xf32>
    %293 = vector.shape_cast %283 : vector<16x32xf32> to vector<16x8x4xf32>
    %294 = tpu.transpose %293, [1, 0, 2] : vector<16x8x4xf32> -> vector<8x16x4xf32>
    %295 = arith.truncf %290 : vector<8x8x4xf32> to vector<8x8x4xbf16>
    %296 = arith.truncf %292 : vector<8x16x4xf32> to vector<8x16x4xbf16>
    "tpu.trace_start"() <{level = 10 : i32, message = "hqd,hkd->hqk"}> : () -> ()
    %cst_133 = arith.constant dense<0.000000e+00> : vector<8x8x16xf32>
    %297 = tpu.matmul %295, %296, %cst_133 {dimension_numbers = #tpu.dot_dimension_numbers<[2], [2], [1], [1], [0, 0, 0, 1, 1, 1], [0], [0]>} : vector<8x8x4xbf16>, vector<8x16x4xbf16>, vector<8x8x16xf32> -> vector<8x8x16xf32>
    "tpu.trace_stop"() : () -> ()
    %298 = vector.shape_cast %7 : vector<8x16xf32> to vector<1x8x16xf32>
    %299 = vector.broadcast %298 : vector<1x8x16xf32> to vector<8x8x16xf32>
    %300 = arith.addf %297, %299 : vector<8x8x16xf32>
    %cst_134 = arith.constant dense<0xFF800000> : vector<8x8xf32>
    %301 = vector.multi_reduction <maximumf>, %300, %cst_134 [2] : vector<8x8x16xf32> to vector<8x8xf32>
    %302 = vector.shape_cast %301 : vector<8x8xf32> to vector<8x8x1xf32>
    %303 = vector.broadcast %302 : vector<8x8x1xf32> to vector<8x8x16xf32>
    %304 = arith.subf %300, %303 : vector<8x8x16xf32>
    %305 = math.exp %304 : vector<8x8x16xf32>
    %cst_135 = arith.constant dense<0.000000e+00> : vector<8x8xf32>
    %306 = vector.multi_reduction <add>, %305, %cst_135 [2] : vector<8x8x16xf32> to vector<8x8xf32>
    %307 = vector.shape_cast %306 : vector<8x8xf32> to vector<8x8x1xf32>
    %308 = tpu.reciprocal %307 {approx = true} : vector<8x8x1xf32> -> vector<8x8x1xf32>
    %309 = vector.broadcast %308 : vector<8x8x1xf32> to vector<8x8x16xf32>
    %310 = arith.mulf %305, %309 : vector<8x8x16xf32>
    %311 = arith.truncf %310 : vector<8x8x16xf32> to vector<8x8x16xbf16>
    %312 = arith.truncf %294 : vector<8x16x4xf32> to vector<8x16x4xbf16>
    "tpu.trace_start"() <{level = 10 : i32, message = "hqk,hkd->hqd"}> : () -> ()
    %cst_136 = arith.constant dense<0.000000e+00> : vector<8x8x4xf32>
    %313 = tpu.matmul %311, %312, %cst_136 {dimension_numbers = #tpu.dot_dimension_numbers<[2], [1], [1], [2], [0, 0, 0, 1, 1, 2], [0], [0]>} : vector<8x8x16xbf16>, vector<8x16x4xbf16>, vector<8x8x4xf32> -> vector<8x8x4xf32>
    "tpu.trace_stop"() : () -> ()
    %314 = tpu.transpose %313, [1, 0, 2] : vector<8x8x4xf32> -> vector<8x8x4xf32>
    %315 = vector.shape_cast %314 : vector<8x8x4xf32> to vector<8x32xf32>
    %316 = arith.truncf %315 : vector<8x32xf32> to vector<8x32xbf16>
    %cst_137 = arith.constant dense<0.000000e+00> : vector<8x32xf32>
    %317 = tpu.matmul %316, %285, %cst_137 {dimension_numbers = #tpu.dot_dimension_numbers<[1], [0], [0], [1], [0, 0, 1, 1], [], []>} : vector<8x32xbf16>, vector<32x32xbf16>, vector<8x32xf32> -> vector<8x32xf32>
    %318 = vector.broadcast %286 : vector<1x32xf32> to vector<8x32xf32>
    %319 = arith.addf %317, %318 : vector<8x32xf32>
    %320 = arith.addf %267, %319 : vector<8x32xf32>
    %c1_138 = arith.constant 1 : index
    %c0_139 = arith.constant 0 : index
    %321 = vector.load %arg21[%c1_138, %c0_139] : memref<2x32xf32, #tpu.memory_space<vmem>>, vector<1x32xf32>
    %c1_140 = arith.constant 1 : index
    %c0_141 = arith.constant 0 : index
    %322 = vector.load %arg22[%c1_140, %c0_141] : memref<2x32xf32, #tpu.memory_space<vmem>>, vector<1x32xf32>
    %cst_142 = arith.constant dense<0.000000e+00> : vector<8xf32>
    %323 = vector.multi_reduction <add>, %320, %cst_142 [1] : vector<8x32xf32> to vector<8xf32>
    %324 = vector.shape_cast %323 : vector<8xf32> to vector<8x1xf32>
    %cst_143 = arith.constant 3.200000e+01 : f32
    %325 = vector.broadcast %cst_143 : f32 to vector<8x1xf32>
    %326 = arith.divf %324, %325 : vector<8x1xf32>
    %327 = vector.broadcast %326 : vector<8x1xf32> to vector<8x32xf32>
    %328 = arith.subf %320, %327 : vector<8x32xf32>
    %329 = arith.mulf %328, %328 : vector<8x32xf32>
    %cst_144 = arith.constant dense<0.000000e+00> : vector<8xf32>
    %330 = vector.multi_reduction <add>, %329, %cst_144 [1] : vector<8x32xf32> to vector<8xf32>
    %331 = vector.shape_cast %330 : vector<8xf32> to vector<8x1xf32>
    %cst_145 = arith.constant 3.200000e+01 : f32
    %332 = vector.broadcast %cst_145 : f32 to vector<8x1xf32>
    %333 = arith.divf %331, %332 : vector<8x1xf32>
    %334 = vector.broadcast %326 : vector<8x1xf32> to vector<8x32xf32>
    %335 = arith.subf %320, %334 : vector<8x32xf32>
    %cst_146 = arith.constant 9.99999974E-6 : f32
    %336 = vector.broadcast %cst_146 : f32 to vector<8x1xf32>
    %337 = arith.addf %333, %336 : vector<8x1xf32>
    %338 = math.rsqrt %337 : vector<8x1xf32>
    %339 = vector.broadcast %338 : vector<8x1xf32> to vector<8x32xf32>
    %340 = arith.mulf %335, %339 : vector<8x32xf32>
    %341 = vector.broadcast %321 : vector<1x32xf32> to vector<8x32xf32>
    %342 = arith.mulf %340, %341 : vector<8x32xf32>
    %343 = vector.broadcast %322 : vector<1x32xf32> to vector<8x32xf32>
    %344 = arith.addf %342, %343 : vector<8x32xf32>
    %c1_147 = arith.constant 1 : index
    %c0_148 = arith.constant 0 : index
    %c0_149 = arith.constant 0 : index
    %345 = vector.load %arg15[%c1_147, %c0_148, %c0_149] : memref<2x32x2048xbf16, #tpu.memory_space<vmem>>, vector<1x32x2048xbf16>
    %346 = vector.shape_cast %345 : vector<1x32x2048xbf16> to vector<32x2048xbf16>
    %347 = arith.truncf %344 : vector<8x32xf32> to vector<8x32xbf16>
    %cst_150 = arith.constant dense<0.000000e+00> : vector<8x2048xf32>
    %348 = tpu.matmul %347, %346, %cst_150 {dimension_numbers = #tpu.dot_dimension_numbers<[1], [0], [0], [1], [0, 0, 1, 1], [], []>} : vector<8x32xbf16>, vector<32x2048xbf16>, vector<8x2048xf32> -> vector<8x2048xf32>
    %c1_151 = arith.constant 1 : index
    %c0_152 = arith.constant 0 : index
    %349 = vector.load %arg16[%c1_151, %c0_152] : memref<2x2048xf32, #tpu.memory_space<vmem>>, vector<1x2048xf32>
    %350 = vector.broadcast %349 : vector<1x2048xf32> to vector<8x2048xf32>
    %351 = arith.addf %348, %350 : vector<8x2048xf32>
    %cst_153 = arith.constant 0.000000e+00 : f32
    %352 = vector.broadcast %cst_153 : f32 to vector<8x2048xf32>
    %353 = arith.maximumf %351, %352 : vector<8x2048xf32>
    %c1_154 = arith.constant 1 : index
    %c0_155 = arith.constant 0 : index
    %c0_156 = arith.constant 0 : index
    %354 = vector.load %arg17[%c1_154, %c0_155, %c0_156] : memref<2x2048x32xbf16, #tpu.memory_space<vmem>>, vector<1x2048x32xbf16>
    %355 = vector.shape_cast %354 : vector<1x2048x32xbf16> to vector<2048x32xbf16>
    %356 = arith.truncf %353 : vector<8x2048xf32> to vector<8x2048xbf16>
    %cst_157 = arith.constant dense<0.000000e+00> : vector<8x32xf32>
    %357 = tpu.matmul %356, %355, %cst_157 {dimension_numbers = #tpu.dot_dimension_numbers<[1], [0], [0], [1], [0, 0, 1, 1], [], []>} : vector<8x2048xbf16>, vector<2048x32xbf16>, vector<8x32xf32> -> vector<8x32xf32>
    %c1_158 = arith.constant 1 : index
    %c0_159 = arith.constant 0 : index
    %358 = vector.load %arg18[%c1_158, %c0_159] : memref<2x32xf32, #tpu.memory_space<vmem>>, vector<1x32xf32>
    %359 = vector.broadcast %358 : vector<1x32xf32> to vector<8x32xf32>
    %360 = arith.addf %357, %359 : vector<8x32xf32>
    %361 = arith.addf %344, %360 : vector<8x32xf32>
    %c1_160 = arith.constant 1 : index
    %c0_161 = arith.constant 0 : index
    %362 = vector.load %arg23[%c1_160, %c0_161] : memref<2x32xf32, #tpu.memory_space<vmem>>, vector<1x32xf32>
    %c1_162 = arith.constant 1 : index
    %c0_163 = arith.constant 0 : index
    %363 = vector.load %arg24[%c1_162, %c0_163] : memref<2x32xf32, #tpu.memory_space<vmem>>, vector<1x32xf32>
    %cst_164 = arith.constant dense<0.000000e+00> : vector<8xf32>
    %364 = vector.multi_reduction <add>, %361, %cst_164 [1] : vector<8x32xf32> to vector<8xf32>
    %365 = vector.shape_cast %364 : vector<8xf32> to vector<8x1xf32>
    %cst_165 = arith.constant 3.200000e+01 : f32
    %366 = vector.broadcast %cst_165 : f32 to vector<8x1xf32>
    %367 = arith.divf %365, %366 : vector<8x1xf32>
    %368 = vector.broadcast %367 : vector<8x1xf32> to vector<8x32xf32>
    %369 = arith.subf %361, %368 : vector<8x32xf32>
    %370 = arith.mulf %369, %369 : vector<8x32xf32>
    %cst_166 = arith.constant dense<0.000000e+00> : vector<8xf32>
    %371 = vector.multi_reduction <add>, %370, %cst_166 [1] : vector<8x32xf32> to vector<8xf32>
    %372 = vector.shape_cast %371 : vector<8xf32> to vector<8x1xf32>
    %cst_167 = arith.constant 3.200000e+01 : f32
    %373 = vector.broadcast %cst_167 : f32 to vector<8x1xf32>
    %374 = arith.divf %372, %373 : vector<8x1xf32>
    %375 = vector.broadcast %367 : vector<8x1xf32> to vector<8x32xf32>
    %376 = arith.subf %361, %375 : vector<8x32xf32>
    %cst_168 = arith.constant 9.99999974E-6 : f32
    %377 = vector.broadcast %cst_168 : f32 to vector<8x1xf32>
    %378 = arith.addf %374, %377 : vector<8x1xf32>
    %379 = math.rsqrt %378 : vector<8x1xf32>
    %380 = vector.broadcast %379 : vector<8x1xf32> to vector<8x32xf32>
    %381 = arith.mulf %376, %380 : vector<8x32xf32>
    %382 = vector.broadcast %362 : vector<1x32xf32> to vector<8x32xf32>
    %383 = arith.mulf %381, %382 : vector<8x32xf32>
    %384 = vector.broadcast %363 : vector<1x32xf32> to vector<8x32xf32>
    %385 = arith.addf %383, %384 : vector<8x32xf32>
    %c0_169 = arith.constant 0 : index
    %c0_170 = arith.constant 0 : index
    %386 = vector.load %arg25[%c0_169, %c0_170] : memref<32x128xbf16, #tpu.memory_space<vmem>>, vector<32x128xbf16>
    %387 = arith.truncf %385 : vector<8x32xf32> to vector<8x32xbf16>
    %cst_171 = arith.constant dense<0.000000e+00> : vector<8x128xf32>
    %388 = tpu.matmul %387, %386, %cst_171 {dimension_numbers = #tpu.dot_dimension_numbers<[1], [0], [0], [1], [0, 0, 1, 1], [], []>} : vector<8x32xbf16>, vector<32x128xbf16>, vector<8x128xf32> -> vector<8x128xf32>
    %c0_172 = arith.constant 0 : index
    %c0_173 = arith.constant 0 : index
    %389 = vector.load %arg26[%c0_172, %c0_173] : memref<1x128xf32, #tpu.memory_space<vmem>>, vector<1x128xf32>
    %390 = vector.broadcast %389 : vector<1x128xf32> to vector<8x128xf32>
    %391 = arith.addf %388, %390 : vector<8x128xf32>
    %c0_174 = arith.constant 0 : index
    %c0_175 = arith.constant 0 : index
    %c0_176 = arith.constant 0 : index
    %392 = vector.load %arg27[%c0_174, %c0_175, %c0_176] : memref<1x8x128xf32, #tpu.memory_space<vmem>>, vector<1x8x128xf32>
    %393 = vector.shape_cast %392 : vector<1x8x128xf32> to vector<8x128xf32>
    %394 = vector.shape_cast %391 : vector<8x128xf32> to vector<1x8x128xf32>
    tpu.vector_store %arg27[%c0_174, %c0_175, %c0_176], %394 {strides = array<i32>} : memref<1x8x128xf32, #tpu.memory_space<vmem>>, vector<1x8x128xf32>,
    return
  }
  func.func @transform_0(%arg0: i32) -> (i32, i32, i32) {
    %c0_i32 = arith.constant 0 : i32
    %c0_i32_0 = arith.constant 0 : i32
    %c0_i32_1 = arith.constant 0 : i32
    return %arg0, %c0_i32, %c0_i32_0 : i32, i32, i32
  }
  func.func @transform_1(%arg0: i32) -> (i32, i32, i32) {
    %c0_i32 = arith.constant 0 : i32
    %c0_i32_0 = arith.constant 0 : i32
    %c0_i32_1 = arith.constant 0 : i32
    return %arg0, %c0_i32, %c0_i32_0 : i32, i32, i32
  }
  func.func @transform_2(%arg0: i32) -> (i32, i32, i32) {
    %c0_i32 = arith.constant 0 : i32
    %c0_i32_0 = arith.constant 0 : i32
    %c0_i32_1 = arith.constant 0 : i32
    return %arg0, %c0_i32, %c0_i32_0 : i32, i32, i32
  }
  func.func @transform_3(%arg0: i32) -> (i32, i32, i32) {
    %c0_i32 = arith.constant 0 : i32
    %c0_i32_0 = arith.constant 0 : i32
    %c0_i32_1 = arith.constant 0 : i32
    return %arg0, %c0_i32, %c0_i32_0 : i32, i32, i32
  }
  func.func @transform_4(%arg0: i32) -> (i32, i32, i32) {
    %c0_i32 = arith.constant 0 : i32
    %c0_i32_0 = arith.constant 0 : i32
    %c0_i32_1 = arith.constant 0 : i32
    %c0_i32_2 = arith.constant 0 : i32
    return %c0_i32, %c0_i32_0, %c0_i32_1 : i32, i32, i32
  }
  func.func @transform_5(%arg0: i32) -> (i32, i32) {
    %c0_i32 = arith.constant 0 : i32
    %c0_i32_0 = arith.constant 0 : i32
    %c0_i32_1 = arith.constant 0 : i32
    return %c0_i32, %c0_i32_0 : i32, i32
  }
  func.func @transform_6(%arg0: i32) -> (i32, i32, i32) {
    %c0_i32 = arith.constant 0 : i32
    %c0_i32_0 = arith.constant 0 : i32
    %c0_i32_1 = arith.constant 0 : i32
    %c0_i32_2 = arith.constant 0 : i32
    return %c0_i32, %c0_i32_0, %c0_i32_1 : i32, i32, i32
  }
  func.func @transform_7(%arg0: i32) -> (i32, i32) {
    %c0_i32 = arith.constant 0 : i32
    %c0_i32_0 = arith.constant 0 : i32
    %c0_i32_1 = arith.constant 0 : i32
    return %c0_i32, %c0_i32_0 : i32, i32
  }
  func.func @transform_8(%arg0: i32) -> (i32, i32, i32) {
    %c0_i32 = arith.constant 0 : i32
    %c0_i32_0 = arith.constant 0 : i32
    %c0_i32_1 = arith.constant 0 : i32
    %c0_i32_2 = arith.constant 0 : i32
    return %c0_i32, %c0_i32_0, %c0_i32_1 : i32, i32, i32
  }
  func.func @transform_9(%arg0: i32) -> (i32, i32) {
    %c0_i32 = arith.constant 0 : i32
    %c0_i32_0 = arith.constant 0 : i32
    %c0_i32_1 = arith.constant 0 : i32
    return %c0_i32, %c0_i32_0 : i32, i32
  }
  func.func @transform_10(%arg0: i32) -> (i32, i32, i32) {
    %c0_i32 = arith.constant 0 : i32
    %c0_i32_0 = arith.constant 0 : i32
    %c0_i32_1 = arith.constant 0 : i32
    %c0_i32_2 = arith.constant 0 : i32
    return %c0_i32, %c0_i32_0, %c0_i32_1 : i32, i32, i32
  }
  func.func @transform_11(%arg0: i32) -> (i32, i32) {
    %c0_i32 = arith.constant 0 : i32
    %c0_i32_0 = arith.constant 0 : i32
    %c0_i32_1 = arith.constant 0 : i32
    return %c0_i32, %c0_i32_0 : i32, i32
  }
  func.func @transform_12(%arg0: i32) -> (i32, i32, i32) {
    %c0_i32 = arith.constant 0 : i32
    %c0_i32_0 = arith.constant 0 : i32
    %c0_i32_1 = arith.constant 0 : i32
    %c0_i32_2 = arith.constant 0 : i32
    return %c0_i32, %c0_i32_0, %c0_i32_1 : i32, i32, i32
  }
  func.func @transform_13(%arg0: i32) -> (i32, i32) {
    %c0_i32 = arith.constant 0 : i32
    %c0_i32_0 = arith.constant 0 : i32
    %c0_i32_1 = arith.constant 0 : i32
    return %c0_i32, %c0_i32_0 : i32, i32
  }
  func.func @transform_14(%arg0: i32) -> (i32, i32, i32) {
    %c0_i32 = arith.constant 0 : i32
    %c0_i32_0 = arith.constant 0 : i32
    %c0_i32_1 = arith.constant 0 : i32
    %c0_i32_2 = arith.constant 0 : i32
    return %c0_i32, %c0_i32_0, %c0_i32_1 : i32, i32, i32
  }
  func.func @transform_15(%arg0: i32) -> (i32, i32) {
    %c0_i32 = arith.constant 0 : i32
    %c0_i32_0 = arith.constant 0 : i32
    %c0_i32_1 = arith.constant 0 : i32
    return %c0_i32, %c0_i32_0 : i32, i32
  }
  func.func @transform_16(%arg0: i32) -> (i32, i32, i32) {
    %c0_i32 = arith.constant 0 : i32
    %c0_i32_0 = arith.constant 0 : i32
    %c0_i32_1 = arith.constant 0 : i32
    %c0_i32_2 = arith.constant 0 : i32
    return %c0_i32, %c0_i32_0, %c0_i32_1 : i32, i32, i32
  }
  func.func @transform_17(%arg0: i32) -> (i32, i32) {
    %c0_i32 = arith.constant 0 : i32
    %c0_i32_0 = arith.constant 0 : i32
    %c0_i32_1 = arith.constant 0 : i32
    return %c0_i32, %c0_i32_0 : i32, i32
  }
  func.func @transform_18(%arg0: i32) -> (i32, i32) {
    %c0_i32 = arith.constant 0 : i32
    %c0_i32_0 = arith.constant 0 : i32
    %c0_i32_1 = arith.constant 0 : i32
    return %c0_i32, %c0_i32_0 : i32, i32
  }
  func.func @transform_19(%arg0: i32) -> (i32, i32) {
    %c0_i32 = arith.constant 0 : i32
    %c0_i32_0 = arith.constant 0 : i32
    %c0_i32_1 = arith.constant 0 : i32
    return %c0_i32, %c0_i32_0 : i32, i32
  }
  func.func @transform_20(%arg0: i32) -> (i32, i32) {
    %c0_i32 = arith.constant 0 : i32
    %c0_i32_0 = arith.constant 0 : i32
    %c0_i32_1 = arith.constant 0 : i32
    return %c0_i32, %c0_i32_0 : i32, i32
  }
  func.func @transform_21(%arg0: i32) -> (i32, i32) {
    %c0_i32 = arith.constant 0 : i32
    %c0_i32_0 = arith.constant 0 : i32
    %c0_i32_1 = arith.constant 0 : i32
    return %c0_i32, %c0_i32_0 : i32, i32
  }
  func.func @transform_22(%arg0: i32) -> (i32, i32) {
    %c0_i32 = arith.constant 0 : i32
    %c0_i32_0 = arith.constant 0 : i32
    %c0_i32_1 = arith.constant 0 : i32
    return %c0_i32, %c0_i32_0 : i32, i32
  }
  func.func @transform_23(%arg0: i32) -> (i32, i32) {
    %c0_i32 = arith.constant 0 : i32
    %c0_i32_0 = arith.constant 0 : i32
    %c0_i32_1 = arith.constant 0 : i32
    return %c0_i32, %c0_i32_0 : i32, i32
  }
  func.func @transform_24(%arg0: i32) -> (i32, i32) {
    %c0_i32 = arith.constant 0 : i32
    %c0_i32_0 = arith.constant 0 : i32
    %c0_i32_1 = arith.constant 0 : i32
    return %c0_i32, %c0_i32_0 : i32, i32
  }
  func.func @transform_25(%arg0: i32) -> (i32, i32) {
    %c0_i32 = arith.constant 0 : i32
    %c0_i32_0 = arith.constant 0 : i32
    %c0_i32_1 = arith.constant 0 : i32
    return %c0_i32, %c0_i32_0 : i32, i32
  }
  func.func @transform_26(%arg0: i32) -> (i32, i32, i32) {
    %c0_i32 = arith.constant 0 : i32
    %c0_i32_0 = arith.constant 0 : i32
    %c0_i32_1 = arith.constant 0 : i32
    return %arg0, %c0_i32, %c0_i32_0 : i32, i32, i32
  }
}

</mosaic_0001>

<bundles_post_ra>
// kernel: transformer_decoder_forward.1
= control target key start
LH: loop header
LB: loop body
LE: loop exit
PB: predicated region body
PF: predicated region fallthrough
CT: control target
= control target key end

     0   :  { %s19084_s0 = inlined_call_operand.vmem [shape: f32[2,8,32], index: 0, kind: input, shape index: {}]   ;;  %s19085_s1 = inlined_call_operand.vmem [shape: f32[2,16,32], index: 1, kind: input, shape index: {}]   ;;  %s19086_s2 = inlined_call_operand.vmem [shape: f32[2,8,8], index: 2, kind: input, shape index: {}]   ;;  %s19087_s3 = inlined_call_operand.vmem [shape: f32[2,8,16], index: 3, kind: input, shape index: {}]   ;;  %s19088_s4 = inlined_call_operand.vmem [shape: bf16[2,32,96], index: 4, kind: input, shape index: {}]   ;;  %s19089_s5 = inlined_call_operand.vmem [shape: f32[2,96], index: 5, kind: input, shape index: {}]   ;;  %s19090_s6 = inlined_call_operand.vmem [shape: bf16[2,32,32], index: 6, kind: input, shape index: {}]   ;;  %s19091_s7 = inlined_call_operand.vmem [shape: f32[2,32], index: 7, kind: input, shape index: {}]   ;;  %s19092_s8 = inlined_call_operand.vmem [shape: bf16[2,32,32], index: 8, kind: input, shape index: {}]   ;;  %s19093_s9 = inlined_call_operand.vmem [shape: f32[2,32], index: 9, kind: input, shape index: {}]   ;;  %s19094_s10 = inlined_call_operand.vmem [shape: bf16[2,32,64], index: 10, kind: input, shape index: {}]   ;;  %s19095_s11 = inlined_call_operand.vmem [shape: f32[2,64], index: 11, kind: input, shape index: {}]   ;;  %s19096_s12 = inlined_call_operand.vmem [shape: bf16[2,32,32], index: 12, kind: input, shape index: {}]   ;;  %s19097_s13 = inlined_call_operand.vmem [shape: f32[2,32], index: 13, kind: input, shape index: {}]   ;;  %s19098_s14 = inlined_call_operand.vmem [shape: bf16[2,32,2048], index: 14, kind: input, shape index: {}]   ;;  %s19099_s15 = inlined_call_operand.vmem [shape: f32[2,2048], index: 15, kind: input, shape index: {}]   ;;  %s19100_s16 = inlined_call_operand.vmem [shape: bf16[2,2048,32], index: 16, kind: input, shape index: {}]   ;;  %s19101_s17 = inlined_call_operand.vmem [shape: f32[2,32], index: 17, kind: input, shape index: {}]   ;;  %s19102_s18 = inlined_call_operand.vmem [shape: f32[2,32], index: 18, kind: input, shape index: {}]   ;;  %s19103_s19 = inlined_call_operand.vmem [shape: f32[2,32], index: 19, kind: input, shape index: {}]   ;;  %s19104_s20 = inlined_call_operand.vmem [shape: f32[2,32], index: 20, kind: input, shape index: {}]   ;;  %s19105_s21 = inlined_call_operand.vmem [shape: f32[2,32], index: 21, kind: input, shape index: {}]   ;;  %s19106_s22 = inlined_call_operand.vmem [shape: f32[2,32], index: 22, kind: input, shape index: {}]   ;;  %s19107_s23 = inlined_call_operand.vmem [shape: f32[2,32], index: 23, kind: input, shape index: {}]   ;;  %s19108_s24 = inlined_call_operand.vmem [shape: bf16[32,128], index: 24, kind: input, shape index: {}]   ;;  %s19109_s25 = inlined_call_operand.vmem [shape: f32[1,128], index: 25, kind: input, shape index: {}]   ;;  %s19110_s26 = inlined_call_operand.hbm [shape: f32[2,8,128], index: 26, kind: output, shape index: {}]  }
   0x1   :  { %19169 = sst [smem:[#allocation15_spill]] %s19084_s0 }
   0x2   :  { %19170 = sst [smem:[#allocation16_spill]] %s19085_s1 }
   0x3   :  { %19171 = sst [smem:[#allocation17_spill]] %s19086_s2 }
   0x4   :  { %19172 = sst [smem:[#allocation18_spill]] %s19087_s3 }
   0x5   :  { %19173 = sst [smem:[#allocation19_spill]] %s19088_s4 }
   0x6   :  { %19174 = sst [smem:[#allocation20_spill]] %s19089_s5 }
   0x7   :  { %19175 = sst [smem:[#allocation21_spill]] %s19090_s6 }
   0x8   :  { %19176 = sst [smem:[#allocation22_spill]] %s19091_s7 }
   0x9   :  { %19177 = sst [smem:[#allocation23_spill]] %s19092_s8 }
   0xa   :  { %19178 = sst [smem:[#allocation24_spill]] %s19093_s9 }
   0xb   :  { %19179 = sst [smem:[#allocation25_spill]] %s19094_s10 }
   0xc   :  { %19180 = sst [smem:[#allocation26_spill]] %s19095_s11 }
   0xd   :  { %19181 = sst [smem:[#allocation27_spill]] %s19096_s12 }
   0xe   :  { %19182 = sst [smem:[#allocation28_spill]] %s19097_s13 }
   0xf   :  { %19183 = sst [smem:[#allocation29_spill]] %s19102_s18 }
  0x10   :  { %19184 = sst [smem:[#allocation30_spill]] %s19103_s19 }
  0x11   :  { %19185 = sst [smem:[#allocation31_spill]] %s19105_s21 }
  0x12   :  { %19186 = sst [smem:[#allocation32_spill]] %s19108_s24 }
  0x13   :  { %19187 = sst [smem:[#allocation33_spill]] %s19109_s25 }
  0x14   :  { %19188 = sst [smem:[#allocation34_spill]] %s19110_s26 }
  0x15   :  { %31 = vsyncpa [#allocation3], 0 }
  0x16   :  { %33 = vsyncpa [#allocation3 + $0x1], 0  ;;  %s14654_s27 = smov 0   ;;  %s14656_s3 = smov 0  }
  0x17   :  { %s14658_s7 = smov 0   ;;  %s14660_s28 = smov 0  }
  0x18 LB: > { %19189 = sst [smem:[#allocation5_spill]] %s14486_s27  ;;  %s14675_s8 = sadd.s32 4294967295, %s14498_s28   ;;  %s14498_s28 = sphi %s14660_s28, %s19263_s28   ;;  %s14494_s7 = sphi %s14658_s7, %s19266_s7   ;;  %s14490_s3 = sphi %s14656_s3, %s19265_s3   ;;  %s14486_s27 = sphi %s14654_s27, %s19264_s27  }
  0x19   : > { %19190 = sst [smem:[#allocation6_spill]] %s14490_s3  ;;  %s11835_s4 = sadd.s32 4294967294, %s14498_s28  }
  0x1a   : > { %19191 = sst [smem:[#allocation7_spill]] %s14494_s7  ;;  %s14679_s29 = sadd.s32 1, %s14498_s28  }
  0x1b   : > { %19192 = sst [smem:[#allocation8_spill]] %s14498_s28  ;;  %s612_s0 = sadd.s32 1, %s14494_s7 }
  0x1c   : > { %19193 = sst [smem:[#allocation9_spill]] %s14675_s8  ;;  %s609_s9 = ssub.s32 %s14498_s28, %s14679_s29 }
  0x1d   : > { %19194 = sst [smem:[#allocation10_spill]] %s14679_s29  ;;  %p622_p0 = scmp.ne.s32.totalorder %s14494_s7, %s14490_s3 }
  0x1e   : > { %p610_p1 = scmp.eq.s32.totalorder %s609_s9, 0  ;;  %p623_p2 = scmp.eq.s32.totalorder %s14675_s8, 1 }
  0x1f   : > { %p628_p3 = scmp.ne.s32.totalorder %s14490_s3, %s14486_s27  ;;  %p629_p4 = scmp.eq.s32.totalorder %s11835_s4, 1 }
  0x20   : > { %s14690_s30 = scalar_select %p610_p1, %s14494_s7, %s612_s0  }
  0x21   : > { %p14692_p5 = por %p623_p2, %p622_p0  ;;  %p14696_p6 = por %p629_p4, %p628_p3 }
  0x22   : > { %19195 = sst [smem:[#allocation11_spill]] %s14690_s30  ;;  %p11838_p7 = scmp.ge.s32.totalorder %s14498_s28, 1 }
  0x23   : > { %s19196_s2 = scalar_select %p14692_p5, 1, 0 }
  0x24   : > { %s19198_s5 = scalar_select %p14696_p6, 1, 0 }
  0x25   : > { %19197 = sst [smem:[#allocation12_spill]] %s19196_s2  ;;  %p742_p8 = scmp.lt.s32.totalorder %s14498_s28, 3 }
  0x26   : > { %19199 = sst [smem:[#allocation13_spill]] %s19198_s5 }
  0x27   : > { %p743_p9 = pnand %p11838_p7, %p742_p8 }
  0x29   : > { %746 = sbr.rel (%p743_p9) target bundleno = 7288 (0x1c78), region = 124 }
  0x2e   : > { %s19200_s1 = sld [smem:[#allocation19_spill]]  ;;  %p824_p10 = scmp.lt.s32.totalorder %s14675_s8, 1  ;;  %vm866_vm0 = vcmask 261120   ;;  %v14509_v26 = vmov 1983009808   ;;  %vm912_vm1 = vcmask 1047556  }
  0x2f   : > { %s19201_s5 = sld [smem:[#allocation15_spill]]  ;;  %s19124_s0 = smov 116   ;;  %v917_v27 = vunpack.c.l.s4 %v14509_v26  ;;  %v14510_v56 = vmov 1934713408   ;;  %vm1663_vm2 = vcmask 31744   ;;  %vm1816_vm3 = vcmask 64512  }
  0x30   : > { %s14710_s9 = scalar_select %p824_p10, %s14675_s8, 1  ;;  %v965_v57 = vunpack.c.l.s4 %v14510_v56  ;;  %vm1924_vm4 = vcmask 1043456   ;;  %vm2328_vm5 = vcmask 97280   ;;  %vm2330_vm6 = vcmask 130048  }
  0x31   : > { %s19202_s4 = sld [smem:[#allocation20_spill]]  ;;  %s19136_s28 = smov 108   ;;  %v14770_v35 = vunpack.c.0.s8 %v917_v27  ;;  %vm2332_vm7 = vcmask 162816   ;;  %vm2334_vm8 = vcmask 195584   ;;  %vm2336_vm9 = vcmask 228352  }
  0x32   : > { %s14713_s30 = sshll.u32 %s14710_s9, 3  ;;  %s19126_s7 = smov 112  }
  0x33   : > { %s19132_s29 = smov 124   ;;  %s19128_s10 = smov 120  }
  0x34   : > { %v13637_v0 = vld [vmem:[%s19200_s1 + $0x8] sm:$0xff]  ;;  %v13636_v1 = vld [vmem:[%s19200_s1] sm:$0xff]  ;;  %s19146_s6 = smov 100   ;;  %s19205_s2 = sld [smem:[#allocation21_spill]] }
  0x35   : > { %876 = vmatpush.bf16.msra.mxu0 %v13637_v0  ;;  %s14719_s27 = scalar_lea.vmem %s19201_s5, %s14713_s30  ;;  %s19134_s5 = smov 104  }
  0x36   : > { %v842_v2 = vld [vmem:[%s14719_s27] sm:$0xff]  ;;  %s13635_s25 = sshll.u32 %s14710_s9, 4  ;;  %s19207_s8 = sld [smem:[#allocation25_spill]] }
  0x37   : > { %v851_v3 = vpack.c.bf16 %v842_v2, %v842_v2  ;;  %v14266_v4 = vld [vmem:[%s19202_s4] ss:$0 sm:$0xff]  ;;  %s19209_s11 = sld [smem:[#allocation26_spill]]  ;;  %s19220_s3 = smov 96  }
  0x38   : > { %s19216_s24 = sld [smem:[#allocation23_spill]]  ;;  %s19225_s9 = smov 8  }
  0x39   : > { %877 = vmatpush.bf16.msra.mxu0 %v13636_v1  ;;  %s19217_s18 = sld [smem:[#allocation29_spill]]  ;;  %s19226_s26 = smov 4  }
  0x3a   : > { %s19218_s19 = sld [smem:[#allocation30_spill]] }
  0x3b   : > { %s19230_s12 = sld [smem:[#allocation27_spill]] }
  0x3c   : > { %11853 = vmatmul.msk.bf16.vlgmr.msra.gmra.mxu0 %vm866_vm0, %v851_v3  ;;  %s19231_s13 = sld [smem:[#allocation28_spill]] }
  0x3d   : > { %s19232_s21 = sld [smem:[#allocation31_spill]] }
  0xb9   : > { %v879_v5 = vpop.f32.mrf.mxu0 }
  0xba   : > { %v880_v6 = vadd.f32 %v14266_v4, %v879_v5 }
  0xbc   : > { %1141 = vrot.lane.b32.xlu2 %v880_v6, %s19124_s0  ;;  %1145 = vrot.lane.b32.xlu1 %v880_v6, %s19136_s28  ;;  %v14732_v8 = vmul.f32 0.5, %v880_v6  ;;  %s19130_s0 = smov 96  }
  0xbd   : > { %1143 = vrot.lane.b32.xlu0 %v880_v6, %s19126_s7 }
  0xbe   : > { %v914_v42 = vrot.slane %v14732_v8, 4 }
  0xc1   : > { %v881_v7 = vpop.f32.mrf.mxu0 }
  0xc4   : > { %1137 = vrot.lane.b32.xlu2 %v880_v6, %s19132_s29  ;;  %1147 = vrot.lane.b32.xlu1 %v880_v6, %s19134_s5 }
  0xc5   : > { %1139 = vrot.lane.b32.xlu0 %v880_v6, %s19128_s10 }
  0xcc   : > { %899 = vrot.lane.b32.xlu2 %v14732_v8, %s19126_s7  ;;  %s19203_s7 = smov 116  }
  0xcd   : > { %1149 = vrot.lane.b32.xlu0 %v880_v6, %s19146_s6 }
 0x116   : > { %v1142_v12 = vpop.permute.xlu2 %1141 }
 0x11e   : > { %v1138_v18 = vpop.permute.xlu2 %1137 }
 0x126   : > { %v900_v20 = vpop.permute.xlu2 %899 }
 0x127   : > { %v938_v33 = vrot.slane %v900_v20, 4 }
 0x12e   : > { %v1146_v9 = vpop.permute.xlu1 %1145 }
 0x12f   : > { %v14737_v10 = vpack.i.bf16 %v1146_v9, %v880_v6  ;;  %v1144_v11 = vpop.permute.xlu0 %1143  ;;  %v14796_v9 = vunpack.c.0.s8 %v965_v57 }
 0x131   : > { %14042 = vrot.lane.b32.xlu2 %v14737_v10, %s19130_s0 }
 0x136   : > { %v1148_v13 = vpop.permute.xlu1 %1147 }
 0x137   : > { %v14741_v14 = vpack.i.bf16 %v1142_v12, %v1148_v13  ;;  %v1140_v15 = vpop.permute.xlu0 %1139 }
 0x138   : > { %v14036_v16 = vpack.i.bf16 %v1140_v15, %v1144_v11 }
 0x139   : > { %14047 = vrot.lane.b32.xlu0 %v14741_v14, %s19130_s0  ;;  %905 = vrot.lane.b32.xlu2 %v14732_v8, %s19134_s5  ;;  %s19204_s5 = sld [smem:[#allocation17_spill]] }
 0x13a   : > { %14037 = vrot.lane.b32.xlu1 %v14036_v16, %s19130_s0 }
 0x13f   : > { %v1150_v17 = vpop.permute.xlu0 %1149 }
 0x140   : > { %v14754_v19 = vpack.i.bf16 %v1150_v17, %v1138_v18 }
 0x141   : > { %893 = vrot.lane.b32.xlu0 %v14732_v8, %s19128_s10  ;;  %908 = vrot.lane.b32.xlu2 %v14732_v8, %s19146_s6  ;;  %s19138_s10 = smov 64   ;;  %s19206_s6 = sld [smem:[#allocation16_spill]] }
 0x142   : > { %902 = vrot.lane.b32.xlu1 %v14732_v8, %s19136_s28  ;;  %s15029_s28 = scalar_lea.vmem %s19204_s5, %s14713_s30  ;;  %s19144_s5 = smov 12  }
 0x149   : > { %896 = vrot.lane.b32.xlu0 %v14732_v8, %s19203_s7 }
 0x14a   : > { %14052 = vrot.lane.b32.xlu1 %v14754_v19, %s19130_s0  ;;  %s19142_s0 = smov 8  }
 0x152   : > { %890 = vrot.lane.b32.xlu1 %v14732_v8, %s19132_s29  ;;  %s19140_s29 = smov 4  }
 0x15a   : > { %14057 = vrot.lane.b32.xlu1 %v14036_v16, %s19138_s10 }
 0x18b   : > { %v14763_v21 = vpop.permute.xlu2 %14042 }
 0x18c   : > { %v14044_v31 = vunpack.i.l.bf16 %v14763_v21  ;;  %v14045_v43 = vunpack.i.h.bf16 %v14763_v21 }
 0x18e   : > { %v1177_v39 = vrot.slane %v14044_v31, 4  ;;  %v1213_v6 = vrot.slane %v14045_v43, 4 }
 0x193   : > { %v906_v22 = vpop.permute.xlu2 %905 }
 0x194   : > { %v936_v25 = vrot.slane %v906_v22, 4  ;;  %v939_v44 = vsel %vm912_vm1, %v906_v22, %v938_v33 }
 0x195   : > { %v947_v55 = vperm.slane %v939_v44, %v14770_v35 }
 0x196   : > { %v937_v34 = vsel %vm912_vm1, %v936_v25, %v900_v20 }
 0x197   : > { %v943_v45 = vperm.slane %v937_v34, %v14770_v35  ;;  %v998_v7 = vrot.slane %v947_v55, 4 }
 0x199   : > { %v986_v3 = vrot.slane %v943_v45, 4 }
 0x19b   : > { %v909_v32 = vpop.permute.xlu2 %908 }
 0x19c   : > { %v948_v40 = vrot.slane %v909_v32, 4 }
 0x1ab   : > { %v14765_v23 = vpop.permute.xlu0 %14047 }
 0x1ac   : > { %v14038_v24 = vpop.permute.xlu1 %14037  ;;  %v14049_v30 = vunpack.i.l.bf16 %v14765_v23  ;;  %v14050_v61 = vunpack.i.h.bf16 %v14765_v23 }
 0x1ad   : > { %v14040_v28 = vunpack.i.h.bf16 %v14038_v24  ;;  %v14039_v29 = vunpack.i.l.bf16 %v14038_v24 }
 0x1ae   : > { %v1199_v38 = vrot.slane %v14049_v30, 4  ;;  %v1187_v13 = vrot.slane %v14050_v61, 4 }
 0x1af   : > { %v1175_v36 = vrot.slane %v14040_v28, 4  ;;  %v1201_v37 = vrot.slane %v14039_v29, 4  ;;  %v1178_v47 = vsel %vm912_vm1, %v14040_v28, %v1177_v39 }
 0x1b0   : > { %v1200_v52 = vsel %vm912_vm1, %v1199_v38, %v14039_v29  ;;  %v1186_v60 = vperm.slane %v1178_v47, %v14770_v35 }
 0x1b1   : > { %v1176_v51 = vsel %vm912_vm1, %v1175_v36, %v14044_v31  ;;  %v1202_v53 = vsel %vm912_vm1, %v14049_v30, %v1201_v37  ;;  %v1206_v0 = vperm.slane %v1200_v52, %v14770_v35 }
 0x1b2   : > { %v1182_v63 = vperm.slane %v1176_v51, %v14770_v35  ;;  %v1210_v1 = vperm.slane %v1202_v53, %v14770_v35  ;;  %v1237_v12 = vrot.slane %v1186_v60, 4 }
 0x1b3   : > { %v894_v41 = vpop.permute.xlu0 %893 }
 0x1b4   : > { %v903_v46 = vpop.permute.xlu1 %902  ;;  %v911_v50 = vrot.slane %v894_v41, 4  ;;  %v915_v59 = vsel %vm912_vm1, %v894_v41, %v914_v42  ;;  %v1225_v18 = vrot.slane %v1182_v63, 4  ;;  %v1261_v20 = vrot.slane %v1210_v1, 4 }
 0x1b5   : > { %v949_v48 = vsel %vm912_vm1, %v948_v40, %v903_v46  ;;  %v950_v49 = vrot.slane %v903_v46, 4  ;;  %v14794_v5 = vperm.slane %v915_v59, %v14770_v35 }
 0x1b6   : > { %v955_v54 = vperm.slane %v949_v48, %v14770_v35  ;;  %v913_v2 = vsel %vm912_vm1, %v911_v50, %v14732_v8  ;;  %v1249_v8 = vrot.slane %v1206_v0, 4 }
 0x1b7   : > { %v951_v58 = vsel %vm912_vm1, %v909_v32, %v950_v49  ;;  %v14800_v16 = vperm.slane %v913_v2, %v14770_v35  ;;  %v974_v24 = vrot.slane %v14794_v5, 4 }
 0x1b8   : > { %v959_v62 = vperm.slane %v951_v58, %v14770_v35  ;;  %v984_v4 = vrot.slane %v955_v54, 4  ;;  %v987_v15 = vsel %vm912_vm1, %v955_v54, %v986_v3 }
 0x1b9   : > { %v14806_v26 = vperm.slane %v987_v15, %v14796_v9  ;;  %v962_v30 = vrot.slane %v14800_v16, 4 }
 0x1ba   : > { %v996_v11 = vrot.slane %v959_v62, 4  ;;  %v985_v22 = vsel %vm912_vm1, %v984_v4, %v943_v45  ;;  %v999_v23 = vsel %vm912_vm1, %v959_v62, %v998_v7 }
 0x1bb   : > { %v14814_v34 = vperm.slane %v985_v22, %v14796_v9  ;;  %v14817_v36 = vperm.slane %v999_v23, %v14796_v9  ;;  %v1012_v4 = vrot.slane %v14806_v26, 4 }
 0x1bc   : > { %v14053_v17 = vpop.permute.xlu1 %14052  ;;  %v997_v27 = vsel %vm912_vm1, %v996_v11, %v947_v55  ;;  %v897_v55 = vpop.permute.xlu0 %896 }
 0x1bd   : > { %v14055_v21 = vunpack.i.h.bf16 %v14053_v17  ;;  %v14054_v25 = vunpack.i.l.bf16 %v14053_v17  ;;  %v14822_v39 = vperm.slane %v997_v27, %v14796_v9  ;;  %v1008_v3 = vrot.slane %v14814_v34, 4 }
 0x1be   : > { %v924_v7 = vrot.slane %v897_v55, 4 }
 0x1bf   : > { %v1211_v28 = vrot.slane %v14055_v21, 4  ;;  %v1214_v29 = vsel %vm912_vm1, %v14055_v21, %v1213_v6  ;;  %v1188_v31 = vsel %vm912_vm1, %v1187_v13, %v14054_v25  ;;  %v1189_v32 = vrot.slane %v14054_v25, 4 }
 0x1c0   : > { %v1222_v33 = vperm.slane %v1214_v29, %v14770_v35  ;;  %v1194_v37 = vperm.slane %v1188_v31, %v14770_v35 }
 0x1c1   : > { %v1212_v38 = vsel %vm912_vm1, %v1211_v28, %v14045_v43  ;;  %v1190_v40 = vsel %vm912_vm1, %v14050_v61, %v1189_v32 }
 0x1c2   : > { %v1218_v41 = vperm.slane %v1212_v38, %v14770_v35  ;;  %v1259_v42 = vrot.slane %v1222_v33, 4  ;;  %v1198_v44 = vperm.slane %v1190_v40, %v14770_v35  ;;  %v1223_v45 = vrot.slane %v1194_v37, 4 }
 0x1c3   : > { %v1226_v46 = vsel %vm912_vm1, %v1194_v37, %v1225_v18  ;;  %v1262_v47 = vsel %vm912_vm1, %v1222_v33, %v1261_v20  ;;  %v1020_v20 = vrot.slane %v14817_v36, 4 }
 0x1c4   : > { %v1234_v48 = vperm.slane %v1226_v46, %v14796_v9  ;;  %v1247_v49 = vrot.slane %v1218_v41, 4  ;;  %v1250_v43 = vsel %vm912_vm1, %v1218_v41, %v1249_v8  ;;  %v1260_v50 = vsel %vm912_vm1, %v1259_v42, %v1210_v1  ;;  %v891_v2 = vpop.permute.xlu1 %890 }
 0x1c5   : > { %v1224_v51 = vsel %vm912_vm1, %v1223_v45, %v1182_v63  ;;  %v1235_v52 = vrot.slane %v1198_v44, 4  ;;  %v1238_v53 = vsel %vm912_vm1, %v1198_v44, %v1237_v12  ;;  %v1258_v54 = vperm.slane %v1250_v43, %v14796_v9 }
 0x1c6   : > { %v1230_v56 = vperm.slane %v1224_v51, %v14796_v9  ;;  %v1246_v57 = vperm.slane %v1238_v53, %v14796_v9  ;;  %v1248_v58 = vsel %vm912_vm1, %v1247_v49, %v1206_v0  ;;  %v1266_v59 = vperm.slane %v1260_v50, %v14796_v9 }
 0x1c7   : > { %v1236_v61 = vsel %vm912_vm1, %v1235_v52, %v1186_v60  ;;  %v1254_v62 = vperm.slane %v1248_v58, %v14796_v9  ;;  %v1270_v63 = vperm.slane %v1262_v47, %v14796_v9  ;;  %v1275_v1 = vrot.slane %v1258_v54, 4 }
 0x1c8   : > { %v1277_v6 = vrot.slane %v1234_v48, 4  ;;  %v1242_v11 = vperm.slane %v1236_v61, %v14796_v9  ;;  %v1273_v0 = vrot.slane %v1230_v56, 4  ;;  %v1279_v60 = vrot.slane %v1266_v59, 4 }
 0x1c9   : > { %v1271_v12 = vrot.slane %v1254_v62, 4  ;;  %v14846_v13 = vsel %vm912_vm1, %v1275_v1, %v1234_v48  ;;  %v1285_v15 = vrot.slane %v1246_v57, 4  ;;  %v925_v17 = vsel %vm912_vm1, %v924_v7, %v891_v2 }
 0x1ca   : > { %v926_v18 = vrot.slane %v891_v2, 4  ;;  %v1016_v8 = vrot.slane %v14822_v39, 4  ;;  %v1283_v21 = vrot.slane %v1270_v63, 4  ;;  %v931_v22 = vperm.slane %v925_v17, %v14770_v35 }
 0x1cb   : > { %v1278_v23 = vsel %vm912_vm1, %v1258_v54, %v1277_v6  ;;  %v1272_v27 = vsel %vm912_vm1, %v1271_v12, %v1230_v56  ;;  %v1287_v28 = vrot.slane %v14846_v13, 4  ;;  %v1281_v29 = vrot.slane %v1242_v11, 4 }
 0x1cc   : > { %v927_v25 = vsel %vm912_vm1, %v897_v55, %v926_v18  ;;  %v960_v32 = vrot.slane %v931_v22, 4  ;;  %v963_v33 = vsel %vm912_vm1, %v931_v22, %v962_v30  ;;  %v1286_v37 = vsel %vm912_vm1, %v1270_v63, %v1285_v15 }
 0x1cd   : > { %v935_v31 = vperm.slane %v927_v25, %v14770_v35  ;;  %v971_v38 = vperm.slane %v963_v33, %v14796_v9  ;;  %v1274_v40 = vsel %vm912_vm1, %v1254_v62, %v1273_v0  ;;  %v1280_v41 = vsel %vm912_vm1, %v1279_v60, %v1242_v11 }
 0x1ce   : > { %v961_v42 = vsel %vm912_vm1, %v960_v32, %v14800_v16  ;;  %v1288_v46 = vsel %vm912_vm1, %v1287_v28, %v1272_v27  ;;  %v1282_v16 = vsel %vm912_vm1, %v1266_v59, %v1281_v29  ;;  %v1284_v50 = vsel %vm912_vm1, %v1283_v21, %v1246_v57 }
 0x1cf   : > { %v972_v44 = vrot.slane %v935_v31, 4  ;;  %v975_v45 = vsel %vm912_vm1, %v935_v31, %v974_v24  ;;  %v967_v30 = vperm.slane %v961_v42, %v14796_v9  ;;  %v14871_v48 = vsel %vm912_vm1, %v1012_v4, %v971_v38 }
 0x1d0   : > { %v983_v47 = vperm.slane %v975_v45, %v14796_v9  ;;  %v1014_v49 = vrot.slane %v971_v38, 4  ;;  %v1289_v51 = vrot.slane %v1272_v27, 4  ;;  %v1024_v56 = vrot.slane %v14871_v48, 4 }
 0x1d1   : > { %v973_v43 = vsel %vm912_vm1, %v972_v44, %v14794_v5  ;;  %v14881_v52 = vsel %vm912_vm1, %v1008_v3, %v967_v30  ;;  %v1010_v53 = vrot.slane %v967_v30, 4  ;;  %v1294_v58 = vperm.slane %v1288_v46, %v14770_v35 }
 0x1d2   : > { %v14878_v24 = vperm.slane %v973_v43, %v14796_v9  ;;  %v14885_v54 = vsel %vm912_vm1, %v14806_v26, %v1014_v49  ;;  %v1022_v55 = vrot.slane %v983_v47, 4  ;;  %v1026_v5 = vrot.slane %v14881_v52, 4 }
 0x1d3   : > { %v14892_v57 = vsel %vm912_vm1, %v14814_v34, %v1010_v53  ;;  %v14895_v59 = vsel %vm912_vm1, %v1020_v20, %v983_v47  ;;  %v1036_v61 = vrot.slane %v14885_v54, 4  ;;  %v1299_v62 = vrot.slane %v1278_v23, 4 }
 0x1d4   : > { %v1018_v26 = vrot.slane %v14878_v24, 4  ;;  %v1027_v63 = vsel %vm912_vm1, %v14871_v48, %v1026_v5  ;;  %v1301_v1 = vrot.slane %v1274_v40, 4  ;;  %v1311_v2 = vrot.slane %v1284_v50, 4 }
 0x1d5   : > { %v14903_v3 = vsel %vm912_vm1, %v14817_v36, %v1022_v55  ;;  %v1038_v34 = vrot.slane %v14892_v57, 4  ;;  %v1300_v4 = vsel %vm912_vm1, %v1299_v62, %v1274_v40  ;;  %v1323_v6 = vrot.slane %v1286_v37, 4 }
 0x1d6   : > { %v14908_v7 = vperm.slane %v1027_v63, %v14770_v35  ;;  %v1306_v11 = vperm.slane %v1300_v4, %v14770_v35  ;;  %v1312_v12 = vsel %vm912_vm1, %v1311_v2, %v1280_v41  ;;  %v1313_v0 = vrot.slane %v1280_v41, 4 }
 0x1d7   : > { %v1318_v60 = vperm.slane %v1312_v12, %v14770_v35  ;;  %v1324_v15 = vsel %vm912_vm1, %v1323_v6, %v1282_v16  ;;  %v1325_v17 = vrot.slane %v1282_v16, 4  ;;  %v1337_v36 = vrot.slane %v1294_v58, 4 }
 0x1d8   : > { %v1330_v18 = vperm.slane %v1324_v15, %v14770_v35  ;;  %v1335_v20 = vrot.slane %v1306_v11, 4  ;;  %v1290_v21 = vsel %vm912_vm1, %v14846_v13, %v1289_v51  ;;  %v1302_v22 = vsel %vm912_vm1, %v1278_v23, %v1301_v1 }
 0x1d9   : > { %v1338_v25 = vsel %vm912_vm1, %v1306_v11, %v1337_v36  ;;  %v1361_v27 = vrot.slane %v1318_v60, 4  ;;  %v1298_v28 = vperm.slane %v1290_v21, %v14770_v35  ;;  %v1310_v29 = vperm.slane %v1302_v22, %v14770_v35 }
 0x1da   : > { %v1336_v31 = vsel %vm912_vm1, %v1335_v20, %v1294_v58  ;;  %v1359_v32 = vrot.slane %v1330_v18, 4  ;;  %v1346_v33 = vperm.slane %v1338_v25, %v14796_v9  ;;  %v1314_v38 = vsel %vm912_vm1, %v1284_v50, %v1313_v0 }
 0x1db   : > { %v1342_v40 = vperm.slane %v1336_v31, %v14796_v9  ;;  %v1362_v13 = vsel %vm912_vm1, %v1330_v18, %v1361_v27  ;;  %v1322_v23 = vperm.slane %v1314_v38, %v14770_v35  ;;  %v1326_v41 = vsel %vm912_vm1, %v1286_v37, %v1325_v17 }
 0x1dc   : > { %v1360_v42 = vsel %vm912_vm1, %v1359_v32, %v1318_v60  ;;  %v1370_v44 = vperm.slane %v1362_v13, %v14796_v9  ;;  %v1389_v45 = vrot.slane %v1346_v33, 4  ;;  %v1334_v46 = vperm.slane %v1326_v41, %v14770_v35 }
 0x1dd   : > { %v1366_v30 = vperm.slane %v1360_v42, %v14796_v9  ;;  %v1385_v47 = vrot.slane %v1342_v40, 4  ;;  %v1347_v49 = vrot.slane %v1310_v29, 4  ;;  %v1349_v43 = vrot.slane %v1298_v28, 4 }
 0x1de   : > { %v1387_v16 = vrot.slane %v1370_v44, 4  ;;  %v1390_v50 = vsel %vm912_vm1, %v1370_v44, %v1389_v45  ;;  %v1371_v51 = vrot.slane %v1334_v46, 4  ;;  %v1373_v53 = vrot.slane %v1322_v23, 4 }
 0x1df   : > { %v1386_v55 = vsel %vm912_vm1, %v1366_v30, %v1385_v47  ;;  %v1383_v37 = vrot.slane %v1366_v30, 4  ;;  %v1658_v5 = vpack.c.bf16 %v1390_v50, %v1390_v50  ;;  %v1348_v58 = vsel %vm912_vm1, %v1347_v49, %v1298_v28 }
 0x1e0   : > { %v1656_v62 = vpack.c.bf16 %v1386_v55, %v1386_v55  ;;  %v1388_v63 = vsel %vm912_vm1, %v1387_v16, %v1346_v33  ;;  %v1354_v1 = vperm.slane %v1348_v58, %v14796_v9  ;;  %v1372_v2 = vsel %vm912_vm1, %v1371_v51, %v1322_v23 }
 0x1e1   : > { %v1657_v4 = vpack.c.bf16 %v1388_v63, %v1388_v63  ;;  %v1384_v6 = vsel %vm912_vm1, %v1383_v37, %v1342_v40  ;;  %v1725_v11 = vsel %vm1663_vm2, %v1658_v5, 0  ;;  %v1378_v12 = vperm.slane %v1372_v2, %v14796_v9 }
 0x1e2   : > { %v1687_v0 = vsel %vm1663_vm2, %v1656_v62, 0  ;;  %v1655_v60 = vpack.c.bf16 %v1384_v6, %v1384_v6  ;;  %1734 = vmatpush.bf16.xpose.msrb.mxu0 %v1725_v11  ;;  %v1393_v15 = vrot.slane %v1354_v1, 4  ;;  %v1350_v17 = vsel %vm912_vm1, %v1310_v29, %v1349_v43 }
 0x1e3   : > { %1696 = vmatpush.bf16.xpose.msra.mxu2 %v1687_v0  ;;  %v1706_v36 = vsel %vm1663_vm2, %v1657_v4, 0  ;;  %v1358_v18 = vperm.slane %v1350_v17, %v14796_v9  ;;  %v1374_v20 = vsel %vm912_vm1, %v1334_v46, %v1373_v53  ;;  %v1391_v21 = vrot.slane %v1378_v12, 4 }
 0x1e4   : > { %1715 = vmatpush.bf16.xpose.msra.mxu3 %v1706_v36  ;;  %v1668_v22 = vsel %vm1663_vm2, %v1655_v60, 0  ;;  %v1394_v25 = vsel %vm912_vm1, %v1378_v12, %v1393_v15  ;;  %v1382_v27 = vperm.slane %v1374_v20, %v14796_v9  ;;  %v1017_v28 = vsel %vm912_vm1, %v1016_v8, %v14878_v24 }
 0x1e5   : > { %1677 = vmatpush.bf16.xpose.msra.mxu1 %v1668_v22  ;;  %v1660_v29 = vpack.c.bf16 %v1394_v25, %v1394_v25  ;;  %v1397_v31 = vrot.slane %v1358_v18, 4  ;;  %v1392_v32 = vsel %vm912_vm1, %v1391_v21, %v1354_v1  ;;  %v1019_v33 = vsel %vm912_vm1, %v14822_v39, %v1018_v26 }
 0x1e6   : > { %v1395_v38 = vrot.slane %v1382_v27, 4  ;;  %v1659_v40 = vpack.c.bf16 %v1392_v32, %v1392_v32  ;;  %v1025_v13 = vsel %vm912_vm1, %v1024_v56, %v14881_v52  ;;  %v1037_v8 = vsel %vm912_vm1, %v1036_v61, %v14892_v57 }
 0x1e7   : > { %v1763_v23 = vsel %vm1663_vm2, %v1660_v29, 0  ;;  %v1398_v41 = vsel %vm912_vm1, %v1382_v27, %v1397_v31  ;;  %v1031_v24 = vperm.slane %v1025_v13, %v14770_v35  ;;  %v1043_v39 = vperm.slane %v1037_v8, %v14770_v35 }
 0x1e8   : > { %v1396_v26 = vsel %vm912_vm1, %v1395_v38, %v1358_v18  ;;  %v1744_v48 = vsel %vm1663_vm2, %v1659_v40, 0  ;;  %v1662_v42 = vpack.c.bf16 %v1398_v41, %v1398_v41  ;;  %v1048_v52 = vrot.slane %v14895_v59, 4 }
 0x1e9   : > { %v1661_v56 = vpack.c.bf16 %v1396_v26, %v1396_v26  ;;  %v1050_v44 = vrot.slane %v1017_v28, 4  ;;  %v1060_v61 = vrot.slane %v14903_v3, 4  ;;  %v1062_v45 = vrot.slane %v1019_v33, 4 }
 0x1ea   : > { %v1801_v46 = vsel %vm1663_vm2, %v1662_v42, 0  ;;  %v1049_v30 = vsel %vm912_vm1, %v1048_v52, %v1017_v28  ;;  %v1072_v47 = vrot.slane %v1043_v39, 4  ;;  %v1074_v49 = vrot.slane %v1031_v24, 4 }
 0x1eb   : > { %1772 = vmatpush.bf16.xpose.msrb.mxu2 %v1763_v23  ;;  %v1039_v43 = vsel %vm912_vm1, %v14885_v54, %v1038_v34  ;;  %v1782_v16 = vsel %vm1663_vm2, %v1661_v56, 0  ;;  %1810 = vmatpush.bf16.xpose.msra.mxu0 %v1801_v46  ;;  %v1055_v50 = vperm.slane %v1049_v30, %v14770_v35  ;;  %v1061_v51 = vsel %vm912_vm1, %v1060_v61, %v1019_v33 }
 0x1ec   : > { %1791 = vmatpush.bf16.xpose.msrb.mxu3 %v1782_v16  ;;  %v1067_v53 = vperm.slane %v1061_v51, %v14770_v35  ;;  %v1073_v55 = vsel %vm912_vm1, %v1072_v47, %v1031_v24  ;;  %v1075_v37 = vsel %vm912_vm1, %v1043_v39, %v1074_v49  ;;  %v1051_v57 = vsel %vm912_vm1, %v14895_v59, %v1050_v44  ;;  %v845_v47 = vld [vmem:[%s15029_s28] sm:$0xff] }
 0x1ed   : > { %1753 = vmatpush.bf16.xpose.msrb.mxu1 %v1744_v48  ;;  %v1079_v5 = vperm.slane %v1073_v55, %v14796_v9  ;;  %v1083_v54 = vperm.slane %v1075_v37, %v14796_v9  ;;  %v1098_v34 = vrot.slane %v1055_v50, 4  ;;  %v1063_v58 = vsel %vm912_vm1, %v14903_v3, %v1062_v45 }
 0x1ee   : > { %v1047_v62 = vperm.slane %v1039_v43, %v14770_v35  ;;  %v1096_v63 = vrot.slane %v1067_v53, 4  ;;  %v1059_v6 = vperm.slane %v1051_v57, %v14770_v35  ;;  %v1071_v12 = vperm.slane %v1063_v58, %v14770_v35 }
 0x1ef   : > { %v1122_v1 = vrot.slane %v1079_v5, 4  ;;  %v1099_v2 = vsel %vm912_vm1, %v1067_v53, %v1098_v34  ;;  %v1126_v4 = vrot.slane %v1083_v54, 4  ;;  %v1086_v60 = vrot.slane %v14908_v7, 4 }
 0x1f0   : > { %v1097_v11 = vsel %vm912_vm1, %v1096_v63, %v1055_v50  ;;  %v1107_v59 = vperm.slane %v1099_v2, %v14796_v9  ;;  %v1084_v17 = vrot.slane %v1047_v62, 4  ;;  %v1110_v21 = vrot.slane %v1059_v6, 4 }
 0x1f1   : > { %v1103_v0 = vperm.slane %v1097_v11, %v14796_v9  ;;  %v1108_v27 = vrot.slane %v1071_v12, 4  ;;  %v1087_v31 = vsel %vm912_vm1, %v1047_v62, %v1086_v60 }
 0x1f2   : > { %v1124_v3 = vrot.slane %v1107_v59, 4  ;;  %v1127_v15 = vsel %vm912_vm1, %v1107_v59, %v1126_v4  ;;  %v1085_v33 = vsel %vm912_vm1, %v1084_v17, %v14908_v7  ;;  %v1111_v38 = vsel %vm912_vm1, %v1071_v12, %v1110_v21 }
 0x1f3   : > { %v1123_v36 = vsel %vm912_vm1, %v1103_v0, %v1122_v1  ;;  %v1120_v18 = vrot.slane %v1103_v0, 4  ;;  %v1650_v20 = vpack.c.bf16 %v1127_v15, %v1127_v15  ;;  %v1109_v40 = vsel %vm912_vm1, %v1108_v27, %v1059_v6 }
 0x1f4   : > { %v1648_v22 = vpack.c.bf16 %v1123_v36, %v1123_v36  ;;  %v1125_v25 = vsel %vm912_vm1, %v1124_v3, %v1083_v54  ;;  %v1095_v13 = vperm.slane %v1087_v31, %v14796_v9  ;;  %v1091_v8 = vperm.slane %v1085_v33, %v14796_v9 }
 0x1f5   : > { %v1649_v28 = vpack.c.bf16 %v1125_v25, %v1125_v25  ;;  %v1121_v29 = vsel %vm912_vm1, %v1120_v18, %v1079_v5  ;;  %11857 = vmatmul.msk.bf16.vlgmr.msrb.gmra.mxu0 %vm1663_vm2, %v1650_v20  ;;  %v1119_v23 = vperm.slane %v1111_v38, %v14796_v9  ;;  %v1115_v41 = vperm.slane %v1109_v40, %v14796_v9 }
 0x1f6   : > { %11855 = vmatmul.msk.bf16.vlgmr.msra.gmra.mxu2 %vm1663_vm2, %v1648_v22  ;;  %v1647_v32 = vpack.c.bf16 %v1121_v29, %v1121_v29  ;;  %v1134_v24 = vrot.slane %v1095_v13, 4  ;;  %v1130_v39 = vrot.slane %v1091_v8, 4  ;;  %v15049_v22 = vpop.permute.xlu1 %14057 }
 0x1f7   : > { %11856 = vmatmul.msk.bf16.vlgmr.msra.gmra.mxu3 %vm1663_vm2, %v1649_v28  ;;  %v1132_v7 = vrot.slane %v1119_v23, 4  ;;  %v1128_v26 = vrot.slane %v1115_v41, 4 }
 0x1f8   : > { %11854 = vmatmul.msk.bf16.vlgmr.msra.gmra.mxu1 %vm1663_vm2, %v1647_v32  ;;  %v1135_v48 = vsel %vm912_vm1, %v1119_v23, %v1134_v24  ;;  %v1131_v42 = vsel %vm912_vm1, %v1115_v41, %v1130_v39 }
 0x1f9   : > { %v1133_v52 = vsel %vm912_vm1, %v1132_v7, %v1095_v13  ;;  %v1129_v56 = vsel %vm912_vm1, %v1128_v26, %v1091_v8  ;;  %v1654_v44 = vpack.c.bf16 %v1135_v48, %v1135_v48  ;;  %v1652_v61 = vpack.c.bf16 %v1131_v42, %v1131_v42 }
 0x1fa   : > { %v1653_v45 = vpack.c.bf16 %v1133_v52, %v1133_v52  ;;  %v1651_v46 = vpack.c.bf16 %v1129_v56, %v1129_v56 }
 0x205   : > { %11861 = vmatmul.msk.bf16.vlgmr.msra.gmra.mxu0 %vm1663_vm2, %v1654_v44 }
 0x206   : > { %11859 = vmatmul.msk.bf16.vlgmr.msrb.gmra.mxu2 %vm1663_vm2, %v1652_v61 }
 0x207   : > { %11860 = vmatmul.msk.bf16.vlgmr.msrb.gmra.mxu3 %vm1663_vm2, %v1653_v45 }
 0x208   : > { %11858 = vmatmul.msk.bf16.vlgmr.msrb.gmra.mxu1 %vm1663_vm2, %v1651_v46 }
 0x272   : > { %v1736_v30 = vpop.f32.mrf.mxu0 }
 0x273   : > { %v1737_v57 = vadd.f32 %v1736_v30, %v845_v47 }
 0x275   : > { %v1679_v49 = vpop.f32.mrf.mxu1  ;;  %v1826_v58 = vsel %vm1816_vm3, %v1737_v57, -inf }
 0x276   : > { %v1680_v43 = vadd.f32 %v1679_v49, %v845_v47 }
 0x278   : > { %v1817_v16 = vsel %vm1816_vm3, %v1680_v43, -inf }
 0x279   : > { %v1698_v50 = vpop.f32.mrf.mxu2  ;;  %1818 = vmax.xlane.f32.xlu2 %v1817_v16 }
 0x27a   : > { %v1699_v51 = vadd.f32 %v1698_v50, %v845_v47  ;;  %v1717_v53 = vpop.f32.mrf.mxu3  ;;  %v1738_v55 = vpop.f32.mrf.mxu0 }
 0x27b   : > { %v1718_v37 = vadd.f32 %v1717_v53, %v845_v47 }
 0x27c   : > { %v1820_v5 = vsel %vm1816_vm3, %v1699_v51, -inf }
 0x27d   : > { %v1823_v54 = vsel %vm1816_vm3, %v1718_v37, -inf  ;;  %1821 = vmax.xlane.f32.xlu1 %v1820_v5  ;;  %v1681_v34 = vpop.f32.mrf.mxu1 }
 0x27e   : > { %1824 = vmax.xlane.f32.xlu0 %v1823_v54  ;;  %v14060_v54 = vunpack.i.h.bf16 %v15049_v22  ;;  %v14059_v34 = vunpack.i.l.bf16 %v15049_v22 }
 0x281   : > { %v1700_v62 = vpop.f32.mrf.mxu2  ;;  %1827 = vmax.xlane.f32.xlu2 %v1826_v58 }
 0x282   : > { %v1719_v63 = vpop.f32.mrf.mxu3  ;;  %v1812_v1 = vpop.f32.mrf.mxu0 }
 0x283   : > { %v15036_v2 = vadd.f32 %v1812_v1, %v845_v47  ;;  %v1423_v63 = vrot.slane %v14060_v54, 4  ;;  %v1449_v1 = vrot.slane %v14059_v34, 4 }
 0x285   : > { %v1755_v4 = vpop.f32.mrf.mxu1  ;;  %v1838_v6 = vsel %vm1816_vm3, %v15036_v2, -inf }
 0x286   : > { %v1756_v11 = vadd.f32 %v1755_v4, %v845_v47  ;;  %1839 = vmax.xlane.f32.xlu0 %v1838_v6 }
 0x288   : > { %v1829_v59 = vsel %vm1816_vm3, %v1756_v11, -inf }
 0x289   : > { %v1774_v12 = vpop.f32.mrf.mxu2  ;;  %1830 = vmax.xlane.f32.xlu2 %v1829_v59 }
 0x28a   : > { %v1793_v0 = vpop.f32.mrf.mxu3  ;;  %v1775_v60 = vadd.f32 %v1774_v12, %v845_v47  ;;  %v1814_v3 = vpop.f32.mrf.mxu0 }
 0x28b   : > { %v1794_v15 = vadd.f32 %v1793_v0, %v845_v47 }
 0x28c   : > { %v1832_v17 = vsel %vm1816_vm3, %v1775_v60, -inf }
 0x28d   : > { %1833 = vmax.xlane.f32.xlu1 %v1832_v17  ;;  %v1757_v36 = vpop.f32.mrf.mxu1  ;;  %v1835_v18 = vsel %vm1816_vm3, %v1794_v15, -inf }
 0x28e   : > { %1836 = vmax.xlane.f32.xlu0 %v1835_v18 }
 0x291   : > { %v1776_v20 = vpop.f32.mrf.mxu2 }
 0x292   : > { %v1795_v21 = vpop.f32.mrf.mxu3 }
 0x2a1   : > { %14062 = vrot.lane.b32.xlu2 %v14737_v10, %s19138_s10 }
 0x2a2   : > { %14067 = vrot.lane.b32.xlu0 %v14741_v14, %s19138_s10 }
 0x2a6   : > { %14072 = vrot.lane.b32.xlu1 %v14754_v19, %s19138_s10  ;;  %s19150_s10 = smov 16  }
 0x2ec   : > { %v1819_v25 = vpop.xlane.xlu2 %1818 }
 0x2ed   : > { %v1841_v27 = vsub.f32 %v1680_v43, %v1819_v25 }
 0x2ef   : > { %v1849_v28 = vmul.f32 1.442695, %v1841_v27 }
 0x2f0   : > { %v1822_v29 = vpop.xlane.xlu1 %1821 }
 0x2f1   : > { %14291 = vpow2.f32 %v1849_v28  ;;  %v1825_v31 = vpop.xlane.xlu0 %1824  ;;  %v1842_v32 = vsub.f32 %v1699_v51, %v1822_v29 }
 0x2f2   : > { %v1843_v33 = vsub.f32 %v1718_v37, %v1825_v31 }
 0x2f3   : > { %v1851_v38 = vmul.f32 1.442695, %v1842_v32 }
 0x2f4   : > { %v1853_v40 = vmul.f32 1.442695, %v1843_v33  ;;  %v1828_v13 = vpop.xlane.xlu2 %1827 }
 0x2f5   : > { %14293 = vpow2.f32 %v1851_v38  ;;  %v1844_v10 = vsub.f32 %v1737_v57, %v1828_v13 }
 0x2f6   : > { %14295 = vpow2.f32 %v1853_v40 }
 0x2f7   : > { %v15051_v14 = vpop.eup %14291  ;;  %v1855_v8 = vmul.f32 1.442695, %v1844_v10 }
 0x2f8   : > { %v1865_v19 = vsel %vm1816_vm3, %v15051_v14, 0.0 }
 0x2f9   : > { %1866 = vadd.xlane.f32.xlu1 %v1865_v19  ;;  %v1840_v23 = vpop.xlane.xlu0 %1839  ;;  %14297 = vpow2.f32 %v1855_v8 }
 0x2fa   : > { %v1848_v30 = vsub.f32 %v15036_v2, %v1840_v23 }
 0x2fb   : > { %v15055_v41 = vpop.eup %14293 }
 0x2fc   : > { %v15057_v24 = vpop.eup %14295  ;;  %v1831_v39 = vpop.xlane.xlu2 %1830  ;;  %v1868_v7 = vsel %vm1816_vm3, %v15055_v41, 0.0  ;;  %v1863_v43 = vmul.f32 1.442695, %v1848_v30 }
 0x2fd   : > { %v1845_v26 = vsub.f32 %v1756_v11, %v1831_v39  ;;  %v1871_v48 = vsel %vm1816_vm3, %v15057_v24, 0.0  ;;  %1869 = vadd.xlane.f32.xlu2 %v1868_v7 }
 0x2fe   : > { %1872 = vadd.xlane.f32.xlu0 %v1871_v48 }
 0x2ff   : > { %v1857_v42 = vmul.f32 1.442695, %v1845_v26  ;;  %v15063_v61 = vpop.eup %14297 }
 0x300   : > { %v1834_v52 = vpop.xlane.xlu1 %1833  ;;  %v1874_v49 = vsel %vm1816_vm3, %v15063_v61, 0.0 }
 0x301   : > { %v1846_v56 = vsub.f32 %v1775_v60, %v1834_v52  ;;  %v1837_v44 = vpop.xlane.xlu0 %1836  ;;  %14299 = vpow2.f32 %v1857_v42 }
 0x302   : > { %v1847_v45 = vsub.f32 %v1794_v15, %v1837_v44 }
 0x303   : > { %v1859_v46 = vmul.f32 1.442695, %v1846_v56 }
 0x304   : > { %v1861_v47 = vmul.f32 1.442695, %v1847_v45  ;;  %v14063_v51 = vpop.permute.xlu2 %14062 }
 0x305   : > { %14301 = vpow2.f32 %v1859_v46  ;;  %v14064_v5 = vunpack.i.l.bf16 %v14063_v51  ;;  %v14065_v2 = vunpack.i.h.bf16 %v14063_v51 }
 0x306   : > { %14303 = vpow2.f32 %v1861_v47  ;;  %1875 = vadd.xlane.f32.xlu0 %v1874_v49 }
 0x307   : > { %v15068_v16 = vpop.eup %14299  ;;  %14305 = vpow2.f32 %v1863_v43  ;;  %v1425_v62 = vrot.slane %v14064_v5, 4  ;;  %v1424_v6 = vsel %vm912_vm1, %v1423_v63, %v14064_v5  ;;  %v1461_v17 = vrot.slane %v14065_v2, 4 }
 0x308   : > { %v1877_v37 = vsel %vm1816_vm3, %v15068_v16, 0.0  ;;  %v1430_v36 = vperm.slane %v1424_v6, %v14770_v35 }
 0x309   : > { %v1426_v0 = vsel %vm912_vm1, %v14060_v54, %v1425_v62 }
 0x30a   : > { %v1434_v21 = vperm.slane %v1426_v0, %v14770_v35  ;;  %v1473_v40 = vrot.slane %v1430_v36, 4 }
 0x30b   : > { %v15070_v50 = vpop.eup %14301 }
 0x30c   : > { %v15072_v53 = vpop.eup %14303  ;;  %v1880_v55 = vsel %vm1816_vm3, %v15070_v50, 0.0  ;;  %v1485_v8 = vrot.slane %v1434_v21, 4 }
 0x30d   : > { %1881 = vadd.xlane.f32.xlu1 %v1880_v55  ;;  %v1883_v57 = vsel %vm1816_vm3, %v15072_v53, 0.0  ;;  %v15082_v58 = vpop.eup %14305 }
 0x30e   : > { %1878 = vadd.xlane.f32.xlu0 %v1877_v37  ;;  %1884 = vadd.xlane.f32.xlu2 %v1883_v57  ;;  %v1886_v12 = vsel %vm1816_vm3, %v15082_v58, 0.0 }
 0x314   : > { %v14068_v4 = vpop.permute.xlu0 %14067 }
 0x315   : > { %v14070_v11 = vunpack.i.h.bf16 %v14068_v4  ;;  %v14069_v59 = vunpack.i.l.bf16 %v14068_v4 }
 0x316   : > { %1887 = vadd.xlane.f32.xlu2 %v1886_v12 }
 0x317   : > { %v1435_v60 = vrot.slane %v14070_v11, 4  ;;  %v1447_v3 = vrot.slane %v14069_v59, 4  ;;  %v1450_v15 = vsel %vm912_vm1, %v14069_v59, %v1449_v1 }
 0x318   : > { %v1458_v18 = vperm.slane %v1450_v15, %v14770_v35  ;;  %v14073_v20 = vpop.permute.xlu1 %14072 }
 0x319   : > { %v1448_v22 = vsel %vm912_vm1, %v1447_v3, %v14059_v34  ;;  %v14075_v25 = vunpack.i.h.bf16 %v14073_v20  ;;  %v14074_v27 = vunpack.i.l.bf16 %v14073_v20 }
 0x31a   : > { %v1454_v28 = vperm.slane %v1448_v22, %v14770_v35  ;;  %v1509_v29 = vrot.slane %v1458_v18, 4 }
 0x31b   : > { %v1459_v31 = vrot.slane %v14075_v25, 4  ;;  %v1436_v32 = vsel %vm912_vm1, %v1435_v60, %v14074_v27  ;;  %v1437_v33 = vrot.slane %v14074_v27, 4  ;;  %v1462_v38 = vsel %vm912_vm1, %v14075_v25, %v1461_v17 }
 0x31c   : > { %v1442_v13 = vperm.slane %v1436_v32, %v14770_v35  ;;  %v1470_v10 = vperm.slane %v1462_v38, %v14770_v35  ;;  %v1497_v19 = vrot.slane %v1454_v28, 4 }
 0x31d   : > { %v1438_v23 = vsel %vm912_vm1, %v14070_v11, %v1437_v33  ;;  %v1460_v39 = vsel %vm912_vm1, %v1459_v31, %v14065_v2 }
 0x31e   : > { %v1446_v7 = vperm.slane %v1438_v23, %v14770_v35  ;;  %v1466_v26 = vperm.slane %v1460_v39, %v14770_v35  ;;  %v1471_v48 = vrot.slane %v1442_v13, 4  ;;  %v1474_v42 = vsel %vm912_vm1, %v1442_v13, %v1473_v40 }
 0x31f   : > { %v1482_v52 = vperm.slane %v1474_v42, %v14796_v9  ;;  %v1507_v56 = vrot.slane %v1470_v10, 4  ;;  %v1510_v44 = vsel %vm912_vm1, %v1470_v10, %v1509_v29 }
 0x320   : > { %v1472_v45 = vsel %vm912_vm1, %v1471_v48, %v1430_v36  ;;  %v1483_v46 = vrot.slane %v1446_v7, 4  ;;  %v1486_v30 = vsel %vm912_vm1, %v1446_v7, %v1485_v8  ;;  %v1495_v47 = vrot.slane %v1466_v26, 4 }
 0x321   : > { %v1478_v49 = vperm.slane %v1472_v45, %v14796_v9  ;;  %v1494_v43 = vperm.slane %v1486_v30, %v14796_v9  ;;  %v1498_v51 = vsel %vm912_vm1, %v1466_v26, %v1497_v19  ;;  %v1508_v55 = vsel %vm912_vm1, %v1507_v56, %v1458_v18 }
 0x322   : > { %v1484_v37 = vsel %vm912_vm1, %v1483_v46, %v1434_v21  ;;  %v1496_v57 = vsel %vm912_vm1, %v1495_v47, %v1454_v28  ;;  %v1506_v5 = vperm.slane %v1498_v51, %v14796_v9  ;;  %v1514_v54 = vperm.slane %v1508_v55, %v14796_v9 }
 0x323   : > { %v1490_v34 = vperm.slane %v1484_v37, %v14796_v9  ;;  %v1502_v62 = vperm.slane %v1496_v57, %v14796_v9  ;;  %v1518_v63 = vperm.slane %v1510_v44, %v14796_v9  ;;  %v1521_v1 = vrot.slane %v1478_v49, 4 }
 0x324   : > { %v1523_v2 = vrot.slane %v1506_v5, 4  ;;  %v1525_v4 = vrot.slane %v1482_v52, 4  ;;  %v1527_v6 = vrot.slane %v1514_v54, 4  ;;  %v1533_v11 = vrot.slane %v1494_v43, 4 }
 0x325   : > { %v1519_v59 = vrot.slane %v1502_v62, 4  ;;  %v1522_v12 = vsel %vm912_vm1, %v1502_v62, %v1521_v1  ;;  %v1529_v0 = vrot.slane %v1490_v34, 4  ;;  %v1531_v60 = vrot.slane %v1518_v63, 4 }
 0x326   : > { %v1524_v3 = vsel %vm912_vm1, %v1523_v2, %v1482_v52  ;;  %v1526_v15 = vsel %vm912_vm1, %v1506_v5, %v1525_v4  ;;  %v1534_v17 = vsel %vm912_vm1, %v1518_v63, %v1533_v11  ;;  %v1528_v36 = vsel %vm912_vm1, %v1527_v6, %v1490_v34 }
 0x327   : > { %v1520_v18 = vsel %vm912_vm1, %v1519_v59, %v1478_v49  ;;  %v1530_v20 = vsel %vm912_vm1, %v1514_v54, %v1529_v0  ;;  %v1532_v21 = vsel %vm912_vm1, %v1531_v60, %v1494_v43  ;;  %v1535_v22 = vrot.slane %v1524_v3, 4 }
 0x328   : > { %v1537_v25 = vrot.slane %v1520_v18, 4  ;;  %v1547_v27 = vrot.slane %v1526_v15, 4  ;;  %v1559_v28 = vrot.slane %v1532_v21, 4  ;;  %v1571_v29 = vrot.slane %v1534_v17, 4 }
 0x329   : > { %v1573_v31 = vrot.slane %v1530_v20, 4  ;;  %v1536_v32 = vsel %vm912_vm1, %v1535_v22, %v1520_v18  ;;  %v1561_v33 = vrot.slane %v1528_v36, 4  ;;  %v1549_v38 = vrot.slane %v1522_v12, 4 }
 0x32a   : > { %v1542_v40 = vperm.slane %v1536_v32, %v14770_v35  ;;  %v1548_v13 = vsel %vm912_vm1, %v1547_v27, %v1522_v12  ;;  %v1560_v10 = vsel %vm912_vm1, %v1559_v28, %v1528_v36  ;;  %v1572_v8 = vsel %vm912_vm1, %v1571_v29, %v1530_v20 }
 0x32b   : > { %v1554_v19 = vperm.slane %v1548_v13, %v14770_v35  ;;  %v1566_v23 = vperm.slane %v1560_v10, %v14770_v35  ;;  %v1578_v39 = vperm.slane %v1572_v8, %v14770_v35  ;;  %v1538_v7 = vsel %vm912_vm1, %v1524_v3, %v1537_v25 }
 0x32c   : > { %v1585_v26 = vrot.slane %v1542_v40, 4  ;;  %v1546_v48 = vperm.slane %v1538_v7, %v14770_v35  ;;  %v1550_v42 = vsel %vm912_vm1, %v1526_v15, %v1549_v38  ;;  %v1562_v52 = vsel %vm912_vm1, %v1532_v21, %v1561_v33 }
 0x32d   : > { %v1583_v56 = vrot.slane %v1554_v19, 4  ;;  %v1607_v44 = vrot.slane %v1578_v39, 4  ;;  %v1609_v45 = vrot.slane %v1566_v23, 4  ;;  %v1558_v46 = vperm.slane %v1550_v42, %v14770_v35 }
 0x32e   : > { %v1586_v30 = vsel %vm912_vm1, %v1554_v19, %v1585_v26  ;;  %v1570_v47 = vperm.slane %v1562_v52, %v14770_v35  ;;  %v1574_v49 = vsel %vm912_vm1, %v1534_v17, %v1573_v31  ;;  %v1597_v43 = vrot.slane %v1546_v48, 4 }
 0x32f   : > { %v1584_v51 = vsel %vm912_vm1, %v1583_v56, %v1542_v40  ;;  %v1608_v55 = vsel %vm912_vm1, %v1607_v44, %v1566_v23  ;;  %v1594_v37 = vperm.slane %v1586_v30, %v14796_v9  ;;  %v1610_v57 = vsel %vm912_vm1, %v1578_v39, %v1609_v45 }
 0x330   : > { %v1590_v5 = vperm.slane %v1584_v51, %v14796_v9  ;;  %v1614_v54 = vperm.slane %v1608_v55, %v14796_v9  ;;  %v1618_v34 = vperm.slane %v1610_v57, %v14796_v9  ;;  %v1582_v62 = vperm.slane %v1574_v49, %v14770_v35 }
 0x331   : > { %v1598_v63 = vsel %vm912_vm1, %v1558_v46, %v1597_v43  ;;  %v1621_v1 = vrot.slane %v1570_v47, 4  ;;  %v1637_v2 = vrot.slane %v1594_v37, 4  ;;  %v1595_v4 = vrot.slane %v1558_v46, 4 }
 0x332   : > { %v1633_v6 = vrot.slane %v1590_v5, 4  ;;  %v1635_v11 = vrot.slane %v1618_v34, 4  ;;  %v1631_v59 = vrot.slane %v1614_v54, 4  ;;  %v1606_v12 = vperm.slane %v1598_v63, %v14796_v9 }
 0x333   : > { %v1622_v0 = vsel %vm912_vm1, %v1582_v62, %v1621_v1  ;;  %v1638_v60 = vsel %vm912_vm1, %v1618_v34, %v1637_v2  ;;  %v1596_v3 = vsel %vm912_vm1, %v1595_v4, %v1546_v48  ;;  %v1619_v15 = vrot.slane %v1582_v62, 4 }
 0x334   : > { %v1634_v17 = vsel %vm912_vm1, %v1614_v54, %v1633_v6  ;;  %v1636_v36 = vsel %vm912_vm1, %v1635_v11, %v1594_v37  ;;  %v1632_v18 = vsel %vm912_vm1, %v1631_v59, %v1590_v5  ;;  %v1630_v20 = vperm.slane %v1622_v0, %v14796_v9 }
 0x335   : > { %v1914_v21 = vpack.c.bf16 %v1634_v17, %v1634_v17  ;;  %v1915_v22 = vpack.c.bf16 %v1636_v36, %v1636_v36  ;;  %v1913_v25 = vpack.c.bf16 %v1632_v18, %v1632_v18  ;;  %v1916_v27 = vpack.c.bf16 %v1638_v60, %v1638_v60 }
 0x336   : > { %v1643_v28 = vrot.slane %v1630_v20, 4  ;;  %v1602_v29 = vperm.slane %v1596_v3, %v14796_v9  ;;  %v1620_v31 = vsel %vm912_vm1, %v1619_v15, %v1570_v47  ;;  %v1645_v32 = vrot.slane %v1606_v12, 4 }
 0x337   : > { %v1945_v33 = vsel %vm1924_vm4, %v1914_v21, 0  ;;  %v1964_v38 = vsel %vm1924_vm4, %v1915_v22, 0  ;;  %v1926_v40 = vsel %vm1924_vm4, %v1913_v25, 0  ;;  %v1983_v13 = vsel %vm1924_vm4, %v1916_v27, 0 }
 0x338   : > { %1954 = vmatpush.bf16.msra.mxu2 %v1945_v33  ;;  %1973 = vmatpush.bf16.msra.mxu3 %v1964_v38  ;;  %v1644_v10 = vsel %vm912_vm1, %v1643_v28, %v1606_v12  ;;  %v1626_v8 = vperm.slane %v1620_v31, %v14796_v9  ;;  %v1641_v19 = vrot.slane %v1602_v29, 4  ;;  %v1646_v23 = vsel %vm912_vm1, %v1630_v20, %v1645_v32 }
 0x339   : > { %1935 = vmatpush.bf16.msra.mxu1 %v1926_v40  ;;  %v1919_v39 = vpack.c.bf16 %v1644_v10, %v1644_v10  ;;  %1992 = vmatpush.bf16.msrb.mxu0 %v1983_v13  ;;  %v1920_v7 = vpack.c.bf16 %v1646_v23, %v1646_v23 }
 0x33a   : > { %v1642_v26 = vsel %vm912_vm1, %v1626_v8, %v1641_v19  ;;  %v1639_v48 = vrot.slane %v1626_v8, 4 }
 0x33b   : > { %v2040_v42 = vsel %vm1924_vm4, %v1919_v39, 0  ;;  %v1918_v52 = vpack.c.bf16 %v1642_v26, %v1642_v26  ;;  %v2059_v56 = vsel %vm1924_vm4, %v1920_v7, 0 }
 0x33c   : > { %2049 = vmatpush.bf16.msrb.mxu3 %v2040_v42  ;;  %v1640_v44 = vsel %vm912_vm1, %v1639_v48, %v1602_v29 }
 0x33d   : > { %2068 = vmatpush.bf16.msra.mxu0 %v2059_v56  ;;  %v2021_v45 = vsel %vm1924_vm4, %v1918_v52, 0  ;;  %v1917_v46 = vpack.c.bf16 %v1640_v44, %v1640_v44 }
 0x33e   : > { %2030 = vmatpush.bf16.msrb.mxu2 %v2021_v45 }
 0x33f   : > { %v2002_v30 = vsel %vm1924_vm4, %v1917_v46, 0 }
 0x340   : > { %2011 = vmatpush.bf16.msrb.mxu1 %v2002_v30 }
 0x36c   : > { %v1867_v47 = vpop.xlane.xlu1 %1866 }
 0x36d   : > { %14307 = vrcp.f32 %v1867_v47 }
 0x370   : > { %v1870_v49 = vpop.xlane.xlu2 %1869 }
 0x371   : > { %v1873_v43 = vpop.xlane.xlu0 %1872  ;;  %14309 = vrcp.f32 %v1870_v49 }
 0x372   : > { %14311 = vrcp.f32 %v1873_v43 }
 0x373   : > { %v14308_v51 = vpop.eup %14307 }
 0x374   : > { %v1897_v55 = vmul.f32 %v14308_v51, %v15051_v14 }
 0x376   : > { %v1905_v37 = vpack.c.bf16 %v1897_v55, %v1897_v55 }
 0x377   : > { %v14310_v57 = vpop.eup %14309 }
 0x378   : > { %v14312_v5 = vpop.eup %14311  ;;  %v1898_v54 = vmul.f32 %v14310_v57, %v15055_v41  ;;  %11862 = vmatmul.msk.bf16.vlgmr.msra.gmra.mxu1 %vm1816_vm3, %v1905_v37 }
 0x379   : > { %v1899_v34 = vmul.f32 %v14312_v5, %v15057_v24  ;;  %v1876_v62 = vpop.xlane.xlu0 %1875 }
 0x37a   : > { %v1906_v63 = vpack.c.bf16 %v1898_v54, %v1898_v54  ;;  %14313 = vrcp.f32 %v1876_v62 }
 0x37b   : > { %v1907_v1 = vpack.c.bf16 %v1899_v34, %v1899_v34 }
 0x37c   : > { %11863 = vmatmul.msk.bf16.vlgmr.msra.gmra.mxu2 %vm1816_vm3, %v1906_v63 }
 0x37d   : > { %11864 = vmatmul.msk.bf16.vlgmr.msra.gmra.mxu3 %vm1816_vm3, %v1907_v1 }
 0x380   : > { %v14314_v2 = vpop.eup %14313  ;;  %v1882_v4 = vpop.xlane.xlu1 %1881 }
 0x381   : > { %v1900_v14 = vmul.f32 %v14314_v2, %v15063_v61  ;;  %14315 = vrcp.f32 %v1882_v4  ;;  %v1879_v6 = vpop.xlane.xlu0 %1878  ;;  %v1885_v11 = vpop.xlane.xlu2 %1884 }
 0x382   : > { %14317 = vrcp.f32 %v1879_v6 }
 0x383   : > { %v1908_v41 = vpack.c.bf16 %v1900_v14, %v1900_v14  ;;  %14319 = vrcp.f32 %v1885_v11 }
 0x385   : > { %11865 = vmatmul.msk.bf16.vlgmr.msrb.gmra.mxu0 %vm1816_vm3, %v1908_v41 }
 0x387   : > { %v14316_v24 = vpop.eup %14315 }
 0x388   : > { %v14318_v59 = vpop.eup %14317  ;;  %v1902_v12 = vmul.f32 %v14316_v24, %v15070_v50 }
 0x389   : > { %v14320_v0 = vpop.eup %14319  ;;  %v1901_v60 = vmul.f32 %v14318_v59, %v15068_v16  ;;  %v1888_v3 = vpop.xlane.xlu2 %1887 }
 0x38a   : > { %v1910_v15 = vpack.c.bf16 %v1902_v12, %v1902_v12  ;;  %v1903_v17 = vmul.f32 %v14320_v0, %v15072_v53  ;;  %14321 = vrcp.f32 %v1888_v3 }
 0x38b   : > { %v1909_v61 = vpack.c.bf16 %v1901_v60, %v1901_v60 }
 0x38c   : > { %v1911_v36 = vpack.c.bf16 %v1903_v17, %v1903_v17  ;;  %11867 = vmatmul.msk.bf16.vlgmr.msrb.gmra.mxu2 %vm1816_vm3, %v1910_v15 }
 0x38d   : > { %11866 = vmatmul.msk.bf16.vlgmr.msrb.gmra.mxu1 %vm1816_vm3, %v1909_v61 }
 0x38e   : > { %11868 = vmatmul.msk.bf16.vlgmr.msrb.gmra.mxu3 %vm1816_vm3, %v1911_v36 }
 0x390   : > { %v14322_v18 = vpop.eup %14321 }
 0x391   : > { %v1904_v20 = vmul.f32 %v14322_v18, %v15082_v58 }
 0x393   : > { %v1912_v50 = vpack.c.bf16 %v1904_v20, %v1904_v20 }
 0x395   : > { %11869 = vmatmul.msk.bf16.vlgmr.msra.gmra.mxu0 %vm1816_vm3, %v1912_v50 }
 0x3f5   : > { %v1937_v16 = vpop.f32.mrf.mxu1 }
 0x3f6   : > { %v2076_v29 = vrot.slane %v1937_v16, 4 }
 0x3fd   : > { %v1939_v21 = vpop.f32.mrf.mxu1 }
 0x3ff   : > { %v1956_v22 = vpop.f32.mrf.mxu2 }
 0x400   : > { %v1975_v25 = vpop.f32.mrf.mxu3  ;;  %v2088_v53 = vrot.slane %v1956_v22, 4 }
 0x401   : > { %v2074_v27 = vrot.slane %v1975_v25, 4  ;;  %v2077_v32 = vsel %vm912_vm1, %v1975_v25, %v2076_v29 }
 0x402   : > { %v1994_v28 = vpop.f32.mrf.mxu0  ;;  %v2085_v13 = vperm.slane %v2077_v32, %v14770_v35 }
 0x403   : > { %v2086_v31 = vrot.slane %v1994_v28, 4  ;;  %v2075_v33 = vsel %vm912_vm1, %v2074_v27, %v1937_v16  ;;  %v2089_v38 = vsel %vm912_vm1, %v1994_v28, %v2088_v53 }
 0x404   : > { %v2081_v8 = vperm.slane %v2075_v33, %v14770_v35  ;;  %v2097_v19 = vperm.slane %v2089_v38, %v14770_v35  ;;  %v2136_v26 = vrot.slane %v2085_v13, 4 }
 0x405   : > { %v2087_v58 = vsel %vm912_vm1, %v2086_v31, %v1956_v22 }
 0x406   : > { %v2093_v23 = vperm.slane %v2087_v58, %v14770_v35  ;;  %v2124_v48 = vrot.slane %v2081_v8, 4  ;;  %v2134_v42 = vrot.slane %v2097_v19, 4  ;;  %v2137_v44 = vsel %vm912_vm1, %v2097_v19, %v2136_v26 }
 0x407   : > { %v1958_v40 = vpop.f32.mrf.mxu2  ;;  %v2145_v5 = vperm.slane %v2137_v44, %v14796_v9 }
 0x408   : > { %v1977_v10 = vpop.f32.mrf.mxu3  ;;  %v2122_v52 = vrot.slane %v2093_v23, 4  ;;  %v2125_v46 = vsel %vm912_vm1, %v2093_v23, %v2124_v48  ;;  %v2135_v30 = vsel %vm912_vm1, %v2134_v42, %v2085_v13 }
 0x409   : > { %v2133_v63 = vperm.slane %v2125_v46, %v14796_v9  ;;  %v2141_v1 = vperm.slane %v2135_v30, %v14796_v9  ;;  %v2184_v12 = vrot.slane %v2145_v5, 4 }
 0x40a   : > { %v1996_v39 = vpop.f32.mrf.mxu0  ;;  %v2013_v7 = vpop.f32.mrf.mxu1  ;;  %v2123_v43 = vsel %vm912_vm1, %v2122_v52, %v2081_v8 }
 0x40b   : > { %v2100_v45 = vrot.slane %v2013_v7, 4  ;;  %v2129_v14 = vperm.slane %v2123_v43, %v14796_v9  ;;  %v2176_v15 = vrot.slane %v2133_v63, 4  ;;  %v2180_v20 = vrot.slane %v2141_v1, 4 }
 0x40d   : > { %v2172_v18 = vrot.slane %v2129_v14, 4 }
 0x40f   : > { %v2032_v56 = vpop.f32.mrf.mxu2 }
 0x410   : > { %v2112_v47 = vrot.slane %v2032_v56, 4 }
 0x411   : > { %v2051_v49 = vpop.f32.mrf.mxu3 }
 0x412   : > { %v2015_v51 = vpop.f32.mrf.mxu1  ;;  %v2098_v55 = vrot.slane %v2051_v49, 4  ;;  %v2101_v37 = vsel %vm912_vm1, %v2051_v49, %v2100_v45  ;;  %v2070_v57 = vpop.f32.mrf.mxu0 }
 0x413   : > { %v2109_v54 = vperm.slane %v2101_v37, %v14770_v35  ;;  %v2110_v34 = vrot.slane %v2070_v57, 4  ;;  %v2113_v62 = vsel %vm912_vm1, %v2070_v57, %v2112_v47 }
 0x414   : > { %v2099_v2 = vsel %vm912_vm1, %v2098_v55, %v2013_v7  ;;  %v2121_v4 = vperm.slane %v2113_v62, %v14770_v35 }
 0x415   : > { %v2105_v6 = vperm.slane %v2099_v2, %v14770_v35  ;;  %v2160_v11 = vrot.slane %v2109_v54, 4  ;;  %v2111_v41 = vsel %vm912_vm1, %v2110_v34, %v2032_v56 }
 0x416   : > { %v2117_v24 = vperm.slane %v2111_v41, %v14770_v35  ;;  %v2158_v59 = vrot.slane %v2121_v4, 4 }
 0x417   : > { %v2148_v0 = vrot.slane %v2105_v6, 4  ;;  %v2161_v60 = vsel %vm912_vm1, %v2121_v4, %v2160_v11  ;;  %v2034_v3 = vpop.f32.mrf.mxu2 }
 0x418   : > { %v2146_v17 = vrot.slane %v2117_v24, 4  ;;  %v2159_v61 = vsel %vm912_vm1, %v2158_v59, %v2109_v54  ;;  %v2169_v36 = vperm.slane %v2161_v60, %v14796_v9 }
 0x419   : > { %v2149_v50 = vsel %vm912_vm1, %v2117_v24, %v2148_v0  ;;  %v2165_v16 = vperm.slane %v2159_v61, %v14796_v9  ;;  %v2053_v21 = vpop.f32.mrf.mxu3 }
 0x41a   : > { %v2147_v22 = vsel %vm912_vm1, %v2146_v17, %v2105_v6  ;;  %v2157_v25 = vperm.slane %v2149_v50, %v14796_v9  ;;  %v2182_v53 = vrot.slane %v2169_v36, 4  ;;  %v2185_v27 = vsel %vm912_vm1, %v2169_v36, %v2184_v12  ;;  %v2072_v28 = vpop.f32.mrf.mxu0 }
 0x41b   : > { %v2153_v29 = vperm.slane %v2147_v22, %v14796_v9  ;;  %v2178_v31 = vrot.slane %v2165_v16, 4  ;;  %v2181_v32 = vsel %vm912_vm1, %v2165_v16, %v2180_v20  ;;  %v2222_v33 = vrot.slane %v2185_v27, 4 }
 0x41c   : > { %v2174_v38 = vrot.slane %v2157_v25, 4  ;;  %v2177_v58 = vsel %vm912_vm1, %v2157_v25, %v2176_v15  ;;  %v2183_v40 = vsel %vm912_vm1, %v2182_v53, %v2145_v5  ;;  %v2224_v13 = vrot.slane %v2181_v32, 4 }
 0x41d   : > { %v2170_v10 = vrot.slane %v2153_v29, 4  ;;  %v2179_v8 = vsel %vm912_vm1, %v2178_v31, %v2141_v1  ;;  %v2210_v19 = vrot.slane %v2183_v40, 4  ;;  %v2173_v23 = vsel %vm912_vm1, %v2153_v29, %v2172_v18 }
 0x41e   : > { %v2175_v39 = vsel %vm912_vm1, %v2174_v38, %v2133_v63  ;;  %v2212_v7 = vrot.slane %v2179_v8, 4  ;;  %v2225_v26 = vsel %vm912_vm1, %v2185_v27, %v2224_v13  ;;  %v2198_v48 = vrot.slane %v2177_v58, 4 }
 0x41f   : > { %v2171_v42 = vsel %vm912_vm1, %v2170_v10, %v2129_v14  ;;  %v2186_v52 = vrot.slane %v2175_v39, 4  ;;  %v2200_v56 = vrot.slane %v2173_v23, 4  ;;  %v2211_v44 = vsel %vm912_vm1, %v2210_v19, %v2179_v8 }
 0x420   : > { %v2199_v45 = vsel %vm912_vm1, %v2198_v48, %v2173_v23  ;;  %v2217_v46 = vperm.slane %v2211_v44, %v14770_v35  ;;  %v2223_v30 = vsel %vm912_vm1, %v2222_v33, %v2181_v32  ;;  %v2188_v47 = vrot.slane %v2171_v42, 4 }
 0x421   : > { %v2187_v49 = vsel %vm912_vm1, %v2186_v52, %v2171_v42  ;;  %v2205_v43 = vperm.slane %v2199_v45, %v14770_v35  ;;  %v2229_v51 = vperm.slane %v2223_v30, %v14770_v35  ;;  %v2201_v55 = vsel %vm912_vm1, %v2177_v58, %v2200_v56 }
 0x422   : > { %v2193_v37 = vperm.slane %v2187_v49, %v14770_v35  ;;  %v2260_v57 = vrot.slane %v2217_v46, 4  ;;  %v2189_v5 = vsel %vm912_vm1, %v2175_v39, %v2188_v47  ;;  %v2209_v54 = vperm.slane %v2201_v55, %v14770_v35 }
 0x423   : > { %v2234_v34 = vrot.slane %v2205_v43, 4  ;;  %v2258_v62 = vrot.slane %v2229_v51, 4  ;;  %v2197_v63 = vperm.slane %v2189_v5, %v14770_v35  ;;  %v2213_v1 = vsel %vm912_vm1, %v2183_v40, %v2212_v7  ;;  %v13639_v7 = vld [vmem:[%s19205_s2 + $0x8] sm:$0xff] }
 0x424   : > { %v2236_v2 = vrot.slane %v2193_v37, 4  ;;  %v2261_v4 = vsel %vm912_vm1, %v2229_v51, %v2260_v57  ;;  %v2221_v14 = vperm.slane %v2213_v1, %v14770_v35  ;;  %v2233_v6 = vperm.slane %v2225_v26, %v14770_v35  ;;  %2361 = vmatpush.bf16.msra.mxu1 %v13639_v7  ;;  %v13638_v26 = vld [vmem:[%s19205_s2] sm:$0xff]  ;;  %v13643_v5 = vld [vmem:[%s19207_s8 + $0x8] sm:$0xff]  ;;  %s19241_s2 = sld [smem:[#allocation25_spill]] }
 0x425   : > { %v2269_v11 = vperm.slane %v2261_v4, %v14796_v9  ;;  %v2235_v41 = vsel %vm912_vm1, %v2234_v34, %v2193_v37  ;;  %v2259_v24 = vsel %vm912_vm1, %v2258_v62, %v2217_v46  ;;  %v2246_v59 = vrot.slane %v2209_v54, 4  ;;  %2467 = vmatpush.bf16.msra.mxu3 %v13643_v5  ;;  %v13642_v62 = vld [vmem:[%s19207_s8] sm:$0xff]  ;;  %s19244_s8 = sld [smem:[#allocation23_spill]] }
 0x426   : > { %v2237_v12 = vsel %vm912_vm1, %v2205_v43, %v2236_v2  ;;  %v2241_v0 = vperm.slane %v2235_v41, %v14796_v9  ;;  %v2265_v60 = vperm.slane %v2259_v24, %v14796_v9  ;;  %v2270_v3 = vrot.slane %v2233_v6, 4 }
 0x427   : > { %v2245_v15 = vperm.slane %v2237_v12, %v14796_v9  ;;  %v2286_v17 = vrot.slane %v2269_v11, 4  ;;  %v2247_v61 = vsel %vm912_vm1, %v2246_v59, %v2197_v63  ;;  %v2248_v50 = vrot.slane %v2197_v63, 4 }
 0x428   : > { %v2282_v36 = vrot.slane %v2265_v60, 4  ;;  %v2284_v18 = vrot.slane %v2241_v0, 4  ;;  %v2271_v20 = vsel %vm912_vm1, %v2270_v3, %v2221_v14  ;;  %v2253_v53 = vperm.slane %v2247_v61, %v14796_v9  ;;  %2362 = vmatpush.bf16.msra.mxu1 %v13638_v26  ;;  %v14268_v61 = vld [vmem:[%s19209_s11] ss:$0 sm:$0xff]  ;;  %s19219_s11 = sld [smem:[#allocation24_spill]] }
 0x429   : > { %v2287_v16 = vsel %vm912_vm1, %v2286_v17, %v2245_v15  ;;  %v2288_v21 = vrot.slane %v2245_v15, 4  ;;  %v2277_v22 = vperm.slane %v2271_v20, %v14796_v9  ;;  %v2272_v27 = vrot.slane %v2221_v14, 4  ;;  %2468 = vmatpush.bf16.msra.mxu3 %v13642_v62  ;;  %v14433_v14 = vld [vmem:[%s14719_s27] sm:$0xff]  ;;  %s19210_s27 = smov 112  }
 0x42a   : > { %2303 = vrot.lane.b32.xlu0 %v2287_v16, %s19142_s0  ;;  %v2285_v25 = vsel %vm912_vm1, %v2265_v60, %v2284_v18  ;;  %v2283_v29 = vsel %vm912_vm1, %v2282_v36, %v2241_v0  ;;  %v2249_v31 = vsel %vm912_vm1, %v2209_v54, %v2248_v50  ;;  %v2292_v58 = vrot.slane %v2253_v53, 4  ;;  %s19157_s0 = smov 24  }
 0x42b   : > { %2299 = vrot.lane.b32.xlu1 %v2285_v25, %s19140_s29  ;;  %v2289_v28 = vsel %vm912_vm1, %v2269_v11, %v2288_v21  ;;  %v2273_v32 = vsel %vm912_vm1, %v2233_v6, %v2272_v27  ;;  %v2290_v33 = vrot.slane %v2277_v22, 4  ;;  %v2257_v40 = vperm.slane %v2249_v31, %v14796_v9  ;;  %s19155_s29 = smov 20   ;;  %v13641_v27 = vld [vmem:[%s19216_s24 + $0x8] sm:$0xff] }
 0x42c   : > { %2307 = vrot.lane.b32.xlu2 %v2289_v28, %s19144_s5  ;;  %v2281_v38 = vperm.slane %v2273_v32, %v14796_v9  ;;  %v2293_v8 = vsel %vm912_vm1, %v2277_v22, %v2292_v58  ;;  %s19153_s5 = smov 28   ;;  %v14518_v24 = vmov 32.0   ;;  %2432 = vmatpush.bf16.msra.mxu2 %v13641_v27  ;;  %v13640_v28 = vld [vmem:[%s19216_s24] sm:$0xff]  ;;  %s19229_s24 = smov 28  }
 0x42d   : > { %v2291_v10 = vsel %vm912_vm1, %v2290_v33, %v2253_v53  ;;  %v2296_v23 = vrot.slane %v2257_v40, 4  ;;  %14323 = vrcp.f32 %v14518_v24 }
 0x42e   : > { %v2294_v13 = vrot.slane %v2281_v38, 4 }
 0x42f   : > { %v2297_v39 = vsel %vm912_vm1, %v2281_v38, %v2296_v23 }
 0x430   : > { %v2295_v19 = vsel %vm912_vm1, %v2294_v13, %v2257_v40  ;;  %2433 = vmatpush.bf16.msra.mxu2 %v13640_v28 }
 0x432   : > { %2311 = vrot.lane.b32.xlu0 %v2291_v10, %s19150_s10  ;;  %s19214_s10 = smov 124  }
 0x433   : > { %2315 = vrot.lane.b32.xlu1 %v2293_v8, %s19155_s29  ;;  %v14324_v59 = vpop.eup %14323  ;;  %s19212_s29 = smov 108   ;;  %v14269_v8 = vld [vmem:[%s19217_s18] ss:$0 sm:$0xff]  ;;  %s19228_s18 = smov 20  }
 0x434   : > { %2319 = vrot.lane.b32.xlu2 %v2295_v19, %s19157_s0  ;;  %v2375_v12 = vmul.f32 32.0, %v14324_v59  ;;  %vm2379_vm10 = vweird.f32 %v14324_v59  ;;  %s19211_s0 = smov 100  }
 0x436   : > { %v2376_v0 = vsub.f32 1.0, %v2375_v12 }
 0x438   : > { %v2377_v60 = vmul.f32 %v14324_v59, %v2376_v0 }
 0x43a   : > { %2323 = vrot.lane.b32.xlu0 %v2297_v39, %s19153_s5  ;;  %s832_s5 = scalar_lea.vmem %s19206_s6, %s13635_s25  ;;  %s19208_s25 = sld [smem:[#allocation22_spill]]  ;;  %v2378_v3 = vadd.f32 %v14324_v59, %v2377_v60  ;;  %v14270_v39 = vld [vmem:[%s19218_s19] ss:$0 sm:$0xff] }
 0x43b   : > { %v843_v54 = vld [vmem:[%s832_s5] sm:$0xff]  ;;  %v844_v34 = vld [vmem:[%s832_s5 + $0x8] sm:$0xff]  ;;  %s19213_s5 = smov 104   ;;  %s19215_s6 = smov 120  }
 0x43c   : > { %v15301_v63 = vpack.c.bf16 %v844_v34, %v843_v54  ;;  %v15310_v17 = vsel %vm2379_vm10, %v14324_v59, %v2378_v3 }
 0x43e   : > { %11896 = vmatmul.msk.bf16.vlgmr.msra.gmra.mxu3 %vm866_vm0, %v15301_v63 }
 0x440   : > { %v14267_v1 = vld [vmem:[%s19208_s25] ss:$0 sm:$0xff]  ;;  %s19243_s25 = sld [smem:[#allocation26_spill]] }
 0x486   : > { %v2308_v56 = vpop.permute.xlu2 %2307 }
 0x48e   : > { %v2320_v43 = vpop.permute.xlu2 %2319 }
 0x49c   : > { %v2304_v48 = vpop.permute.xlu0 %2303 }
 0x49d   : > { %v2300_v42 = vpop.permute.xlu1 %2299 }
 0x49e   : > { %v2326_v52 = vsel %vm1663_vm2, %v2283_v29, %v2300_v42 }
 0x49f   : > { %v2327_v44 = vsel %vm1816_vm3, %v2326_v52, %v2304_v48 }
 0x4a0   : > { %v2329_v46 = vsel %vm2328_vm5, %v2327_v44, %v2308_v56 }
 0x4a4   : > { %v2312_v45 = vpop.permute.xlu0 %2311 }
 0x4a5   : > { %v2331_v30 = vsel %vm2330_vm6, %v2329_v46, %v2312_v45  ;;  %v2316_v47 = vpop.permute.xlu1 %2315 }
 0x4a6   : > { %v2333_v49 = vsel %vm2332_vm7, %v2331_v30, %v2316_v47 }
 0x4a7   : > { %v2335_v55 = vsel %vm2334_vm8, %v2333_v49, %v2320_v43 }
 0x4ac   : > { %v2324_v51 = vpop.permute.xlu0 %2323 }
 0x4ad   : > { %v2337_v37 = vsel %vm2336_vm9, %v2335_v55, %v2324_v51 }
 0x4ae   : > { %v2338_v57 = vpack.c.bf16 %v2337_v37, %v2337_v37 }
 0x4b0   : > { %11878 = vmatmul.msk.bf16.vlgmr.msra.gmra.mxu1 %vm866_vm0, %v2338_v57 }
 0x4c1   : > { %v2470_v15 = vpop.f32.mrf.mxu3 }
 0x4c2   : > { %v15316_v20 = vadd.f32 %v14268_v61, %v2470_v15 }
 0x4c9   : > { %v2472_v16 = vpop.f32.mrf.mxu3 }
 0x4ca   : > { %v15318_v21 = vadd.f32 %v14268_v61, %v2472_v16 }
 0x4cc   : > { %v15322_v25 = vpack.i.bf16 %v15318_v21, %v15316_v20  ;;  %v2885_v0 = vrot.slane %v15318_v21, 4 }
 0x4ce   : > { %14077 = vrot.lane.b32.xlu0 %v15322_v25, %s19210_s27 }
 0x4d6   : > { %14082 = vrot.lane.b32.xlu0 %v15322_v25, %s19212_s29 }
 0x4de   : > { %14087 = vrot.lane.b32.xlu0 %v15322_v25, %s19213_s5 }
 0x4e6   : > { %14092 = vrot.lane.b32.xlu0 %v15322_v25, %s19214_s10 }
 0x4ee   : > { %14097 = vrot.lane.b32.xlu0 %v15322_v25, %s19215_s6 }
 0x52d   : > { %v2364_v2 = vpop.f32.mrf.mxu1 }
 0x52e   : > { %v2365_v4 = vadd.f32 %v14267_v1, %v2364_v2 }
 0x530   : > { %v2368_v6 = vadd.f32 %v14433_v14, %v2365_v4 }
 0x532   : > { %v2371_v11 = vsel %vm866_vm0, %v2368_v6, 0.0 }
 0x533   : > { %2372 = vadd.xlane.f32.xlu1 %v2371_v11 }
 0x535   : > { %v2366_v41 = vpop.f32.mrf.mxu1 }
 0x540   : > { %v15352_v26 = vpop.permute.xlu0 %14077 }
 0x541   : > { %v14080_v45 = vunpack.i.h.bf16 %v15352_v26  ;;  %v14079_v46 = vunpack.i.l.bf16 %v15352_v26 }
 0x543   : > { %v2909_v43 = vrot.slane %v14080_v45, 4  ;;  %v2797_v51 = vrot.slane %v14079_v46, 4 }
 0x548   : > { %v15359_v52 = vpop.permute.xlu0 %14082 }
 0x549   : > { %v14085_v47 = vunpack.i.h.bf16 %v15359_v52  ;;  %v14084_v55 = vunpack.i.l.bf16 %v15359_v52 }
 0x54b   : > { %v2921_v57 = vrot.slane %v14085_v47, 4  ;;  %v2809_v2 = vrot.slane %v14084_v55, 4 }
 0x54c   : > { %14102 = vrot.lane.b32.xlu1 %v15322_v25, %s19211_s0 }
 0x550   : > { %v15361_v56 = vpop.permute.xlu0 %14087 }
 0x551   : > { %v14090_v30 = vunpack.i.h.bf16 %v15361_v56  ;;  %v14089_v49 = vunpack.i.l.bf16 %v15361_v56 }
 0x553   : > { %v2907_v37 = vrot.slane %v14090_v30, 4  ;;  %v2795_v5 = vrot.slane %v14089_v49, 4  ;;  %v2910_v62 = vsel %vm912_vm1, %v14090_v30, %v2909_v43  ;;  %v2798_v4 = vsel %vm912_vm1, %v14089_v49, %v2797_v51 }
 0x554   : > { %v2918_v12 = vperm.slane %v2910_v62, %v14770_v35 }
 0x555   : > { %v2908_v14 = vsel %vm912_vm1, %v2907_v37, %v14080_v45  ;;  %v2796_v11 = vsel %vm912_vm1, %v2795_v5, %v14079_v46 }
 0x556   : > { %v2914_v60 = vperm.slane %v2908_v14, %v14770_v35 }
 0x558   : > { %v15363_v44 = vpop.permute.xlu0 %14092 }
 0x560   : > { %v15371_v54 = vpop.permute.xlu0 %14097 }
 0x561   : > { %v14099_v41 = vunpack.i.l.bf16 %v15371_v54 }
 0x5a6   : > { %v2373_v36 = vpop.xlane.xlu1 %2372 }
 0x5a7   : > { %v2381_v18 = vmul.f32 %v15310_v17, %v2373_v36  ;;  %v2802_v36 = vperm.slane %v2796_v11, %v14770_v35 }
 0x5a9   : > { %v2382_v50 = vsub.f32 %v2368_v6, %v2381_v18  ;;  %v14100_v6 = vunpack.i.h.bf16 %v15371_v54  ;;  %v2806_v18 = vperm.slane %v2798_v4, %v14770_v35 }
 0x5ab   : > { %v2383_v22 = vmul.f32 %v2382_v50, %v2382_v50  ;;  %v2883_v16 = vrot.slane %v14100_v6, 4 }
 0x5ad   : > { %v2384_v53 = vsel %vm866_vm0, %v2383_v22, 0.0  ;;  %v2771_v22 = vrot.slane %v14099_v41, 4 }
 0x5ae   : > { %2385 = vadd.xlane.f32.xlu2 %v2384_v53 }
 0x5be   : > { %v15373_v34 = vpop.permute.xlu1 %14102 }
 0x5bf   : > { %v14105_v1 = vunpack.i.h.bf16 %v15373_v34  ;;  %v14104_v61 = vunpack.i.l.bf16 %v15373_v34 }
 0x5c1   : > { %v2919_v24 = vrot.slane %v14105_v1, 4  ;;  %v2922_v59 = vsel %vm912_vm1, %v14105_v1, %v2921_v57  ;;  %v2807_v27 = vrot.slane %v14104_v61, 4  ;;  %v2810_v28 = vsel %vm912_vm1, %v14104_v61, %v2809_v2 }
 0x5c2   : > { %v2930_v15 = vperm.slane %v2922_v59, %v14770_v35 }
 0x5c3   : > { %v2920_v3 = vsel %vm912_vm1, %v2919_v24, %v14085_v47 }
 0x5c4   : > { %v2926_v53 = vperm.slane %v2920_v3, %v14770_v35 }
 0x5c6   : > { %14107 = vrot.lane.b32.xlu2 %v15322_v25, %s19203_s7 }
 0x621   : > { %v2386_v29 = vpop.xlane.xlu2 %2385 }
 0x622   : > { %v2387_v31 = vmul.f32 %v2386_v29, %v15310_v17  ;;  %v2969_v29 = vrot.slane %v2918_v12, 4 }
 0x624   : > { %v2388_v32 = vadd.f32 1e-05, %v2387_v31  ;;  %v2818_v31 = vperm.slane %v2810_v28, %v14770_v35  ;;  %v2970_v46 = vsel %vm912_vm1, %v2930_v15, %v2969_v29 }
 0x625   : > { %v15416_v57 = vperm.slane %v2970_v46, %v14796_v9 }
 0x626   : > { %14325 = vrsqrt.f32 %v2388_v32  ;;  %vm2395_vm12 = vweird.f32 %v2388_v32  ;;  %v2855_v30 = vrot.slane %v2818_v31, 4 }
 0x628   : > { %v2856_v4 = vsel %vm912_vm1, %v2855_v30, %v2806_v18 }
 0x62c   : > { %v14326_v33 = vpop.eup %14325 }
 0x62d   : > { %v2390_v38 = vmul.f32 %v14326_v33, %v2388_v32  ;;  %vm2396_vm11 = vweird.f32 %v14326_v33  ;;  %v2957_v32 = vrot.slane %v2914_v60, 4 }
 0x62e   : > { %vm2397_vm13 = vmor %vm2395_vm12, %vm2396_vm11 }
 0x62f   : > { %v2391_v58 = vmul.f32 %v14326_v33, %v2390_v38  ;;  %v2967_v38 = vrot.slane %v2930_v15, 4  ;;  %v2958_v49 = vsel %vm912_vm1, %v2926_v53, %v2957_v32 }
 0x630   : > { %v15420_v62 = vperm.slane %v2958_v49, %v14796_v9 }
 0x631   : > { %v2392_v40 = vmul.f32 0.5, %v2391_v58  ;;  %v2808_v58 = vsel %vm912_vm1, %v2807_v27, %v14084_v55  ;;  %v2968_v43 = vsel %vm912_vm1, %v2967_v38, %v2918_v12  ;;  %v15429_v12 = vpop.permute.xlu2 %14107 }
 0x632   : > { %v15423_v1 = vperm.slane %v2968_v43, %v14796_v9  ;;  %v14110_v3 = vunpack.i.h.bf16 %v15429_v12  ;;  %v14109_v15 = vunpack.i.l.bf16 %v15429_v12 }
 0x633   : > { %v2393_v13 = vsub.f32 1.5, %v2392_v40  ;;  %v2845_v40 = vrot.slane %v2802_v36, 4 }
 0x634   : > { %v2783_v28 = vrot.slane %v14109_v15, 4 }
 0x635   : > { %v2394_v10 = vmul.f32 %v14326_v33, %v2393_v13  ;;  %v2857_v13 = vrot.slane %v2806_v18, 4  ;;  %v15441_v18 = vperm.slane %v2856_v4, %v14796_v9 }
 0x637   : > { %v2398_v19 = vsel %vm2397_vm13, %v14326_v33, %v2394_v10  ;;  %v2886_v33 = vsel %vm912_vm1, %v14100_v6, %v2885_v0  ;;  %v2858_v5 = vsel %vm912_vm1, %v2818_v31, %v2857_v13 }
 0x638   : > { %v2399_v23 = vmul.f32 %v2398_v19, %v2382_v50  ;;  %v2773_v50 = vrot.slane %v15316_v20, 4  ;;  %v14095_v19 = vunpack.i.h.bf16 %v15363_v44  ;;  %v2894_v45 = vperm.slane %v2886_v33, %v14770_v35 }
 0x63a   : > { %v2401_v7 = vmul.f32 %v14269_v8, %v2399_v23  ;;  %v2774_v10 = vsel %vm912_vm1, %v14099_v41, %v2773_v50  ;;  %v2814_v8 = vperm.slane %v2808_v58, %v14770_v35  ;;  %v2884_v23 = vsel %vm912_vm1, %v2883_v16, %v15318_v21 }
 0x63b   : > { %v15408_v47 = vperm.slane %v2774_v10, %v14770_v35  ;;  %v2890_v21 = vperm.slane %v2884_v23, %v14770_v35  ;;  %v2897_v55 = vrot.slane %v14095_v19, 4  ;;  %v2945_v6 = vrot.slane %v2894_v45, 4 }
 0x63c   : > { %v15354_v48 = vadd.f32 %v14270_v39, %v2401_v7  ;;  %v2772_v39 = vsel %vm912_vm1, %v2771_v22, %v15316_v20  ;;  %v2955_v7 = vrot.slane %v2926_v53, 4  ;;  %v2843_v51 = vrot.slane %v2814_v8, 4 }
 0x63d   : > { %v2778_v20 = vperm.slane %v2772_v39, %v14770_v35  ;;  %v2846_v2 = vsel %vm912_vm1, %v2814_v8, %v2845_v40  ;;  %v2833_v11 = vrot.slane %v15408_v47, 4  ;;  %v2933_v24 = vrot.slane %v2890_v21, 4 }
 0x63e   : > { %v2408_v42 = vpack.c.bf16 %v15354_v48, %v15354_v48  ;;  %v2956_v37 = vsel %vm912_vm1, %v2955_v7, %v2914_v60  ;;  %v2844_v41 = vsel %vm912_vm1, %v2843_v51, %v2802_v36  ;;  %v15435_v60 = vperm.slane %v2858_v5, %v14796_v9 }
 0x63f   : > { %v2821_v59 = vrot.slane %v2778_v20, 4  ;;  %v15432_v0 = vperm.slane %v2956_v37, %v14796_v9  ;;  %v2854_v61 = vperm.slane %v2846_v2, %v14796_v9  ;;  %v2983_v36 = vrot.slane %v15420_v62, 4 }
 0x640   : > { %11887 = vmatmul.msk.bf16.vlgmr.msra.gmra.mxu2 %vm866_vm0, %v2408_v42  ;;  %v14094_v42 = vunpack.i.l.bf16 %v15363_v44  ;;  %v2987_v50 = vrot.slane %v15423_v1, 4  ;;  %v2991_v16 = vrot.slane %v15416_v57, 4  ;;  %v15447_v22 = vperm.slane %v2844_v41, %v14796_v9 }
 0x641   : > { %v2895_v53 = vrot.slane %v14110_v3, 4  ;;  %v2898_v27 = vsel %vm912_vm1, %v14110_v3, %v2897_v55  ;;  %v2979_v33 = vrot.slane %v15432_v0, 4  ;;  %v2879_v38 = vrot.slane %v15435_v60, 4 }
 0x642   : > { %v2785_v14 = vrot.slane %v14094_v42, 4  ;;  %v2906_v31 = vperm.slane %v2898_v27, %v14770_v35  ;;  %v2784_v40 = vsel %vm912_vm1, %v2783_v28, %v14094_v42  ;;  %v2871_v13 = vrot.slane %v2854_v61, 4 }
 0x643   : > { %v2896_v58 = vsel %vm912_vm1, %v2895_v53, %v14095_v19  ;;  %v2875_v10 = vrot.slane %v15441_v18, 4  ;;  %v2790_v7 = vperm.slane %v2784_v40, %v14770_v35  ;;  %v2867_v43 = vrot.slane %v15447_v22, 4 }
 0x644   : > { %v2786_v29 = vsel %vm912_vm1, %v14109_v15, %v2785_v14  ;;  %v2902_v8 = vperm.slane %v2896_v58, %v14770_v35  ;;  %v2943_v23 = vrot.slane %v2906_v31, 4  ;;  %v2946_v39 = vsel %vm912_vm1, %v2906_v31, %v2945_v6 }
 0x645   : > { %v2794_v32 = vperm.slane %v2786_v29, %v14770_v35  ;;  %v2954_v46 = vperm.slane %v2946_v39, %v14796_v9  ;;  %v2819_v55 = vrot.slane %v2790_v7, 4  ;;  %v2822_v4 = vsel %vm912_vm1, %v2790_v7, %v2821_v59 }
 0x646   : > { %v2931_v19 = vrot.slane %v2902_v8, 4  ;;  %v2934_v42 = vsel %vm912_vm1, %v2902_v8, %v2933_v24  ;;  %v2944_v51 = vsel %vm912_vm1, %v2943_v23, %v2894_v45 }
 0x647   : > { %v2831_v30 = vrot.slane %v2794_v32, 4  ;;  %v2834_v49 = vsel %vm912_vm1, %v2794_v32, %v2833_v11  ;;  %v2942_v37 = vperm.slane %v2934_v42, %v14796_v9  ;;  %v2950_v5 = vperm.slane %v2944_v51, %v14796_v9 }
 0x648   : > { %v2993_v2 = vrot.slane %v2954_v46, 4  ;;  %v2932_v14 = vsel %vm912_vm1, %v2931_v19, %v2890_v21  ;;  %v2820_v6 = vsel %vm912_vm1, %v2819_v55, %v2778_v20  ;;  %v2830_v11 = vperm.slane %v2822_v4, %v14796_v9 }
 0x649   : > { %v2832_v41 = vsel %vm912_vm1, %v2831_v30, %v15408_v47  ;;  %v2938_v24 = vperm.slane %v2932_v14, %v14796_v9  ;;  %v2985_v45 = vrot.slane %v2942_v37, 4  ;;  %v2989_v3 = vrot.slane %v2950_v5, 4 }
 0x64a   : > { %v2826_v15 = vperm.slane %v2820_v6, %v14796_v9  ;;  %v2838_v53 = vperm.slane %v2832_v41, %v14796_v9  ;;  %v2842_v27 = vperm.slane %v2834_v49, %v14796_v9  ;;  %v2873_v59 = vrot.slane %v2830_v11, 4 }
 0x64b   : > { %v15479_v21 = vsel %vm912_vm1, %v2983_v36, %v2942_v37  ;;  %v2981_v20 = vrot.slane %v2938_v24, 4  ;;  %v15483_v29 = vsel %vm912_vm1, %v15420_v62, %v2985_v45  ;;  %v15486_v47 = vsel %vm912_vm1, %v2987_v50, %v2950_v5 }
 0x64c   : > { %v2869_v28 = vrot.slane %v2826_v15, 4  ;;  %v2877_v31 = vrot.slane %v2838_v53, 4  ;;  %v2881_v32 = vrot.slane %v2842_v27, 4  ;;  %v2990_v58 = vsel %vm912_vm1, %v15423_v1, %v2989_v3 }
 0x64d   : > { %v15491_v40 = vsel %vm912_vm1, %v2991_v16, %v2954_v46  ;;  %v2994_v36 = vsel %vm912_vm1, %v15416_v57, %v2993_v2  ;;  %v3119_v8 = vrot.slane %v15483_v29, 4  ;;  %v3133_v62 = vrot.slane %v15486_v47, 4 }
 0x64e   : > { %v3131_v23 = vrot.slane %v15491_v40, 4  ;;  %v3143_v39 = vrot.slane %v2994_v36, 4  ;;  %v3145_v50 = vrot.slane %v2990_v58, 4  ;;  %v15499_v7 = vsel %vm912_vm1, %v2871_v13, %v2830_v11 }
 0x64f   : > { %v15502_v30 = vsel %vm912_vm1, %v2854_v61, %v2873_v59  ;;  %v15505_v1 = vsel %vm912_vm1, %v2875_v10, %v2838_v53  ;;  %v2878_v57 = vsel %vm912_vm1, %v15441_v18, %v2877_v31  ;;  %v15510_v16 = vsel %vm912_vm1, %v2879_v38, %v2842_v27 }
 0x650   : > { %v2882_v46 = vsel %vm912_vm1, %v15435_v60, %v2881_v32  ;;  %v3144_v49 = vsel %vm912_vm1, %v3143_v39, %v2990_v58  ;;  %v3146_v13 = vsel %vm912_vm1, %v2994_v36, %v3145_v50  ;;  %v3007_v19 = vrot.slane %v15502_v30, 4 }
 0x651   : > { %v3019_v61 = vrot.slane %v15510_v16, 4  ;;  %v15519_v10 = vperm.slane %v3146_v13, %v14770_v35  ;;  %v3021_v42 = vrot.slane %v15505_v1, 4  ;;  %v3031_v18 = vrot.slane %v2882_v46, 4 }
 0x652   : > { %v3033_v51 = vrot.slane %v2878_v57, 4  ;;  %v2868_v38 = vsel %vm912_vm1, %v2867_v43, %v2826_v15  ;;  %v15525_v60 = vsel %vm912_vm1, %v15447_v22, %v2869_v28  ;;  %v15530_v55 = vsel %vm912_vm1, %v2979_v33, %v2938_v24 }
 0x653   : > { %v15534_v37 = vsel %vm912_vm1, %v15432_v0, %v2981_v20  ;;  %v3032_v5 = vsel %vm912_vm1, %v3031_v18, %v2878_v57  ;;  %v2995_v4 = vrot.slane %v15499_v7, 4  ;;  %v2997_v43 = vrot.slane %v2868_v38, 4 }
 0x654   : > { %v3034_v2 = vsel %vm912_vm1, %v2882_v46, %v3033_v51  ;;  %v3008_v22 = vsel %vm912_vm1, %v3007_v19, %v15525_v60  ;;  %v3009_v33 = vrot.slane %v15525_v60, 4  ;;  %v3020_v6 = vsel %vm912_vm1, %v3019_v61, %v15505_v1 }
 0x655   : > { %v15540_v14 = vperm.slane %v3034_v2, %v14770_v35  ;;  %v2996_v0 = vsel %vm912_vm1, %v2995_v4, %v2868_v38  ;;  %v3014_v11 = vperm.slane %v3008_v22, %v14770_v35  ;;  %v3026_v41 = vperm.slane %v3020_v6, %v14770_v35 }
 0x656   : > { %v3038_v24 = vperm.slane %v3032_v5, %v14770_v35  ;;  %v3002_v45 = vperm.slane %v2996_v0, %v14770_v35  ;;  %v3107_v3 = vrot.slane %v15479_v21, 4  ;;  %v3109_v15 = vrot.slane %v15530_v55, 4 }
 0x657   : > { %v3120_v53 = vsel %vm912_vm1, %v3119_v8, %v15534_v37  ;;  %v3043_v27 = vrot.slane %v3014_v11, 4  ;;  %v3121_v20 = vrot.slane %v15534_v37, 4  ;;  %v3132_v32 = vsel %vm912_vm1, %v3131_v23, %v15486_v47 }
 0x658   : > { %v3067_v59 = vrot.slane %v3038_v24, 4  ;;  %v3126_v28 = vperm.slane %v3120_v53, %v14770_v35  ;;  %v3108_v31 = vsel %vm912_vm1, %v3107_v3, %v15530_v55  ;;  %v3150_v58 = vperm.slane %v3144_v49, %v14770_v35 }
 0x659   : > { %v3045_v36 = vrot.slane %v3002_v45, 4  ;;  %v3044_v39 = vsel %vm912_vm1, %v3043_v27, %v3002_v45  ;;  %v3114_v8 = vperm.slane %v3108_v31, %v14770_v35  ;;  %v3138_v57 = vperm.slane %v3132_v32, %v14770_v35 }
 0x65a   : > { %v3068_v50 = vsel %vm912_vm1, %v3067_v59, %v3026_v41  ;;  %v3050_v46 = vperm.slane %v3044_v39, %v14796_v9  ;;  %v3155_v19 = vrot.slane %v3126_v28, 4  ;;  %v3179_v61 = vrot.slane %v3150_v58, 4 }
 0x65b   : > { %v3074_v13 = vperm.slane %v3068_v50, %v14796_v9  ;;  %v3046_v18 = vsel %vm912_vm1, %v3014_v11, %v3045_v36  ;;  %v3069_v23 = vrot.slane %v3026_v41, 4  ;;  %v3157_v51 = vrot.slane %v3114_v8, 4 }
 0x65c   : > { %v3181_v49 = vrot.slane %v3138_v57, 4  ;;  %v3156_v60 = vsel %vm912_vm1, %v3155_v19, %v3114_v8  ;;  %v3180_v55 = vsel %vm912_vm1, %v3179_v61, %v3138_v57  ;;  %v3093_v5 = vrot.slane %v3050_v46, 4 }
 0x65d   : > { %v3091_v38 = vrot.slane %v3074_v13, 4  ;;  %v3162_v2 = vperm.slane %v3156_v60, %v14796_v9  ;;  %v3186_v4 = vperm.slane %v3180_v55, %v14796_v9  ;;  %v15575_v22 = vperm.slane %v3046_v18, %v14796_v9 }
 0x65e   : > { %v3070_v6 = vsel %vm912_vm1, %v3038_v24, %v3069_v23  ;;  %v3094_v11 = vsel %vm912_vm1, %v3074_v13, %v3093_v5  ;;  %v3158_v45 = vsel %vm912_vm1, %v3126_v28, %v3157_v51  ;;  %v3182_v36 = vsel %vm912_vm1, %v3150_v58, %v3181_v49 }
 0x65f   : > { %v3092_v0 = vsel %vm912_vm1, %v3091_v38, %v3050_v46  ;;  %v3078_v41 = vperm.slane %v3070_v6, %v14796_v9  ;;  %v3203_v3 = vrot.slane %v3186_v4, 4  ;;  %v3205_v27 = vrot.slane %v3162_v2, 4 }
 0x660   : > { %v3723_v53 = vpack.c.bf16 %v3092_v0, %v3092_v0  ;;  %v3725_v59 = vpack.c.bf16 %v3094_v11, %v3094_v11  ;;  %v3166_v32 = vperm.slane %v3158_v45, %v14796_v9  ;;  %v2998_v24 = vsel %vm912_vm1, %v15499_v7, %v2997_v43 }
 0x661   : > { %v3095_v31 = vrot.slane %v3078_v41, 4  ;;  %v3204_v39 = vsel %vm912_vm1, %v3203_v3, %v3162_v2  ;;  %v3206_v8 = vsel %vm912_vm1, %v3186_v4, %v3205_v27  ;;  %v3190_v19 = vperm.slane %v3182_v36, %v14796_v9 }
 0x662   : > { %v3741_v50 = vunpack.c.l.b16 %v3723_v53  ;;  %v3765_v57 = vunpack.c.l.b16 %v3725_v59  ;;  %v3724_v46 = vpack.c.bf16 %v3204_v39, %v3204_v39  ;;  %v3726_v28 = vpack.c.bf16 %v3206_v8, %v3206_v8 }
 0x663   : > { %v3096_v13 = vsel %vm912_vm1, %v3095_v31, %v15575_v22  ;;  %v3006_v18 = vperm.slane %v2998_v24, %v14770_v35  ;;  %v3010_v58 = vsel %vm912_vm1, %v15502_v30, %v3009_v33  ;;  %v3022_v7 = vsel %vm912_vm1, %v15510_v16, %v3021_v42 }
 0x664   : > { %v3727_v61 = vpack.c.bf16 %v3096_v13, %v3096_v13  ;;  %v3742_v43 = vunpack.c.l.b16 %v3724_v46  ;;  %v3766_v23 = vunpack.c.l.b16 %v3726_v28  ;;  %v3207_v51 = vrot.slane %v3190_v19, 4 }
 0x665   : > { %v3018_v49 = vperm.slane %v3010_v58, %v14770_v35  ;;  %v3030_v60 = vperm.slane %v3022_v7, %v14770_v35  ;;  %v3079_v55 = vrot.slane %v15540_v14, 4  ;;  %v3110_v5 = vsel %vm912_vm1, %v15479_v21, %v3109_v15 }
 0x666   : > { %v3789_v38 = vunpack.c.l.b16 %v3727_v61  ;;  %v3743_v2 = vpack.c.b16 %v3742_v43, %v3741_v50  ;;  %v3767_v30 = vpack.c.b16 %v3766_v23, %v3765_v57  ;;  %v3208_v1 = vsel %vm912_vm1, %v3207_v51, %v3166_v32 }
 0x667   : > { %v3055_v33 = vrot.slane %v3018_v49, 4  ;;  %v3728_v4 = vpack.c.bf16 %v3208_v1, %v3208_v1  ;;  %v3080_v16 = vsel %vm912_vm1, %v3079_v55, %v3030_v60  ;;  %v3118_v42 = vperm.slane %v3110_v5, %v14770_v35 }
 0x668   : > { %v3122_v6 = vsel %vm912_vm1, %v15483_v29, %v3121_v20  ;;  %v3748_v0 = vsel %vm1663_vm2, %v3743_v2, 0  ;;  %v3772_v11 = vsel %vm1663_vm2, %v3767_v30, 0  ;;  %v3086_v15 = vperm.slane %v3080_v16, %v14796_v9 }
 0x669   : > { %v3056_v21 = vsel %vm912_vm1, %v3055_v33, %v3006_v18  ;;  %3757 = vmatpush.bf16.xpose.msrb.mxu0 %v3748_v0  ;;  %3781 = vmatpush.bf16.xpose.msrb.mxu1 %v3772_v11  ;;  %v3790_v45 = vunpack.c.l.b16 %v3728_v4  ;;  %v3130_v53 = vperm.slane %v3122_v6, %v14770_v35  ;;  %v3134_v29 = vsel %vm912_vm1, %v15491_v40, %v3133_v62 }
 0x66a   : > { %v3062_v3 = vperm.slane %v3056_v21, %v14796_v9  ;;  %v3099_v37 = vrot.slane %v3086_v15, 4  ;;  %v3142_v20 = vperm.slane %v3134_v29, %v14770_v35  ;;  %v3191_v27 = vrot.slane %v15519_v10, 4 }
 0x66b   : > { %v3097_v59 = vrot.slane %v15575_v22, 4  ;;  %v3791_v31 = vpack.c.b16 %v3790_v45, %v3789_v38  ;;  %v3167_v36 = vrot.slane %v3130_v53, 4  ;;  %v3209_v24 = vrot.slane %v3166_v32, 4 }
 0x66c   : > { %v3101_v39 = vrot.slane %v3062_v3, 4  ;;  %v3100_v50 = vsel %vm912_vm1, %v3099_v37, %v3062_v3  ;;  %v3192_v8 = vsel %vm912_vm1, %v3191_v27, %v3142_v20  ;;  %v3057_v57 = vrot.slane %v3006_v18, 4 }
 0x66d   : > { %v3098_v47 = vsel %vm912_vm1, %v3078_v41, %v3097_v59  ;;  %v3796_v40 = vsel %vm1663_vm2, %v3791_v31, 0  ;;  %v3168_v62 = vsel %vm912_vm1, %v3167_v36, %v3118_v42  ;;  %v3198_v46 = vperm.slane %v3192_v8, %v14796_v9 }
 0x66e   : > { %v3731_v28 = vpack.c.bf16 %v3100_v50, %v3100_v50  ;;  %3805 = vmatpush.bf16.xpose.msrb.mxu2 %v3796_v40  ;;  %v3174_v22 = vperm.slane %v3168_v62, %v14796_v9  ;;  %v3210_v32 = vsel %vm912_vm1, %v3190_v19, %v3209_v24  ;;  %v3729_v13 = vpack.c.bf16 %v3098_v47, %v3098_v47 }
 0x66f   : > { %v3102_v61 = vsel %vm912_vm1, %v3086_v15, %v3101_v39  ;;  %v3211_v58 = vrot.slane %v3198_v46, 4  ;;  %v3730_v43 = vpack.c.bf16 %v3210_v32, %v3210_v32  ;;  %v3058_v51 = vsel %vm912_vm1, %v3018_v49, %v3057_v57 }
 0x670   : > { %v3837_v7 = vunpack.c.l.b16 %v3731_v28  ;;  %v3733_v41 = vpack.c.bf16 %v3102_v61, %v3102_v61  ;;  %v3813_v18 = vunpack.c.l.b16 %v3729_v13  ;;  %v3213_v23 = vrot.slane %v3174_v22, 4 }
 0x671   : > { %v3081_v38 = vrot.slane %v3030_v60, 4  ;;  %v3212_v55 = vsel %vm912_vm1, %v3211_v58, %v3174_v22  ;;  %v3814_v5 = vunpack.c.l.b16 %v3730_v43  ;;  %v3066_v30 = vperm.slane %v3058_v51, %v14796_v9  ;;  %v14271_v58 = vld [vmem:[%s19219_s11] ss:$0 sm:$0xff]  ;;  %s19221_s11 = sld [smem:[#allocation18_spill]] }
 0x672   : > { %v3861_v2 = vunpack.c.l.b16 %v3733_v41  ;;  %v3732_v1 = vpack.c.bf16 %v3212_v55, %v3212_v55  ;;  %v3214_v19 = vsel %vm912_vm1, %v3198_v46, %v3213_v23  ;;  %v3169_v4 = vrot.slane %v3118_v42, 4 }
 0x673   : > { %v3082_v33 = vsel %vm912_vm1, %v15540_v14, %v3081_v38  ;;  %v3815_v16 = vpack.c.b16 %v3814_v5, %v3813_v18  ;;  %v3734_v6 = vpack.c.bf16 %v3214_v19, %v3214_v19  ;;  %v3193_v11 = vrot.slane %v3142_v20, 4 }
 0x674   : > { %v3090_v0 = vperm.slane %v3082_v33, %v14796_v9  ;;  %v3838_v49 = vunpack.c.l.b16 %v3732_v1  ;;  %v3170_v60 = vsel %vm912_vm1, %v3130_v53, %v3169_v4  ;;  %v3105_v21 = vrot.slane %v3066_v30, 4 }
 0x675   : > { %v3820_v15 = vsel %vm1663_vm2, %v3815_v16, 0  ;;  %v3862_v45 = vunpack.c.l.b16 %v3734_v6  ;;  %v3178_v29 = vperm.slane %v3170_v60, %v14796_v9  ;;  %v3194_v14 = vsel %vm912_vm1, %v15519_v10, %v3193_v11 }
 0x676   : > { %v3103_v3 = vrot.slane %v3090_v0, 4  ;;  %v3839_v37 = vpack.c.b16 %v3838_v49, %v3837_v7  ;;  %3829 = vmatpush.bf16.xpose.msrb.mxu3 %v3820_v15  ;;  %v3106_v42 = vsel %vm912_vm1, %v3090_v0, %v3105_v21  ;;  %v3202_v59 = vperm.slane %v3194_v14, %v14796_v9 }
 0x677   : > { %v3863_v27 = vpack.c.b16 %v3862_v45, %v3861_v2  ;;  %v3217_v53 = vrot.slane %v3178_v29, 4  ;;  %v3737_v24 = vpack.c.bf16 %v3106_v42, %v3106_v42  ;;  %s15765_s19 = scalar_lea.vmem %s19221_s11, %s14713_s30  ;;  %s19223_s30 = smov 16  }
 0x678   : > { %v3104_v20 = vsel %vm912_vm1, %v3103_v3, %v3066_v30  ;;  %v3844_v31 = vsel %vm1663_vm2, %v3839_v37, 0  ;;  %v3215_v50 = vrot.slane %v3202_v59, 4  ;;  %19222 = sst [smem:[#allocation14_spill]] %s15765_s19  ;;  %s19224_s11 = smov 12  }
 0x679   : > { %v3735_v36 = vpack.c.bf16 %v3104_v20, %v3104_v20  ;;  %3853 = vmatpush.bf16.xpose.msra.mxu0 %v3844_v31  ;;  %v3868_v39 = vsel %vm1663_vm2, %v3863_v27, 0  ;;  %v3218_v8 = vsel %vm912_vm1, %v3202_v59, %v3217_v53  ;;  %v3909_v47 = vunpack.c.l.b16 %v3737_v24 }
 0x67a   : > { %3877 = vmatpush.bf16.xpose.msra.mxu1 %v3868_v39  ;;  %v3738_v10 = vpack.c.bf16 %v3218_v8, %v3218_v8  ;;  %v3216_v57 = vsel %vm912_vm1, %v3215_v50, %v3178_v29 }
 0x67b   : > { %v3736_v40 = vpack.c.bf16 %v3216_v57, %v3216_v57  ;;  %v3885_v62 = vunpack.c.l.b16 %v3735_v36 }
 0x67c   : > { %v3910_v46 = vunpack.c.l.b16 %v3738_v10 }
 0x67d   : > { %v3886_v28 = vunpack.c.l.b16 %v3736_v40 }
 0x67e   : > { %v3911_v22 = vpack.c.b16 %v3910_v46, %v3909_v47 }
 0x67f   : > { %v3887_v32 = vpack.c.b16 %v3886_v28, %v3885_v62 }
 0x680   : > { %v3916_v13 = vsel %vm1663_vm2, %v3911_v22, 0 }
 0x681   : > { %3925 = vmatpush.bf16.xpose.msra.mxu3 %v3916_v13  ;;  %v3892_v61 = vsel %vm1663_vm2, %v3887_v32, 0 }
 0x682   : > { %3901 = vmatpush.bf16.xpose.msra.mxu2 %v3892_v61 }
 0x6c3   : > { %v2435_v7 = vpop.f32.mrf.mxu2 }
 0x6c4   : > { %v2436_v43 = vadd.f32 %v14271_v58, %v2435_v7 }
 0x6c6   : > { %v2480_v41 = vmul.f32 0.5, %v2436_v43 }
 0x6c8   : > { %2485 = vrot.lane.b32.xlu2 %v2480_v41, %s19215_s6  ;;  %2482 = vrot.lane.b32.xlu1 %v2480_v41, %s19214_s10  ;;  %v2505_v2 = vrot.slane %v2480_v41, 4 }
 0x6c9   : > { %2491 = vrot.lane.b32.xlu0 %v2480_v41, %s19210_s27 }
 0x6cb   : > { %v2437_v18 = vpop.f32.mrf.mxu2 }
 0x6d0   : > { %14117 = vrot.lane.b32.xlu2 %v15322_v25, %s19220_s3  ;;  %2488 = vrot.lane.b32.xlu1 %v2480_v41, %s19203_s7 }
 0x6d1   : > { %2494 = vrot.lane.b32.xlu0 %v2480_v41, %s19212_s29 }
 0x6d8   : > { %14112 = vrot.lane.b32.xlu1 %v15352_v26, %s19220_s3 }
 0x6d9   : > { %2497 = vrot.lane.b32.xlu0 %v2480_v41, %s19213_s5 }
 0x6e0   : > { %14132 = vrot.lane.b32.xlu1 %v15363_v44, %s19220_s3 }
 0x6e1   : > { %2500 = vrot.lane.b32.xlu0 %v2480_v41, %s19211_s0 }
 0x6e9   : > { %14122 = vrot.lane.b32.xlu0 %v15359_v52, %s19220_s3 }
 0x6f1   : > { %14127 = vrot.lane.b32.xlu0 %v15361_v56, %s19220_s3 }
 0x722   : > { %v2486_v51 = vpop.permute.xlu2 %2485 }
 0x723   : > { %v2503_v26 = vrot.slane %v2486_v51, 4  ;;  %v2506_v1 = vsel %vm912_vm1, %v2486_v51, %v2505_v2 }
 0x724   : > { %v2514_v33 = vperm.slane %v2506_v1, %v14770_v35 }
 0x725   : > { %v2504_v52 = vsel %vm912_vm1, %v2503_v26, %v2480_v41 }
 0x726   : > { %v2510_v6 = vperm.slane %v2504_v52, %v14770_v35  ;;  %v2565_v60 = vrot.slane %v2514_v33, 4 }
 0x728   : > { %v2553_v45 = vrot.slane %v2510_v6, 4 }
 0x73a   : > { %v2483_v25 = vpop.permute.xlu1 %2482 }
 0x73b   : > { %v2492_v23 = vpop.permute.xlu0 %2491  ;;  %v2517_v30 = vrot.slane %v2483_v25, 4 }
 0x73c   : > { %v2529_v0 = vrot.slane %v2492_v23, 4 }
 0x742   : > { %v2489_v38 = vpop.permute.xlu1 %2488 }
 0x743   : > { %v2495_v55 = vpop.permute.xlu0 %2494  ;;  %v2515_v5 = vrot.slane %v2489_v38, 4  ;;  %v2518_v19 = vsel %vm912_vm1, %v2489_v38, %v2517_v30 }
 0x744   : > { %v2526_v4 = vperm.slane %v2518_v19, %v14770_v35  ;;  %v2541_v14 = vrot.slane %v2495_v55, 4 }
 0x745   : > { %v2516_v44 = vsel %vm912_vm1, %v2515_v5, %v2483_v25 }
 0x746   : > { %v2522_v56 = vperm.slane %v2516_v44, %v14770_v35  ;;  %v2563_v15 = vrot.slane %v2526_v4, 4  ;;  %v2566_v29 = vsel %vm912_vm1, %v2526_v4, %v2565_v60 }
 0x747   : > { %v2574_v31 = vperm.slane %v2566_v29, %v14796_v9 }
 0x748   : > { %v2551_v21 = vrot.slane %v2522_v56, 4  ;;  %v2554_v42 = vsel %vm912_vm1, %v2522_v56, %v2553_v45  ;;  %v2564_v20 = vsel %vm912_vm1, %v2563_v15, %v2514_v33 }
 0x749   : > { %v2562_v39 = vperm.slane %v2554_v42, %v14796_v9  ;;  %v2570_v47 = vperm.slane %v2564_v20, %v14796_v9  ;;  %v2613_v22 = vrot.slane %v2574_v31, 4 }
 0x74a   : > { %v2552_v27 = vsel %vm912_vm1, %v2551_v21, %v2510_v6 }
 0x74b   : > { %v2498_v16 = vpop.permute.xlu0 %2497  ;;  %v2558_v10 = vperm.slane %v2552_v27, %v14796_v9  ;;  %v2605_v13 = vrot.slane %v2562_v39, 4  ;;  %v2609_v51 = vrot.slane %v2570_v47, 4 }
 0x74c   : > { %v2527_v11 = vrot.slane %v2498_v16, 4  ;;  %v2530_v49 = vsel %vm912_vm1, %v2498_v16, %v2529_v0 }
 0x74d   : > { %v2538_v37 = vperm.slane %v2530_v49, %v14770_v35 }
 0x74e   : > { %v2528_v3 = vsel %vm912_vm1, %v2527_v11, %v2492_v23  ;;  %v2601_v23 = vrot.slane %v2558_v10, 4 }
 0x74f   : > { %v2534_v59 = vperm.slane %v2528_v3, %v14770_v35  ;;  %v2589_v50 = vrot.slane %v2538_v37, 4 }
 0x751   : > { %v2577_v40 = vrot.slane %v2534_v59, 4 }
 0x753   : > { %v2501_v53 = vpop.permute.xlu0 %2500 }
 0x754   : > { %v2539_v36 = vrot.slane %v2501_v53, 4  ;;  %v2542_v24 = vsel %vm912_vm1, %v2501_v53, %v2541_v14 }
 0x755   : > { %v2550_v8 = vperm.slane %v2542_v24, %v14770_v35 }
 0x756   : > { %v2540_v57 = vsel %vm912_vm1, %v2539_v36, %v2495_v55 }
 0x757   : > { %v2546_v62 = vperm.slane %v2540_v57, %v14770_v35  ;;  %v2587_v46 = vrot.slane %v2550_v8, 4  ;;  %v2590_v28 = vsel %vm912_vm1, %v2550_v8, %v2589_v50 }
 0x758   : > { %v2598_v32 = vperm.slane %v2590_v28, %v14796_v9 }
 0x759   : > { %v2575_v61 = vrot.slane %v2546_v62, 4  ;;  %v2578_v58 = vsel %vm912_vm1, %v2546_v62, %v2577_v40  ;;  %v2588_v7 = vsel %vm912_vm1, %v2587_v46, %v2538_v37 }
 0x75a   : > { %v2586_v43 = vperm.slane %v2578_v58, %v14796_v9  ;;  %v2594_v41 = vperm.slane %v2588_v7, %v14796_v9  ;;  %v2611_v18 = vrot.slane %v2598_v32, 4  ;;  %v2614_v25 = vsel %vm912_vm1, %v2598_v32, %v2613_v22 }
 0x75b   : > { %v2576_v38 = vsel %vm912_vm1, %v2575_v61, %v2534_v59  ;;  %v2651_v55 = vrot.slane %v2614_v25, 4 }
 0x75c   : > { %v2582_v5 = vperm.slane %v2576_v38, %v14796_v9  ;;  %v2603_v26 = vrot.slane %v2586_v43, 4  ;;  %v2606_v2 = vsel %vm912_vm1, %v2586_v43, %v2605_v13  ;;  %v2607_v30 = vrot.slane %v2594_v41, 4 }
 0x75d   : > { %v2610_v1 = vsel %vm912_vm1, %v2594_v41, %v2609_v51  ;;  %v2612_v44 = vsel %vm912_vm1, %v2611_v18, %v2574_v31  ;;  %v2627_v19 = vrot.slane %v2606_v2, 4 }
 0x75e   : > { %v2599_v52 = vrot.slane %v2582_v5, 4  ;;  %v2602_v33 = vsel %vm912_vm1, %v2582_v5, %v2601_v23  ;;  %v2604_v56 = vsel %vm912_vm1, %v2603_v26, %v2562_v39  ;;  %v2608_v4 = vsel %vm912_vm1, %v2607_v30, %v2570_v47 }
 0x75f   : > { %v2615_v16 = vrot.slane %v2604_v56, 4  ;;  %v2628_v6 = vsel %vm912_vm1, %v2627_v19, %v2602_v33  ;;  %v2639_v0 = vrot.slane %v2612_v44, 4  ;;  %v2629_v49 = vrot.slane %v2602_v33, 4 }
 0x760   : > { %v2600_v11 = vsel %vm912_vm1, %v2599_v52, %v2558_v10  ;;  %v2641_v60 = vrot.slane %v2608_v4, 4  ;;  %v2652_v21 = vsel %vm912_vm1, %v2651_v55, %v2610_v1  ;;  %v2634_v45 = vperm.slane %v2628_v6, %v14770_v35 }
 0x761   : > { %v2617_v15 = vrot.slane %v2600_v11, 4  ;;  %v2640_v3 = vsel %vm912_vm1, %v2639_v0, %v2608_v4  ;;  %v2653_v29 = vrot.slane %v2610_v1, 4  ;;  %v2658_v42 = vperm.slane %v2652_v21, %v14770_v35 }
 0x762   : > { %v2642_v37 = vsel %vm912_vm1, %v2612_v44, %v2641_v60  ;;  %v2646_v14 = vperm.slane %v2640_v3, %v14770_v35  ;;  %v2616_v20 = vsel %vm912_vm1, %v2615_v16, %v2600_v11  ;;  %v2630_v59 = vsel %vm912_vm1, %v2606_v2, %v2629_v49 }
 0x763   : > { %v2654_v27 = vsel %vm912_vm1, %v2614_v25, %v2653_v29  ;;  %v2687_v53 = vrot.slane %v2658_v42, 4  ;;  %v2622_v36 = vperm.slane %v2616_v20, %v14770_v35  ;;  %v2618_v24 = vsel %vm912_vm1, %v2604_v56, %v2617_v15  ;;  %v846_v20 = vld [vmem:[%s15765_s19] sm:$0xff]  ;;  %s19227_s19 = smov 24  }
 0x764   : > { %v2689_v31 = vrot.slane %v2646_v14, 4  ;;  %v2650_v39 = vperm.slane %v2642_v37, %v14770_v35  ;;  %v2663_v50 = vrot.slane %v2634_v45, 4  ;;  %v2662_v8 = vperm.slane %v2654_v27, %v14770_v35 }
 0x765   : > { %v2688_v10 = vsel %vm912_vm1, %v2687_v53, %v2646_v14  ;;  %v2665_v47 = vrot.slane %v2622_v36, 4  ;;  %v2638_v40 = vperm.slane %v2630_v59, %v14770_v35  ;;  %v2626_v13 = vperm.slane %v2618_v24, %v14770_v35 }
 0x766   : > { %v2690_v57 = vsel %vm912_vm1, %v2658_v42, %v2689_v31  ;;  %v2664_v62 = vsel %vm912_vm1, %v2663_v50, %v2622_v36  ;;  %v2694_v46 = vperm.slane %v2688_v10, %v14796_v9  ;;  %v2699_v43 = vrot.slane %v2662_v8, 4 }
 0x767   : > { %v2698_v28 = vperm.slane %v2690_v57, %v14796_v9  ;;  %v2670_v22 = vperm.slane %v2664_v62, %v14796_v9  ;;  %v2666_v32 = vsel %vm912_vm1, %v2634_v45, %v2665_v47  ;;  %v2701_v41 = vrot.slane %v2650_v39, 4 }
 0x768   : > { %v2711_v61 = vrot.slane %v2694_v46, 4  ;;  %v2674_v58 = vperm.slane %v2666_v32, %v14796_v9  ;;  %v2675_v38 = vrot.slane %v2638_v40, 4  ;;  %v2677_v2 = vrot.slane %v2626_v13, 4 }
 0x769   : > { %v2715_v7 = vrot.slane %v2698_v28, 4  ;;  %v2713_v18 = vrot.slane %v2670_v22, 4  ;;  %v2700_v19 = vsel %vm912_vm1, %v2699_v43, %v2650_v39  ;;  %v2702_v33 = vsel %vm912_vm1, %v2662_v8, %v2701_v41 }
 0x76a   : > { %v2712_v25 = vsel %vm912_vm1, %v2711_v61, %v2670_v22  ;;  %v2717_v51 = vrot.slane %v2674_v58, 4  ;;  %v2676_v52 = vsel %vm912_vm1, %v2675_v38, %v2626_v13  ;;  %v2678_v56 = vsel %vm912_vm1, %v2638_v40, %v2677_v2 }
 0x76b   : > { %v2716_v23 = vsel %vm912_vm1, %v2715_v7, %v2674_v58  ;;  %v3715_v55 = vpack.c.bf16 %v2712_v25, %v2712_v25  ;;  %v2714_v5 = vsel %vm912_vm1, %v2694_v46, %v2713_v18  ;;  %v2706_v4 = vperm.slane %v2700_v19, %v14796_v9  ;;  %v15791_v19 = vpop.permute.xlu2 %14117 }
 0x76c   : > { %v3717_v26 = vpack.c.bf16 %v2716_v23, %v2716_v23  ;;  %v3716_v30 = vpack.c.bf16 %v2714_v5, %v2714_v5  ;;  %v2718_v1 = vsel %vm912_vm1, %v2698_v28, %v2717_v51  ;;  %v2710_v16 = vperm.slane %v2702_v33, %v14796_v9 }
 0x76d   : > { %11897 = vmatmul.msk.bf16.vlgmr.msrb.gmra.mxu0 %vm1663_vm2, %v3715_v55  ;;  %v3718_v44 = vpack.c.bf16 %v2718_v1, %v2718_v1  ;;  %v2682_v6 = vperm.slane %v2676_v52, %v14796_v9  ;;  %v2686_v0 = vperm.slane %v2678_v56, %v14796_v9  ;;  %v2719_v11 = vrot.slane %v2706_v4, 4  ;;  %v15787_v1 = vpop.permute.xlu0 %14122 }
 0x76e   : > { %11899 = vmatmul.msk.bf16.vlgmr.msrb.gmra.mxu2 %vm1663_vm2, %v3717_v26  ;;  %11898 = vmatmul.msk.bf16.vlgmr.msrb.gmra.mxu1 %vm1663_vm2, %v3716_v30  ;;  %v2723_v49 = vrot.slane %v2710_v16, 4  ;;  %v15785_v30 = vpop.permute.xlu1 %14112 }
 0x76f   : > { %11900 = vmatmul.msk.bf16.vlgmr.msrb.gmra.mxu3 %vm1663_vm2, %v3718_v44  ;;  %v2721_v60 = vrot.slane %v2682_v6, 4  ;;  %v2725_v21 = vrot.slane %v2686_v0, 4  ;;  %v2720_v15 = vsel %vm912_vm1, %v2719_v11, %v2682_v6 }
 0x770   : > { %v2724_v45 = vsel %vm912_vm1, %v2723_v49, %v2686_v0  ;;  %v3719_v37 = vpack.c.bf16 %v2720_v15, %v2720_v15 }
 0x771   : > { %v2722_v3 = vsel %vm912_vm1, %v2706_v4, %v2721_v60  ;;  %v2726_v29 = vsel %vm912_vm1, %v2710_v16, %v2725_v21  ;;  %v3721_v14 = vpack.c.bf16 %v2724_v45, %v2724_v45 }
 0x772   : > { %v3720_v42 = vpack.c.bf16 %v2722_v3, %v2722_v3  ;;  %v3722_v27 = vpack.c.bf16 %v2726_v29, %v2726_v29 }
 0x775   : > { %v15793_v52 = vpop.permute.xlu0 %14127 }
 0x776   : > { %v15789_v44 = vpop.permute.xlu1 %14132 }
 0x77d   : > { %11901 = vmatmul.msk.bf16.vlgmr.msra.gmra.mxu0 %vm1663_vm2, %v3719_v37 }
 0x77e   : > { %11903 = vmatmul.msk.bf16.vlgmr.msra.gmra.mxu2 %vm1663_vm2, %v3721_v14  ;;  %11902 = vmatmul.msk.bf16.vlgmr.msra.gmra.mxu1 %vm1663_vm2, %v3720_v42 }
 0x77f   : > { %11904 = vmatmul.msk.bf16.vlgmr.msra.gmra.mxu3 %vm1663_vm2, %v3722_v27 }
 0x7ea   : > { %v3759_v59 = vpop.f32.mrf.mxu0 }
 0x7eb   : > { %v3760_v53 = vadd.f32 %v3759_v59, %v846_v20  ;;  %v3783_v31 = vpop.f32.mrf.mxu1 }
 0x7ec   : > { %v3784_v36 = vadd.f32 %v3783_v31, %v846_v20 }
 0x7ed   : > { %v3931_v24 = vsel %vm2330_vm6, %v3760_v53, -inf }
 0x7ee   : > { %3932 = vmax.xlane.f32.xlu1 %v3931_v24  ;;  %v3934_v39 = vsel %vm2330_vm6, %v3784_v36, -inf }
 0x7ef   : > { %3935 = vmax.xlane.f32.xlu2 %v3934_v39 }
 0x7f1   : > { %v3807_v50 = vpop.f32.mrf.mxu2 }
 0x7f2   : > { %v3761_v8 = vpop.f32.mrf.mxu0  ;;  %v3808_v10 = vadd.f32 %v3807_v50, %v846_v20  ;;  %v3831_v47 = vpop.f32.mrf.mxu3  ;;  %v14114_v50 = vunpack.i.l.bf16 %v15785_v30 }
 0x7f3   : > { %v3785_v57 = vpop.f32.mrf.mxu1  ;;  %v3832_v40 = vadd.f32 %v3831_v47, %v846_v20 }
 0x7f4   : > { %v3937_v46 = vsel %vm2330_vm6, %v3808_v10, -inf  ;;  %v14130_v57 = vunpack.i.h.bf16 %v15793_v52 }
 0x7f5   : > { %v3940_v62 = vsel %vm2330_vm6, %v3832_v40, -inf }
 0x7f6   : > { %3941 = vmax.xlane.f32.xlu0 %v3940_v62  ;;  %v14115_v62 = vunpack.i.h.bf16 %v15785_v30 }
 0x7f7   : > { %3938 = vmax.xlane.f32.xlu2 %v3937_v46 }
 0x7f9   : > { %v3809_v28 = vpop.f32.mrf.mxu2 }
 0x7fa   : > { %v3855_v22 = vpop.f32.mrf.mxu0  ;;  %v3833_v32 = vpop.f32.mrf.mxu3  ;;  %v14129_v28 = vunpack.i.l.bf16 %v15793_v52  ;;  %v14125_v52 = vunpack.i.h.bf16 %v15787_v1 }
 0x7fb   : > { %v3856_v13 = vadd.f32 %v3855_v22, %v846_v20  ;;  %v3879_v61 = vpop.f32.mrf.mxu1  ;;  %v3293_v32 = vrot.slane %v14114_v50, 4 }
 0x7fc   : > { %v15772_v58 = vadd.f32 %v3879_v61, %v846_v20  ;;  %v14120_v61 = vunpack.i.h.bf16 %v15791_v19 }
 0x7fd   : > { %v3943_v43 = vsel %vm2330_vm6, %v3856_v13, -inf }
 0x7fe   : > { %v3946_v7 = vsel %vm2330_vm6, %v15772_v58, -inf }
 0x7ff   : > { %3947 = vmax.xlane.f32.xlu0 %v3946_v7  ;;  %3944 = vmax.xlane.f32.xlu2 %v3943_v43  ;;  %v14119_v43 = vunpack.i.l.bf16 %v15791_v19 }
 0x801   : > { %v3903_v41 = vpop.f32.mrf.mxu2  ;;  %v3269_v19 = vrot.slane %v14119_v43, 4 }
 0x802   : > { %v3857_v18 = vpop.f32.mrf.mxu0  ;;  %v3904_v25 = vadd.f32 %v3903_v41, %v846_v20  ;;  %v3927_v23 = vpop.f32.mrf.mxu3  ;;  %v3405_v41 = vrot.slane %v14115_v62, 4 }
 0x803   : > { %v3881_v51 = vpop.f32.mrf.mxu1  ;;  %v3928_v38 = vadd.f32 %v3927_v23, %v846_v20  ;;  %v3291_v23 = vrot.slane %v14129_v28, 4 }
 0x804   : > { %v3949_v5 = vsel %vm2330_vm6, %v3904_v25, -inf }
 0x805   : > { %v3952_v55 = vsel %vm2330_vm6, %v3928_v38, -inf }
 0x806   : > { %3953 = vmax.xlane.f32.xlu1 %v3952_v55 }
 0x807   : > { %3950 = vmax.xlane.f32.xlu0 %v3949_v5  ;;  %v3381_v5 = vrot.slane %v14120_v61, 4 }
 0x809   : > { %v3905_v26 = vpop.f32.mrf.mxu2 }
 0x80a   : > { %v3929_v2 = vpop.f32.mrf.mxu3 }
 0x817   : > { %14137 = vrot.lane.b32.xlu2 %v15371_v54, %s19220_s3 }
 0x81b   : > { %14142 = vrot.lane.b32.xlu0 %v15373_v34, %s19220_s3 }
 0x81f   : > { %14147 = vrot.lane.b32.xlu1 %v15429_v12, %s19220_s3 }
 0x861   : > { %v3933_v33 = vpop.xlane.xlu1 %3932 }
 0x862   : > { %v3955_v56 = vsub.f32 %v3760_v53, %v3933_v33  ;;  %v3936_v4 = vpop.xlane.xlu2 %3935  ;;  %v3406_v33 = vsel %vm912_vm1, %v14130_v57, %v3405_v41 }
 0x863   : > { %v3956_v49 = vsub.f32 %v3784_v36, %v3936_v4  ;;  %v14124_v4 = vunpack.i.l.bf16 %v15787_v1 }
 0x864   : > { %v3963_v54 = vmul.f32 1.442695, %v3955_v56 }
 0x865   : > { %v3965_v15 = vmul.f32 1.442695, %v3956_v49 }
 0x866   : > { %14327 = vpow2.f32 %v3963_v54  ;;  %v3292_v54 = vsel %vm912_vm1, %v3291_v23, %v14114_v50 }
 0x867   : > { %v3298_v1 = vperm.slane %v3292_v54, %v14770_v35 }
 0x869   : > { %v3942_v16 = vpop.xlane.xlu0 %3941 }
 0x86a   : > { %v3958_v34 = vsub.f32 %v3832_v40, %v3942_v16  ;;  %v3939_v6 = vpop.xlane.xlu2 %3938 }
 0x86b   : > { %v3957_v0 = vsub.f32 %v3808_v10, %v3939_v6 }
 0x86c   : > { %v15795_v12 = vpop.eup %14327  ;;  %v3969_v11 = vmul.f32 1.442695, %v3958_v34 }
 0x86d   : > { %v3967_v60 = vmul.f32 1.442695, %v3957_v0  ;;  %v3979_v21 = vsel %vm2330_vm6, %v15795_v12, 0.0  ;;  %v14135_v0 = vunpack.i.h.bf16 %v15789_v44 }
 0x86e   : > { %14329 = vpow2.f32 %v3969_v11  ;;  %3980 = vadd.xlane.f32.xlu1 %v3979_v21  ;;  %v3414_v11 = vperm.slane %v3406_v33, %v14770_v35 }
 0x86f   : > { %14331 = vpow2.f32 %v3967_v60 }
 0x870   : > { %14333 = vpow2.f32 %v3965_v15  ;;  %v14134_v15 = vunpack.i.l.bf16 %v15789_v44 }
 0x872   : > { %v3948_v45 = vpop.xlane.xlu0 %3947  ;;  %v3945_v3 = vpop.xlane.xlu2 %3944 }
 0x873   : > { %v3959_v29 = vsub.f32 %v3856_v13, %v3945_v3  ;;  %v3960_v8 = vsub.f32 %v15772_v58, %v3948_v45  ;;  %v3403_v58 = vrot.slane %v14130_v57, 4  ;;  %v3341_v57 = vrot.slane %v3298_v1, 4 }
 0x874   : > { %v15799_v37 = vpop.eup %14329 }
 0x875   : > { %v15801_v14 = vpop.eup %14331  ;;  %v3971_v42 = vmul.f32 1.442695, %v3959_v29  ;;  %v3988_v27 = vsel %vm2330_vm6, %v15799_v37, 0.0  ;;  %v3973_v13 = vmul.f32 1.442695, %v3960_v8  ;;  %v3404_v26 = vsel %vm912_vm1, %v3403_v58, %v14115_v62 }
 0x876   : > { %v3985_v20 = vsel %vm2330_vm6, %v15801_v14, 0.0  ;;  %3989 = vadd.xlane.f32.xlu0 %v3988_v27  ;;  %v15807_v36 = vpop.eup %14333  ;;  %v3410_v6 = vperm.slane %v3404_v26, %v14770_v35  ;;  %v3417_v29 = vrot.slane %v14125_v52, 4  ;;  %v3281_v62 = vrot.slane %v14134_v15, 4 }
 0x877   : > { %3986 = vadd.xlane.f32.xlu2 %v3985_v20  ;;  %14335 = vpow2.f32 %v3971_v42  ;;  %v3982_v40 = vsel %vm2330_vm6, %v15807_v36, 0.0  ;;  %v3305_v42 = vrot.slane %v14124_v4, 4 }
 0x878   : > { %v3453_v20 = vrot.slane %v3410_v6, 4 }
 0x879   : > { %v3954_v59 = vpop.xlane.xlu1 %3953 }
 0x87a   : > { %v3951_v53 = vpop.xlane.xlu0 %3950  ;;  %v3962_v31 = vsub.f32 %v3928_v38, %v3954_v59  ;;  %v14138_v46 = vpop.permute.xlu2 %14137  ;;  %v3294_v38 = vsel %vm912_vm1, %v14129_v28, %v3293_v32  ;;  %v3393_v59 = vrot.slane %v14135_v0, 4 }
 0x87b   : > { %v3961_v24 = vsub.f32 %v3904_v25, %v3951_v53  ;;  %v14140_v7 = vunpack.i.h.bf16 %v14138_v46  ;;  %v14139_v18 = vunpack.i.l.bf16 %v14138_v46  ;;  %v3302_v16 = vperm.slane %v3294_v38, %v14770_v35 }
 0x87c   : > { %v3977_v39 = vmul.f32 1.442695, %v3962_v31 }
 0x87d   : > { %v3975_v10 = vmul.f32 1.442695, %v3961_v24  ;;  %v15811_v47 = vpop.eup %14335  ;;  %v3379_v2 = vrot.slane %v14140_v7, 4  ;;  %v3267_v56 = vrot.slane %v14139_v18, 4  ;;  %v3382_v34 = vsel %vm912_vm1, %v14140_v7, %v3381_v5 }
 0x87e   : > { %14337 = vpow2.f32 %v3977_v39  ;;  %v3991_v22 = vsel %vm2330_vm6, %v15811_v47, 0.0  ;;  %v3270_v60 = vsel %vm912_vm1, %v14139_v18, %v3269_v19  ;;  %v15848_v45 = vperm.slane %v3382_v34, %v14770_v35 }
 0x87f   : > { %14339 = vpow2.f32 %v3975_v10  ;;  %3983 = vadd.xlane.f32.xlu2 %v3982_v40  ;;  %3992 = vadd.xlane.f32.xlu1 %v3991_v22  ;;  %v3380_v49 = vsel %vm912_vm1, %v3379_v2, %v14120_v61  ;;  %v3268_v3 = vsel %vm912_vm1, %v3267_v56, %v14119_v43  ;;  %v3353_v27 = vrot.slane %v3302_v16, 4 }
 0x880   : > { %14341 = vpow2.f32 %v3973_v13  ;;  %v15854_v53 = vperm.slane %v3380_v49, %v14770_v35  ;;  %v15857_v31 = vperm.slane %v3270_v60, %v14770_v35  ;;  %v15860_v39 = vperm.slane %v3268_v3, %v14770_v35 }
 0x881   : > { %v3465_v40 = vrot.slane %v3414_v11, 4  ;;  %v3441_v46 = vrot.slane %v15848_v45, 4 }
 0x882   : > { %v3429_v61 = vrot.slane %v15854_v53, 4  ;;  %v3329_v58 = vrot.slane %v15857_v31, 4  ;;  %v3317_v18 = vrot.slane %v15860_v39, 4 }
 0x884   : > { %v15822_v25 = vpop.eup %14337 }
 0x885   : > { %v15824_v51 = vpop.eup %14339  ;;  %v4000_v55 = vsel %vm2330_vm6, %v15822_v25, 0.0 }
 0x886   : > { %v3997_v30 = vsel %vm2330_vm6, %v15824_v51, 0.0  ;;  %v15843_v21 = vpop.eup %14341 }
 0x887   : > { %4001 = vadd.xlane.f32.xlu2 %v4000_v55  ;;  %3998 = vadd.xlane.f32.xlu0 %v3997_v30  ;;  %v3994_v10 = vsel %vm2330_vm6, %v15843_v21, 0.0 }
 0x88d   : > { %v14143_v24 = vpop.permute.xlu0 %14142 }
 0x88e   : > { %v14145_v50 = vunpack.i.h.bf16 %v14143_v24  ;;  %v14144_v8 = vunpack.i.l.bf16 %v14143_v24 }
 0x88f   : > { %3995 = vadd.xlane.f32.xlu0 %v3994_v10 }
 0x890   : > { %v3415_v28 = vrot.slane %v14145_v50, 4  ;;  %v3418_v22 = vsel %vm912_vm1, %v14145_v50, %v3417_v29  ;;  %v3303_v32 = vrot.slane %v14144_v8, 4  ;;  %v3306_v13 = vsel %vm912_vm1, %v14144_v8, %v3305_v42 }
 0x891   : > { %v3426_v7 = vperm.slane %v3418_v22, %v14770_v35  ;;  %v3314_v43 = vperm.slane %v3306_v13, %v14770_v35  ;;  %v14148_v41 = vpop.permute.xlu1 %14147 }
 0x892   : > { %v3416_v23 = vsel %vm912_vm1, %v3415_v28, %v14125_v52  ;;  %v3304_v38 = vsel %vm912_vm1, %v3303_v32, %v14124_v4  ;;  %v14150_v55 = vunpack.i.h.bf16 %v14148_v41  ;;  %v14149_v42 = vunpack.i.l.bf16 %v14148_v41 }
 0x893   : > { %v3422_v5 = vperm.slane %v3416_v23, %v14770_v35  ;;  %v3463_v26 = vrot.slane %v3426_v7, 4  ;;  %v3466_v2 = vsel %vm912_vm1, %v3426_v7, %v3465_v40  ;;  %v3310_v30 = vperm.slane %v3304_v38, %v14770_v35 }
 0x894   : > { %v15880_v19 = vperm.slane %v3466_v2, %v14796_v9  ;;  %v3351_v33 = vrot.slane %v3314_v43, 4  ;;  %v3354_v56 = vsel %vm912_vm1, %v3314_v43, %v3353_v27  ;;  %v3391_v54 = vrot.slane %v14150_v55, 4 }
 0x895   : > { %v3451_v34 = vrot.slane %v3422_v5, 4  ;;  %v3454_v52 = vsel %vm912_vm1, %v3422_v5, %v3453_v20  ;;  %v3464_v4 = vsel %vm912_vm1, %v3463_v26, %v3414_v11  ;;  %v3339_v49 = vrot.slane %v3310_v30, 4 }
 0x896   : > { %v15886_v60 = vperm.slane %v3454_v52, %v14796_v9  ;;  %v15889_v3 = vperm.slane %v3464_v4, %v14796_v9  ;;  %v3342_v29 = vsel %vm912_vm1, %v3310_v30, %v3341_v57  ;;  %v3352_v20 = vsel %vm912_vm1, %v3351_v33, %v3302_v16 }
 0x897   : > { %v3452_v24 = vsel %vm912_vm1, %v3451_v34, %v3410_v6  ;;  %v3340_v27 = vsel %vm912_vm1, %v3339_v49, %v3298_v1  ;;  %v3350_v50 = vperm.slane %v3342_v29, %v14796_v9  ;;  %v3487_v10 = vrot.slane %v15880_v19, 4 }
 0x898   : > { %v3458_v11 = vperm.slane %v3452_v24, %v14796_v9  ;;  %v3479_v8 = vrot.slane %v15886_v60, 4  ;;  %v3346_v40 = vperm.slane %v3340_v27, %v14796_v9  ;;  %v3483_v28 = vrot.slane %v15889_v3, 4 }
 0x899   : > { %v3358_v57 = vperm.slane %v3352_v20, %v14796_v9  ;;  %v3362_v6 = vperm.slane %v3354_v56, %v14796_v9  ;;  %v3392_v1 = vsel %vm912_vm1, %v3391_v54, %v14135_v0  ;;  %v3367_v16 = vrot.slane %v3350_v50, 4 }
 0x89a   : > { %v3475_v22 = vrot.slane %v3458_v11, 4  ;;  %v3394_v32 = vsel %vm912_vm1, %v14150_v55, %v3393_v59  ;;  %v3398_v13 = vperm.slane %v3392_v1, %v14770_v35  ;;  %v3363_v7 = vrot.slane %v3346_v40, 4 }
 0x89b   : > { %v3371_v43 = vrot.slane %v3358_v57, 4  ;;  %v3402_v41 = vperm.slane %v3394_v32, %v14770_v35  ;;  %v3279_v23 = vrot.slane %v14149_v42, 4  ;;  %v3375_v38 = vrot.slane %v3362_v6, 4 }
 0x89c   : > { %v3427_v5 = vrot.slane %v3398_v13, 4  ;;  %v3430_v26 = vsel %vm912_vm1, %v3398_v13, %v3429_v61  ;;  %v3282_v2 = vsel %vm912_vm1, %v14149_v42, %v3281_v62 }
 0x89d   : > { %v3438_v30 = vperm.slane %v3430_v26, %v14796_v9  ;;  %v3439_v0 = vrot.slane %v3402_v41, 4  ;;  %v3442_v33 = vsel %vm912_vm1, %v3402_v41, %v3441_v46  ;;  %v3280_v59 = vsel %vm912_vm1, %v3279_v23, %v14134_v15 }
 0x89e   : > { %v3428_v55 = vsel %vm912_vm1, %v3427_v5, %v15854_v53  ;;  %v3450_v56 = vperm.slane %v3442_v33, %v14796_v9  ;;  %v3286_v54 = vperm.slane %v3280_v59, %v14770_v35  ;;  %v3290_v61 = vperm.slane %v3282_v2, %v14770_v35 }
 0x89f   : > { %v3434_v62 = vperm.slane %v3428_v55, %v14796_v9  ;;  %v3440_v34 = vsel %vm912_vm1, %v3439_v0, %v15848_v45  ;;  %v3481_v52 = vrot.slane %v3438_v30, 4  ;;  %v15925_v46 = vsel %vm912_vm1, %v3479_v8, %v3438_v30 }
 0x8a0   : > { %v3446_v44 = vperm.slane %v3440_v34, %v14796_v9  ;;  %v3489_v15 = vrot.slane %v3450_v56, 4  ;;  %v3315_v4 = vrot.slane %v3286_v54, 4  ;;  %v3318_v53 = vsel %vm912_vm1, %v3286_v54, %v3317_v18 }
 0x8a1   : > { %v3477_v49 = vrot.slane %v3434_v62, 4  ;;  %v3326_v29 = vperm.slane %v3318_v53, %v14796_v9  ;;  %v3327_v42 = vrot.slane %v3290_v61, 4  ;;  %v3330_v24 = vsel %vm912_vm1, %v3290_v61, %v3329_v58 }
 0x8a2   : > { %v3485_v27 = vrot.slane %v3446_v44, 4  ;;  %v3316_v45 = vsel %vm912_vm1, %v3315_v4, %v15860_v39  ;;  %v3338_v20 = vperm.slane %v3330_v24, %v14796_v9  ;;  %v3476_v8 = vsel %vm912_vm1, %v3475_v22, %v3434_v62 }
 0x8a3   : > { %v3322_v1 = vperm.slane %v3316_v45, %v14796_v9  ;;  %v3328_v18 = vsel %vm912_vm1, %v3327_v42, %v15857_v31  ;;  %v3368_v32 = vsel %vm912_vm1, %v3367_v16, %v3326_v29  ;;  %v3369_v13 = vrot.slane %v3326_v29, 4 }
 0x8a4   : > { %v3334_v41 = vperm.slane %v3328_v18, %v14796_v9  ;;  %v3376_v58 = vsel %vm912_vm1, %v3375_v38, %v3338_v20  ;;  %v3377_v23 = vrot.slane %v3338_v20, 4  ;;  %v15944_v5 = vsel %vm912_vm1, %v3458_v11, %v3477_v49 }
 0x8a5   : > { %v3364_v39 = vsel %vm912_vm1, %v3363_v7, %v3322_v1  ;;  %v3365_v26 = vrot.slane %v3322_v1, 4  ;;  %v15948_v22 = vsel %vm912_vm1, %v3350_v50, %v3369_v13  ;;  %v15952_v31 = vsel %vm912_vm1, %v15886_v60, %v3481_v52 }
 0x8a6   : > { %v3372_v16 = vsel %vm912_vm1, %v3371_v43, %v3334_v41  ;;  %v3373_v2 = vrot.slane %v3334_v41, 4  ;;  %v3378_v30 = vsel %vm912_vm1, %v3362_v6, %v3377_v23  ;;  %v3484_v38 = vsel %vm912_vm1, %v3483_v28, %v3446_v44 }
 0x8a7   : > { %v15958_v11 = vsel %vm912_vm1, %v3346_v40, %v3365_v26  ;;  %v3486_v7 = vsel %vm912_vm1, %v15889_v3, %v3485_v27  ;;  %v3488_v50 = vsel %vm912_vm1, %v3487_v10, %v3450_v56  ;;  %v3490_v0 = vsel %vm912_vm1, %v15880_v19, %v3489_v15 }
 0x8a8   : > { %v3374_v60 = vsel %vm912_vm1, %v3358_v57, %v3373_v2  ;;  %v3491_v33 = vrot.slane %v3368_v32, 4  ;;  %v3493_v43 = vrot.slane %v3364_v39, 4  ;;  %v3503_v59 = vrot.slane %v15948_v22, 4 }
 0x8a9   : > { %v3505_v6 = vrot.slane %v15958_v11, 4  ;;  %v3515_v28 = vrot.slane %v3376_v58, 4  ;;  %v3517_v55 = vrot.slane %v3372_v16, 4  ;;  %v3527_v40 = vrot.slane %v3378_v30, 4 }
 0x8aa   : > { %v15969_v54 = vsel %vm912_vm1, %v3368_v32, %v3493_v43  ;;  %v3529_v3 = vrot.slane %v3374_v60, 4  ;;  %v3603_v10 = vrot.slane %v15925_v46, 4  ;;  %v3605_v56 = vrot.slane %v3476_v8, 4 }
 0x8ab   : > { %v3516_v19 = vsel %vm912_vm1, %v3515_v28, %v3372_v16  ;;  %v3518_v57 = vsel %vm912_vm1, %v3376_v58, %v3517_v55  ;;  %v3615_v61 = vrot.slane %v15952_v31, 4  ;;  %v3617_v62 = vrot.slane %v15944_v5, 4 }
 0x8ac   : > { %v3522_v34 = vperm.slane %v3516_v19, %v14770_v35  ;;  %v15978_v52 = vperm.slane %v3518_v57, %v14770_v35  ;;  %v15981_v44 = vsel %vm912_vm1, %v3378_v30, %v3529_v3  ;;  %v15985_v15 = vsel %vm912_vm1, %v15925_v46, %v3605_v56 }
 0x8ad   : > { %v3627_v4 = vrot.slane %v3488_v50, 4  ;;  %v3629_v53 = vrot.slane %v3484_v38, 4  ;;  %v3639_v49 = vrot.slane %v3490_v0, 4  ;;  %v3641_v29 = vrot.slane %v3486_v7, 4 }
 0x8ae   : > { %v3492_v42 = vsel %vm912_vm1, %v3491_v33, %v3364_v39  ;;  %v3504_v24 = vsel %vm912_vm1, %v3503_v59, %v15958_v11  ;;  %v3528_v27 = vsel %vm912_vm1, %v3527_v40, %v3374_v60  ;;  %v3565_v45 = vrot.slane %v3522_v34, 4 }
 0x8af   : > { %v3628_v20 = vsel %vm912_vm1, %v3627_v4, %v3484_v38  ;;  %v3630_v1 = vsel %vm912_vm1, %v3488_v50, %v3629_v53  ;;  %v15994_v18 = vsel %vm912_vm1, %v3490_v0, %v3641_v29  ;;  %v3498_v46 = vperm.slane %v3492_v42, %v14770_v35 }
 0x8b0   : > { %v3634_v32 = vperm.slane %v3628_v20, %v14770_v35  ;;  %v15999_v13 = vperm.slane %v3630_v1, %v14770_v35  ;;  %v3510_v41 = vperm.slane %v3504_v24, %v14770_v35  ;;  %v3534_v58 = vperm.slane %v3528_v27, %v14770_v35 }
 0x8b1   : > { %v3541_v23 = vrot.slane %v3498_v46, 4  ;;  %v3604_v39 = vsel %vm912_vm1, %v3603_v10, %v3476_v8  ;;  %v3616_v26 = vsel %vm912_vm1, %v3615_v61, %v15944_v5  ;;  %v3640_v16 = vsel %vm912_vm1, %v3639_v49, %v3486_v7 }
 0x8b2   : > { %v3566_v2 = vsel %vm912_vm1, %v3534_v58, %v3565_v45  ;;  %v3610_v30 = vperm.slane %v3604_v39, %v14770_v35  ;;  %v3622_v38 = vperm.slane %v3616_v26, %v14770_v35  ;;  %v3646_v50 = vperm.slane %v3640_v16, %v14770_v35 }
 0x8b3   : > { %v3542_v0 = vsel %vm912_vm1, %v3510_v41, %v3541_v23  ;;  %v3574_v60 = vperm.slane %v3566_v2, %v14796_v9  ;;  %v3677_v33 = vrot.slane %v3634_v32, 4  ;;  %v3539_v43 = vrot.slane %v3510_v41, 4 }
 0x8b4   : > { %v3550_v8 = vperm.slane %v3542_v0, %v14796_v9  ;;  %v3653_v59 = vrot.slane %v3610_v30, 4  ;;  %v3563_v28 = vrot.slane %v3534_v58, 4  ;;  %v3651_v55 = vrot.slane %v3622_v38, 4 }
 0x8b5   : > { %v3591_v7 = vrot.slane %v3574_v60, 4  ;;  %v3678_v40 = vsel %vm912_vm1, %v3646_v50, %v3677_v33  ;;  %v3540_v3 = vsel %vm912_vm1, %v3539_v43, %v3498_v46  ;;  %v3675_v10 = vrot.slane %v3646_v50, 4 }
 0x8b6   : > { %v3654_v56 = vsel %vm912_vm1, %v3622_v38, %v3653_v59  ;;  %v3686_v19 = vperm.slane %v3678_v40, %v14796_v9  ;;  %v16019_v57 = vperm.slane %v3540_v3, %v14796_v9  ;;  %v3564_v61 = vsel %vm912_vm1, %v3563_v28, %v3522_v34 }
 0x8b7   : > { %v3592_v4 = vsel %vm912_vm1, %v3591_v7, %v3550_v8  ;;  %v3662_v53 = vperm.slane %v3654_v56, %v14796_v9  ;;  %v3570_v49 = vperm.slane %v3564_v61, %v14796_v9  ;;  %v3652_v29 = vsel %vm912_vm1, %v3651_v55, %v3610_v30 }
 0x8b8   : > { %v3703_v42 = vrot.slane %v3686_v19, 4  ;;  %v4031_v24 = vpack.c.bf16 %v3592_v4, %v3592_v4  ;;  %v3658_v27 = vperm.slane %v3652_v29, %v14796_v9  ;;  %v3676_v45 = vsel %vm912_vm1, %v3675_v10, %v3634_v32 }
 0x8b9   : > { %v3587_v20 = vrot.slane %v3570_v49, 4  ;;  %v3682_v1 = vperm.slane %v3676_v45, %v14796_v9  ;;  %v3593_v46 = vrot.slane %v3550_v8, 4  ;;  %v3705_v41 = vrot.slane %v3662_v53, 4 }
 0x8ba   : > { %v3704_v34 = vsel %vm912_vm1, %v3703_v42, %v3662_v53  ;;  %v4089_v58 = vunpack.c.l.b16 %v4031_v24  ;;  %v3502_v23 = vperm.slane %v15969_v54, %v14770_v35  ;;  %v3506_v39 = vsel %vm912_vm1, %v15948_v22, %v3505_v6 }
 0x8bb   : > { %v4032_v26 = vpack.c.bf16 %v3704_v34, %v3704_v34  ;;  %v3588_v32 = vsel %vm912_vm1, %v3587_v20, %v16019_v57  ;;  %v3699_v16 = vrot.slane %v3682_v1, 4  ;;  %v3594_v2 = vsel %vm912_vm1, %v3574_v60, %v3593_v46 }
 0x8bc   : > { %v4027_v30 = vpack.c.bf16 %v3588_v32, %v3588_v32  ;;  %v3706_v38 = vsel %vm912_vm1, %v3686_v19, %v3705_v41  ;;  %v4033_v50 = vpack.c.bf16 %v3594_v2, %v3594_v2  ;;  %v3514_v0 = vperm.slane %v3506_v39, %v14770_v35 }
 0x8bd   : > { %v4090_v33 = vunpack.c.l.b16 %v4032_v26  ;;  %v3700_v54 = vsel %vm912_vm1, %v3699_v16, %v3658_v27  ;;  %v4034_v11 = vpack.c.bf16 %v3706_v38, %v3706_v38  ;;  %v3538_v22 = vperm.slane %v15981_v44, %v14770_v35 }
 0x8be   : > { %v4028_v6 = vpack.c.bf16 %v3700_v54, %v3700_v54  ;;  %v4045_v43 = vunpack.c.l.b16 %v4027_v30  ;;  %v4111_v8 = vunpack.c.l.b16 %v4033_v50  ;;  %v3553_v59 = vrot.slane %v3502_v23, 4 }
 0x8bf   : > { %v4091_v28 = vpack.c.b16 %v4090_v33, %v4089_v58  ;;  %v4112_v55 = vunpack.c.l.b16 %v4034_v11  ;;  %v3577_v60 = vrot.slane %v15978_v52, 4  ;;  %v3614_v7 = vperm.slane %v15985_v15, %v14770_v35 }
 0x8c0   : > { %v4046_v40 = vunpack.c.l.b16 %v4028_v6  ;;  %v3554_v3 = vsel %vm912_vm1, %v3514_v0, %v3553_v59  ;;  %v3618_v10 = vsel %vm912_vm1, %v15952_v31, %v3617_v62  ;;  %v3650_v44 = vperm.slane %v15994_v18, %v14770_v35 }
 0x8c1   : > { %4103 = vmatpush.bf16.msrb.mxu2 %v4091_v28  ;;  %v4113_v56 = vpack.c.b16 %v4112_v55, %v4111_v8  ;;  %v3562_v19 = vperm.slane %v3554_v3, %v14796_v9  ;;  %v3578_v61 = vsel %vm912_vm1, %v3538_v22, %v3577_v60  ;;  %v3626_v4 = vperm.slane %v3618_v10, %v14770_v35 }
 0x8c2   : > { %v4047_v15 = vpack.c.b16 %v4046_v40, %v4045_v43  ;;  %v3586_v53 = vperm.slane %v3578_v61, %v14796_v9  ;;  %v3665_v29 = vrot.slane %v3614_v7, 4  ;;  %v3689_v5 = vrot.slane %v15999_v13, 4 }
 0x8c3   : > { %4125 = vmatpush.bf16.msrb.mxu3 %v4113_v56  ;;  %v3589_v31 = vrot.slane %v16019_v57, 4  ;;  %v3701_v62 = vrot.slane %v3658_v27, 4  ;;  %v3551_v42 = vrot.slane %v3514_v0, 4  ;;  %v3575_v18 = vrot.slane %v3538_v22, 4 }
 0x8c4   : > { %4059 = vmatpush.bf16.msrb.mxu0 %v4047_v15  ;;  %v3599_v24 = vrot.slane %v3586_v53, 4  ;;  %v3666_v45 = vsel %vm912_vm1, %v3626_v4, %v3665_v29  ;;  %v3690_v20 = vsel %vm912_vm1, %v3650_v44, %v3689_v5  ;;  %v3663_v46 = vrot.slane %v3626_v4, 4 }
 0x8c5   : > { %v3674_v41 = vperm.slane %v3666_v45, %v14796_v9  ;;  %v3698_v34 = vperm.slane %v3690_v20, %v14796_v9  ;;  %v3590_v58 = vsel %vm912_vm1, %v3570_v49, %v3589_v31  ;;  %v3702_v39 = vsel %vm912_vm1, %v3682_v1, %v3701_v62 }
 0x8c6   : > { %v3600_v57 = vsel %vm912_vm1, %v3599_v24, %v3562_v19  ;;  %v4029_v27 = vpack.c.bf16 %v3590_v58, %v3590_v58  ;;  %v4030_v26 = vpack.c.bf16 %v3702_v39, %v3702_v39  ;;  %v3552_v32 = vsel %vm912_vm1, %v3551_v42, %v3502_v23 }
 0x8c7   : > { %v3711_v16 = vrot.slane %v3698_v34, 4  ;;  %v4039_v2 = vpack.c.bf16 %v3600_v57, %v3600_v57  ;;  %v3558_v30 = vperm.slane %v3552_v32, %v14796_v9  ;;  %v3576_v38 = vsel %vm912_vm1, %v3575_v18, %v15978_v52 }
 0x8c8   : > { %v4067_v50 = vunpack.c.l.b16 %v4029_v27  ;;  %v4068_v0 = vunpack.c.l.b16 %v4030_v26  ;;  %v3582_v33 = vperm.slane %v3576_v38, %v14796_v9  ;;  %v3664_v49 = vsel %vm912_vm1, %v3663_v46, %v3614_v7 }
 0x8c9   : > { %v3712_v1 = vsel %vm912_vm1, %v3711_v16, %v3674_v41  ;;  %v4177_v54 = vunpack.c.l.b16 %v4039_v2  ;;  %v3670_v11 = vperm.slane %v3664_v49, %v14796_v9  ;;  %v3687_v22 = vrot.slane %v3650_v44, 4 }
 0x8ca   : > { %v4040_v23 = vpack.c.bf16 %v3712_v1, %v3712_v1  ;;  %v4069_v6 = vpack.c.b16 %v4068_v0, %v4067_v50  ;;  %v3595_v43 = vrot.slane %v3582_v33, 4  ;;  %v3601_v8 = vrot.slane %v3562_v19, 4 }
 0x8cb   : > { %v3688_v59 = vsel %vm912_vm1, %v3687_v22, %v15999_v13  ;;  %v3713_v52 = vrot.slane %v3674_v41, 4  ;;  %v3597_v28 = vrot.slane %v3558_v30, 4  ;;  %v3709_v55 = vrot.slane %v3670_v11, 4 }
 0x8cc   : > { %v4178_v60 = vunpack.c.l.b16 %v4040_v23  ;;  %4081 = vmatpush.bf16.msrb.mxu1 %v4069_v6  ;;  %v3596_v7 = vsel %vm912_vm1, %v3595_v43, %v3558_v30  ;;  %v3694_v40 = vperm.slane %v3688_v59, %v14796_v9  ;;  %v3602_v3 = vsel %vm912_vm1, %v3586_v53, %v3601_v8 }
 0x8cd   : > { %v4035_v10 = vpack.c.bf16 %v3596_v7, %v3596_v7  ;;  %v3714_v44 = vsel %vm912_vm1, %v3698_v34, %v3713_v52  ;;  %v4041_v56 = vpack.c.bf16 %v3602_v3, %v3602_v3  ;;  %v3598_v19 = vsel %vm912_vm1, %v3582_v33, %v3597_v28 }
 0x8ce   : > { %v4179_v61 = vpack.c.b16 %v4178_v60, %v4177_v54  ;;  %v3707_v4 = vrot.slane %v3694_v40, 4  ;;  %v4042_v13 = vpack.c.bf16 %v3714_v44, %v3714_v44  ;;  %v3710_v15 = vsel %vm912_vm1, %v3694_v40, %v3709_v55 }
 0x8cf   : > { %v4199_v29 = vunpack.c.l.b16 %v4041_v56  ;;  %v4037_v5 = vpack.c.bf16 %v3598_v19, %v3598_v19  ;;  %v4038_v31 = vpack.c.bf16 %v3710_v15, %v3710_v15  ;;  %v4133_v53 = vunpack.c.l.b16 %v4035_v10 }
 0x8d0   : > { %4191 = vmatpush.bf16.msra.mxu2 %v4179_v61  ;;  %v3708_v62 = vsel %vm912_vm1, %v3707_v4, %v3670_v11  ;;  %v4200_v42 = vunpack.c.l.b16 %v4042_v13 }
 0x8d1   : > { %v4036_v18 = vpack.c.bf16 %v3708_v62, %v3708_v62  ;;  %v4155_v24 = vunpack.c.l.b16 %v4037_v5  ;;  %v4156_v45 = vunpack.c.l.b16 %v4038_v31 }
 0x8d2   : > { %v4201_v20 = vpack.c.b16 %v4200_v42, %v4199_v29 }
 0x8d3   : > { %v4134_v46 = vunpack.c.l.b16 %v4036_v18  ;;  %v4157_v41 = vpack.c.b16 %v4156_v45, %v4155_v24 }
 0x8d4   : > { %4213 = vmatpush.bf16.msra.mxu3 %v4201_v20 }
 0x8d5   : > { %v4135_v34 = vpack.c.b16 %v4134_v46, %v4133_v53  ;;  %4169 = vmatpush.bf16.msra.mxu1 %v4157_v41 }
 0x8d7   : > { %4147 = vmatpush.bf16.msra.mxu0 %v4135_v34 }
 0x8e1   : > { %v3981_v58 = vpop.xlane.xlu1 %3980 }
 0x8e2   : > { %14343 = vrcp.f32 %v3981_v58 }
 0x8e8   : > { %v14344_v39 = vpop.eup %14343 }
 0x8e9   : > { %v4011_v57 = vmul.f32 %v14344_v39, %v15795_v12  ;;  %v3990_v27 = vpop.xlane.xlu0 %3989 }
 0x8ea   : > { %v3987_v26 = vpop.xlane.xlu2 %3986  ;;  %14345 = vrcp.f32 %v3990_v27 }
 0x8eb   : > { %v4019_v32 = vpack.c.bf16 %v4011_v57, %v4011_v57  ;;  %14347 = vrcp.f32 %v3987_v26 }
 0x8ed   : > { %11905 = vmatmul.msk.bf16.vlgmr.msrb.gmra.mxu0 %vm2330_vm6, %v4019_v32 }
 0x8f0   : > { %v14346_v16 = vpop.eup %14345 }
 0x8f1   : > { %v14348_v2 = vpop.eup %14347  ;;  %v4014_v30 = vmul.f32 %v14346_v16, %v15799_v37 }
 0x8f2   : > { %v4013_v38 = vmul.f32 %v14348_v2, %v15801_v14  ;;  %v3984_v50 = vpop.xlane.xlu2 %3983  ;;  %v3993_v49 = vpop.xlane.xlu1 %3992 }
 0x8f3   : > { %v4022_v0 = vpack.c.bf16 %v4014_v30, %v4014_v30  ;;  %14349 = vrcp.f32 %v3984_v50 }
 0x8f4   : > { %v4021_v33 = vpack.c.bf16 %v4013_v38, %v4013_v38  ;;  %14351 = vrcp.f32 %v3993_v49 }
 0x8f5   : > { %11908 = vmatmul.msk.bf16.vlgmr.msrb.gmra.mxu3 %vm2330_vm6, %v4022_v0 }
 0x8f6   : > { %11907 = vmatmul.msk.bf16.vlgmr.msrb.gmra.mxu2 %vm2330_vm6, %v4021_v33 }
 0x8f9   : > { %v14350_v12 = vpop.eup %14349 }
 0x8fa   : > { %v4012_v1 = vmul.f32 %v14350_v12, %v15807_v36  ;;  %v4002_v54 = vpop.xlane.xlu2 %4001  ;;  %v3999_v11 = vpop.xlane.xlu0 %3998 }
 0x8fb   : > { %v14352_v22 = vpop.eup %14351  ;;  %14353 = vrcp.f32 %v4002_v54 }
 0x8fc   : > { %v4020_v37 = vpack.c.bf16 %v4012_v1, %v4012_v1  ;;  %v4015_v14 = vmul.f32 %v14352_v22, %v15811_v47  ;;  %14355 = vrcp.f32 %v3999_v11 }
 0x8fe   : > { %v4023_v23 = vpack.c.bf16 %v4015_v14, %v4015_v14  ;;  %11906 = vmatmul.msk.bf16.vlgmr.msrb.gmra.mxu1 %vm2330_vm6, %v4020_v37 }
 0x900   : > { %11909 = vmatmul.msk.bf16.vlgmr.msra.gmra.mxu0 %vm2330_vm6, %v4023_v23 }
 0x901   : > { %v14354_v6 = vpop.eup %14353 }
 0x902   : > { %v14356_v43 = vpop.eup %14355  ;;  %v4018_v8 = vmul.f32 %v14354_v6, %v15822_v25  ;;  %v3996_v59 = vpop.xlane.xlu0 %3995 }
 0x903   : > { %v4017_v36 = vmul.f32 %v14356_v43, %v15824_v51  ;;  %14357 = vrcp.f32 %v3996_v59 }
 0x904   : > { %v4026_v52 = vpack.c.bf16 %v4018_v8, %v4018_v8 }
 0x905   : > { %v4025_v28 = vpack.c.bf16 %v4017_v36, %v4017_v36 }
 0x906   : > { %11912 = vmatmul.msk.bf16.vlgmr.msra.gmra.mxu3 %vm2330_vm6, %v4026_v52 }
 0x907   : > { %11911 = vmatmul.msk.bf16.vlgmr.msra.gmra.mxu2 %vm2330_vm6, %v4025_v28 }
 0x909   : > { %v14358_v47 = vpop.eup %14357 }
 0x90a   : > { %v4016_v55 = vmul.f32 %v14358_v47, %v15843_v21 }
 0x90c   : > { %v4024_v60 = vpack.c.bf16 %v4016_v55, %v4016_v55 }
 0x90e   : > { %11910 = vmatmul.msk.bf16.vlgmr.msra.gmra.mxu1 %vm2330_vm6, %v4024_v60 }
 0x96a   : > { %v4061_v7 = vpop.f32.mrf.mxu0 }
 0x96b   : > { %v4221_v4 = vrot.slane %v4061_v7, 4 }
 0x972   : > { %v4063_v40 = vpop.f32.mrf.mxu0 }
 0x978   : > { %v4127_v3 = vpop.f32.mrf.mxu3 }
 0x979   : > { %v4105_v25 = vpop.f32.mrf.mxu2  ;;  %v4231_v10 = vrot.slane %v4127_v3, 4 }
 0x97a   : > { %v4219_v51 = vrot.slane %v4105_v25, 4  ;;  %v4222_v5 = vsel %vm912_vm1, %v4105_v25, %v4221_v4 }
 0x97b   : > { %v4083_v44 = vpop.f32.mrf.mxu1  ;;  %v4230_v53 = vperm.slane %v4222_v5, %v14770_v35 }
 0x97c   : > { %v4233_v56 = vrot.slane %v4083_v44, 4  ;;  %v4232_v61 = vsel %vm912_vm1, %v4231_v10, %v4083_v44  ;;  %v4220_v13 = vsel %vm912_vm1, %v4219_v51, %v4061_v7 }
 0x97d   : > { %v4149_v19 = vpop.f32.mrf.mxu0  ;;  %v4238_v31 = vperm.slane %v4232_v61, %v14770_v35  ;;  %v4226_v62 = vperm.slane %v4220_v13, %v14770_v35  ;;  %v4281_v41 = vrot.slane %v4230_v53, 4 }
 0x97e   : > { %v4234_v21 = vsel %vm912_vm1, %v4127_v3, %v4233_v56  ;;  %v4245_v34 = vrot.slane %v4149_v19, 4 }
 0x97f   : > { %v4242_v18 = vperm.slane %v4234_v21, %v14770_v35  ;;  %v4267_v45 = vrot.slane %v4238_v31, 4  ;;  %v4269_v20 = vrot.slane %v4226_v62, 4 }
 0x980   : > { %v4129_v15 = vpop.f32.mrf.mxu3 }
 0x981   : > { %v4107_v29 = vpop.f32.mrf.mxu2  ;;  %v4279_v46 = vrot.slane %v4242_v18, 4  ;;  %v4268_v39 = vsel %vm912_vm1, %v4267_v45, %v4226_v62  ;;  %v4270_v26 = vsel %vm912_vm1, %v4238_v31, %v4269_v20  ;;  %v4282_v32 = vsel %vm912_vm1, %v4242_v18, %v4281_v41 }
 0x982   : > { %v4274_v49 = vperm.slane %v4268_v39, %v14796_v9  ;;  %v4278_v54 = vperm.slane %v4270_v26, %v14796_v9  ;;  %v4290_v11 = vperm.slane %v4282_v32, %v14796_v9 }
 0x983   : > { %v4085_v42 = vpop.f32.mrf.mxu1  ;;  %v4280_v38 = vsel %vm912_vm1, %v4279_v46, %v4230_v53 }
 0x984   : > { %v4286_v14 = vperm.slane %v4280_v38, %v14796_v9  ;;  %v4317_v59 = vrot.slane %v4274_v49, 4  ;;  %v4321_v55 = vrot.slane %v4278_v54, 4  ;;  %v4329_v10 = vrot.slane %v4290_v11, 4 }
 0x985   : > { %v4151_v24 = vpop.f32.mrf.mxu0 }
 0x986   : > { %v4325_v25 = vrot.slane %v4286_v14, 4 }
 0x989   : > { %v4215_v58 = vpop.f32.mrf.mxu3 }
 0x98a   : > { %v4193_v57 = vpop.f32.mrf.mxu2  ;;  %v4255_v27 = vrot.slane %v4215_v58, 4 }
 0x98b   : > { %v4243_v16 = vrot.slane %v4193_v57, 4  ;;  %v4246_v2 = vsel %vm912_vm1, %v4193_v57, %v4245_v34  ;;  %v4171_v30 = vpop.f32.mrf.mxu1 }
 0x98c   : > { %v4254_v50 = vperm.slane %v4246_v2, %v14770_v35  ;;  %v4256_v0 = vsel %vm912_vm1, %v4255_v27, %v4171_v30  ;;  %v4257_v33 = vrot.slane %v4171_v30, 4 }
 0x98d   : > { %v4244_v12 = vsel %vm912_vm1, %v4243_v16, %v4149_v19  ;;  %v4262_v1 = vperm.slane %v4256_v0, %v14770_v35 }
 0x98e   : > { %v4250_v22 = vperm.slane %v4244_v12, %v14770_v35  ;;  %v4258_v37 = vsel %vm912_vm1, %v4215_v58, %v4257_v33  ;;  %v4305_v23 = vrot.slane %v4254_v50, 4 }
 0x98f   : > { %v4266_v6 = vperm.slane %v4258_v37, %v14770_v35  ;;  %v4291_v43 = vrot.slane %v4262_v1, 4 }
 0x990   : > { %v4293_v8 = vrot.slane %v4250_v22, 4 }
 0x991   : > { %v4292_v36 = vsel %vm912_vm1, %v4291_v43, %v4250_v22  ;;  %v4303_v52 = vrot.slane %v4266_v6, 4  ;;  %v4306_v28 = vsel %vm912_vm1, %v4266_v6, %v4305_v23  ;;  %v4217_v47 = vpop.f32.mrf.mxu3 }
 0x992   : > { %v4294_v60 = vsel %vm912_vm1, %v4262_v1, %v4293_v8  ;;  %v4298_v7 = vperm.slane %v4292_v36, %v14796_v9  ;;  %v4314_v40 = vperm.slane %v4306_v28, %v14796_v9  ;;  %v4195_v3 = vpop.f32.mrf.mxu2 }
 0x993   : > { %v4302_v44 = vperm.slane %v4294_v60, %v14796_v9  ;;  %v4304_v51 = vsel %vm912_vm1, %v4303_v52, %v4254_v50  ;;  %v4173_v56 = vpop.f32.mrf.mxu1 }
 0x994   : > { %v4310_v19 = vperm.slane %v4304_v51, %v14796_v9  ;;  %v4315_v61 = vrot.slane %v4298_v7, 4  ;;  %v4318_v4 = vsel %vm912_vm1, %v4298_v7, %v4317_v59  ;;  %v4327_v13 = vrot.slane %v4314_v40, 4 }
 0x995   : > { %v4319_v15 = vrot.slane %v4302_v44, 4  ;;  %v4322_v21 = vsel %vm912_vm1, %v4302_v44, %v4321_v55  ;;  %v4330_v29 = vsel %vm912_vm1, %v4314_v40, %v4329_v10  ;;  %v4345_v5 = vrot.slane %v4318_v4, 4 }
 0x996   : > { %v4316_v31 = vsel %vm912_vm1, %v4315_v61, %v4274_v49  ;;  %v4323_v62 = vrot.slane %v4310_v19, 4  ;;  %v4326_v42 = vsel %vm912_vm1, %v4310_v19, %v4325_v25  ;;  %v4343_v18 = vrot.slane %v4322_v21, 4 }
 0x997   : > { %v4320_v53 = vsel %vm912_vm1, %v4319_v15, %v4278_v54  ;;  %v4369_v24 = vrot.slane %v4326_v42, 4  ;;  %v4328_v45 = vsel %vm912_vm1, %v4327_v13, %v4290_v11  ;;  %v4333_v20 = vrot.slane %v4316_v31, 4 }
 0x998   : > { %v4331_v46 = vrot.slane %v4320_v53, 4  ;;  %v4324_v41 = vsel %vm912_vm1, %v4323_v62, %v4286_v14  ;;  %v4346_v34 = vsel %vm912_vm1, %v4322_v21, %v4345_v5  ;;  %v4355_v58 = vrot.slane %v4328_v45, 4 }
 0x999   : > { %v4334_v39 = vsel %vm912_vm1, %v4320_v53, %v4333_v20  ;;  %v4354_v57 = vperm.slane %v4346_v34, %v14770_v35  ;;  %v4357_v27 = vrot.slane %v4324_v41, 4  ;;  %v4370_v26 = vsel %vm912_vm1, %v4330_v29, %v4369_v24  ;;  %v13645_v34 = vld [vmem:[%s19230_s12 + $0x8] sm:$0xff] }
 0x99a   : > { %v4342_v32 = vperm.slane %v4334_v39, %v14770_v35  ;;  %v4378_v16 = vperm.slane %v4370_v26, %v14770_v35  ;;  %v4332_v2 = vsel %vm912_vm1, %v4331_v46, %v4316_v31  ;;  %v4344_v30 = vsel %vm912_vm1, %v4343_v18, %v4318_v4  ;;  %4501 = vmatpush.bf16.msrb.mxu0 %v13645_v34 }
 0x99b   : > { %v4358_v38 = vsel %vm912_vm1, %v4328_v45, %v4357_v27  ;;  %v4391_v50 = vrot.slane %v4354_v57, 4  ;;  %v4338_v0 = vperm.slane %v4332_v2, %v14770_v35  ;;  %v4356_v12 = vsel %vm912_vm1, %v4355_v58, %v4324_v41  ;;  %v13644_v58 = vld [vmem:[%s19230_s12] sm:$0xff] }
 0x99c   : > { %v4366_v33 = vperm.slane %v4358_v38, %v14770_v35  ;;  %v4415_v49 = vrot.slane %v4378_v16, 4  ;;  %v4367_v1 = vrot.slane %v4330_v29, 4  ;;  %v4350_v54 = vperm.slane %v4344_v30, %v14770_v35 }
 0x99d   : > { %v4362_v11 = vperm.slane %v4356_v12, %v14770_v35  ;;  %v4381_v22 = vrot.slane %v4338_v0, 4  ;;  %v4392_v37 = vsel %vm912_vm1, %v4391_v50, %v4342_v32  ;;  %v4393_v10 = vrot.slane %v4342_v32, 4 }
 0x99e   : > { %v4416_v14 = vsel %vm912_vm1, %v4415_v49, %v4366_v33  ;;  %v4368_v23 = vsel %vm912_vm1, %v4367_v1, %v4326_v42  ;;  %v4417_v6 = vrot.slane %v4366_v33, 4  ;;  %v4398_v28 = vperm.slane %v4392_v37, %v14796_v9  ;;  %4502 = vmatpush.bf16.msrb.mxu0 %v13644_v58  ;;  %v12013_v58 = vld [vmem:[%s19098_s14 + $0x98] sm:$0xf] }
 0x99f   : > { %v4422_v43 = vperm.slane %v4416_v14, %v14796_v9  ;;  %v4374_v8 = vperm.slane %v4368_v23, %v14770_v35  ;;  %v4382_v59 = vsel %vm912_vm1, %v4350_v54, %v4381_v22  ;;  %v4405_v36 = vrot.slane %v4362_v11, 4 }
 0x9a0   : > { %v4390_v52 = vperm.slane %v4382_v59, %v14796_v9  ;;  %v4418_v60 = vsel %vm912_vm1, %v4378_v16, %v4417_v6  ;;  %v4379_v3 = vrot.slane %v4350_v54, 4  ;;  %v4394_v29 = vsel %vm912_vm1, %v4354_v57, %v4393_v10  ;;  %v14272_v54 = vld [vmem:[%s19231_s13] ss:$0 sm:$0xff]  ;;  %v11999_v10 = vld [vmem:[%s19098_s14 + $0xc8] sm:$0xf0]  ;;  %s19246_s13 = sld [smem:[#allocation30_spill]] }
 0x9a1   : > { %v4435_v47 = vrot.slane %v4422_v43, 4  ;;  %v4406_v55 = vsel %vm912_vm1, %v4374_v8, %v4405_v36  ;;  %v4403_v44 = vrot.slane %v4374_v8, 4  ;;  %v4426_v19 = vperm.slane %v4418_v60, %v14796_v9  ;;  %v11997_v60 = vld [vmem:[%s19098_s14 + $0x88] sm:$0xf] }
 0x9a2   : > { %v4414_v7 = vperm.slane %v4406_v55, %v14796_v9  ;;  %v4433_v40 = vrot.slane %v4390_v52, 4  ;;  %v4380_v61 = vsel %vm912_vm1, %v4379_v3, %v4338_v0  ;;  %v4402_v42 = vperm.slane %v4394_v29, %v14796_v9  ;;  %v11991_v55 = vld [vmem:[%s19098_s14 + $0xc0] sm:$0xf0]  ;;  %v11933_v29 = vld [vmem:[%s19098_s14 + $0x8] sm:$0xf] }
 0x9a3   : > { %v4436_v25 = vsel %vm912_vm1, %v4435_v47, %v4398_v28  ;;  %v4386_v4 = vperm.slane %v4380_v61, %v14796_v9  ;;  %v4404_v13 = vsel %vm912_vm1, %v4403_v44, %v4362_v11  ;;  %v4439_v31 = vrot.slane %v4426_v19, 4  ;;  %v11925_v44 = vld [vmem:[%s19098_s14] sm:$0xf]  ;;  %v13646_v61 = vld [vmem:[%s19098_s14 + $0x4] sm:$0xf] }
 0x9a4   : > { %4456 = vrot.lane.b32.xlu2 %v4436_v25, %s19223_s30  ;;  %v4434_v51 = vsel %vm912_vm1, %v4414_v7, %v4433_v40  ;;  %v4431_v56 = vrot.slane %v4414_v7, 4  ;;  %v4410_v21 = vperm.slane %v4404_v13, %v14796_v9  ;;  %v4437_v18 = vrot.slane %v4398_v28, 4  ;;  %v13662_v28 = vld [vmem:[%s19098_s14 + $0x84] sm:$0xf]  ;;  %v13671_v7 = vld [vmem:[%s19098_s14 + $0xc4] sm:$0xf0] }
 0x9a5   : > { %4452 = vrot.lane.b32.xlu0 %v4434_v51, %s19224_s11  ;;  %v4429_v5 = vrot.slane %v4386_v4, 4  ;;  %v4440_v45 = vsel %vm912_vm1, %v4439_v31, %v4402_v42  ;;  %v4441_v46 = vrot.slane %v4402_v42, 4  ;;  %v11994_v40 = vor.u32 %v13662_v28, %v11991_v55  ;;  %v13663_v25 = vld [vmem:[%s19098_s14 + $0x8c] sm:$0xf]  ;;  %v13674_v55 = vld [vmem:[%s19098_s14 + $0xdc] sm:$0xf0] }
 0x9a6   : > { %v4432_v15 = vsel %vm912_vm1, %v4431_v56, %v4390_v52  ;;  %v4427_v62 = vrot.slane %v4410_v21, 4  ;;  %v4438_v20 = vsel %vm912_vm1, %v4422_v43, %v4437_v18  ;;  %v11989_v52 = vld [vmem:[%s19098_s14 + $0x80] sm:$0xf]  ;;  %v11998_v3 = vor.u32 %v13671_v7, %v11997_v60  ;;  %v13647_v31 = vld [vmem:[%s19098_s14 + $0xc] sm:$0xf]  ;;  %s19237_s11 = smov 24  }
 0x9a7   : > { %4448 = vrot.lane.b32.xlu1 %v4432_v15, %s19225_s9  ;;  %v4430_v24 = vsel %vm912_vm1, %v4410_v21, %v4429_v5  ;;  %v4442_v41 = vsel %vm912_vm1, %v4426_v19, %v4441_v46  ;;  %v12002_v56 = vor.u32 %v13663_v25, %v11999_v10  ;;  %v13654_v19 = vld [vmem:[%s19098_s14 + $0x3c] sm:$0xf0]  ;;  %4789 = vmatpush.bf16.msrb.mxu2 %v11994_v40  ;;  %v13655_v5 = vld [vmem:[%s19098_s14 + $0x44] sm:$0xf0]  ;;  %v11935_v42 = vld [vmem:[%s19098_s14 + $0x48] sm:$0xf0] }
 0x9a8   : > { %v4428_v53 = vsel %vm912_vm1, %v4427_v62, %v4386_v4  ;;  %v11927_v4 = vld [vmem:[%s19098_s14 + $0x40] sm:$0xf0]  ;;  %4802 = vmatpush.bf16.msrb.mxu3 %v11998_v3  ;;  %v11926_v15 = vor.u32 %v13654_v19, %v11925_v44  ;;  %v11934_v62 = vor.u32 %v13655_v5, %v11933_v29  ;;  %v12005_v18 = vld [vmem:[%s19098_s14 + $0x90] sm:$0xf]  ;;  %v13664_v46 = vld [vmem:[%s19098_s14 + $0x94] sm:$0xf] }
 0x9a9   : > { %v11930_v21 = vor.u32 %v13646_v61, %v11927_v4  ;;  %4815 = vmatpush.bf16.msra.mxu0 %v12002_v56  ;;  %v13666_v60 = vld [vmem:[%s19098_s14 + $0xa4] sm:$0xf]  ;;  %v13675_v3 = vld [vmem:[%s19098_s14 + $0xe4] sm:$0xf0]  ;;  %v13667_v25 = vld [vmem:[%s19098_s14 + $0xac] sm:$0xf] }
 0x9aa   : > { %v12023_v7 = vld [vmem:[%s19098_s14 + $0xe0] sm:$0xf0]  ;;  %v12031_v10 = vld [vmem:[%s19098_s14 + $0xe8] sm:$0xf0]  ;;  %v11957_v19 = vld [vmem:[%s19098_s14 + $0x20] sm:$0xf] }
 0x9ab   : > { %4790 = vmatpush.bf16.msrb.mxu2 %v11930_v21  ;;  %v12026_v56 = vor.u32 %v13666_v60, %v12023_v7  ;;  %v13658_v61 = vld [vmem:[%s19098_s14 + $0x5c] sm:$0xf0]  ;;  %v11959_v21 = vld [vmem:[%s19098_s14 + $0x60] sm:$0xf0]  ;;  %v11965_v29 = vld [vmem:[%s19098_s14 + $0x28] sm:$0xf] }
 0x9ac   : > { %4444 = vrot.lane.b32.xlu2 %v4430_v24, %s19226_s26  ;;  %4803 = vmatpush.bf16.msrb.mxu3 %v11934_v62  ;;  %v13659_v5 = vld [vmem:[%s19098_s14 + $0x64] sm:$0xf0]  ;;  %v11967_v62 = vld [vmem:[%s19098_s14 + $0x68] sm:$0xf0]  ;;  %v13682_v60 = vld [vmem:[%s19100_s16 + $0x20] sm:$0xff]  ;;  %s19239_s9 = smov 28  }
 0x9ad   : > { %4464 = vrot.lane.b32.xlu0 %v4440_v45, %s19227_s19  ;;  %v11938_v45 = vor.u32 %v13647_v31, %v11935_v42  ;;  %v13651_v31 = vld [vmem:[%s19098_s14 + $0x2c] sm:$0xf]  ;;  %v11958_v42 = vor.u32 %v13658_v61, %v11957_v19  ;;  %v13706_v7 = vld [vmem:[%s19100_s16 + $0xe0] sm:$0xff]  ;;  %v13680_v19 = vld [vmem:[%s19100_s16 + $0x10] sm:$0xff]  ;;  %s19236_s19 = smov 16   ;;  %s19240_s30 = sld [smem:[#allocation21_spill]] }
 0x9ae   : > { %v13704_v61 = vld [vmem:[%s19100_s16 + $0xd0] sm:$0xff] }
 0x9af   : > { %4460 = vrot.lane.b32.xlu1 %v4438_v20, %s19228_s18  ;;  %4816 = vmatpush.bf16.msra.mxu0 %v11938_v45  ;;  %v12037_v45 = vld [vmem:[%s19098_s14 + $0xb0] sm:$0xf]  ;;  %s19233_s18 = smov 64  }
 0x9b4   : > { %4468 = vrot.lane.b32.xlu2 %v4442_v41, %s19229_s24  ;;  %v12007_v41 = vld [vmem:[%s19098_s14 + $0xd0] sm:$0xf0]  ;;  %s19235_s24 = smov 8  }
 0x9b5   : > { %v12010_v34 = vor.u32 %v13664_v46, %v12007_v41  ;;  %v13668_v46 = vld [vmem:[%s19098_s14 + $0xb4] sm:$0xf] }
 0x9b6   : > { %v12039_v41 = vld [vmem:[%s19098_s14 + $0xf0] sm:$0xf0] }
 0x9b7   : > { %4841 = vmatpush.bf16.msra.mxu2 %v12010_v34  ;;  %v12045_v34 = vld [vmem:[%s19098_s14 + $0xb8] sm:$0xf] }
 0x9fe   : > { %v4457_v39 = vpop.permute.xlu2 %4456 }
 0xa06   : > { %v4445_v57 = vpop.permute.xlu2 %4444 }
 0xa07   : > { %v4471_v32 = vsel %vm1663_vm2, %v4428_v53, %v4445_v57  ;;  %v13672_v53 = vld [vmem:[%s19098_s14 + $0xcc] sm:$0xf0]  ;;  %v13665_v57 = vld [vmem:[%s19098_s14 + $0x9c] sm:$0xf] }
 0xa08   : > { %v12006_v20 = vor.u32 %v13672_v53, %v12005_v18  ;;  %v11966_v53 = vor.u32 %v13659_v5, %v11965_v29  ;;  %v13695_v29 = vld [vmem:[%s19100_s16 + $0x88] sm:$0xff]  ;;  %v13678_v5 = vld [vmem:[%s19100_s16] sm:$0xff] }
 0xa0e   : > { %v4469_v33 = vpop.permute.xlu2 %4468 }
 0xa17   : > { %v4453_v27 = vpop.permute.xlu0 %4452 }
 0xa19   : > { %v4449_v26 = vpop.permute.xlu1 %4448 }
 0xa1a   : > { %v4472_v16 = vsel %vm1816_vm3, %v4471_v32, %v4449_v26  ;;  %v12015_v26 = vld [vmem:[%s19098_s14 + $0xd8] sm:$0xf0]  ;;  %v11941_v32 = vld [vmem:[%s19098_s14 + $0x10] sm:$0xf] }
 0xa1b   : > { %v4473_v2 = vsel %vm2328_vm5, %v4472_v16, %v4453_v27  ;;  %v13656_v16 = vld [vmem:[%s19098_s14 + $0x4c] sm:$0xf0] }
 0xa1c   : > { %v4474_v50 = vsel %vm2330_vm6, %v4473_v2, %v4457_v39  ;;  %v13673_v39 = vld [vmem:[%s19098_s14 + $0xd4] sm:$0xf0]  ;;  %v12018_v2 = vor.u32 %v13665_v57, %v12015_v26  ;;  %v12047_v57 = vld [vmem:[%s19098_s14 + $0xf8] sm:$0xf0]  ;;  %v12042_v26 = vor.u32 %v13668_v46, %v12039_v41  ;;  %v13740_v46 = vld [vmem:[%s19100_s16 + $0x1f0] sm:$0xff] }
 0xa1d   : > { %v12014_v27 = vor.u32 %v13673_v39, %v12013_v58  ;;  %v13677_v58 = vld [vmem:[%s19098_s14 + $0xf4] sm:$0xf0]  ;;  %v13669_v39 = vld [vmem:[%s19098_s14 + $0xbc] sm:$0xf]  ;;  %v13724_v41 = vld [vmem:[%s19100_s16 + $0x170] sm:$0xff] }
 0xa1f   : > { %v4465_v30 = vpop.permute.xlu0 %4464  ;;  %4854 = vmatpush.bf16.msra.mxu3 %v12014_v27 }
 0xa21   : > { %v4461_v38 = vpop.permute.xlu1 %4460 }
 0xa22   : > { %v4475_v0 = vsel %vm2332_vm7, %v4474_v50, %v4461_v38  ;;  %v13648_v38 = vld [vmem:[%s19098_s14 + $0x14] sm:$0xf] }
 0xa23   : > { %v4476_v49 = vsel %vm2334_vm8, %v4475_v0, %v4465_v30  ;;  %v11942_v30 = vor.u32 %v13656_v16, %v11941_v32  ;;  %v11943_v50 = vld [vmem:[%s19098_s14 + $0x50] sm:$0xf0]  ;;  %v11949_v0 = vld [vmem:[%s19098_s14 + $0x18] sm:$0xf]  ;;  %v11973_v32 = vld [vmem:[%s19098_s14 + $0x30] sm:$0xf] }
 0xa24   : > { %v4477_v12 = vsel %vm2336_vm9, %v4476_v49, %v4469_v33  ;;  %v11946_v33 = vor.u32 %v13648_v38, %v11943_v50  ;;  %v13657_v49 = vld [vmem:[%s19098_s14 + $0x54] sm:$0xf0]  ;;  %v13660_v16 = vld [vmem:[%s19098_s14 + $0x6c] sm:$0xf0]  ;;  %v13652_v38 = vld [vmem:[%s19098_s14 + $0x34] sm:$0xf] }
 0xa25   : > { %v4478_v1 = vpack.c.bf16 %v4477_v12, %v4477_v12  ;;  %v13649_v12 = vld [vmem:[%s19098_s14 + $0x1c] sm:$0xf]  ;;  %v11975_v50 = vld [vmem:[%s19098_s14 + $0x70] sm:$0xf0] }
 0xa26   : > { %4842 = vmatpush.bf16.msra.mxu2 %v11946_v33  ;;  %v13661_v33 = vld [vmem:[%s19098_s14 + $0x74] sm:$0xf0] }
 0xa27   : > { %11921 = vmatmul.msk.bf16.vlgmr.msrb.gmra.mxu0 %vm866_vm0, %v4478_v1  ;;  %v11951_v1 = vld [vmem:[%s19098_s14 + $0x58] sm:$0xf0] }
 0xa28   : > { %4867 = vmatpush.bf16.msrb.mxu0 %v12018_v2  ;;  %v12046_v2 = vor.u32 %v13677_v58, %v12045_v34  ;;  %v13732_v34 = vld [vmem:[%s19100_s16 + $0x1b0] sm:$0xff]  ;;  %v13715_v58 = vld [vmem:[%s19100_s16 + $0x128] sm:$0xff] }
 0xaa4   : > { %v4504_v11 = vpop.f32.mrf.mxu0 }
 0xaa5   : > { %v4505_v22 = vadd.f32 %v14272_v54, %v4504_v11  ;;  %v11950_v54 = vor.u32 %v13657_v49, %v11949_v0  ;;  %v11954_v11 = vor.u32 %v13649_v12, %v11951_v1  ;;  %v11981_v0 = vld [vmem:[%s19098_s14 + $0x38] sm:$0xf]  ;;  %v13653_v49 = vld [vmem:[%s19098_s14 + $0x3c] sm:$0xf]  ;;  %v11974_v1 = vor.u32 %v13660_v16, %v11973_v32  ;;  %v13738_v32 = vld [vmem:[%s19100_s16 + $0x1e0] sm:$0xff] }
 0xaa6   : > { %v11983_v12 = vld [vmem:[%s19098_s14 + $0x78] sm:$0xf0]  ;;  %v13722_v16 = vld [vmem:[%s19100_s16 + $0x160] sm:$0xff] }
 0xaa7   : > { %v4508_v37 = vadd.f32 %v4505_v22, %v15354_v48  ;;  %v13670_v48 = vld [vmem:[%s19098_s14 + $0xbc] sm:$0xf0]  ;;  %4855 = vmatpush.bf16.msra.mxu3 %v11950_v54  ;;  %4868 = vmatpush.bf16.msrb.mxu0 %v11954_v11  ;;  %v11978_v54 = vor.u32 %v13652_v38, %v11975_v50  ;;  %v11982_v11 = vor.u32 %v13661_v33, %v11981_v0  ;;  %v13737_v38 = vld [vmem:[%s19100_s16 + $0x1d8] sm:$0xff]  ;;  %v13712_v50 = vld [vmem:[%s19100_s16 + $0x110] sm:$0xff] }
 0xaa8   : > { %v11990_v47 = vor.u32 %v13670_v48, %v11989_v52  ;;  %v14274_v52 = vld [vmem:[%s19232_s21] ss:$0 sm:$0xff]  ;;  %v13736_v0 = vld [vmem:[%s19100_s16 + $0x1d0] sm:$0xff]  ;;  %v13721_v33 = vld [vmem:[%s19100_s16 + $0x158] sm:$0xff]  ;;  %s19238_s21 = smov 20  }
 0xaa9   : > { %v4511_v14 = vsel %vm866_vm0, %v4508_v37, 0.0 }
 0xaaa   : > { %4512 = vadd.xlane.f32.xlu1 %v4511_v14  ;;  %4776 = vmatpush.bf16.msrb.mxu1 %v11990_v47  ;;  %v12021_v47 = vld [vmem:[%s19098_s14 + $0xa0] sm:$0xf] }
 0xaac   : > { %v4506_v23 = vpop.f32.mrf.mxu0 }
 0xaae   : > { %4777 = vmatpush.bf16.msrb.mxu1 %v11926_v15  ;;  %v13650_v15 = vld [vmem:[%s19098_s14 + $0x24] sm:$0xf] }
 0xaaf   : > { %v11962_v18 = vor.u32 %v13650_v15, %v11959_v21  ;;  %v13703_v15 = vld [vmem:[%s19100_s16 + $0xc8] sm:$0xff] }
 0xab0   : > { %v13687_v21 = vld [vmem:[%s19100_s16 + $0x48] sm:$0xff] }
 0xab2   : > { %4828 = vmatpush.bf16.msra.mxu1 %v12006_v20  ;;  %v13676_v20 = vld [vmem:[%s19098_s14 + $0xec] sm:$0xf0] }
 0xab3   : > { %v12038_v27 = vor.u32 %v13676_v20, %v12037_v45  ;;  %v13733_v45 = vld [vmem:[%s19100_s16 + $0x1b8] sm:$0xff]  ;;  %v13716_v20 = vld [vmem:[%s19100_s16 + $0x130] sm:$0xff] }
 0xab6   : > { %4829 = vmatpush.bf16.msra.mxu1 %v11942_v30  ;;  %v12050_v30 = vor.u32 %v13669_v39, %v12047_v57  ;;  %v13739_v39 = vld [vmem:[%s19100_s16 + $0x1e8] sm:$0xff] }
 0xab7   : > { %v13723_v57 = vld [vmem:[%s19100_s16 + $0x168] sm:$0xff] }
 0xb1d   : > { %v4513_v6 = vpop.xlane.xlu1 %4512 }
 0xb1e   : > { %v4514_v43 = vmul.f32 %v4513_v6, %v15310_v17 }
 0xb20   : > { %v16207_v8 = vsub.f32 %v4508_v37, %v4514_v43 }
 0xb22   : > { %v4516_v59 = vmul.f32 %v16207_v8, %v16207_v8 }
 0xb24   : > { %v4517_v36 = vsel %vm866_vm0, %v4516_v59, 0.0  ;;  %v14273_v59 = vld [vmem:[%s19104_s20] ss:$0 sm:$0xff] }
 0xb25   : > { %4518 = vadd.xlane.f32.xlu0 %v4517_v36 }
 0xb98   : > { %v4519_v51 = vpop.xlane.xlu0 %4518 }
 0xb99   : > { %v4520_v13 = vmul.f32 %v4519_v51, %v15310_v17  ;;  %v12022_v51 = vor.u32 %v13674_v55, %v12021_v47  ;;  %v13691_v47 = vld [vmem:[%s19100_s16 + $0x68] sm:$0xff] }
 0xb9a   : > { %v13699_v55 = vld [vmem:[%s19100_s16 + $0xa8] sm:$0xff] }
 0xb9b   : > { %v4521_v24 = vadd.f32 1e-05, %v4520_v13  ;;  %v12034_v13 = vor.u32 %v13667_v25, %v12031_v10  ;;  %v13681_v25 = vld [vmem:[%s19100_s16 + $0x18] sm:$0xff] }
 0xb9c   : > { %v13705_v10 = vld [vmem:[%s19100_s16 + $0xd8] sm:$0xff] }
 0xb9d   : > { %14359 = vrsqrt.f32 %v4521_v24  ;;  %vm4528_vm15 = vweird.f32 %v4521_v24 }
 0xba3   : > { %v14360_v22 = vpop.eup %14359 }
 0xba4   : > { %v4523_v37 = vmul.f32 %v14360_v22, %v4521_v24  ;;  %vm4529_vm14 = vweird.f32 %v14360_v22  ;;  %v11970_v24 = vor.u32 %v13651_v31, %v11967_v62  ;;  %v13702_v31 = vld [vmem:[%s19100_s16 + $0xc0] sm:$0xff]  ;;  %v13717_v62 = vld [vmem:[%s19100_s16 + $0x138] sm:$0xff] }
 0xba5   : > { %vm4530_vm10 = vmor %vm4528_vm15, %vm4529_vm14 }
 0xba6   : > { %v4524_v14 = vmul.f32 %v14360_v22, %v4523_v37  ;;  %v13685_v37 = vld [vmem:[%s19100_s16 + $0x38] sm:$0xff] }
 0xba8   : > { %v4525_v23 = vmul.f32 0.5, %v4524_v14  ;;  %v13709_v14 = vld [vmem:[%s19100_s16 + $0xf8] sm:$0xff] }
 0xbaa   : > { %v4526_v6 = vsub.f32 1.5, %v4525_v23  ;;  %v13693_v23 = vld [vmem:[%s19100_s16 + $0x78] sm:$0xff] }
 0xbac   : > { %v4527_v43 = vmul.f32 %v14360_v22, %v4526_v6  ;;  %v13701_v6 = vld [vmem:[%s19100_s16 + $0xb8] sm:$0xff] }
 0xbae   : > { %v4531_v36 = vsel %vm4530_vm10, %v14360_v22, %v4527_v43  ;;  %v11986_v22 = vor.u32 %v13653_v49, %v11983_v12  ;;  %v13684_v43 = vld [vmem:[%s19100_s16 + $0x30] sm:$0xff]  ;;  %v13729_v49 = vld [vmem:[%s19100_s16 + $0x198] sm:$0xff]  ;;  %v13711_v12 = vld [vmem:[%s19100_s16 + $0x108] sm:$0xff] }
 0xbaf   : > { %v4532_v48 = vmul.f32 %v4531_v36, %v16207_v8  ;;  %v12029_v8 = vld [vmem:[%s19098_s14 + $0xa8] sm:$0xf]  ;;  %v13692_v36 = vld [vmem:[%s19100_s16 + $0x70] sm:$0xff] }
 0xbb0   : > { %v12030_v4 = vor.u32 %v13675_v3, %v12029_v8  ;;  %v13690_v8 = vld [vmem:[%s19100_s16 + $0x60] sm:$0xff] }
 0xbb1   : > { %v4534_v28 = vmul.f32 %v14273_v59, %v4532_v48  ;;  %v13708_v59 = vld [vmem:[%s19100_s16 + $0xf0] sm:$0xff]  ;;  %v13683_v48 = vld [vmem:[%s19100_s16 + $0x28] sm:$0xff]  ;;  %v13698_v3 = vld [vmem:[%s19100_s16 + $0xa0] sm:$0xff] }
 0xbb3   : > { %v16331_v40 = vadd.f32 %v14274_v52, %v4534_v28  ;;  %v13700_v52 = vld [vmem:[%s19100_s16 + $0xb0] sm:$0xff]  ;;  %v13707_v28 = vld [vmem:[%s19100_s16 + $0xe8] sm:$0xff] }
 0xbb5   : > { %v16344_v44 = vpack.c.bf16 %v16331_v40, %v16331_v40 }
 0xbb7   : > { %12051 = vmatmul.msk.bf16.vlgmr.msrb.gmra.mxu1 %vm866_vm0, %v16344_v44  ;;  %12052 = vmatmul.msk.bf16.vlgmr.msrb.gmra.mxu2 %vm866_vm0, %v16344_v44 }
 0xbb8   : > { %12053 = vmatmul.msk.bf16.vlgmr.msrb.gmra.mxu3 %vm866_vm0, %v16344_v44  ;;  %12054 = vmatmul.msk.bf16.vlgmr.msra.gmra.mxu0 %vm866_vm0, %v16344_v44 }
 0xbb9   : > { %4880 = vmatpush.bf16.msrb.mxu1 %v12022_v51  ;;  %4893 = vmatpush.bf16.msrb.mxu2 %v12026_v56  ;;  %v13689_v51 = vld [vmem:[%s19100_s16 + $0x58] sm:$0xff] }
 0xbba   : > { %4906 = vmatpush.bf16.msrb.mxu3 %v12030_v4  ;;  %4919 = vmatpush.bf16.msra.mxu0 %v12034_v13  ;;  %v13697_v56 = vld [vmem:[%s19100_s16 + $0x98] sm:$0xff]  ;;  %v13688_v4 = vld [vmem:[%s19100_s16 + $0x50] sm:$0xff]  ;;  %v13679_v13 = vld [vmem:[%s19100_s16 + $0x8] sm:$0xff] }
 0xbbd   : > { %4881 = vmatpush.bf16.msrb.mxu1 %v11958_v42  ;;  %4894 = vmatpush.bf16.msrb.mxu2 %v11962_v18  ;;  %v13741_v42 = vld [vmem:[%s19100_s16 + $0x1f8] sm:$0xff]  ;;  %v13686_v18 = vld [vmem:[%s19100_s16 + $0x40] sm:$0xff] }
 0xbbe   : > { %4907 = vmatpush.bf16.msrb.mxu3 %v11966_v53  ;;  %4920 = vmatpush.bf16.msra.mxu0 %v11970_v24  ;;  %v13694_v53 = vld [vmem:[%s19100_s16 + $0x80] sm:$0xff]  ;;  %v13725_v24 = vld [vmem:[%s19100_s16 + $0x178] sm:$0xff] }
 0xbc7   : > { %12055 = vmatmul.msk.bf16.vlgmr.msra.gmra.mxu1 %vm866_vm0, %v16344_v44  ;;  %12056 = vmatmul.msk.bf16.vlgmr.msra.gmra.mxu2 %vm866_vm0, %v16344_v44 }
 0xbc8   : > { %12057 = vmatmul.msk.bf16.vlgmr.msra.gmra.mxu3 %vm866_vm0, %v16344_v44  ;;  %12058 = vmatmul.msk.bf16.vlgmr.msrb.gmra.mxu0 %vm866_vm0, %v16344_v44 }
 0xbc9   : > { %4932 = vmatpush.bf16.msra.mxu1 %v12038_v27  ;;  %4945 = vmatpush.bf16.msra.mxu2 %v12042_v26  ;;  %v13731_v27 = vld [vmem:[%s19100_s16 + $0x1a8] sm:$0xff]  ;;  %v13714_v26 = vld [vmem:[%s19100_s16 + $0x120] sm:$0xff] }
 0xbca   : > { %4958 = vmatpush.bf16.msra.mxu3 %v12046_v2  ;;  %4971 = vmatpush.bf16.msrb.mxu0 %v12050_v30  ;;  %v13730_v2 = vld [vmem:[%s19100_s16 + $0x1a0] sm:$0xff]  ;;  %v13713_v30 = vld [vmem:[%s19100_s16 + $0x118] sm:$0xff] }
 0xbcd   : > { %4933 = vmatpush.bf16.msra.mxu1 %v11974_v1  ;;  %4946 = vmatpush.bf16.msra.mxu2 %v11978_v54  ;;  %v13735_v1 = vld [vmem:[%s19100_s16 + $0x1c8] sm:$0xff]  ;;  %v13720_v54 = vld [vmem:[%s19100_s16 + $0x150] sm:$0xff] }
 0xbce   : > { %4959 = vmatpush.bf16.msra.mxu3 %v11982_v11  ;;  %4972 = vmatpush.bf16.msrb.mxu0 %v11986_v22  ;;  %v13728_v11 = vld [vmem:[%s19100_s16 + $0x190] sm:$0xff]  ;;  %v13710_v22 = vld [vmem:[%s19100_s16 + $0x100] sm:$0xff] }
 0xbd7   : > { %12059 = vmatmul.msk.bf16.vlgmr.msrb.gmra.mxu1 %vm866_vm0, %v16344_v44  ;;  %12060 = vmatmul.msk.bf16.vlgmr.msrb.gmra.mxu2 %vm866_vm0, %v16344_v44 }
 0xbd8   : > { %12061 = vmatmul.msk.bf16.vlgmr.msrb.gmra.mxu3 %vm866_vm0, %v16344_v44  ;;  %12062 = vmatmul.msk.bf16.vlgmr.msra.gmra.mxu0 %vm866_vm0, %v16344_v44 }
 0xbd9   : > { %6036 = vmatpush.bf16.msrb.mxu1 %v13685_v37  ;;  %6075 = vmatpush.bf16.msra.mxu0 %v13709_v14  ;;  %v13734_v37 = vld [vmem:[%s19100_s16 + $0x1c0] sm:$0xff]  ;;  %v13719_v14 = vld [vmem:[%s19100_s16 + $0x148] sm:$0xff] }
 0xbda   : > { %6049 = vmatpush.bf16.msrb.mxu2 %v13693_v23  ;;  %6062 = vmatpush.bf16.msrb.mxu3 %v13701_v6  ;;  %v13727_v23 = vld [vmem:[%s19100_s16 + $0x188] sm:$0xff]  ;;  %v13718_v6 = vld [vmem:[%s19100_s16 + $0x140] sm:$0xff] }
 0xbdd   : > { %6037 = vmatpush.bf16.msrb.mxu1 %v13684_v43  ;;  %6076 = vmatpush.bf16.msra.mxu0 %v13708_v59  ;;  %v13726_v43 = vld [vmem:[%s19100_s16 + $0x180] sm:$0xff] }
 0xbde   : > { %6050 = vmatpush.bf16.msrb.mxu2 %v13692_v36  ;;  %6063 = vmatpush.bf16.msrb.mxu3 %v13700_v52  ;;  %v16645_v59 = vld [vmem:[%s19099_s15] ss:$2 sm:$0xff] }
 0xbdf   : > { %v4575_v36 = vperm.slane %v16645_v59, 0  ;;  %v4578_v52 = vperm.slane %v16645_v59, 3 }
 0xbe1   : > { %6038 = vmatpush.bf16.msrb.mxu1 %v13683_v48  ;;  %6077 = vmatpush.bf16.msra.mxu0 %v13707_v28 }
 0xbe2   : > { %6051 = vmatpush.bf16.msrb.mxu2 %v13691_v47  ;;  %6064 = vmatpush.bf16.msrb.mxu3 %v13699_v55 }
 0xbe5   : > { %6039 = vmatpush.bf16.msrb.mxu1 %v13682_v60  ;;  %6078 = vmatpush.bf16.msra.mxu0 %v13706_v7  ;;  %v4576_v7 = vperm.slane %v16645_v59, 1 }
 0xbe6   : > { %6052 = vmatpush.bf16.msrb.mxu2 %v13690_v8  ;;  %6065 = vmatpush.bf16.msrb.mxu3 %v13698_v3  ;;  %v4577_v3 = vperm.slane %v16645_v59, 2 }
 0xbe7   : > { %12063 = vmatmul.msk.bf16.vlgmr.msra.gmra.mxu1 %vm866_vm0, %v16344_v44  ;;  %12064 = vmatmul.msk.bf16.vlgmr.msra.gmra.mxu2 %vm866_vm0, %v16344_v44 }
 0xbe8   : > { %12065 = vmatmul.msk.bf16.vlgmr.msra.gmra.mxu3 %vm866_vm0, %v16344_v44  ;;  %12066 = vmatmul.msk.bf16.vlgmr.msrb.gmra.mxu0 %vm866_vm0, %v16344_v44  ;;  %v13696_v44 = vld [vmem:[%s19100_s16 + $0x90] sm:$0xff] }
 0xbe9   : > { %6040 = vmatpush.bf16.msrb.mxu1 %v13681_v25  ;;  %6079 = vmatpush.bf16.msra.mxu0 %v13705_v10  ;;  %v13749_v25 = vld [vmem:[%s19100_s16 + $0x238] sm:$0xff] }
 0xbea   : > { %6053 = vmatpush.bf16.msrb.mxu2 %v13689_v51  ;;  %6066 = vmatpush.bf16.msrb.mxu3 %v13697_v56  ;;  %v13773_v51 = vld [vmem:[%s19100_s16 + $0x2f8] sm:$0xff] }
 0xbed   : > { %6041 = vmatpush.bf16.msrb.mxu1 %v13680_v19  ;;  %6080 = vmatpush.bf16.msra.mxu0 %v13704_v61 }
 0xbee   : > { %6054 = vmatpush.bf16.msrb.mxu2 %v13688_v4  ;;  %6067 = vmatpush.bf16.msrb.mxu3 %v13696_v44 }
 0xbf1   : > { %6042 = vmatpush.bf16.msrb.mxu1 %v13679_v13  ;;  %6081 = vmatpush.bf16.msra.mxu0 %v13703_v15  ;;  %v13748_v15 = vld [vmem:[%s19100_s16 + $0x230] sm:$0xff] }
 0xbf2   : > { %6055 = vmatpush.bf16.msrb.mxu2 %v13687_v21  ;;  %6068 = vmatpush.bf16.msrb.mxu3 %v13695_v29 }
 0xbf5   : > { %6043 = vmatpush.bf16.msrb.mxu1 %v13678_v5  ;;  %6082 = vmatpush.bf16.msra.mxu0 %v13702_v31  ;;  %v13772_v5 = vld [vmem:[%s19100_s16 + $0x2f0] sm:$0xff] }
 0xbf6   : > { %6056 = vmatpush.bf16.msrb.mxu2 %v13686_v18  ;;  %6069 = vmatpush.bf16.msrb.mxu3 %v13694_v53  ;;  %v13765_v18 = vld [vmem:[%s19100_s16 + $0x2b8] sm:$0xff] }
 0xbf9   : > { %6088 = vmatpush.bf16.msra.mxu1 %v13717_v62  ;;  %6127 = vmatpush.bf16.msrb.mxu0 %v13741_v42  ;;  %v13757_v62 = vld [vmem:[%s19100_s16 + $0x278] sm:$0xff] }
 0xbfa   : > { %6101 = vmatpush.bf16.msra.mxu2 %v13725_v24  ;;  %6114 = vmatpush.bf16.msra.mxu3 %v13733_v45  ;;  %v13747_v24 = vld [vmem:[%s19100_s16 + $0x228] sm:$0xff] }
 0xbfb   : > { %v13771_v45 = vld [vmem:[%s19100_s16 + $0x2e8] sm:$0xff] }
 0xbfd   : > { %6089 = vmatpush.bf16.msra.mxu1 %v13716_v20  ;;  %6128 = vmatpush.bf16.msrb.mxu0 %v13740_v46  ;;  %v4579_v20 = vperm.slane %v16645_v59, 4 }
 0xbfe   : > { %6102 = vmatpush.bf16.msra.mxu2 %v13724_v41  ;;  %6115 = vmatpush.bf16.msra.mxu3 %v13732_v34  ;;  %v4582_v41 = vperm.slane %v16645_v59, 7  ;;  %v13756_v34 = vld [vmem:[%s19100_s16 + $0x270] sm:$0xff] }
 0xc01   : > { %6090 = vmatpush.bf16.msra.mxu1 %v13715_v58  ;;  %6129 = vmatpush.bf16.msrb.mxu0 %v13739_v39  ;;  %v13764_v39 = vld [vmem:[%s19100_s16 + $0x2b0] sm:$0xff] }
 0xc02   : > { %6103 = vmatpush.bf16.msra.mxu2 %v13723_v57  ;;  %6116 = vmatpush.bf16.msra.mxu3 %v13731_v27  ;;  %v13746_v27 = vld [vmem:[%s19100_s16 + $0x220] sm:$0xff] }
 0xc05   : > { %6091 = vmatpush.bf16.msra.mxu1 %v13714_v26  ;;  %6130 = vmatpush.bf16.msrb.mxu0 %v13738_v32 }
 0xc06   : > { %6104 = vmatpush.bf16.msra.mxu2 %v13722_v16  ;;  %6117 = vmatpush.bf16.msra.mxu3 %v13730_v2  ;;  %v13770_v16 = vld [vmem:[%s19100_s16 + $0x2e0] sm:$0xff] }
 0xc09   : > { %6092 = vmatpush.bf16.msra.mxu1 %v13713_v30  ;;  %6131 = vmatpush.bf16.msrb.mxu0 %v13737_v38  ;;  %v13755_v30 = vld [vmem:[%s19100_s16 + $0x268] sm:$0xff] }
 0xc0a   : > { %6105 = vmatpush.bf16.msra.mxu2 %v13721_v33  ;;  %6118 = vmatpush.bf16.msra.mxu3 %v13729_v49  ;;  %v4581_v49 = vperm.slane %v16645_v59, 6 }
 0xc0d   : > { %6093 = vmatpush.bf16.msra.mxu1 %v13712_v50  ;;  %6132 = vmatpush.bf16.msrb.mxu0 %v13736_v0  ;;  %v13763_v50 = vld [vmem:[%s19100_s16 + $0x2a8] sm:$0xff]  ;;  %v4580_v0 = vperm.slane %v16645_v59, 5 }
 0xc0e   : > { %6106 = vmatpush.bf16.msra.mxu2 %v13720_v54  ;;  %6119 = vmatpush.bf16.msra.mxu3 %v13728_v11  ;;  %v13769_v54 = vld [vmem:[%s19100_s16 + $0x2d8] sm:$0xff] }
 0xc11   : > { %6094 = vmatpush.bf16.msra.mxu1 %v13711_v12  ;;  %6133 = vmatpush.bf16.msrb.mxu0 %v13735_v1  ;;  %v13745_v12 = vld [vmem:[%s19100_s16 + $0x218] sm:$0xff] }
 0xc12   : > { %6107 = vmatpush.bf16.msra.mxu2 %v13719_v14  ;;  %6120 = vmatpush.bf16.msra.mxu3 %v13727_v23 }
 0xc15   : > { %6095 = vmatpush.bf16.msra.mxu1 %v13710_v22  ;;  %6134 = vmatpush.bf16.msrb.mxu0 %v13734_v37  ;;  %v13754_v37 = vld [vmem:[%s19100_s16 + $0x260] sm:$0xff] }
 0xc16   : > { %6108 = vmatpush.bf16.msra.mxu2 %v13718_v6  ;;  %6121 = vmatpush.bf16.msra.mxu3 %v13726_v43  ;;  %v13762_v6 = vld [vmem:[%s19100_s16 + $0x2a0] sm:$0xff] }
 0xc34   : > { %v4779_v48 = vpop.f32.mrf.mxu1 }
 0xc35   : > { %v4780_v28 = vadd.f32 %v4779_v48, %v4575_v36  ;;  %v4818_v47 = vpop.f32.mrf.mxu0  ;;  %v13744_v36 = vld [vmem:[%s19100_s16 + $0x210] sm:$0xff] }
 0xc36   : > { %v4819_v55 = vadd.f32 %v4818_v47, %v4578_v52 }
 0xc37   : > { %v4978_v60 = vmax.f32 %v4780_v28, 0.0  ;;  %v13768_v28 = vld [vmem:[%s19100_s16 + $0x2d0] sm:$0xff] }
 0xc38   : > { %v4981_v8 = vmax.f32 %v4819_v55, 0.0  ;;  %v13753_v55 = vld [vmem:[%s19100_s16 + $0x258] sm:$0xff] }
 0xc39   : > { %v5250_v10 = vpack.c.bf16 %v4978_v60, %v4978_v60  ;;  %v16721_v60 = vld [vmem:[%s19099_s15 + $0x10] ss:$2 sm:$0xff] }
 0xc3a   : > { %v5253_v56 = vpack.c.bf16 %v4981_v8, %v4981_v8  ;;  %v4792_v19 = vpop.f32.mrf.mxu2  ;;  %v13761_v8 = vld [vmem:[%s19100_s16 + $0x298] sm:$0xff] }
 0xc3b   : > { %v4793_v61 = vadd.f32 %v4792_v19, %v4576_v7  ;;  %v4805_v4 = vpop.f32.mrf.mxu3  ;;  %6044 = vmatmul.bf16.vlgmr.msrb.gmra.mxu1 %v5250_v10  ;;  %v13767_v10 = vld [vmem:[%s19100_s16 + $0x2c8] sm:$0xff]  ;;  %v4586_v19 = vperm.slane %v16721_v60, 3 }
 0xc3c   : > { %v4806_v44 = vadd.f32 %v4805_v4, %v4577_v3  ;;  %6083 = vmatmul.bf16.vlgmr.msra.gmra.mxu0 %v5253_v56  ;;  %6140 = vmatpush.bf16.msrb.mxu1 %v13749_v25  ;;  %v4781_v13 = vpop.f32.mrf.mxu1  ;;  %v13743_v25 = vld [vmem:[%s19100_s16 + $0x208] sm:$0xff] }
 0xc3d   : > { %v4979_v21 = vmax.f32 %v4793_v61, 0.0  ;;  %6179 = vmatpush.bf16.msra.mxu0 %v13773_v51  ;;  %v4820_v29 = vpop.f32.mrf.mxu0  ;;  %v4583_v51 = vperm.slane %v16721_v60, 0  ;;  %v13752_v61 = vld [vmem:[%s19100_s16 + $0x250] sm:$0xff] }
 0xc3e   : > { %v4980_v31 = vmax.f32 %v4806_v44, 0.0  ;;  %v13760_v44 = vld [vmem:[%s19100_s16 + $0x290] sm:$0xff] }
 0xc3f   : > { %v5251_v42 = vpack.c.bf16 %v4979_v21, %v4979_v21 }
 0xc40   : > { %v5252_v53 = vpack.c.bf16 %v4980_v31, %v4980_v31  ;;  %6141 = vmatpush.bf16.msrb.mxu1 %v13748_v15  ;;  %v13742_v15 = vld [vmem:[%s19100_s16 + $0x200] sm:$0xff]  ;;  %v13781_v31 = vld [vmem:[%s19100_s16 + $0x338] sm:$0xff] }
 0xc41   : > { %6180 = vmatpush.bf16.msra.mxu0 %v13772_v5  ;;  %6057 = vmatmul.bf16.vlgmr.msrb.gmra.mxu2 %v5251_v42  ;;  %v13766_v5 = vld [vmem:[%s19100_s16 + $0x2c0] sm:$0xff]  ;;  %v13805_v42 = vld [vmem:[%s19100_s16 + $0x3f8] sm:$0xff] }
 0xc42   : > { %6070 = vmatmul.bf16.vlgmr.msrb.gmra.mxu3 %v5252_v53  ;;  %6153 = vmatpush.bf16.msrb.mxu2 %v13757_v62  ;;  %v4794_v46 = vpop.f32.mrf.mxu2 }
 0xc43   : > { %6166 = vmatpush.bf16.msrb.mxu3 %v13765_v18  ;;  %v4807_v58 = vpop.f32.mrf.mxu3  ;;  %v13751_v18 = vld [vmem:[%s19100_s16 + $0x248] sm:$0xff]  ;;  %v4585_v46 = vperm.slane %v16721_v60, 2 }
 0xc44   : > { %6142 = vmatpush.bf16.msrb.mxu1 %v13747_v24  ;;  %v4831_v57 = vpop.f32.mrf.mxu1  ;;  %v13759_v24 = vld [vmem:[%s19100_s16 + $0x288] sm:$0xff] }
 0xc45   : > { %6181 = vmatpush.bf16.msra.mxu0 %v13771_v45  ;;  %v4832_v26 = vadd.f32 %v4831_v57, %v4579_v20  ;;  %v4870_v32 = vpop.f32.mrf.mxu0  ;;  %v4584_v45 = vperm.slane %v16721_v60, 1  ;;  %v13804_v57 = vld [vmem:[%s19100_s16 + $0x3f0] sm:$0xff] }
 0xc46   : > { %v4871_v2 = vadd.f32 %v4870_v32, %v4582_v41  ;;  %6154 = vmatpush.bf16.msrb.mxu2 %v13756_v34  ;;  %v13780_v34 = vld [vmem:[%s19100_s16 + $0x330] sm:$0xff] }
 0xc47   : > { %v4982_v38 = vmax.f32 %v4832_v26, 0.0  ;;  %6167 = vmatpush.bf16.msrb.mxu3 %v13764_v39 }
 0xc48   : > { %v4985_v33 = vmax.f32 %v4871_v2, 0.0  ;;  %6143 = vmatpush.bf16.msrb.mxu1 %v13746_v27  ;;  %v13750_v27 = vld [vmem:[%s19100_s16 + $0x240] sm:$0xff]  ;;  %v13789_v2 = vld [vmem:[%s19100_s16 + $0x378] sm:$0xff] }
 0xc49   : > { %v5254_v1 = vpack.c.bf16 %v4982_v38, %v4982_v38  ;;  %6182 = vmatpush.bf16.msra.mxu0 %v13770_v16  ;;  %v13758_v16 = vld [vmem:[%s19100_s16 + $0x280] sm:$0xff] }
 0xc4a   : > { %v5257_v11 = vpack.c.bf16 %v4985_v33, %v4985_v33  ;;  %6155 = vmatpush.bf16.msrb.mxu2 %v13755_v30  ;;  %v4844_v22 = vpop.f32.mrf.mxu2 }
 0xc4b   : > { %6168 = vmatpush.bf16.msrb.mxu3 %v13763_v50  ;;  %v4845_v14 = vadd.f32 %v4844_v22, %v4580_v0  ;;  %v4857_v23 = vpop.f32.mrf.mxu3  ;;  %6096 = vmatmul.bf16.vlgmr.msra.gmra.mxu1 %v5254_v1  ;;  %v13797_v50 = vld [vmem:[%s19100_s16 + $0x3b8] sm:$0xff]  ;;  %v13803_v1 = vld [vmem:[%s19100_s16 + $0x3e8] sm:$0xff] }
 0xc4c   : > { %v4858_v43 = vadd.f32 %v4857_v23, %v4581_v49  ;;  %6135 = vmatmul.bf16.vlgmr.msrb.gmra.mxu0 %v5257_v11  ;;  %6144 = vmatpush.bf16.msrb.mxu1 %v13745_v12  ;;  %v4833_v59 = vpop.f32.mrf.mxu1  ;;  %v13779_v49 = vld [vmem:[%s19100_s16 + $0x328] sm:$0xff]  ;;  %v13788_v11 = vld [vmem:[%s19100_s16 + $0x370] sm:$0xff] }
 0xc4d   : > { %v4983_v52 = vmax.f32 %v4845_v14, 0.0  ;;  %6183 = vmatpush.bf16.msra.mxu0 %v13769_v54  ;;  %v4872_v48 = vpop.f32.mrf.mxu0  ;;  %v13778_v14 = vld [vmem:[%s19100_s16 + $0x320] sm:$0xff]  ;;  %v13787_v59 = vld [vmem:[%s19100_s16 + $0x368] sm:$0xff] }
 0xc4e   : > { %v4984_v47 = vmax.f32 %v4858_v43, 0.0  ;;  %6156 = vmatpush.bf16.msrb.mxu2 %v13754_v37  ;;  %v13796_v37 = vld [vmem:[%s19100_s16 + $0x3b0] sm:$0xff] }
 0xc4f   : > { %v5255_v7 = vpack.c.bf16 %v4983_v52, %v4983_v52  ;;  %6169 = vmatpush.bf16.msrb.mxu3 %v13762_v6  ;;  %v13802_v6 = vld [vmem:[%s19100_s16 + $0x3e0] sm:$0xff]  ;;  %v13795_v52 = vld [vmem:[%s19100_s16 + $0x3a8] sm:$0xff] }
 0xc50   : > { %v5256_v3 = vpack.c.bf16 %v4984_v47, %v4984_v47  ;;  %6145 = vmatpush.bf16.msrb.mxu1 %v13744_v36  ;;  %v13801_v47 = vld [vmem:[%s19100_s16 + $0x3d8] sm:$0xff] }
 0xc51   : > { %6184 = vmatpush.bf16.msra.mxu0 %v13768_v28  ;;  %6109 = vmatmul.bf16.vlgmr.msra.gmra.mxu2 %v5255_v7  ;;  %v13777_v28 = vld [vmem:[%s19100_s16 + $0x318] sm:$0xff]  ;;  %v13794_v7 = vld [vmem:[%s19100_s16 + $0x3a0] sm:$0xff] }
 0xc52   : > { %6122 = vmatmul.bf16.vlgmr.msra.gmra.mxu3 %v5256_v3  ;;  %6157 = vmatpush.bf16.msrb.mxu2 %v13753_v55  ;;  %v4846_v56 = vpop.f32.mrf.mxu2  ;;  %v13786_v55 = vld [vmem:[%s19100_s16 + $0x360] sm:$0xff]  ;;  %v4587_v3 = vperm.slane %v16721_v60, 4 }
 0xc53   : > { %6170 = vmatpush.bf16.msrb.mxu3 %v13761_v8  ;;  %v4859_v4 = vpop.f32.mrf.mxu3  ;;  %v13776_v8 = vld [vmem:[%s19100_s16 + $0x310] sm:$0xff] }
 0xc54   : > { %6146 = vmatpush.bf16.msrb.mxu1 %v13743_v25  ;;  %v4883_v13 = vpop.f32.mrf.mxu1  ;;  %v13793_v4 = vld [vmem:[%s19100_s16 + $0x398] sm:$0xff] }
 0xc55   : > { %6185 = vmatpush.bf16.msra.mxu0 %v13767_v10  ;;  %v4884_v21 = vadd.f32 %v4883_v13, %v4583_v51  ;;  %v4922_v29 = vpop.f32.mrf.mxu0  ;;  %v13800_v10 = vld [vmem:[%s19100_s16 + $0x3d0] sm:$0xff]  ;;  %v4590_v51 = vperm.slane %v16721_v60, 7  ;;  %v13775_v13 = vld [vmem:[%s19100_s16 + $0x308] sm:$0xff] }
 0xc56   : > { %v4923_v62 = vadd.f32 %v4922_v29, %v4586_v19  ;;  %6158 = vmatpush.bf16.msrb.mxu2 %v13752_v61  ;;  %v13785_v19 = vld [vmem:[%s19100_s16 + $0x358] sm:$0xff] }
 0xc57   : > { %v4986_v53 = vmax.f32 %v4884_v21, 0.0  ;;  %6171 = vmatpush.bf16.msrb.mxu3 %v13760_v44  ;;  %v13799_v21 = vld [vmem:[%s19100_s16 + $0x3c8] sm:$0xff] }
 0xc58   : > { %v4989_v20 = vmax.f32 %v4923_v62, 0.0  ;;  %6147 = vmatpush.bf16.msrb.mxu1 %v13742_v15  ;;  %v13792_v62 = vld [vmem:[%s19100_s16 + $0x390] sm:$0xff] }
 0xc59   : > { %v5258_v41 = vpack.c.bf16 %v4986_v53, %v4986_v53  ;;  %6186 = vmatpush.bf16.msra.mxu0 %v13766_v5  ;;  %v13784_v5 = vld [vmem:[%s19100_s16 + $0x350] sm:$0xff] }
 0xc5a   : > { %v5261_v58 = vpack.c.bf16 %v4989_v20, %v4989_v20  ;;  %6159 = vmatpush.bf16.msrb.mxu2 %v13751_v18  ;;  %v4896_v39 = vpop.f32.mrf.mxu2  ;;  %v13774_v18 = vld [vmem:[%s19100_s16 + $0x300] sm:$0xff] }
 0xc5b   : > { %6172 = vmatpush.bf16.msrb.mxu3 %v13759_v24  ;;  %v4897_v26 = vadd.f32 %v4896_v39, %v4584_v45  ;;  %v4909_v32 = vpop.f32.mrf.mxu3  ;;  %6148 = vmatmul.bf16.vlgmr.msrb.gmra.mxu1 %v5258_v41  ;;  %v13798_v45 = vld [vmem:[%s19100_s16 + $0x3c0] sm:$0xff]  ;;  %v13783_v41 = vld [vmem:[%s19100_s16 + $0x348] sm:$0xff] }
 0xc5c   : > { %6192 = vmatpush.bf16.msra.mxu1 %v13781_v31  ;;  %v4910_v30 = vadd.f32 %v4909_v32, %v4585_v46  ;;  %6187 = vmatmul.bf16.vlgmr.msra.gmra.mxu0 %v5261_v58  ;;  %v4885_v38 = vpop.f32.mrf.mxu1  ;;  %v4588_v31 = vperm.slane %v16721_v60, 5  ;;  %v13790_v32 = vld [vmem:[%s19100_s16 + $0x380] sm:$0xff] }
 0xc5d   : > { %6231 = vmatpush.bf16.msrb.mxu0 %v13805_v42  ;;  %v4987_v0 = vmax.f32 %v4897_v26, 0.0  ;;  %v4924_v33 = vpop.f32.mrf.mxu0  ;;  %v4589_v42 = vperm.slane %v16721_v60, 6 }
 0xc5e   : > { %v4988_v12 = vmax.f32 %v4910_v30, 0.0  ;;  %6160 = vmatpush.bf16.msrb.mxu2 %v13750_v27  ;;  %v13782_v27 = vld [vmem:[%s19100_s16 + $0x340] sm:$0xff] }
 0xc5f   : > { %v5259_v54 = vpack.c.bf16 %v4987_v0, %v4987_v0  ;;  %6173 = vmatpush.bf16.msrb.mxu3 %v13758_v16 }
 0xc60   : > { %6193 = vmatpush.bf16.msra.mxu1 %v13780_v34  ;;  %v5260_v22 = vpack.c.bf16 %v4988_v12, %v4988_v12  ;;  %v13791_v34 = vld [vmem:[%s19100_s16 + $0x388] sm:$0xff] }
 0xc61   : > { %6232 = vmatpush.bf16.msrb.mxu0 %v13804_v57  ;;  %6161 = vmatmul.bf16.vlgmr.msrb.gmra.mxu2 %v5259_v54 }
 0xc62   : > { %6205 = vmatpush.bf16.msra.mxu2 %v13789_v2  ;;  %6174 = vmatmul.bf16.vlgmr.msrb.gmra.mxu3 %v5260_v22  ;;  %v4898_v23 = vpop.f32.mrf.mxu2 }
 0xc63   : > { %6218 = vmatpush.bf16.msra.mxu3 %v13797_v50  ;;  %v4911_v43 = vpop.f32.mrf.mxu3  ;;  %v14275_v23 = vld [vmem:[%s19101_s17] ss:$0 sm:$0xff] }
 0xc64   : > { %6194 = vmatpush.bf16.msra.mxu1 %v13779_v49  ;;  %v4935_v36 = vpop.f32.mrf.mxu1 }
 0xc65   : > { %6233 = vmatpush.bf16.msrb.mxu0 %v13803_v1  ;;  %v4974_v48 = vpop.f32.mrf.mxu0  ;;  %v4936_v15 = vadd.f32 %v4935_v36, %v4587_v3 }
 0xc66   : > { %6206 = vmatpush.bf16.msra.mxu2 %v13788_v11  ;;  %v4975_v29 = vadd.f32 %v4974_v48, %v4590_v51 }
 0xc67   : > { %6219 = vmatpush.bf16.msra.mxu3 %v13796_v37  ;;  %v4990_v53 = vmax.f32 %v4936_v15, 0.0 }
 0xc68   : > { %6195 = vmatpush.bf16.msra.mxu1 %v13778_v14  ;;  %v4993_v20 = vmax.f32 %v4975_v29, 0.0 }
 0xc69   : > { %6234 = vmatpush.bf16.msrb.mxu0 %v13802_v6  ;;  %v5262_v39 = vpack.c.bf16 %v4990_v53, %v4990_v53 }
 0xc6a   : > { %6207 = vmatpush.bf16.msra.mxu2 %v13787_v59  ;;  %v4948_v25 = vpop.f32.mrf.mxu2  ;;  %v5265_v57 = vpack.c.bf16 %v4993_v20, %v4993_v20 }
 0xc6b   : > { %6220 = vmatpush.bf16.msra.mxu3 %v13795_v52  ;;  %v4961_v56 = vpop.f32.mrf.mxu3  ;;  %v4949_v60 = vadd.f32 %v4948_v25, %v4588_v31 }
 0xc6c   : > { %6196 = vmatpush.bf16.msra.mxu1 %v13777_v28  ;;  %v4937_v61 = vpop.f32.mrf.mxu1  ;;  %v4962_v58 = vadd.f32 %v4961_v56, %v4589_v42 }
 0xc6d   : > { %6235 = vmatpush.bf16.msrb.mxu0 %v13801_v47  ;;  %v4976_v44 = vpop.f32.mrf.mxu0  ;;  %v4991_v26 = vmax.f32 %v4949_v60, 0.0 }
 0xc6e   : > { %6208 = vmatpush.bf16.msra.mxu2 %v13786_v55  ;;  %v4992_v16 = vmax.f32 %v4962_v58, 0.0 }
 0xc6f   : > { %6221 = vmatpush.bf16.msra.mxu3 %v13794_v7  ;;  %v5263_v2 = vpack.c.bf16 %v4991_v26, %v4991_v26 }
 0xc70   : > { %6197 = vmatpush.bf16.msra.mxu1 %v13776_v8  ;;  %v5264_v30 = vpack.c.bf16 %v4992_v16, %v4992_v16  ;;  %v13807_v16 = vld [vmem:[%s19200_s1 + $0x18] sm:$0xff] }
 0xc71   : > { %6236 = vmatpush.bf16.msrb.mxu0 %v13800_v10 }
 0xc72   : > { %6209 = vmatpush.bf16.msra.mxu2 %v13785_v19  ;;  %v4950_v24 = vpop.f32.mrf.mxu2 }
 0xc73   : > { %6222 = vmatpush.bf16.msra.mxu3 %v13793_v4  ;;  %v4963_v46 = vpop.f32.mrf.mxu3 }
 0xc74   : > { %6198 = vmatpush.bf16.msra.mxu1 %v13775_v13 }
 0xc75   : > { %6237 = vmatpush.bf16.msrb.mxu0 %v13799_v21 }
 0xc76   : > { %6210 = vmatpush.bf16.msra.mxu2 %v13784_v5 }
 0xc77   : > { %6223 = vmatpush.bf16.msra.mxu3 %v13792_v62 }
 0xc78   : > { %6199 = vmatpush.bf16.msra.mxu1 %v13774_v18 }
 0xc79   : > { %6238 = vmatpush.bf16.msrb.mxu0 %v13798_v45 }
 0xc7a   : > { %6211 = vmatpush.bf16.msra.mxu2 %v13783_v41 }
 0xc7b   : > { %6224 = vmatpush.bf16.msra.mxu3 %v13791_v34  ;;  %6200 = vmatmul.bf16.vlgmr.msra.gmra.mxu1 %v5262_v39 }
 0xc7c   : > { %6239 = vmatmul.bf16.vlgmr.msrb.gmra.mxu0 %v5265_v57  ;;  %6302 = vmatpush.bf16.msrb.mxu1 %v13807_v16 }
 0xc7e   : > { %6212 = vmatpush.bf16.msra.mxu2 %v13782_v27 }
 0xc7f   : > { %6225 = vmatpush.bf16.msra.mxu3 %v13790_v32 }
 0xc81   : > { %6213 = vmatmul.bf16.vlgmr.msra.gmra.mxu2 %v5263_v2 }
 0xc82   : > { %6226 = vmatmul.bf16.vlgmr.msra.gmra.mxu3 %v5264_v30 }
 0xcb8   : > { %v6045_v38 = vpop.f32.mrf.mxu1 }
 0xcb9   : > { %v6084_v50 = vpop.f32.mrf.mxu0  ;;  %v6046_v59 = vadd.f32 %v14275_v23, %v6045_v38 }
 0xcc0   : > { %v6047_v0 = vpop.f32.mrf.mxu1 }
 0xcc1   : > { %v6086_v33 = vpop.f32.mrf.mxu0 }
 0xcc4   : > { %v6058_v49 = vpop.f32.mrf.mxu2 }
 0xcc5   : > { %v6071_v12 = vpop.f32.mrf.mxu3  ;;  %v6059_v48 = vadd.f32 %v6058_v49, %v6046_v59 }
 0xcc7   : > { %v6072_v55 = vadd.f32 %v6071_v12, %v6059_v48 }
 0xcc8   : > { %v6097_v1 = vpop.f32.mrf.mxu1 }
 0xcc9   : > { %v6136_v54 = vpop.f32.mrf.mxu0  ;;  %v6085_v3 = vadd.f32 %v6084_v50, %v6072_v55 }
 0xccb   : > { %v6098_v51 = vadd.f32 %v6097_v1, %v6085_v3 }
 0xccc   : > { %v6060_v11 = vpop.f32.mrf.mxu2 }
 0xccd   : > { %v6073_v22 = vpop.f32.mrf.mxu3 }
 0xcce   : > { %v14277_v22 = vld [vmem:[%s19107_s23] ss:$0 sm:$0xff] }
 0xcd0   : > { %v6099_v37 = vpop.f32.mrf.mxu1 }
 0xcd1   : > { %v6138_v14 = vpop.f32.mrf.mxu0 }
 0xcd4   : > { %v6110_v6 = vpop.f32.mrf.mxu2 }
 0xcd5   : > { %v6123_v43 = vpop.f32.mrf.mxu3  ;;  %v6111_v56 = vadd.f32 %v6110_v6, %v6098_v51 }
 0xcd7   : > { %v6124_v19 = vadd.f32 %v6123_v43, %v6111_v56  ;;  %v14278_v43 = vld [vmem:[%s19202_s4 + $0x1] ss:$0 sm:$0xff]  ;;  %s19242_s4 = sld [smem:[#allocation22_spill]] }
 0xcd8   : > { %v6149_v36 = vpop.f32.mrf.mxu1 }
 0xcd9   : > { %v6188_v52 = vpop.f32.mrf.mxu0  ;;  %v6137_v44 = vadd.f32 %v6136_v54, %v6124_v19  ;;  %v14276_v54 = vld [vmem:[%s19106_s22] ss:$0 sm:$0xff] }
 0xcdb   : > { %v6150_v13 = vadd.f32 %v6149_v36, %v6137_v44 }
 0xcdc   : > { %v6112_v28 = vpop.f32.mrf.mxu2 }
 0xcdd   : > { %v6125_v47 = vpop.f32.mrf.mxu3 }
 0xce0   : > { %v6151_v7 = vpop.f32.mrf.mxu1 }
 0xce1   : > { %v6190_v8 = vpop.f32.mrf.mxu0 }
 0xce4   : > { %v6162_v25 = vpop.f32.mrf.mxu2 }
 0xce5   : > { %v6175_v10 = vpop.f32.mrf.mxu3  ;;  %v6163_v21 = vadd.f32 %v6162_v25, %v6150_v13 }
 0xce7   : > { %v6176_v5 = vadd.f32 %v6175_v10, %v6163_v21 }
 0xce9   : > { %v6189_v62 = vadd.f32 %v6188_v52, %v6176_v5 }
 0xcec   : > { %v6164_v61 = vpop.f32.mrf.mxu2 }
 0xced   : > { %v6177_v4 = vpop.f32.mrf.mxu3 }
 0xcf8   : > { %v6201_v15 = vpop.f32.mrf.mxu1 }
 0xcf9   : > { %v6240_v29 = vpop.f32.mrf.mxu0  ;;  %v6202_v18 = vadd.f32 %v6201_v15, %v6189_v62 }
 0xd00   : > { %v6203_v31 = vpop.f32.mrf.mxu1 }
 0xd01   : > { %v6242_v42 = vpop.f32.mrf.mxu0 }
 0xd04   : > { %v6214_v53 = vpop.f32.mrf.mxu2 }
 0xd05   : > { %v6215_v24 = vadd.f32 %v6214_v53, %v6202_v18  ;;  %v6227_v45 = vpop.f32.mrf.mxu3 }
 0xd07   : > { %v6228_v20 = vadd.f32 %v6227_v45, %v6215_v24 }
 0xd09   : > { %v6241_v46 = vadd.f32 %v6240_v29, %v6228_v20 }
 0xd0b   : > { %v6244_v41 = vadd.f32 %v6241_v46, %v16331_v40  ;;  %v13806_v40 = vld [vmem:[%s19200_s1 + $0x10] sm:$0xff]  ;;  %s19245_s1 = sld [smem:[#allocation29_spill]] }
 0xd0c   : > { %v6216_v60 = vpop.f32.mrf.mxu2  ;;  %6303 = vmatpush.bf16.msrb.mxu1 %v13806_v40 }
 0xd0d   : > { %v6229_v34 = vpop.f32.mrf.mxu3  ;;  %v6247_v58 = vsel %vm866_vm0, %v6244_v41, 0.0 }
 0xd0e   : > { %6248 = vadd.xlane.f32.xlu2 %v6247_v58 }
 0xd81   : > { %v6249_v39 = vpop.xlane.xlu2 %6248 }
 0xd82   : > { %v6250_v57 = vmul.f32 %v6249_v39, %v15310_v17 }
 0xd84   : > { %v6251_v27 = vsub.f32 %v6244_v41, %v6250_v57 }
 0xd86   : > { %v6252_v26 = vmul.f32 %v6251_v27, %v6251_v27 }
 0xd88   : > { %v6253_v32 = vsel %vm866_vm0, %v6252_v26, 0.0 }
 0xd89   : > { %6254 = vadd.xlane.f32.xlu1 %v6253_v32 }
 0xdfc   : > { %v6255_v2 = vpop.xlane.xlu1 %6254 }
 0xdfd   : > { %v6256_v30 = vmul.f32 %v6255_v2, %v15310_v17 }
 0xdff   : > { %v6257_v38 = vadd.f32 1e-05, %v6256_v30 }
 0xe01   : > { %14361 = vrsqrt.f32 %v6257_v38  ;;  %vm6264_vm12 = vweird.f32 %v6257_v38 }
 0xe07   : > { %v14362_v50 = vpop.eup %14361 }
 0xe08   : > { %v6259_v0 = vmul.f32 %v14362_v50, %v6257_v38  ;;  %vm6265_vm11 = vweird.f32 %v14362_v50 }
 0xe09   : > { %vm6266_vm13 = vmor %vm6264_vm12, %vm6265_vm11 }
 0xe0a   : > { %v6260_v33 = vmul.f32 %v14362_v50, %v6259_v0 }
 0xe0c   : > { %v6261_v49 = vmul.f32 0.5, %v6260_v33 }
 0xe0e   : > { %v6262_v12 = vsub.f32 1.5, %v6261_v49 }
 0xe10   : > { %v6263_v1 = vmul.f32 %v14362_v50, %v6262_v12 }
 0xe12   : > { %v6267_v11 = vsel %vm6266_vm13, %v14362_v50, %v6263_v1 }
 0xe13   : > { %v6268_v37 = vmul.f32 %v6267_v11, %v6251_v27 }
 0xe15   : > { %v6270_v14 = vmul.f32 %v14276_v54, %v6268_v37 }
 0xe17   : > { %v16880_v23 = vadd.f32 %v14277_v22, %v6270_v14 }
 0xe19   : > { %v6278_v6 = vpack.c.bf16 %v16880_v23, %v16880_v23 }
 0xe1b   : > { %12591 = vmatmul.msk.bf16.vlgmr.msrb.gmra.mxu1 %vm866_vm0, %v6278_v6 }
 0xe98   : > { %v6305_v59 = vpop.f32.mrf.mxu1 }
 0xe99   : > { %v6306_v36 = vadd.f32 %v14278_v43, %v6305_v59 }
 0xe9b   : > { %6569 = vrot.lane.b32.xlu1 %v6306_v36, %s19210_s27  ;;  %6565 = vrot.lane.b32.xlu2 %v6306_v36, %s19215_s6  ;;  %v6315_v48 = vmul.f32 0.5, %v6306_v36 }
 0xe9c   : > { %6563 = vrot.lane.b32.xlu0 %v6306_v36, %s19214_s10 }
 0xe9d   : > { %v6340_v5 = vrot.slane %v6315_v48, 4 }
 0xea0   : > { %v6307_v52 = vpop.f32.mrf.mxu1 }
 0xea3   : > { %6575 = vrot.lane.b32.xlu1 %v6306_v36, %s19211_s0  ;;  %6573 = vrot.lane.b32.xlu2 %v6306_v36, %s19213_s5 }
 0xea4   : > { %6567 = vrot.lane.b32.xlu0 %v6306_v36, %s19203_s7 }
 0xeab   : > { %6320 = vrot.lane.b32.xlu1 %v6315_v48, %s19215_s6  ;;  %6317 = vrot.lane.b32.xlu2 %v6315_v48, %s19214_s10 }
 0xeac   : > { %6571 = vrot.lane.b32.xlu0 %v6306_v36, %s19212_s29 }
 0xeb4   : > { %6326 = vrot.lane.b32.xlu0 %v6315_v48, %s19210_s27 }
 0xef5   : > { %v6566_v28 = vpop.permute.xlu2 %6565 }
 0xefd   : > { %v6574_v3 = vpop.permute.xlu2 %6573 }
 0xf05   : > { %v6318_v61 = vpop.permute.xlu2 %6317 }
 0xf06   : > { %v6352_v29 = vrot.slane %v6318_v61, 4 }
 0xf0d   : > { %v6570_v47 = vpop.permute.xlu1 %6569 }
 0xf0e   : > { %v16898_v55 = vpack.i.bf16 %v6570_v47, %v6566_v28  ;;  %v6564_v7 = vpop.permute.xlu0 %6563 }
 0xf0f   : > { %v14151_v8 = vpack.i.bf16 %v6564_v7, %v6306_v36 }
 0xf10   : > { %14157 = vrot.lane.b32.xlu2 %v16898_v55, %s19220_s3 }
 0xf11   : > { %14152 = vrot.lane.b32.xlu0 %v14151_v8, %s19220_s3 }
 0xf15   : > { %v6576_v25 = vpop.permute.xlu1 %6575 }
 0xf16   : > { %v16903_v10 = vpack.i.bf16 %v6576_v25, %v6574_v3  ;;  %v6568_v51 = vpop.permute.xlu0 %6567 }
 0xf18   : > { %6323 = vrot.lane.b32.xlu2 %v6315_v48, %s19203_s7 }
 0xf19   : > { %14167 = vrot.lane.b32.xlu0 %v16903_v10, %s19220_s3 }
 0xf1d   : > { %v6321_v13 = vpop.permute.xlu1 %6320 }
 0xf1e   : > { %v6572_v56 = vpop.permute.xlu0 %6571  ;;  %v6338_v21 = vrot.slane %v6321_v13, 4  ;;  %v6341_v42 = vsel %vm912_vm1, %v6321_v13, %v6340_v5 }
 0xf1f   : > { %v16908_v19 = vpack.i.bf16 %v6572_v56, %v6568_v51  ;;  %v6349_v45 = vperm.slane %v6341_v42, %v14770_v35 }
 0xf20   : > { %6335 = vrot.lane.b32.xlu2 %v6315_v48, %s19211_s0  ;;  %v6339_v53 = vsel %vm912_vm1, %v6338_v21, %v6315_v48 }
 0xf21   : > { %6332 = vrot.lane.b32.xlu0 %v6315_v48, %s19213_s5  ;;  %14162 = vrot.lane.b32.xlu1 %v16908_v19, %s19220_s3  ;;  %v6345_v41 = vperm.slane %v6339_v53, %v14770_v35  ;;  %v6400_v57 = vrot.slane %v6349_v45, 4 }
 0xf23   : > { %v6388_v16 = vrot.slane %v6345_v41, 4 }
 0xf26   : > { %v16916_v44 = vpop.permute.xlu0 %6326 }
 0xf27   : > { %v6364_v37 = vrot.slane %v16916_v44, 4 }
 0xf29   : > { %14172 = vrot.lane.b32.xlu0 %v14151_v8, %s19233_s18  ;;  %6329 = vrot.lane.b32.xlu1 %v6315_v48, %s19212_s29 }
 0xf6a   : > { %v14158_v4 = vpop.permute.xlu2 %14157 }
 0xf6b   : > { %v14159_v60 = vunpack.i.l.bf16 %v14158_v4  ;;  %v14160_v58 = vunpack.i.h.bf16 %v14158_v4 }
 0xf6d   : > { %v6601_v40 = vrot.slane %v14159_v60, 4  ;;  %v6627_v50 = vrot.slane %v14160_v58, 4 }
 0xf72   : > { %v6324_v15 = vpop.permute.xlu2 %6323 }
 0xf73   : > { %v6350_v31 = vrot.slane %v6324_v15, 4  ;;  %v6353_v18 = vsel %vm912_vm1, %v6324_v15, %v6352_v29 }
 0xf74   : > { %v6361_v20 = vperm.slane %v6353_v18, %v14770_v35 }
 0xf75   : > { %v6351_v24 = vsel %vm912_vm1, %v6350_v31, %v6318_v61 }
 0xf76   : > { %v6357_v34 = vperm.slane %v6351_v24, %v14770_v35  ;;  %v6398_v27 = vrot.slane %v6361_v20, 4  ;;  %v6401_v30 = vsel %vm912_vm1, %v6361_v20, %v6400_v57 }
 0xf77   : > { %v16932_v54 = vperm.slane %v6401_v30, %v14796_v9 }
 0xf78   : > { %v6386_v2 = vrot.slane %v6357_v34, 4  ;;  %v6389_v0 = vsel %vm912_vm1, %v6357_v34, %v6388_v16  ;;  %v6399_v33 = vsel %vm912_vm1, %v6398_v27, %v6349_v45 }
 0xf79   : > { %v16939_v43 = vperm.slane %v6389_v0, %v14796_v9  ;;  %v16942_v59 = vperm.slane %v6399_v33, %v14796_v9  ;;  %v6448_v51 = vrot.slane %v16932_v54, 4 }
 0xf7a   : > { %v6387_v14 = vsel %vm912_vm1, %v6386_v2, %v6345_v41 }
 0xf7b   : > { %v16948_v25 = vperm.slane %v6387_v14, %v14796_v9 }
 0xf83   : > { %v14153_v62 = vpop.permute.xlu0 %14152 }
 0xf84   : > { %v14154_v46 = vunpack.i.l.bf16 %v14153_v62  ;;  %v14155_v11 = vunpack.i.h.bf16 %v14153_v62 }
 0xf86   : > { %v6603_v26 = vrot.slane %v14154_v46, 4  ;;  %v6602_v49 = vsel %vm912_vm1, %v6601_v40, %v14154_v46  ;;  %v6615_v56 = vrot.slane %v14155_v11, 4 }
 0xf87   : > { %v6608_v36 = vperm.slane %v6602_v49, %v14770_v35 }
 0xf88   : > { %v6604_v12 = vsel %vm912_vm1, %v14159_v60, %v6603_v26 }
 0xf89   : > { %v6612_v52 = vperm.slane %v6604_v12, %v14770_v35  ;;  %v6651_v29 = vrot.slane %v6608_v36, 4 }
 0xf8b   : > { %v14168_v39 = vpop.permute.xlu0 %14167  ;;  %v6663_v5 = vrot.slane %v6612_v52, 4 }
 0xf8c   : > { %v14169_v32 = vunpack.i.l.bf16 %v14168_v39  ;;  %v14170_v1 = vunpack.i.h.bf16 %v14168_v39 }
 0xf8e   : > { %v6625_v38 = vrot.slane %v14169_v32, 4  ;;  %v6628_v6 = vsel %vm912_vm1, %v14169_v32, %v6627_v50  ;;  %v6637_v47 = vrot.slane %v14170_v1, 4 }
 0xf8f   : > { %v6636_v61 = vperm.slane %v6628_v6, %v14770_v35 }
 0xf90   : > { %v6626_v22 = vsel %vm912_vm1, %v6625_v38, %v14160_v58 }
 0xf91   : > { %v6632_v7 = vperm.slane %v6626_v22, %v14770_v35  ;;  %v6687_v45 = vrot.slane %v6636_v61, 4 }
 0xf93   : > { %v6333_v48 = vpop.permute.xlu0 %6332  ;;  %v14163_v28 = vpop.permute.xlu1 %14162  ;;  %v6675_v42 = vrot.slane %v6632_v7, 4 }
 0xf94   : > { %v14165_v8 = vunpack.i.h.bf16 %v14163_v28  ;;  %v14164_v3 = vunpack.i.l.bf16 %v14163_v28  ;;  %v6362_v4 = vrot.slane %v6333_v48, 4 }
 0xf96   : > { %v6638_v13 = vsel %vm912_vm1, %v6637_v47, %v14165_v8  ;;  %v6639_v15 = vrot.slane %v14165_v8, 4  ;;  %v6613_v21 = vrot.slane %v14164_v3, 4  ;;  %v6616_v62 = vsel %vm912_vm1, %v14164_v3, %v6615_v56 }
 0xf97   : > { %v6644_v31 = vperm.slane %v6638_v13, %v14770_v35  ;;  %v6624_v24 = vperm.slane %v6616_v62, %v14770_v35  ;;  %v6363_v60 = vsel %vm912_vm1, %v6362_v4, %v16916_v44  ;;  %v6444_v62 = vrot.slane %v16942_v59, 4 }
 0xf98   : > { %v6640_v18 = vsel %vm912_vm1, %v14170_v1, %v6639_v15  ;;  %v6614_v53 = vsel %vm912_vm1, %v6613_v21, %v14155_v11  ;;  %v6365_v11 = vsel %vm912_vm1, %v6333_v48, %v6364_v37  ;;  %v6369_v22 = vperm.slane %v6363_v60, %v14770_v35 }
 0xf99   : > { %v6648_v20 = vperm.slane %v6640_v18, %v14770_v35  ;;  %v6673_v46 = vrot.slane %v6644_v31, 4  ;;  %v6620_v41 = vperm.slane %v6614_v53, %v14770_v35  ;;  %v6661_v34 = vrot.slane %v6624_v24, 4 }
 0xf9a   : > { %v6664_v58 = vsel %vm912_vm1, %v6624_v24, %v6663_v5  ;;  %v6676_v39 = vsel %vm912_vm1, %v6644_v31, %v6675_v42  ;;  %v6440_v21 = vrot.slane %v16939_v43, 4  ;;  %v6373_v5 = vperm.slane %v6365_v11, %v14770_v35 }
 0xf9b   : > { %v6685_v57 = vrot.slane %v6648_v20, 4  ;;  %v6649_v27 = vrot.slane %v6620_v41, 4  ;;  %v6652_v26 = vsel %vm912_vm1, %v6620_v41, %v6651_v29  ;;  %v6672_v32 = vperm.slane %v6664_v58, %v14796_v9  ;;  %v6330_v15 = vpop.permute.xlu1 %6329 }
 0xf9c   : > { %v6660_v16 = vperm.slane %v6652_v26, %v14796_v9  ;;  %v6662_v40 = vsel %vm912_vm1, %v6661_v34, %v6612_v52  ;;  %v6674_v2 = vsel %vm912_vm1, %v6673_v46, %v6632_v7  ;;  %v6684_v30 = vperm.slane %v6676_v39, %v14796_v9 }
 0xf9d   : > { %v6650_v44 = vsel %vm912_vm1, %v6649_v27, %v6608_v36  ;;  %v6668_v38 = vperm.slane %v6662_v40, %v14796_v9  ;;  %v6680_v50 = vperm.slane %v6674_v2, %v14796_v9  ;;  %v6686_v0 = vsel %vm912_vm1, %v6685_v57, %v6636_v61  ;;  %v6336_v36 = vpop.permute.xlu2 %6335 }
 0xf9e   : > { %v6656_v33 = vperm.slane %v6650_v44, %v14796_v9  ;;  %v6688_v49 = vsel %vm912_vm1, %v6648_v20, %v6687_v45  ;;  %v6692_v12 = vperm.slane %v6686_v0, %v14796_v9  ;;  %v6701_v1 = vrot.slane %v6684_v30, 4 }
 0xf9f   : > { %v6696_v14 = vperm.slane %v6688_v49, %v14796_v9  ;;  %v6703_v6 = vrot.slane %v6660_v16, 4  ;;  %v6697_v52 = vrot.slane %v6680_v50, 4  ;;  %v6711_v7 = vrot.slane %v6672_v32, 4 }
 0xfa0   : > { %v6699_v28 = vrot.slane %v6656_v33, 4  ;;  %v16981_v47 = vsel %vm912_vm1, %v6701_v1, %v6660_v16  ;;  %v6705_v3 = vrot.slane %v6692_v12, 4  ;;  %v6707_v56 = vrot.slane %v6668_v38, 4 }
 0xfa1   : > { %v16984_v8 = vsel %vm912_vm1, %v6684_v30, %v6703_v6  ;;  %v6709_v61 = vrot.slane %v6696_v14, 4  ;;  %v16990_v48 = vsel %vm912_vm1, %v6696_v14, %v6711_v7  ;;  %v6713_v4 = vrot.slane %v16981_v47, 4 }
 0xfa2   : > { %v16987_v37 = vsel %vm912_vm1, %v6680_v50, %v6699_v28  ;;  %v6725_v13 = vrot.slane %v16984_v8, 4  ;;  %v6374_v29 = vrot.slane %v6336_v36, 4  ;;  %v6412_v42 = vrot.slane %v6369_v22, 4 }
 0xfa3   : > { %v16997_v31 = vsel %vm912_vm1, %v6709_v61, %v6672_v32  ;;  %v6749_v53 = vrot.slane %v16990_v48, 4  ;;  %v6376_v45 = vrot.slane %v6330_v15, 4  ;;  %v17004_v20 = vsel %vm912_vm1, %v6697_v52, %v6656_v33 }
 0xfa4   : > { %v6737_v18 = vrot.slane %v16997_v31, 4  ;;  %v6375_v24 = vsel %vm912_vm1, %v6374_v29, %v6330_v15  ;;  %v6726_v46 = vsel %vm912_vm1, %v6725_v13, %v16987_v37  ;;  %v17009_v41 = vsel %vm912_vm1, %v6705_v3, %v6668_v38 }
 0xfa5   : > { %v17012_v60 = vsel %vm912_vm1, %v6692_v12, %v6707_v56  ;;  %v6381_v34 = vperm.slane %v6375_v24, %v14770_v35  ;;  %v6714_v58 = vsel %vm912_vm1, %v6713_v4, %v17004_v20  ;;  %v6436_v39 = vrot.slane %v16948_v25, 4 }
 0xfa6   : > { %v6424_v57 = vrot.slane %v6373_v5, 4  ;;  %v6727_v27 = vrot.slane %v16987_v37, 4  ;;  %v6377_v26 = vsel %vm912_vm1, %v6336_v36, %v6376_v45  ;;  %v17023_v2 = vperm.slane %v6726_v46, %v14770_v35 }
 0xfa7   : > { %v6385_v32 = vperm.slane %v6377_v26, %v14770_v35  ;;  %v6410_v16 = vrot.slane %v6381_v34, 4  ;;  %v6413_v40 = vsel %vm912_vm1, %v6381_v34, %v6412_v42  ;;  %v17027_v44 = vperm.slane %v6714_v58, %v14770_v35 }
 0xfa8   : > { %v6421_v30 = vperm.slane %v6413_v40, %v14796_v9  ;;  %v6738_v38 = vsel %vm912_vm1, %v6737_v18, %v17009_v41  ;;  %v6750_v50 = vsel %vm912_vm1, %v6749_v53, %v17012_v60 }
 0xfa9   : > { %v6411_v0 = vsel %vm912_vm1, %v6410_v16, %v6369_v22  ;;  %v6422_v33 = vrot.slane %v6385_v32, 4  ;;  %v6425_v49 = vsel %vm912_vm1, %v6385_v32, %v6424_v57  ;;  %v17036_v12 = vperm.slane %v6750_v50, %v14770_v35 }
 0xfaa   : > { %v6417_v1 = vperm.slane %v6411_v0, %v14796_v9  ;;  %v6433_v11 = vperm.slane %v6425_v49, %v14796_v9  ;;  %v6438_v14 = vrot.slane %v6421_v30, 4  ;;  %v6441_v6 = vsel %vm912_vm1, %v6421_v30, %v6440_v21 }
 0xfab   : > { %v6423_v36 = vsel %vm912_vm1, %v6422_v33, %v6373_v5  ;;  %v6462_v52 = vrot.slane %v6441_v6, 4  ;;  %v6744_v28 = vperm.slane %v6738_v38, %v14770_v35  ;;  %v6761_v22 = vrot.slane %v17023_v2, 4 }
 0xfac   : > { %v6429_v7 = vperm.slane %v6423_v36, %v14796_v9  ;;  %v6434_v3 = vrot.slane %v6417_v1, 4  ;;  %v6437_v56 = vsel %vm912_vm1, %v6417_v1, %v6436_v39  ;;  %v6439_v61 = vsel %vm912_vm1, %v6438_v14, %v16939_v43 }
 0xfad   : > { %v6446_v4 = vrot.slane %v6433_v11, 4  ;;  %v6449_v13 = vsel %vm912_vm1, %v6433_v11, %v6448_v51  ;;  %v6450_v15 = vrot.slane %v6439_v61, 4  ;;  %v6785_v21 = vrot.slane %v17036_v12, 4 }
 0xfae   : > { %v6435_v29 = vsel %vm912_vm1, %v6434_v3, %v16948_v25  ;;  %v6442_v5 = vrot.slane %v6429_v7, 4  ;;  %v6463_v42 = vsel %vm912_vm1, %v6462_v52, %v6437_v56  ;;  %v6464_v18 = vrot.slane %v6437_v56, 4 }
 0xfaf   : > { %v6445_v53 = vsel %vm912_vm1, %v6429_v7, %v6444_v62  ;;  %v6447_v43 = vsel %vm912_vm1, %v6446_v4, %v16932_v54  ;;  %v6451_v24 = vsel %vm912_vm1, %v6450_v15, %v6435_v29  ;;  %v6452_v45 = vrot.slane %v6435_v29, 4 }
 0xfb0   : > { %v6443_v51 = vsel %vm912_vm1, %v6442_v5, %v16942_v59  ;;  %v17062_v46 = vperm.slane %v6451_v24, %v14770_v35  ;;  %v6465_v25 = vsel %vm912_vm1, %v6441_v6, %v6464_v18  ;;  %v6474_v34 = vrot.slane %v6447_v43, 4 }
 0xfb1   : > { %v6453_v58 = vsel %vm912_vm1, %v6439_v61, %v6452_v45  ;;  %v17067_v39 = vperm.slane %v6463_v42, %v14770_v35  ;;  %v6476_v62 = vrot.slane %v6443_v51, 4  ;;  %v6486_v57 = vrot.slane %v6449_v13, 4 }
 0xfb2   : > { %v17070_v54 = vperm.slane %v6453_v58, %v14770_v35  ;;  %v17073_v26 = vperm.slane %v6465_v25, %v14770_v35  ;;  %v6475_v59 = vsel %vm912_vm1, %v6474_v34, %v6443_v51  ;;  %v6488_v32 = vrot.slane %v6445_v53, 4 }
 0xfb3   : > { %v6477_v16 = vsel %vm912_vm1, %v6447_v43, %v6476_v62  ;;  %v17078_v40 = vperm.slane %v6475_v59, %v14770_v35  ;;  %v6487_v30 = vsel %vm912_vm1, %v6486_v57, %v6445_v53  ;;  %v6500_v38 = vrot.slane %v17062_v46, 4 }
 0xfb4   : > { %v6739_v50 = vrot.slane %v17009_v41, 4  ;;  %v6489_v0 = vsel %vm912_vm1, %v6449_v13, %v6488_v32  ;;  %v17085_v33 = vperm.slane %v6487_v30, %v14770_v35  ;;  %v6762_v49 = vsel %vm912_vm1, %v6761_v22, %v17027_v44 }
 0xfb5   : > { %v6751_v1 = vrot.slane %v17012_v60, 4  ;;  %v6498_v11 = vrot.slane %v17067_v39, 4  ;;  %v6501_v14 = vsel %vm912_vm1, %v17067_v39, %v6500_v38  ;;  %v6715_v6 = vrot.slane %v17004_v20, 4 }
 0xfb6   : > { %v17095_v36 = vperm.slane %v6477_v16, %v14770_v35  ;;  %v17098_v41 = vperm.slane %v6489_v0, %v14770_v35  ;;  %v6510_v52 = vrot.slane %v17073_v26, 4  ;;  %v6512_v7 = vrot.slane %v17070_v54, 4 }
 0xfb7   : > { %v17103_v22 = vperm.slane %v6501_v14, %v14796_v9  ;;  %v6524_v60 = vrot.slane %v17078_v40, 4  ;;  %v6768_v3 = vperm.slane %v6762_v49, %v14796_v9  ;;  %v6786_v56 = vsel %vm912_vm1, %v6785_v21, %v6744_v28 }
 0xfb8   : > { %v6522_v20 = vrot.slane %v17085_v33, 4  ;;  %v6792_v61 = vperm.slane %v6786_v56, %v14796_v9  ;;  %v6763_v4 = vrot.slane %v17027_v44, 4  ;;  %v6787_v13 = vrot.slane %v6744_v28, 4 }
 0xfb9   : > { %v6811_v15 = vrot.slane %v6768_v3, 4  ;;  %v6716_v29 = vsel %vm912_vm1, %v16981_v47, %v6715_v6  ;;  %v6728_v5 = vsel %vm912_vm1, %v16984_v8, %v6727_v27  ;;  %v6740_v42 = vsel %vm912_vm1, %v16997_v31, %v6739_v50 }
 0xfba   : > { %v6809_v21 = vrot.slane %v6792_v61, 4  ;;  %v6764_v18 = vsel %vm912_vm1, %v17023_v2, %v6763_v4  ;;  %v6788_v44 = vsel %vm912_vm1, %v17036_v12, %v6787_v13  ;;  %v6724_v28 = vperm.slane %v6716_v29, %v14770_v35 }
 0xfbb   : > { %v6772_v53 = vperm.slane %v6764_v18, %v14796_v9  ;;  %v6796_v47 = vperm.slane %v6788_v44, %v14796_v9  ;;  %v6812_v37 = vsel %vm912_vm1, %v6792_v61, %v6811_v15  ;;  %v6736_v8 = vperm.slane %v6728_v5, %v14770_v35 }
 0xfbc   : > { %v6810_v27 = vsel %vm912_vm1, %v6809_v21, %v6768_v3  ;;  %v7082_v31 = vpack.c.bf16 %v6812_v37, %v6812_v37  ;;  %v6748_v43 = vperm.slane %v6740_v42, %v14770_v35  ;;  %v6752_v2 = vsel %vm912_vm1, %v16990_v48, %v6751_v1 }
 0xfbd   : > { %v7081_v24 = vpack.c.bf16 %v6810_v27, %v6810_v27  ;;  %v6815_v12 = vrot.slane %v6772_v53, 4  ;;  %v6813_v45 = vrot.slane %v6796_v47, 4  ;;  %v6760_v51 = vperm.slane %v6752_v2, %v14770_v35 }
 0xfbe   : > { %v7112_v25 = vsel %vm1663_vm2, %v7082_v31, 0  ;;  %v6773_v34 = vrot.slane %v6736_v8, 4  ;;  %v6775_v58 = vrot.slane %v6724_v28, 4  ;;  %v6799_v39 = vrot.slane %v6748_v43, 4 }
 0xfbf   : > { %v7093_v62 = vsel %vm1663_vm2, %v7081_v24, 0  ;;  %v6816_v57 = vsel %vm912_vm1, %v6796_v47, %v6815_v12  ;;  %7121 = vmatpush.bf16.xpose.msrb.mxu3 %v7112_v25  ;;  %v6814_v59 = vsel %vm912_vm1, %v6813_v45, %v6772_v53  ;;  %v6797_v32 = vrot.slane %v6760_v51, 4 }
 0xfc0   : > { %7102 = vmatpush.bf16.xpose.msrb.mxu2 %v7093_v62  ;;  %v7084_v48 = vpack.c.bf16 %v6816_v57, %v6816_v57  ;;  %v7083_v16 = vpack.c.bf16 %v6814_v59, %v6814_v59  ;;  %v6774_v30 = vsel %vm912_vm1, %v6773_v34, %v6724_v28  ;;  %v6776_v38 = vsel %vm912_vm1, %v6736_v8, %v6775_v58 }
 0xfc1   : > { %v6780_v50 = vperm.slane %v6774_v30, %v14796_v9  ;;  %v6798_v0 = vsel %vm912_vm1, %v6797_v32, %v6748_v43  ;;  %v6784_v49 = vperm.slane %v6776_v38, %v14796_v9  ;;  %v6800_v1 = vsel %vm912_vm1, %v6760_v51, %v6799_v39 }
 0xfc2   : > { %v7150_v14 = vsel %vm1663_vm2, %v7084_v48, 0  ;;  %v7131_v6 = vsel %vm1663_vm2, %v7083_v16, 0  ;;  %v6804_v3 = vperm.slane %v6798_v0, %v14796_v9  ;;  %v6808_v56 = vperm.slane %v6800_v1, %v14796_v9 }
 0xfc3   : > { %7159 = vmatpush.bf16.xpose.msra.mxu1 %v7150_v14  ;;  %7140 = vmatpush.bf16.xpose.msra.mxu0 %v7131_v6  ;;  %v6823_v61 = vrot.slane %v6784_v49, 4  ;;  %v6819_v4 = vrot.slane %v6780_v50, 4  ;;  %v6499_v13 = vsel %vm912_vm1, %v6498_v11, %v17062_v46  ;;  %v6523_v15 = vsel %vm912_vm1, %v6522_v20, %v17078_v40 }
 0xfc4   : > { %v6817_v29 = vrot.slane %v6804_v3, 4  ;;  %v6821_v5 = vrot.slane %v6808_v56, 4  ;;  %v6505_v42 = vperm.slane %v6499_v13, %v14796_v9  ;;  %v6529_v21 = vperm.slane %v6523_v15, %v14796_v9 }
 0xfc5   : > { %v6824_v18 = vsel %vm912_vm1, %v6808_v56, %v6823_v61  ;;  %v6820_v44 = vsel %vm912_vm1, %v6804_v3, %v6819_v4  ;;  %v6525_v28 = vsel %vm912_vm1, %v17085_v33, %v6524_v60  ;;  %v6552_v53 = vrot.slane %v17103_v22, 4  ;;  %v14434_v4 = vld [vmem:[%s15029_s28] sm:$0xff]  ;;  %s19234_s28 = smov 12  }
 0xfc6   : > { %v6818_v46 = vsel %vm912_vm1, %v6817_v29, %v6780_v50  ;;  %v7088_v11 = vpack.c.bf16 %v6824_v18, %v6824_v18  ;;  %v7086_v47 = vpack.c.bf16 %v6820_v44, %v6820_v44  ;;  %v6822_v40 = vsel %vm912_vm1, %v6821_v5, %v6784_v49 }
 0xfc7   : > { %v7085_v20 = vpack.c.bf16 %v6818_v46, %v6818_v46  ;;  %v7087_v37 = vpack.c.bf16 %v6822_v40, %v6822_v40  ;;  %v6546_v8 = vrot.slane %v6529_v21, 4  ;;  %v6533_v27 = vperm.slane %v6525_v28, %v14796_v9 }
 0xfc8   : > { %v6534_v31 = vrot.slane %v17098_v41, 4  ;;  %v7226_v43 = vsel %vm1663_vm2, %v7088_v11, 0  ;;  %v7188_v2 = vsel %vm1663_vm2, %v7086_v47, 0  ;;  %v6548_v33 = vrot.slane %v6505_v42, 4 }
 0xfc9   : > { %v7169_v60 = vsel %vm1663_vm2, %v7085_v20, 0  ;;  %7197 = vmatpush.bf16.xpose.msra.mxu3 %v7188_v2  ;;  %v7207_v24 = vsel %vm1663_vm2, %v7087_v37, 0  ;;  %v6547_v12 = vsel %vm912_vm1, %v6546_v8, %v6505_v42  ;;  %v6553_v45 = vsel %vm912_vm1, %v6533_v27, %v6552_v53 }
 0xfca   : > { %7178 = vmatpush.bf16.xpose.msra.mxu2 %v7169_v60  ;;  %v7073_v51 = vpack.c.bf16 %v6547_v12, %v6547_v12  ;;  %v7076_v25 = vpack.c.bf16 %v6553_v45, %v6553_v45  ;;  %v6549_v34 = vsel %vm912_vm1, %v6529_v21, %v6548_v33  ;;  %v6550_v58 = vrot.slane %v6533_v27, 4 }
 0xfcb   : > { %7235 = vmatpush.bf16.xpose.msrb.mxu1 %v7226_v43  ;;  %7216 = vmatpush.bf16.xpose.msrb.mxu0 %v7207_v24  ;;  %v6536_v39 = vrot.slane %v17095_v36, 4  ;;  %v7074_v62 = vpack.c.bf16 %v6549_v34, %v6549_v34  ;;  %v6513_v57 = vsel %vm912_vm1, %v17073_v26, %v6512_v7  ;;  %v6535_v32 = vsel %vm912_vm1, %v6534_v31, %v17095_v36 }
 0xfcc   : > { %12596 = vmatmul.msk.bf16.vlgmr.msrb.gmra.mxu2 %vm1663_vm2, %v7073_v51  ;;  %12599 = vmatmul.msk.bf16.vlgmr.msra.gmra.mxu1 %vm1663_vm2, %v7076_v25  ;;  %v6551_v59 = vsel %vm912_vm1, %v6550_v58, %v17103_v22  ;;  %v6511_v48 = vsel %vm912_vm1, %v6510_v52, %v17070_v54  ;;  %v6521_v7 = vperm.slane %v6513_v57, %v14796_v9 }
 0xfcd   : > { %12597 = vmatmul.msk.bf16.vlgmr.msrb.gmra.mxu3 %vm1663_vm2, %v7074_v62  ;;  %v7075_v16 = vpack.c.bf16 %v6551_v59, %v6551_v59  ;;  %v6541_v30 = vperm.slane %v6535_v32, %v14796_v9  ;;  %v6537_v22 = vsel %vm912_vm1, %v17098_v41, %v6536_v39  ;;  %v6517_v38 = vperm.slane %v6511_v48, %v14796_v9  ;;  %v17218_v62 = vpop.permute.xlu0 %14172 }
 0xfce   : > { %v6545_v36 = vperm.slane %v6537_v22, %v14796_v9  ;;  %v6560_v26 = vrot.slane %v6521_v7, 4 }
 0xfcf   : > { %12598 = vmatmul.msk.bf16.vlgmr.msra.gmra.mxu0 %vm1663_vm2, %v7075_v16  ;;  %v6554_v50 = vrot.slane %v6541_v30, 4  ;;  %v6556_v54 = vrot.slane %v6517_v38, 4 }
 0xfd0   : > { %v6558_v52 = vrot.slane %v6545_v36, 4  ;;  %v6561_v49 = vsel %vm912_vm1, %v6545_v36, %v6560_v26 }
 0xfd1   : > { %v6555_v0 = vsel %vm912_vm1, %v6554_v50, %v6517_v38  ;;  %v6557_v1 = vsel %vm912_vm1, %v6541_v30, %v6556_v54  ;;  %v7080_v6 = vpack.c.bf16 %v6561_v49, %v6561_v49 }
 0xfd2   : > { %v7077_v14 = vpack.c.bf16 %v6555_v0, %v6555_v0  ;;  %v6559_v3 = vsel %vm912_vm1, %v6558_v52, %v6521_v7  ;;  %v7078_v41 = vpack.c.bf16 %v6557_v1, %v6557_v1 }
 0xfd3   : > { %v7079_v56 = vpack.c.bf16 %v6559_v3, %v6559_v3 }
 0xfdc   : > { %12600 = vmatmul.msk.bf16.vlgmr.msra.gmra.mxu2 %vm1663_vm2, %v7077_v14  ;;  %12603 = vmatmul.msk.bf16.vlgmr.msrb.gmra.mxu1 %vm1663_vm2, %v7080_v6 }
 0xfdd   : > { %12601 = vmatmul.msk.bf16.vlgmr.msra.gmra.mxu3 %vm1663_vm2, %v7078_v41 }
 0xfdf   : > { %12602 = vmatmul.msk.bf16.vlgmr.msrb.gmra.mxu0 %vm1663_vm2, %v7079_v56 }
0x1049   : > { %v7161_v61 = vpop.f32.mrf.mxu1 }
0x104a   : > { %v7162_v13 = vadd.f32 %v14434_v4, %v7161_v61 }
0x104c   : > { %v7142_v15 = vpop.f32.mrf.mxu0  ;;  %v7250_v29 = vsel %vm1816_vm3, %v7162_v13, -inf }
0x104d   : > { %v7143_v5 = vadd.f32 %v14434_v4, %v7142_v15  ;;  %7251 = vmax.xlane.f32.xlu1 %v7250_v29 }
0x104f   : > { %v7247_v42 = vsel %vm1816_vm3, %v7143_v5, -inf  ;;  %v7104_v21 = vpop.f32.mrf.mxu2 }
0x1050   : > { %7248 = vmax.xlane.f32.xlu2 %v7247_v42  ;;  %v7105_v18 = vadd.f32 %v14434_v4, %v7104_v21  ;;  %v7123_v44 = vpop.f32.mrf.mxu3  ;;  %v14175_v21 = vunpack.i.h.bf16 %v17218_v62 }
0x1051   : > { %v7124_v28 = vadd.f32 %v14434_v4, %v7123_v44  ;;  %v7163_v53 = vpop.f32.mrf.mxu1 }
0x1052   : > { %v7241_v47 = vsel %vm1816_vm3, %v7105_v18, -inf }
0x1053   : > { %v7244_v46 = vsel %vm1816_vm3, %v7124_v28, -inf }
0x1054   : > { %v7144_v11 = vpop.f32.mrf.mxu0  ;;  %7245 = vmax.xlane.f32.xlu0 %v7244_v46 }
0x1055   : > { %7242 = vmax.xlane.f32.xlu1 %v7241_v47  ;;  %v6863_v47 = vrot.slane %v14175_v21, 4 }
0x1057   : > { %v7106_v40 = vpop.f32.mrf.mxu2 }
0x1058   : > { %v7125_v20 = vpop.f32.mrf.mxu3 }
0x1059   : > { %v7237_v37 = vpop.f32.mrf.mxu1 }
0x105a   : > { %v17205_v8 = vadd.f32 %v14434_v4, %v7237_v37 }
0x105c   : > { %v7218_v27 = vpop.f32.mrf.mxu0  ;;  %v7262_v31 = vsel %vm1816_vm3, %v17205_v8, -inf }
0x105d   : > { %v7219_v43 = vadd.f32 %v14434_v4, %v7218_v27  ;;  %7263 = vmax.xlane.f32.xlu2 %v7262_v31  ;;  %v14174_v31 = vunpack.i.l.bf16 %v17218_v62 }
0x105f   : > { %v7180_v2 = vpop.f32.mrf.mxu2  ;;  %v7259_v33 = vsel %vm1816_vm3, %v7219_v43, -inf }
0x1060   : > { %v7181_v60 = vadd.f32 %v14434_v4, %v7180_v2  ;;  %7260 = vmax.xlane.f32.xlu1 %v7259_v33  ;;  %v7199_v24 = vpop.f32.mrf.mxu3 }
0x1061   : > { %v7200_v12 = vadd.f32 %v14434_v4, %v7199_v24  ;;  %v7239_v45 = vpop.f32.mrf.mxu1 }
0x1062   : > { %v7253_v34 = vsel %vm1816_vm3, %v7181_v60, -inf }
0x1063   : > { %v7256_v51 = vsel %vm1816_vm3, %v7200_v12, -inf }
0x1064   : > { %v7220_v25 = vpop.f32.mrf.mxu0  ;;  %7257 = vmax.xlane.f32.xlu0 %v7256_v51 }
0x1065   : > { %7254 = vmax.xlane.f32.xlu2 %v7253_v34  ;;  %v6851_v34 = vrot.slane %v14174_v31, 4 }
0x1067   : > { %v7182_v58 = vpop.f32.mrf.mxu2 }
0x1068   : > { %v7201_v39 = vpop.f32.mrf.mxu3 }
0x1078   : > { %14187 = vrot.lane.b32.xlu0 %v16903_v10, %s19233_s18 }
0x1079   : > { %14177 = vrot.lane.b32.xlu1 %v16898_v55, %s19233_s18 }
0x107d   : > { %14182 = vrot.lane.b32.xlu2 %v16908_v19, %s19233_s18 }
0x10c0   : > { %v7252_v57 = vpop.xlane.xlu1 %7251 }
0x10c1   : > { %v7268_v36 = vsub.f32 %v7162_v13, %v7252_v57 }
0x10c3   : > { %v7249_v59 = vpop.xlane.xlu2 %7248  ;;  %v7279_v50 = vmul.f32 1.442695, %v7268_v36 }
0x10c4   : > { %v7267_v32 = vsub.f32 %v7143_v5, %v7249_v59 }
0x10c6   : > { %v7277_v48 = vmul.f32 1.442695, %v7267_v32 }
0x10c7   : > { %v7246_v16 = vpop.xlane.xlu0 %7245 }
0x10c8   : > { %14363 = vpow2.f32 %v7277_v48  ;;  %v7266_v7 = vsub.f32 %v7124_v28, %v7246_v16  ;;  %v7243_v30 = vpop.xlane.xlu1 %7242 }
0x10c9   : > { %v7265_v22 = vsub.f32 %v7105_v18, %v7243_v30 }
0x10ca   : > { %v7275_v38 = vmul.f32 1.442695, %v7266_v7 }
0x10cb   : > { %v7273_v10 = vmul.f32 1.442695, %v7265_v22 }
0x10cc   : > { %14365 = vpow2.f32 %v7275_v38 }
0x10cd   : > { %14367 = vpow2.f32 %v7273_v10 }
0x10ce   : > { %v17220_v55 = vpop.eup %14363  ;;  %14369 = vpow2.f32 %v7279_v50 }
0x10cf   : > { %v7295_v19 = vsel %vm1816_vm3, %v17220_v55, 0.0 }
0x10d0   : > { %7296 = vadd.xlane.f32.xlu2 %v7295_v19  ;;  %v7264_v26 = vpop.xlane.xlu2 %7263 }
0x10d1   : > { %v7272_v15 = vsub.f32 %v17205_v8, %v7264_v26 }
0x10d2   : > { %v17224_v54 = vpop.eup %14365 }
0x10d3   : > { %v17226_v52 = vpop.eup %14367  ;;  %v7261_v0 = vpop.xlane.xlu1 %7260  ;;  %v7292_v49 = vsel %vm1816_vm3, %v17224_v54, 0.0  ;;  %v7287_v42 = vmul.f32 1.442695, %v7272_v15 }
0x10d4   : > { %v7271_v1 = vsub.f32 %v7219_v43, %v7261_v0  ;;  %7293 = vadd.xlane.f32.xlu1 %v7292_v49  ;;  %v7289_v14 = vsel %vm1816_vm3, %v17226_v52, 0.0  ;;  %v17232_v61 = vpop.eup %14369 }
0x10d5   : > { %7290 = vadd.xlane.f32.xlu0 %v7289_v14  ;;  %v7298_v5 = vsel %vm1816_vm3, %v17232_v61, 0.0 }
0x10d6   : > { %v7285_v6 = vmul.f32 1.442695, %v7271_v1 }
0x10d7   : > { %v7258_v3 = vpop.xlane.xlu0 %7257 }
0x10d8   : > { %v7270_v41 = vsub.f32 %v7200_v12, %v7258_v3  ;;  %v7255_v56 = vpop.xlane.xlu2 %7254  ;;  %14371 = vpow2.f32 %v7285_v6 }
0x10d9   : > { %v7269_v4 = vsub.f32 %v7181_v60, %v7255_v56 }
0x10da   : > { %v7283_v13 = vmul.f32 1.442695, %v7270_v41 }
0x10db   : > { %v7281_v29 = vmul.f32 1.442695, %v7269_v4 }
0x10dc   : > { %14373 = vpow2.f32 %v7283_v13 }
0x10dd   : > { %14375 = vpow2.f32 %v7281_v29  ;;  %7299 = vadd.xlane.f32.xlu0 %v7298_v5 }
0x10de   : > { %v17238_v44 = vpop.eup %14371  ;;  %14377 = vpow2.f32 %v7287_v42 }
0x10df   : > { %v7307_v37 = vsel %vm1816_vm3, %v17238_v44, 0.0 }
0x10e0   : > { %v14183_v18 = vpop.permute.xlu2 %14182 }
0x10e1   : > { %v14184_v28 = vunpack.i.l.bf16 %v14183_v18  ;;  %v14185_v27 = vunpack.i.h.bf16 %v14183_v18 }
0x10e2   : > { %v17240_v53 = vpop.eup %14373 }
0x10e3   : > { %v17242_v46 = vpop.eup %14375  ;;  %v7304_v11 = vsel %vm1816_vm3, %v17240_v53, 0.0  ;;  %v6861_v40 = vrot.slane %v14184_v28, 4  ;;  %v6864_v8 = vsel %vm912_vm1, %v14184_v28, %v6863_v47  ;;  %v6887_v24 = vrot.slane %v14185_v27, 4 }
0x10e4   : > { %7305 = vadd.xlane.f32.xlu2 %v7304_v11  ;;  %v7301_v20 = vsel %vm1816_vm3, %v17242_v46, 0.0  ;;  %v17253_v2 = vpop.eup %14377  ;;  %v6872_v33 = vperm.slane %v6864_v8, %v14770_v35 }
0x10e5   : > { %7302 = vadd.xlane.f32.xlu1 %v7301_v20  ;;  %7308 = vadd.xlane.f32.xlu0 %v7307_v37  ;;  %v6862_v43 = vsel %vm912_vm1, %v6861_v40, %v14175_v21  ;;  %v7310_v57 = vsel %vm1816_vm3, %v17253_v2, 0.0 }
0x10e6   : > { %v6868_v12 = vperm.slane %v6862_v43, %v14770_v35  ;;  %v6909_v62 = vrot.slane %v6872_v33, 4 }
0x10e8   : > { %v6897_v38 = vrot.slane %v6868_v12, 4 }
0x10ea   : > { %v14188_v60 = vpop.permute.xlu0 %14187 }
0x10eb   : > { %v14178_v45 = vpop.permute.xlu1 %14177  ;;  %v14190_v51 = vunpack.i.h.bf16 %v14188_v60  ;;  %v14189_v25 = vunpack.i.l.bf16 %v14188_v60 }
0x10ec   : > { %v14180_v58 = vunpack.i.h.bf16 %v14178_v45  ;;  %v14179_v39 = vunpack.i.l.bf16 %v14178_v45 }
0x10ed   : > { %v6885_v59 = vrot.slane %v14190_v51, 4  ;;  %v6873_v32 = vrot.slane %v14189_v25, 4  ;;  %v6888_v48 = vsel %vm912_vm1, %v14190_v51, %v6887_v24  ;;  %7311 = vadd.xlane.f32.xlu1 %v7310_v57 }
0x10ee   : > { %v6875_v16 = vrot.slane %v14180_v58, 4  ;;  %v6849_v7 = vrot.slane %v14179_v39, 4  ;;  %v6852_v30 = vsel %vm912_vm1, %v14179_v39, %v6851_v34  ;;  %v6896_v22 = vperm.slane %v6888_v48, %v14770_v35 }
0x10ef   : > { %v6860_v36 = vperm.slane %v6852_v30, %v14770_v35  ;;  %v6874_v10 = vsel %vm912_vm1, %v6873_v32, %v14180_v58  ;;  %v6886_v50 = vsel %vm912_vm1, %v6885_v59, %v14185_v27 }
0x10f0   : > { %v6850_v19 = vsel %vm912_vm1, %v6849_v7, %v14174_v31  ;;  %v6876_v26 = vsel %vm912_vm1, %v14189_v25, %v6875_v16  ;;  %v6880_v0 = vperm.slane %v6874_v10, %v14770_v35  ;;  %v6892_v49 = vperm.slane %v6886_v50, %v14770_v35 }
0x10f1   : > { %v6856_v1 = vperm.slane %v6850_v19, %v14770_v35  ;;  %v6910_v14 = vsel %vm912_vm1, %v6909_v62, %v6860_v36  ;;  %v6911_v6 = vrot.slane %v6860_v36, 4  ;;  %v6884_v3 = vperm.slane %v6876_v26, %v14770_v35 }
0x10f2   : > { %v6916_v41 = vperm.slane %v6910_v14, %v14796_v9  ;;  %v6921_v56 = vrot.slane %v6892_v49, 4  ;;  %v6923_v4 = vrot.slane %v6880_v0, 4  ;;  %v6933_v13 = vrot.slane %v6896_v22, 4 }
0x10f3   : > { %v6898_v15 = vsel %vm912_vm1, %v6897_v38, %v6856_v1  ;;  %v6899_v29 = vrot.slane %v6856_v1, 4  ;;  %v6912_v5 = vsel %vm912_vm1, %v6872_v33, %v6911_v6  ;;  %v6935_v42 = vrot.slane %v6884_v3, 4 }
0x10f4   : > { %v6904_v21 = vperm.slane %v6898_v15, %v14796_v9  ;;  %v6920_v18 = vperm.slane %v6912_v5, %v14796_v9  ;;  %v6955_v28 = vrot.slane %v6916_v41, 4  ;;  %v6922_v11 = vsel %vm912_vm1, %v6921_v56, %v6880_v0 }
0x10f5   : > { %v6900_v47 = vsel %vm912_vm1, %v6868_v12, %v6899_v29  ;;  %v6924_v40 = vsel %vm912_vm1, %v6892_v49, %v6923_v4  ;;  %v6928_v20 = vperm.slane %v6922_v11, %v14796_v9  ;;  %v6934_v37 = vsel %vm912_vm1, %v6933_v13, %v6884_v3 }
0x10f6   : > { %v6908_v8 = vperm.slane %v6900_v47, %v14796_v9  ;;  %v6947_v27 = vrot.slane %v6904_v21, 4  ;;  %v6959_v31 = vrot.slane %v6920_v18, 4  ;;  %v6932_v43 = vperm.slane %v6924_v40, %v14796_v9 }
0x10f7   : > { %v6936_v33 = vsel %vm912_vm1, %v6896_v22, %v6935_v42  ;;  %v6940_v60 = vperm.slane %v6934_v37, %v14796_v9  ;;  %v6945_v24 = vrot.slane %v6928_v20, 4 }
0x10f8   : > { %v6951_v45 = vrot.slane %v6908_v8, 4  ;;  %v6944_v12 = vperm.slane %v6936_v33, %v14796_v9  ;;  %v6948_v51 = vsel %vm912_vm1, %v6928_v20, %v6947_v27  ;;  %v6949_v25 = vrot.slane %v6932_v43, 4 }
0x10f9   : > { %v6953_v34 = vrot.slane %v6940_v60, 4  ;;  %v6956_v58 = vsel %vm912_vm1, %v6940_v60, %v6955_v28  ;;  %v6975_v39 = vrot.slane %v6948_v51, 4  ;;  %v6946_v57 = vsel %vm912_vm1, %v6945_v24, %v6904_v21 }
0x10fa   : > { %v6950_v62 = vsel %vm912_vm1, %v6949_v25, %v6908_v8  ;;  %v6952_v59 = vsel %vm912_vm1, %v6932_v43, %v6951_v45  ;;  %v6957_v32 = vrot.slane %v6944_v12, 4  ;;  %v6960_v48 = vsel %vm912_vm1, %v6944_v12, %v6959_v31 }
0x10fb   : > { %v6954_v16 = vsel %vm912_vm1, %v6953_v34, %v6916_v41  ;;  %v6973_v7 = vrot.slane %v6952_v59, 4  ;;  %v6997_v30 = vrot.slane %v6960_v48, 4  ;;  %v6999_v22 = vrot.slane %v6956_v58, 4 }
0x10fc   : > { %v6958_v38 = vsel %vm912_vm1, %v6957_v32, %v6920_v18  ;;  %v6987_v36 = vrot.slane %v6954_v16, 4  ;;  %v6961_v10 = vrot.slane %v6950_v62, 4  ;;  %v6963_v50 = vrot.slane %v6946_v57, 4 }
0x10fd   : > { %v6985_v19 = vrot.slane %v6958_v38, 4  ;;  %v6998_v26 = vsel %vm912_vm1, %v6997_v30, %v6956_v58  ;;  %v7000_v0 = vsel %vm912_vm1, %v6960_v48, %v6999_v22  ;;  %v6974_v49 = vsel %vm912_vm1, %v6973_v7, %v6948_v51 }
0x10fe   : > { %v6962_v1 = vsel %vm912_vm1, %v6961_v10, %v6946_v57  ;;  %v6980_v14 = vperm.slane %v6974_v49, %v14770_v35  ;;  %v7004_v6 = vperm.slane %v6998_v26, %v14770_v35  ;;  %v6964_v3 = vsel %vm912_vm1, %v6950_v62, %v6963_v50 }
0x10ff   : > { %v6968_v41 = vperm.slane %v6962_v1, %v14770_v35  ;;  %v6986_v56 = vsel %vm912_vm1, %v6985_v19, %v6954_v16  ;;  %v6972_v4 = vperm.slane %v6964_v3, %v14770_v35  ;;  %v6976_v13 = vsel %vm912_vm1, %v6952_v59, %v6975_v39 }
0x1100   : > { %v6992_v15 = vperm.slane %v6986_v56, %v14770_v35  ;;  %v7009_v29 = vrot.slane %v6980_v14, 4  ;;  %v7033_v5 = vrot.slane %v7004_v6, 4  ;;  %v6984_v42 = vperm.slane %v6976_v13, %v14770_v35 }
0x1101   : > { %v6988_v21 = vsel %vm912_vm1, %v6958_v38, %v6987_v36  ;;  %v7008_v18 = vperm.slane %v7000_v0, %v14770_v35  ;;  %v7011_v28 = vrot.slane %v6968_v41, 4  ;;  %v7023_v11 = vrot.slane %v6972_v4, 4 }
0x1102   : > { %v7010_v47 = vsel %vm912_vm1, %v7009_v29, %v6968_v41  ;;  %v7034_v40 = vsel %vm912_vm1, %v7033_v5, %v6992_v15  ;;  %v6996_v20 = vperm.slane %v6988_v21, %v14770_v35  ;;  %v7021_v37 = vrot.slane %v6984_v42, 4 }
0x1103   : > { %v7016_v8 = vperm.slane %v7010_v47, %v14796_v9  ;;  %v7040_v27 = vperm.slane %v7034_v40, %v14796_v9  ;;  %v7045_v31 = vrot.slane %v7008_v18, 4  ;;  %v7012_v43 = vsel %vm912_vm1, %v6980_v14, %v7011_v28 }
0x1104   : > { %v7022_v33 = vsel %vm912_vm1, %v7021_v37, %v6972_v4  ;;  %v7020_v60 = vperm.slane %v7012_v43, %v14796_v9  ;;  %v7035_v24 = vrot.slane %v6992_v15, 4  ;;  %v7024_v45 = vsel %vm912_vm1, %v6984_v42, %v7023_v11 }
0x1105   : > { %v7057_v12 = vrot.slane %v7040_v27, 4  ;;  %v7028_v51 = vperm.slane %v7022_v33, %v14796_v9  ;;  %v7046_v25 = vsel %vm912_vm1, %v7045_v31, %v6996_v20  ;;  %v7059_v34 = vrot.slane %v7016_v8, 4 }
0x1106   : > { %v7052_v58 = vperm.slane %v7046_v25, %v14796_v9  ;;  %v7036_v39 = vsel %vm912_vm1, %v7004_v6, %v7035_v24  ;;  %v7063_v57 = vrot.slane %v7020_v60, 4  ;;  %v7032_v62 = vperm.slane %v7024_v45, %v14796_v9 }
0x1107   : > { %v7058_v59 = vsel %vm912_vm1, %v7057_v12, %v7016_v8  ;;  %v7060_v32 = vsel %vm912_vm1, %v7040_v27, %v7059_v34  ;;  %v7044_v48 = vperm.slane %v7036_v39, %v14796_v9  ;;  %v7067_v16 = vrot.slane %v7028_v51, 4 }
0x1108   : > { %v7337_v7 = vpack.c.bf16 %v7058_v59, %v7058_v59  ;;  %v7065_v30 = vrot.slane %v7052_v58, 4  ;;  %v7338_v22 = vpack.c.bf16 %v7060_v32, %v7060_v32  ;;  %v7047_v38 = vrot.slane %v6996_v20, 4 }
0x1109   : > { %v7061_v36 = vrot.slane %v7044_v48, 4  ;;  %v7064_v10 = vsel %vm912_vm1, %v7044_v48, %v7063_v57  ;;  %v7068_v50 = vsel %vm912_vm1, %v7052_v58, %v7067_v16  ;;  %v7071_v3 = vrot.slane %v7032_v62, 4 }
0x110a   : > { %v7349_v19 = vsel %vm1924_vm4, %v7337_v7, 0  ;;  %v7066_v26 = vsel %vm912_vm1, %v7065_v30, %v7028_v51  ;;  %v7368_v0 = vsel %vm1924_vm4, %v7338_v22, 0  ;;  %v7340_v49 = vpack.c.bf16 %v7064_v10, %v7064_v10 }
0x110b   : > { %7358 = vmatpush.bf16.msrb.mxu2 %v7349_v19  ;;  %v7341_v1 = vpack.c.bf16 %v7066_v26, %v7066_v26  ;;  %7377 = vmatpush.bf16.msrb.mxu3 %v7368_v0  ;;  %v7062_v14 = vsel %vm912_vm1, %v7061_v36, %v7020_v60  ;;  %v7342_v6 = vpack.c.bf16 %v7068_v50, %v7068_v50 }
0x110c   : > { %v7339_v41 = vpack.c.bf16 %v7062_v14, %v7062_v14  ;;  %v7406_v56 = vsel %vm1924_vm4, %v7340_v49, 0  ;;  %v7048_v4 = vsel %vm912_vm1, %v7008_v18, %v7047_v38 }
0x110d   : > { %v7425_v13 = vsel %vm1924_vm4, %v7341_v1, 0  ;;  %7415 = vmatpush.bf16.msra.mxu1 %v7406_v56  ;;  %v7444_v15 = vsel %vm1924_vm4, %v7342_v6, 0  ;;  %v7056_v29 = vperm.slane %v7048_v4, %v14796_v9 }
0x110e   : > { %v7387_v5 = vsel %vm1924_vm4, %v7339_v41, 0 }
0x110f   : > { %7434 = vmatpush.bf16.msra.mxu2 %v7425_v13  ;;  %7453 = vmatpush.bf16.msra.mxu3 %v7444_v15  ;;  %v7069_v42 = vrot.slane %v7056_v29, 4  ;;  %v7072_v21 = vsel %vm912_vm1, %v7056_v29, %v7071_v3 }
0x1110   : > { %7396 = vmatpush.bf16.msra.mxu0 %v7387_v5  ;;  %v7344_v28 = vpack.c.bf16 %v7072_v21, %v7072_v21 }
0x1111   : > { %v7070_v11 = vsel %vm912_vm1, %v7069_v42, %v7032_v62 }
0x1112   : > { %v7343_v47 = vpack.c.bf16 %v7070_v11, %v7070_v11  ;;  %v7482_v18 = vsel %vm1924_vm4, %v7344_v28, 0 }
0x1113   : > { %7491 = vmatpush.bf16.msrb.mxu1 %v7482_v18 }
0x1114   : > { %v7463_v40 = vsel %vm1924_vm4, %v7343_v47, 0 }
0x1115   : > { %7472 = vmatpush.bf16.msrb.mxu0 %v7463_v40 }
0x1143   : > { %v7297_v20 = vpop.xlane.xlu2 %7296 }
0x1144   : > { %14379 = vrcp.f32 %v7297_v20 }
0x1147   : > { %v7294_v37 = vpop.xlane.xlu1 %7293 }
0x1148   : > { %v7291_v8 = vpop.xlane.xlu0 %7290  ;;  %14381 = vrcp.f32 %v7294_v37 }
0x1149   : > { %14383 = vrcp.f32 %v7291_v8 }
0x114a   : > { %v14380_v27 = vpop.eup %14379 }
0x114b   : > { %v7323_v31 = vmul.f32 %v14380_v27, %v17220_v55 }
0x114d   : > { %v7331_v43 = vpack.c.bf16 %v7323_v31, %v7323_v31 }
0x114e   : > { %v14382_v33 = vpop.eup %14381 }
0x114f   : > { %v14384_v60 = vpop.eup %14383  ;;  %v7322_v24 = vmul.f32 %v14382_v33, %v17224_v54  ;;  %12606 = vmatmul.msk.bf16.vlgmr.msra.gmra.mxu0 %vm1816_vm3, %v7331_v43 }
0x1150   : > { %v7321_v45 = vmul.f32 %v14384_v60, %v17226_v52  ;;  %v7300_v12 = vpop.xlane.xlu0 %7299 }
0x1151   : > { %v7330_v51 = vpack.c.bf16 %v7322_v24, %v7322_v24  ;;  %14385 = vrcp.f32 %v7300_v12 }
0x1152   : > { %v7329_v25 = vpack.c.bf16 %v7321_v45, %v7321_v45 }
0x1153   : > { %12605 = vmatmul.msk.bf16.vlgmr.msrb.gmra.mxu3 %vm1816_vm3, %v7330_v51 }
0x1154   : > { %12604 = vmatmul.msk.bf16.vlgmr.msrb.gmra.mxu2 %vm1816_vm3, %v7329_v25 }
0x1157   : > { %v14386_v34 = vpop.eup %14385  ;;  %v7306_v58 = vpop.xlane.xlu2 %7305 }
0x1158   : > { %v7324_v55 = vmul.f32 %v14386_v34, %v17232_v61  ;;  %14387 = vrcp.f32 %v7306_v58  ;;  %v7309_v39 = vpop.xlane.xlu0 %7308  ;;  %v7303_v57 = vpop.xlane.xlu1 %7302 }
0x1159   : > { %14389 = vrcp.f32 %v7309_v39 }
0x115a   : > { %v7332_v54 = vpack.c.bf16 %v7324_v55, %v7324_v55  ;;  %14391 = vrcp.f32 %v7303_v57 }
0x115c   : > { %12607 = vmatmul.msk.bf16.vlgmr.msra.gmra.mxu1 %vm1816_vm3, %v7332_v54 }
0x115e   : > { %v14388_v52 = vpop.eup %14387 }
0x115f   : > { %v14390_v62 = vpop.eup %14389  ;;  %v7326_v59 = vmul.f32 %v14388_v52, %v17240_v53 }
0x1160   : > { %v14392_v32 = vpop.eup %14391  ;;  %v7327_v48 = vmul.f32 %v14390_v62, %v17238_v44  ;;  %v7312_v16 = vpop.xlane.xlu1 %7311 }
0x1161   : > { %v7334_v7 = vpack.c.bf16 %v7326_v59, %v7326_v59  ;;  %v7325_v30 = vmul.f32 %v14392_v32, %v17242_v46  ;;  %14393 = vrcp.f32 %v7312_v16 }
0x1162   : > { %v7335_v61 = vpack.c.bf16 %v7327_v48, %v7327_v48 }
0x1163   : > { %v7333_v22 = vpack.c.bf16 %v7325_v30, %v7325_v30  ;;  %12609 = vmatmul.msk.bf16.vlgmr.msra.gmra.mxu3 %vm1816_vm3, %v7334_v7 }
0x1164   : > { %12610 = vmatmul.msk.bf16.vlgmr.msrb.gmra.mxu0 %vm1816_vm3, %v7335_v61 }
0x1165   : > { %12608 = vmatmul.msk.bf16.vlgmr.msra.gmra.mxu2 %vm1816_vm3, %v7333_v22 }
0x1167   : > { %v14394_v38 = vpop.eup %14393 }
0x1168   : > { %v7328_v36 = vmul.f32 %v14394_v38, %v17253_v2 }
0x116a   : > { %v7336_v53 = vpack.c.bf16 %v7328_v36, %v7328_v36 }
0x116c   : > { %12611 = vmatmul.msk.bf16.vlgmr.msrb.gmra.mxu1 %vm1816_vm3, %v7336_v53 }
0x11cc   : > { %v7398_v44 = vpop.f32.mrf.mxu0 }
0x11cd   : > { %v7497_v1 = vrot.slane %v7398_v44, 4 }
0x11d4   : > { %v7400_v10 = vpop.f32.mrf.mxu0 }
0x11d6   : > { %v7379_v50 = vpop.f32.mrf.mxu3 }
0x11d7   : > { %v7360_v19 = vpop.f32.mrf.mxu2  ;;  %v7511_v0 = vrot.slane %v7379_v50, 4 }
0x11d8   : > { %v7499_v26 = vrot.slane %v7360_v19, 4  ;;  %v7498_v41 = vsel %vm912_vm1, %v7497_v1, %v7360_v19 }
0x11d9   : > { %v7417_v46 = vpop.f32.mrf.mxu1  ;;  %v7504_v5 = vperm.slane %v7498_v41, %v14770_v35 }
0x11da   : > { %v7509_v49 = vrot.slane %v7417_v46, 4  ;;  %v7500_v14 = vsel %vm912_vm1, %v7398_v44, %v7499_v26  ;;  %v7512_v6 = vsel %vm912_vm1, %v7417_v46, %v7511_v0 }
0x11db   : > { %v7508_v4 = vperm.slane %v7500_v14, %v14770_v35  ;;  %v7520_v13 = vperm.slane %v7512_v6, %v14770_v35  ;;  %v7547_v11 = vrot.slane %v7504_v5, 4 }
0x11dc   : > { %v7510_v2 = vsel %vm912_vm1, %v7509_v49, %v7379_v50 }
0x11dd   : > { %v7516_v42 = vperm.slane %v7510_v2, %v14770_v35  ;;  %v7559_v21 = vrot.slane %v7508_v4, 4  ;;  %v7557_v28 = vrot.slane %v7520_v13, 4 }
0x11de   : > { %v7381_v3 = vpop.f32.mrf.mxu3 }
0x11df   : > { %v7362_v56 = vpop.f32.mrf.mxu2  ;;  %v7545_v47 = vrot.slane %v7516_v42, 4  ;;  %v7548_v37 = vsel %vm912_vm1, %v7516_v42, %v7547_v11  ;;  %v7558_v27 = vsel %vm912_vm1, %v7557_v28, %v7508_v4  ;;  %v7560_v31 = vsel %vm912_vm1, %v7520_v13, %v7559_v21 }
0x11e0   : > { %v7556_v34 = vperm.slane %v7548_v37, %v14796_v9  ;;  %v7564_v39 = vperm.slane %v7558_v27, %v14796_v9  ;;  %v7568_v57 = vperm.slane %v7560_v31, %v14796_v9 }
0x11e1   : > { %v7419_v15 = vpop.f32.mrf.mxu1  ;;  %v7474_v29 = vpop.f32.mrf.mxu0  ;;  %v7546_v45 = vsel %vm912_vm1, %v7545_v47, %v7504_v5 }
0x11e2   : > { %v7521_v40 = vrot.slane %v7474_v29, 4  ;;  %v7552_v62 = vperm.slane %v7546_v45, %v14796_v9  ;;  %v7599_v30 = vrot.slane %v7556_v34, 4  ;;  %v7603_v36 = vrot.slane %v7564_v39, 4 }
0x11e3   : > { %v7607_v46 = vrot.slane %v7568_v57, 4 }
0x11e4   : > { %v7595_v19 = vrot.slane %v7552_v62, 4 }
0x11e6   : > { %v7455_v18 = vpop.f32.mrf.mxu3 }
0x11e7   : > { %v7535_v20 = vrot.slane %v7455_v18, 4 }
0x11e8   : > { %v7436_v8 = vpop.f32.mrf.mxu2 }
0x11e9   : > { %v7522_v43 = vsel %vm912_vm1, %v7521_v40, %v7436_v8  ;;  %v7523_v33 = vrot.slane %v7436_v8, 4  ;;  %v7476_v60 = vpop.f32.mrf.mxu0  ;;  %v7493_v24 = vpop.f32.mrf.mxu1 }
0x11ea   : > { %v7528_v12 = vperm.slane %v7522_v43, %v14770_v35  ;;  %v7533_v51 = vrot.slane %v7493_v24, 4  ;;  %v7536_v25 = vsel %vm912_vm1, %v7493_v24, %v7535_v20 }
0x11eb   : > { %v7524_v58 = vsel %vm912_vm1, %v7474_v29, %v7523_v33  ;;  %v7544_v55 = vperm.slane %v7536_v25, %v14770_v35 }
0x11ec   : > { %v7532_v54 = vperm.slane %v7524_v58, %v14770_v35  ;;  %v7534_v52 = vsel %vm912_vm1, %v7533_v51, %v7455_v18  ;;  %v7571_v59 = vrot.slane %v7528_v12, 4 }
0x11ed   : > { %v7540_v32 = vperm.slane %v7534_v52, %v14770_v35  ;;  %v7581_v48 = vrot.slane %v7544_v55, 4 }
0x11ee   : > { %v7583_v16 = vrot.slane %v7532_v54, 4  ;;  %v7457_v7 = vpop.f32.mrf.mxu3 }
0x11ef   : > { %v7569_v61 = vrot.slane %v7540_v32, 4  ;;  %v7572_v22 = vsel %vm912_vm1, %v7540_v32, %v7571_v59  ;;  %v7582_v38 = vsel %vm912_vm1, %v7581_v48, %v7532_v54 }
0x11f0   : > { %v7580_v53 = vperm.slane %v7572_v22, %v14796_v9  ;;  %v7584_v44 = vsel %vm912_vm1, %v7544_v55, %v7583_v16  ;;  %v7588_v10 = vperm.slane %v7582_v38, %v14796_v9  ;;  %v7438_v50 = vpop.f32.mrf.mxu2 }
0x11f1   : > { %v7570_v26 = vsel %vm912_vm1, %v7569_v61, %v7528_v12  ;;  %v7592_v0 = vperm.slane %v7584_v44, %v14796_v9  ;;  %v7495_v49 = vpop.f32.mrf.mxu1 }
0x11f2   : > { %v7576_v1 = vperm.slane %v7570_v26, %v14796_v9  ;;  %v7597_v14 = vrot.slane %v7580_v53, 4  ;;  %v7600_v6 = vsel %vm912_vm1, %v7580_v53, %v7599_v30  ;;  %v7601_v3 = vrot.slane %v7588_v10, 4 }
0x11f3   : > { %v7604_v41 = vsel %vm912_vm1, %v7588_v10, %v7603_v36  ;;  %v7605_v2 = vrot.slane %v7592_v0, 4  ;;  %v7608_v56 = vsel %vm912_vm1, %v7592_v0, %v7607_v46  ;;  %v7621_v4 = vrot.slane %v7600_v6, 4 }
0x11f4   : > { %v7593_v13 = vrot.slane %v7576_v1, 4  ;;  %v7598_v15 = vsel %vm912_vm1, %v7597_v14, %v7556_v34  ;;  %v7645_v29 = vrot.slane %v7608_v56, 4  ;;  %v7647_v5 = vrot.slane %v7604_v41, 4 }
0x11f5   : > { %v7606_v42 = vsel %vm912_vm1, %v7605_v2, %v7568_v57  ;;  %v7596_v21 = vsel %vm912_vm1, %v7576_v1, %v7595_v19  ;;  %v7602_v28 = vsel %vm912_vm1, %v7601_v3, %v7564_v39  ;;  %v7609_v11 = vrot.slane %v7598_v15, 4 }
0x11f6   : > { %v7633_v47 = vrot.slane %v7606_v42, 4  ;;  %v7648_v18 = vsel %vm912_vm1, %v7608_v56, %v7647_v5  ;;  %v7594_v40 = vsel %vm912_vm1, %v7593_v13, %v7552_v62  ;;  %v7622_v20 = vsel %vm912_vm1, %v7621_v4, %v7596_v21 }
0x11f7   : > { %v7610_v37 = vsel %vm912_vm1, %v7609_v11, %v7594_v40  ;;  %v7628_v8 = vperm.slane %v7622_v20, %v14770_v35  ;;  %v7635_v27 = vrot.slane %v7602_v28, 4  ;;  %v7646_v31 = vsel %vm912_vm1, %v7645_v29, %v7604_v41  ;;  %v13808_v20 = vld [vmem:[%s19240_s30 + $0x10] sm:$0xff] }
0x11f8   : > { %v7616_v43 = vperm.slane %v7610_v37, %v14770_v35  ;;  %v7634_v33 = vsel %vm912_vm1, %v7633_v47, %v7602_v28  ;;  %v7652_v60 = vperm.slane %v7646_v31, %v14770_v35  ;;  %v7611_v24 = vrot.slane %v7594_v40, 4  ;;  %v13809_v40 = vld [vmem:[%s19240_s30 + $0x18] sm:$0xff] }
0x11f9   : > { %v7640_v45 = vperm.slane %v7634_v33, %v14770_v35  ;;  %v7657_v12 = vrot.slane %v7628_v8, 4  ;;  %v7623_v51 = vrot.slane %v7596_v21, 4  ;;  %v7636_v25 = vsel %vm912_vm1, %v7606_v42, %v7635_v27  ;;  %7779 = vmatpush.bf16.msrb.mxu2 %v13809_v40 }
0x11fa   : > { %v7681_v34 = vrot.slane %v7652_v60, 4  ;;  %v7659_v58 = vrot.slane %v7616_v43, 4  ;;  %v7612_v55 = vsel %vm912_vm1, %v7598_v15, %v7611_v24  ;;  %v7644_v39 = vperm.slane %v7636_v25, %v14770_v35 }
0x11fb   : > { %v7658_v57 = vsel %vm912_vm1, %v7657_v12, %v7616_v43  ;;  %v7683_v54 = vrot.slane %v7640_v45, 4  ;;  %v7620_v52 = vperm.slane %v7612_v55, %v14770_v35  ;;  %v7624_v62 = vsel %vm912_vm1, %v7600_v6, %v7623_v51 }
0x11fc   : > { %v7664_v59 = vperm.slane %v7658_v57, %v14796_v9  ;;  %v7682_v32 = vsel %vm912_vm1, %v7681_v34, %v7640_v45  ;;  %v7660_v48 = vsel %vm912_vm1, %v7628_v8, %v7659_v58  ;;  %v7632_v16 = vperm.slane %v7624_v62, %v14770_v35  ;;  %v13812_v57 = vld [vmem:[%s19241_s2 + $0x10] sm:$0xff] }
0x11fd   : > { %v7688_v7 = vperm.slane %v7682_v32, %v14796_v9  ;;  %v7668_v30 = vperm.slane %v7660_v48, %v14796_v9  ;;  %v7684_v61 = vsel %vm912_vm1, %v7652_v60, %v7683_v54  ;;  %v7656_v22 = vperm.slane %v7648_v18, %v14770_v35  ;;  %7780 = vmatpush.bf16.msrb.mxu2 %v13808_v20  ;;  %v14279_v54 = vld [vmem:[%s19242_s4 + $0x1] ss:$0 sm:$0xff] }
0x11fe   : > { %v7707_v38 = vrot.slane %v7664_v59, 4  ;;  %v7692_v36 = vperm.slane %v7684_v61, %v14796_v9  ;;  %v7669_v53 = vrot.slane %v7632_v16, 4  ;;  %v7671_v44 = vrot.slane %v7620_v52, 4 }
0x11ff   : > { %v7705_v10 = vrot.slane %v7688_v7, 4  ;;  %v7711_v50 = vrot.slane %v7668_v30, 4  ;;  %v7693_v19 = vrot.slane %v7656_v22, 4  ;;  %v7695_v46 = vrot.slane %v7644_v39, 4 }
0x1200   : > { %v7708_v26 = vsel %vm912_vm1, %v7688_v7, %v7707_v38  ;;  %v7709_v0 = vrot.slane %v7692_v36, 4  ;;  %v7670_v49 = vsel %vm912_vm1, %v7669_v53, %v7620_v52  ;;  %v7672_v3 = vsel %vm912_vm1, %v7632_v16, %v7671_v44  ;;  %v14280_v7 = vld [vmem:[%s19243_s25 + $0x1] ss:$0 sm:$0xff] }
0x1201   : > { %7722 = vrot.lane.b32.xlu2 %v7708_v26, %s19226_s26  ;;  %v7712_v1 = vsel %vm912_vm1, %v7692_v36, %v7711_v50  ;;  %v7676_v14 = vperm.slane %v7670_v49, %v14796_v9  ;;  %v7694_v6 = vsel %vm912_vm1, %v7693_v19, %v7644_v39  ;;  %v7696_v56 = vsel %vm912_vm1, %v7656_v22, %v7695_v46  ;;  %v13813_v39 = vld [vmem:[%s19241_s2 + $0x18] sm:$0xff]  ;;  %v13810_v50 = vld [vmem:[%s19244_s8 + $0x10] sm:$0xff] }
0x1202   : > { %7730 = vrot.lane.b32.xlu1 %v7712_v1, %s19234_s28  ;;  %v7710_v41 = vsel %vm912_vm1, %v7709_v0, %v7668_v30  ;;  %v7700_v2 = vperm.slane %v7694_v6, %v14796_v9  ;;  %v7706_v4 = vsel %vm912_vm1, %v7705_v10, %v7664_v59  ;;  %v7704_v13 = vperm.slane %v7696_v56, %v14796_v9  ;;  %v13811_v10 = vld [vmem:[%s19244_s8 + $0x18] sm:$0xff] }
0x1203   : > { %7726 = vrot.lane.b32.xlu0 %v7710_v41, %s19235_s24  ;;  %v7680_v29 = vperm.slane %v7672_v3, %v14796_v9  ;;  %v7715_v42 = vrot.slane %v7676_v14, 4  ;;  %7876 = vmatpush.bf16.msra.mxu0 %v13813_v39 }
0x1204   : > { %v7713_v15 = vrot.slane %v7700_v2, 4  ;;  %v7717_v5 = vrot.slane %v7704_v13, 4  ;;  %7844 = vmatpush.bf16.msrb.mxu3 %v13811_v10 }
0x1205   : > { %v7716_v11 = vsel %vm912_vm1, %v7700_v2, %v7715_v42  ;;  %v7719_v47 = vrot.slane %v7680_v29, 4 }
0x1206   : > { %v7714_v21 = vsel %vm912_vm1, %v7713_v15, %v7676_v14  ;;  %v7718_v28 = vsel %vm912_vm1, %v7717_v5, %v7680_v29  ;;  %v14282_v29 = vld [vmem:[%s19246_s13 + $0x1] ss:$0 sm:$0xff] }
0x1207   : > { %v7720_v18 = vsel %vm912_vm1, %v7704_v13, %v7719_v47  ;;  %7877 = vmatpush.bf16.msra.mxu0 %v13812_v57  ;;  %v14281_v13 = vld [vmem:[%s19245_s1 + $0x1] ss:$0 sm:$0xff]  ;;  %s19247_s1 = sld [smem:[#allocation24_spill]] }
0x1208   : > { %7845 = vmatpush.bf16.msrb.mxu3 %v13810_v50 }
0x1209   : > { %7734 = vrot.lane.b32.xlu2 %v7714_v21, %s19236_s19 }
0x120a   : > { %7742 = vrot.lane.b32.xlu1 %v7718_v28, %s19237_s11  ;;  %12646 = vmatmul.msk.bf16.vlgmr.msra.gmra.mxu0 %vm866_vm0, %v15301_v63 }
0x120b   : > { %7738 = vrot.lane.b32.xlu0 %v7716_v11, %s19238_s21 }
0x1211   : > { %7746 = vrot.lane.b32.xlu2 %v7720_v18, %s19239_s9 }
0x125b   : > { %v7723_v37 = vpop.permute.xlu2 %7722 }
0x125c   : > { %v7749_v43 = vsel %vm1663_vm2, %v7706_v4, %v7723_v37 }
0x1263   : > { %v7735_v27 = vpop.permute.xlu2 %7734 }
0x126b   : > { %v7747_v25 = vpop.permute.xlu2 %7746 }
0x1274   : > { %v7731_v8 = vpop.permute.xlu1 %7730 }
0x1275   : > { %v7727_v31 = vpop.permute.xlu0 %7726 }
0x1276   : > { %v7750_v33 = vsel %vm1816_vm3, %v7749_v43, %v7727_v31 }
0x1277   : > { %v7751_v60 = vsel %vm2328_vm5, %v7750_v33, %v7731_v8 }
0x1278   : > { %v7752_v12 = vsel %vm2330_vm6, %v7751_v60, %v7735_v27 }
0x127c   : > { %v7743_v24 = vpop.permute.xlu1 %7742 }
0x127d   : > { %v7739_v45 = vpop.permute.xlu0 %7738 }
0x127e   : > { %v7753_v51 = vsel %vm2332_vm7, %v7752_v12, %v7739_v45 }
0x127f   : > { %v7754_v34 = vsel %vm2334_vm8, %v7753_v51, %v7743_v24 }
0x1280   : > { %v7755_v58 = vsel %vm2336_vm9, %v7754_v34, %v7747_v25 }
0x1281   : > { %v7756_v55 = vpack.c.bf16 %v7755_v58, %v7755_v58 }
0x1283   : > { %12620 = vmatmul.msk.bf16.vlgmr.msrb.gmra.mxu2 %vm866_vm0, %v7756_v55 }
0x1287   : > { %v7879_v16 = vpop.f32.mrf.mxu0 }
0x1288   : > { %v17476_v30 = vadd.f32 %v14280_v7, %v7879_v16 }
0x128a   : > { %v8183_v8 = vrot.slane %v17476_v30, 4 }
0x128f   : > { %v7881_v63 = vpop.f32.mrf.mxu0 }
0x1290   : > { %v7882_v61 = vadd.f32 %v14280_v7, %v7881_v63 }
0x1292   : > { %v17479_v38 = vpack.i.bf16 %v7882_v61, %v17476_v30  ;;  %v8295_v20 = vrot.slane %v7882_v61, 4 }
0x1294   : > { %14192 = vrot.lane.b32.xlu2 %v17479_v38, %s19210_s27 }
0x129c   : > { %14197 = vrot.lane.b32.xlu2 %v17479_v38, %s19215_s6 }
0x12a4   : > { %14202 = vrot.lane.b32.xlu2 %v17479_v38, %s19212_s29 }
0x12ac   : > { %14207 = vrot.lane.b32.xlu2 %v17479_v38, %s19213_s5 }
0x12b4   : > { %14212 = vrot.lane.b32.xlu2 %v17479_v38, %s19203_s7 }
0x12bc   : > { %14222 = vrot.lane.b32.xlu2 %v17479_v38, %s19211_s0 }
0x12ee   : > { %v17499_v19 = vpop.permute.xlu2 %14192 }
0x12ef   : > { %v14194_v40 = vunpack.i.l.bf16 %v17499_v19  ;;  %v14195_v43 = vunpack.i.h.bf16 %v17499_v19 }
0x12f1   : > { %v8207_v33 = vrot.slane %v14194_v40, 4  ;;  %v8319_v34 = vrot.slane %v14195_v43, 4 }
0x12f6   : > { %v17504_v49 = vpop.permute.xlu2 %14197 }
0x12f7   : > { %v14200_v1 = vunpack.i.h.bf16 %v17504_v49  ;;  %v14199_v14 = vunpack.i.l.bf16 %v17504_v49 }
0x12f9   : > { %v8293_v27 = vrot.slane %v14200_v1, 4  ;;  %v8181_v31 = vrot.slane %v14199_v14, 4  ;;  %v8296_v24 = vsel %vm912_vm1, %v14200_v1, %v8295_v20  ;;  %v8184_v51 = vsel %vm912_vm1, %v14199_v14, %v8183_v8 }
0x12fa   : > { %v8304_v57 = vperm.slane %v8296_v24, %v14770_v35 }
0x12fb   : > { %v8294_v45 = vsel %vm912_vm1, %v8293_v27, %v7882_v61  ;;  %v8182_v12 = vsel %vm912_vm1, %v8181_v31, %v17476_v30 }
0x12fc   : > { %v8300_v39 = vperm.slane %v8294_v45, %v14770_v35 }
0x12fe   : > { %v17521_v11 = vpop.permute.xlu2 %14202 }
0x12ff   : > { %v14205_v47 = vunpack.i.h.bf16 %v17521_v11  ;;  %v14204_v18 = vunpack.i.l.bf16 %v17521_v11 }
0x1301   : > { %v8219_v1 = vrot.slane %v14204_v18, 4 }
0x1306   : > { %v7782_v52 = vpop.f32.mrf.mxu2  ;;  %v17526_v37 = vpop.permute.xlu2 %14207 }
0x1307   : > { %v7783_v62 = vadd.f32 %v14279_v54, %v7782_v52  ;;  %v14209_v60 = vunpack.i.l.bf16 %v17526_v37  ;;  %v14210_v25 = vunpack.i.h.bf16 %v17526_v37  ;;  %v8188_v54 = vperm.slane %v8182_v12, %v14770_v35 }
0x1308   : > { %v8192_v52 = vperm.slane %v8184_v51, %v14770_v35 }
0x1309   : > { %v7786_v59 = vadd.f32 %v7783_v62, %v16880_v23  ;;  %v8205_v58 = vrot.slane %v14209_v60, 4  ;;  %v8208_v55 = vsel %vm912_vm1, %v14209_v60, %v8207_v33  ;;  %v8320_v7 = vsel %vm912_vm1, %v14210_v25, %v8319_v34 }
0x130a   : > { %v17547_v16 = vperm.slane %v8208_v55, %v14770_v35  ;;  %v17555_v50 = vperm.slane %v8320_v7, %v14770_v35 }
0x130b   : > { %v7789_v32 = vsel %vm866_vm0, %v7786_v59, 0.0  ;;  %v8206_v30 = vsel %vm912_vm1, %v8205_v58, %v14194_v40 }
0x130c   : > { %7790 = vadd.xlane.f32.xlu0 %v7789_v32  ;;  %v17564_v14 = vperm.slane %v8206_v30, %v14770_v35 }
0x130e   : > { %v7784_v48 = vpop.f32.mrf.mxu2  ;;  %v17542_v62 = vpop.permute.xlu2 %14212 }
0x130f   : > { %v14215_v32 = vunpack.i.h.bf16 %v17542_v62  ;;  %v14214_v48 = vunpack.i.l.bf16 %v17542_v62 }
0x1311   : > { %v8305_v63 = vrot.slane %v14215_v32, 4  ;;  %v8193_v61 = vrot.slane %v14214_v48, 4 }
0x1320   : > { %14217 = vrot.lane.b32.xlu0 %v17479_v38, %s19214_s10 }
0x137f   : > { %v7791_v22 = vpop.xlane.xlu0 %7790 }
0x1380   : > { %v7792_v36 = vmul.f32 %v7791_v22, %v15310_v17  ;;  %v8343_v22 = vrot.slane %v8300_v39, 4 }
0x1382   : > { %v7793_v23 = vsub.f32 %v7786_v59, %v7792_v36  ;;  %v8317_v59 = vrot.slane %v14210_v25, 4  ;;  %v8355_v36 = vrot.slane %v8304_v57, 4 }
0x1384   : > { %v7794_v53 = vmul.f32 %v7793_v23, %v7793_v23  ;;  %v8318_v10 = vsel %vm912_vm1, %v8317_v59, %v14195_v43  ;;  %v8255_v43 = vrot.slane %v17564_v14, 4 }
0x1386   : > { %v7795_v44 = vsel %vm866_vm0, %v7794_v53, 0.0  ;;  %v8243_v53 = vrot.slane %v8192_v52, 4 }
0x1387   : > { %7796 = vadd.xlane.f32.xlu1 %v7795_v44 }
0x1392   : > { %v17551_v44 = vpop.permute.xlu0 %14217 }
0x13fa   : > { %v7797_v46 = vpop.xlane.xlu1 %7796 }
0x13fb   : > { %v7798_v26 = vmul.f32 %v7797_v46, %v15310_v17  ;;  %v14220_v46 = vunpack.i.h.bf16 %v17551_v44 }
0x13fd   : > { %v7799_v0 = vadd.f32 1e-05, %v7798_v26  ;;  %v14219_v26 = vunpack.i.l.bf16 %v17551_v44 }
0x13ff   : > { %14395 = vrsqrt.f32 %v7799_v0  ;;  %vm7806_vm14 = vweird.f32 %v7799_v0 }
0x1405   : > { %v14396_v6 = vpop.eup %14395 }
0x1406   : > { %v7801_v3 = vmul.f32 %v14396_v6, %v7799_v0  ;;  %vm7807_vm4 = vweird.f32 %v14396_v6  ;;  %v8331_v0 = vrot.slane %v14205_v47, 4 }
0x1407   : > { %vm7808_vm15 = vmor %vm7806_vm14, %vm7807_vm4 }
0x1408   : > { %v7802_v41 = vmul.f32 %v14396_v6, %v7801_v3  ;;  %v8306_v3 = vsel %vm912_vm1, %v8305_v63, %v14220_v46 }
0x140a   : > { %v7803_v2 = vmul.f32 0.5, %v7802_v41  ;;  %v8307_v41 = vrot.slane %v14220_v46, 4 }
0x140c   : > { %v7804_v56 = vsub.f32 1.5, %v7803_v2  ;;  %v8194_v2 = vsel %vm912_vm1, %v8193_v61, %v14219_v26 }
0x140e   : > { %v7805_v4 = vmul.f32 %v14396_v6, %v7804_v56  ;;  %v8195_v56 = vrot.slane %v14219_v26, 4 }
0x1410   : > { %v7809_v15 = vsel %vm7808_vm15, %v14396_v6, %v7805_v4  ;;  %v8267_v6 = vrot.slane %v17547_v16, 4  ;;  %v17570_v4 = vperm.slane %v8318_v10, %v14770_v35 }
0x1411   : > { %v7810_v5 = vmul.f32 %v7809_v15, %v7793_v23  ;;  %v8231_v23 = vrot.slane %v8188_v54, 4  ;;  %v8200_v15 = vperm.slane %v8194_v2, %v14770_v35 }
0x1412   : > { %v8367_v30 = vrot.slane %v17570_v4, 4 }
0x1413   : > { %v7812_v42 = vmul.f32 %v14281_v13, %v7810_v5  ;;  %v8312_v13 = vperm.slane %v8306_v3, %v14770_v35  ;;  %v8379_v5 = vrot.slane %v17555_v50, 4  ;;  %v8229_v60 = vrot.slane %v8200_v15, 4 }
0x1414   : > { %v8232_v25 = vsel %vm912_vm1, %v8200_v15, %v8231_v23 }
0x1415   : > { %v17516_v21 = vadd.f32 %v14282_v29, %v7812_v42  ;;  %v17574_v29 = vpop.permute.xlu2 %14222  ;;  %v8308_v42 = vsel %vm912_vm1, %v14215_v32, %v8307_v41  ;;  %v8341_v8 = vrot.slane %v8312_v13, 4  ;;  %v8344_v27 = vsel %vm912_vm1, %v8312_v13, %v8343_v22 }
0x1416   : > { %v14225_v40 = vunpack.i.h.bf16 %v17574_v29  ;;  %v8316_v20 = vperm.slane %v8308_v42, %v14770_v35  ;;  %v17585_v33 = vperm.slane %v8344_v27, %v14796_v9  ;;  %v14224_v24 = vunpack.i.l.bf16 %v17574_v29 }
0x1417   : > { %v7820_v28 = vpack.c.bf16 %v17516_v21, %v17516_v21  ;;  %v8342_v45 = vsel %vm912_vm1, %v8341_v8, %v8300_v39  ;;  %v8230_v55 = vsel %vm912_vm1, %v8229_v60, %v8188_v54  ;;  %v8240_v22 = vperm.slane %v8232_v25, %v14796_v9 }
0x1418   : > { %v8353_v12 = vrot.slane %v8316_v20, 4  ;;  %v8356_v51 = vsel %vm912_vm1, %v8316_v20, %v8355_v36  ;;  %v17592_v34 = vperm.slane %v8342_v45, %v14796_v9  ;;  %v8329_v59 = vrot.slane %v14225_v40, 4 }
0x1419   : > { %12633 = vmatmul.msk.bf16.vlgmr.msrb.gmra.mxu3 %vm866_vm0, %v7820_v28  ;;  %v8196_v28 = vsel %vm912_vm1, %v14214_v48, %v8195_v56  ;;  %v17595_v58 = vperm.slane %v8356_v51, %v14796_v9  ;;  %v17600_v48 = vperm.slane %v8230_v55, %v14796_v9  ;;  %v8395_v61 = vrot.slane %v17585_v33, 4 }
0x141a   : > { %v8204_v31 = vperm.slane %v8196_v28, %v14770_v35  ;;  %v8354_v32 = vsel %vm912_vm1, %v8353_v12, %v8304_v57  ;;  %v8391_v54 = vrot.slane %v17592_v34, 4  ;;  %v8217_v23 = vrot.slane %v14224_v24, 4 }
0x141b   : > { %v17605_v63 = vperm.slane %v8354_v32, %v14796_v9  ;;  %v8403_v10 = vrot.slane %v17595_v58, 4  ;;  %v8279_v46 = vrot.slane %v17600_v48, 4  ;;  %v8220_v3 = vsel %vm912_vm1, %v14224_v24, %v8219_v1 }
0x141c   : > { %v8241_v39 = vrot.slane %v8204_v31, 4  ;;  %v8244_v7 = vsel %vm912_vm1, %v8204_v31, %v8243_v53  ;;  %v8218_v26 = vsel %vm912_vm1, %v8217_v23, %v14204_v18  ;;  %v8330_v41 = vsel %vm912_vm1, %v8329_v59, %v14205_v47 }
0x141d   : > { %v8252_v57 = vperm.slane %v8244_v7, %v14796_v9  ;;  %v8283_v2 = vrot.slane %v8240_v22, 4  ;;  %v8224_v56 = vperm.slane %v8218_v26, %v14770_v35  ;;  %v8228_v13 = vperm.slane %v8220_v3, %v14770_v35 }
0x141e   : > { %v8242_v36 = vsel %vm912_vm1, %v8241_v39, %v8192_v52  ;;  %v8332_v52 = vsel %vm912_vm1, %v14225_v40, %v8331_v0  ;;  %v8336_v15 = vperm.slane %v8330_v41, %v14770_v35  ;;  %v8399_v42 = vrot.slane %v17605_v63, 4 }
0x141f   : > { %v8248_v53 = vperm.slane %v8242_v36, %v14796_v9  ;;  %v8291_v20 = vrot.slane %v8252_v57, 4  ;;  %v8340_v18 = vperm.slane %v8332_v52, %v14770_v35  ;;  %v8253_v1 = vrot.slane %v8224_v56, 4 }
0x1420   : > { %v8256_v8 = vsel %vm912_vm1, %v8224_v56, %v8255_v43  ;;  %v8265_v27 = vrot.slane %v8228_v13, 4  ;;  %v8268_v47 = vsel %vm912_vm1, %v8228_v13, %v8267_v6  ;;  %v8365_v31 = vrot.slane %v8336_v15, 4 }
0x1421   : > { %v8287_v28 = vrot.slane %v8248_v53, 4  ;;  %v8264_v0 = vperm.slane %v8256_v8, %v14796_v9  ;;  %v8276_v40 = vperm.slane %v8268_v47, %v14796_v9  ;;  %v8368_v60 = vsel %vm912_vm1, %v8336_v15, %v8367_v30 }
0x1422   : > { %v8254_v24 = vsel %vm912_vm1, %v8253_v1, %v17564_v14  ;;  %v8266_v45 = vsel %vm912_vm1, %v8265_v27, %v17547_v16  ;;  %v8376_v12 = vperm.slane %v8368_v60, %v14796_v9  ;;  %v8377_v51 = vrot.slane %v8340_v18, 4 }
0x1423   : > { %v8260_v43 = vperm.slane %v8254_v24, %v14796_v9  ;;  %v8272_v6 = vperm.slane %v8266_v45, %v14796_v9  ;;  %v8281_v25 = vrot.slane %v8264_v0, 4  ;;  %v17641_v55 = vsel %vm912_vm1, %v8264_v0, %v8283_v2 }
0x1424   : > { %v8289_v59 = vrot.slane %v8276_v40, 4  ;;  %v8292_v32 = vsel %vm912_vm1, %v8276_v40, %v8291_v20  ;;  %v8366_v14 = vsel %vm912_vm1, %v8365_v31, %v17570_v4  ;;  %v8378_v16 = vsel %vm912_vm1, %v8377_v51, %v17555_v50 }
0x1425   : > { %v8277_v39 = vrot.slane %v8260_v43, 4  ;;  %v17649_v7 = vsel %vm912_vm1, %v8281_v25, %v8240_v22  ;;  %v8285_v30 = vrot.slane %v8272_v6, 4  ;;  %v8288_v36 = vsel %vm912_vm1, %v8272_v6, %v8287_v28 }
0x1426   : > { %v17653_v23 = vsel %vm912_vm1, %v8289_v59, %v8252_v57  ;;  %v8372_v26 = vperm.slane %v8366_v14, %v14796_v9  ;;  %v8380_v3 = vsel %vm912_vm1, %v8340_v18, %v8379_v5  ;;  %v8384_v4 = vperm.slane %v8378_v16, %v14796_v9 }
0x1427   : > { %v17661_v41 = vsel %vm912_vm1, %v8285_v30, %v8248_v53  ;;  %v8388_v22 = vperm.slane %v8380_v3, %v14796_v9  ;;  %v8393_v52 = vrot.slane %v8376_v12, 4  ;;  %v17665_v2 = vsel %vm912_vm1, %v8376_v12, %v8395_v61 }
0x1428   : > { %v8389_v56 = vrot.slane %v8372_v26, 4  ;;  %v8397_v57 = vrot.slane %v8384_v4, 4  ;;  %v8400_v13 = vsel %vm912_vm1, %v8384_v4, %v8399_v42  ;;  %v8417_v15 = vrot.slane %v17641_v55, 4 }
0x1429   : > { %v17671_v50 = vsel %vm912_vm1, %v8393_v52, %v17585_v33  ;;  %v8401_v5 = vrot.slane %v8388_v22, 4  ;;  %v8404_v53 = vsel %vm912_vm1, %v8388_v22, %v8403_v10  ;;  %v8429_v28 = vrot.slane %v17653_v23, 4 }
0x142a   : > { %v17677_v20 = vsel %vm912_vm1, %v8397_v57, %v17605_v63  ;;  %v8431_v61 = vrot.slane %v17661_v41, 4  ;;  %v8441_v18 = vrot.slane %v8292_v32, 4  ;;  %v8443_v1 = vrot.slane %v8288_v36, 4 }
0x142b   : > { %v17682_v42 = vsel %vm912_vm1, %v8401_v5, %v17595_v58  ;;  %v8529_v33 = vrot.slane %v17665_v2, 4  ;;  %v8543_v8 = vrot.slane %v17677_v20, 4  ;;  %v8553_v27 = vrot.slane %v8404_v53, 4 }
0x142c   : > { %v8442_v10 = vsel %vm912_vm1, %v8441_v18, %v8288_v36  ;;  %v8444_v47 = vsel %vm912_vm1, %v8292_v32, %v8443_v1  ;;  %v8541_v63 = vrot.slane %v17682_v42, 4  ;;  %v8555_v0 = vrot.slane %v8400_v13, 4 }
0x142d   : > { %v17690_v40 = vperm.slane %v8444_v47, %v14770_v35  ;;  %v8554_v31 = vsel %vm912_vm1, %v8553_v27, %v8400_v13  ;;  %v8278_v58 = vsel %vm912_vm1, %v8277_v39, %v17600_v48  ;;  %v17698_v60 = vsel %vm912_vm1, %v8260_v43, %v8279_v46 }
0x142e   : > { %v8556_v24 = vsel %vm912_vm1, %v8404_v53, %v8555_v0  ;;  %v17703_v45 = vsel %vm912_vm1, %v8389_v56, %v17592_v34  ;;  %v17708_v12 = vsel %vm912_vm1, %v8372_v26, %v8391_v54  ;;  %v8405_v51 = vrot.slane %v17649_v7, 4 }
0x142f   : > { %v17712_v6 = vperm.slane %v8556_v24, %v14770_v35  ;;  %v8407_v48 = vrot.slane %v8278_v58, 4  ;;  %v8418_v46 = vsel %vm912_vm1, %v8417_v15, %v17698_v60  ;;  %v8419_v43 = vrot.slane %v17698_v60, 4 }
0x1430   : > { %v8406_v25 = vsel %vm912_vm1, %v8405_v51, %v8278_v58  ;;  %v8424_v59 = vperm.slane %v8418_v46, %v14770_v35  ;;  %v8430_v34 = vsel %vm912_vm1, %v8429_v28, %v17661_v41  ;;  %v8448_v54 = vperm.slane %v8442_v10, %v14770_v35 }
0x1431   : > { %v8412_v32 = vperm.slane %v8406_v25, %v14770_v35  ;;  %v8436_v14 = vperm.slane %v8430_v34, %v14770_v35  ;;  %v8517_v16 = vrot.slane %v17671_v50, 4  ;;  %v8519_v39 = vrot.slane %v17703_v45, 4 }
0x1432   : > { %v8453_v30 = vrot.slane %v8424_v59, 4  ;;  %v8477_v36 = vrot.slane %v8448_v54, 4  ;;  %v8530_v26 = vsel %vm912_vm1, %v8529_v33, %v17708_v12  ;;  %v8531_v3 = vrot.slane %v17708_v12, 4 }
0x1433   : > { %v8518_v4 = vsel %vm912_vm1, %v8517_v16, %v17703_v45  ;;  %v8536_v22 = vperm.slane %v8530_v26, %v14770_v35  ;;  %v8542_v52 = vsel %vm912_vm1, %v8541_v63, %v17677_v20  ;;  %v8560_v56 = vperm.slane %v8554_v31, %v14770_v35 }
0x1434   : > { %v8454_v57 = vsel %vm912_vm1, %v8453_v30, %v8412_v32  ;;  %v8478_v13 = vsel %vm912_vm1, %v8477_v36, %v8436_v14  ;;  %v8524_v15 = vperm.slane %v8518_v4, %v14770_v35  ;;  %v8548_v5 = vperm.slane %v8542_v52, %v14770_v35 }
0x1435   : > { %v8460_v53 = vperm.slane %v8454_v57, %v14796_v9  ;;  %v8484_v28 = vperm.slane %v8478_v13, %v14796_v9  ;;  %v8565_v18 = vrot.slane %v8536_v22, 4  ;;  %v8589_v1 = vrot.slane %v8560_v56, 4 }
0x1436   : > { %v8455_v33 = vrot.slane %v8412_v32, 4  ;;  %v8479_v27 = vrot.slane %v8436_v14, 4  ;;  %v8567_v10 = vrot.slane %v8524_v15, 4  ;;  %v8591_v47 = vrot.slane %v8548_v5, 4 }
0x1437   : > { %v8501_v63 = vrot.slane %v8484_v28, 4  ;;  %v8566_v0 = vsel %vm912_vm1, %v8565_v18, %v8524_v15  ;;  %v8590_v31 = vsel %vm912_vm1, %v8589_v1, %v8548_v5  ;;  %v8503_v58 = vrot.slane %v8460_v53, 4 }
0x1438   : > { %v8572_v60 = vperm.slane %v8566_v0, %v14796_v9  ;;  %v8596_v24 = vperm.slane %v8590_v31, %v14796_v9  ;;  %v8456_v51 = vsel %vm912_vm1, %v8424_v59, %v8455_v33  ;;  %v8480_v46 = vsel %vm912_vm1, %v8448_v54, %v8479_v27 }
0x1439   : > { %v8502_v25 = vsel %vm912_vm1, %v8501_v63, %v8460_v53  ;;  %v8504_v34 = vsel %vm912_vm1, %v8484_v28, %v8503_v58  ;;  %v8464_v32 = vperm.slane %v8456_v51, %v14796_v9  ;;  %v8488_v14 = vperm.slane %v8480_v46, %v14796_v9 }
0x143a   : > { %v8613_v16 = vrot.slane %v8596_v24, 4  ;;  %v9133_v30 = vpack.c.bf16 %v8502_v25, %v8502_v25  ;;  %v8615_v36 = vrot.slane %v8572_v60, 4  ;;  %v9135_v26 = vpack.c.bf16 %v8504_v34, %v8504_v34 }
0x143b   : > { %v8505_v4 = vrot.slane %v8488_v14, 4  ;;  %v8568_v52 = vsel %vm912_vm1, %v8536_v22, %v8567_v10  ;;  %v8592_v57 = vsel %vm912_vm1, %v8560_v56, %v8591_v47  ;;  %v8408_v59 = vsel %vm912_vm1, %v17649_v7, %v8407_v48 }
0x143c   : > { %v8614_v54 = vsel %vm912_vm1, %v8613_v16, %v8572_v60  ;;  %v9151_v13 = vunpack.c.l.b16 %v9133_v30  ;;  %v8616_v15 = vsel %vm912_vm1, %v8596_v24, %v8615_v36  ;;  %v9175_v5 = vunpack.c.l.b16 %v9135_v26 }
0x143d   : > { %v9134_v53 = vpack.c.bf16 %v8614_v54, %v8614_v54  ;;  %v9136_v28 = vpack.c.bf16 %v8616_v15, %v8616_v15  ;;  %v8506_v18 = vsel %vm912_vm1, %v8505_v4, %v8464_v32  ;;  %v8576_v1 = vperm.slane %v8568_v52, %v14796_v9 }
0x143e   : > { %v8600_v33 = vperm.slane %v8592_v57, %v14796_v9  ;;  %v9137_v22 = vpack.c.bf16 %v8506_v18, %v8506_v18  ;;  %v8416_v56 = vperm.slane %v8408_v59, %v14770_v35  ;;  %v8420_v7 = vsel %vm912_vm1, %v17641_v55, %v8419_v43 }
0x143f   : > { %v9152_v48 = vunpack.c.l.b16 %v9134_v53  ;;  %v9176_v27 = vunpack.c.l.b16 %v9136_v28  ;;  %v8428_v10 = vperm.slane %v8420_v7, %v14770_v35  ;;  %v8432_v47 = vsel %vm912_vm1, %v17653_v23, %v8431_v61 }
0x1440   : > { %v8617_v63 = vrot.slane %v8600_v33, 4  ;;  %v9199_v0 = vunpack.c.l.b16 %v9137_v22  ;;  %v8440_v31 = vperm.slane %v8432_v47, %v14770_v35  ;;  %v8489_v58 = vrot.slane %v17690_v40, 4 }
0x1441   : > { %v9153_v60 = vpack.c.b16 %v9152_v48, %v9151_v13  ;;  %v9177_v24 = vpack.c.b16 %v9176_v27, %v9175_v5  ;;  %v8465_v51 = vrot.slane %v8428_v10, 4  ;;  %v8520_v55 = vsel %vm912_vm1, %v17671_v50, %v8519_v39 }
0x1442   : > { %v8618_v43 = vsel %vm912_vm1, %v8617_v63, %v8576_v1  ;;  %v8490_v41 = vsel %vm912_vm1, %v8489_v58, %v8440_v31  ;;  %v8528_v23 = vperm.slane %v8520_v55, %v14770_v35  ;;  %v8532_v61 = vsel %vm912_vm1, %v17665_v2, %v8531_v3 }
0x1443   : > { %v9158_v46 = vsel %vm1663_vm2, %v9153_v60, 0  ;;  %v9182_v25 = vsel %vm1663_vm2, %v9177_v24, 0  ;;  %v9138_v34 = vpack.c.bf16 %v8618_v43, %v8618_v43  ;;  %v8466_v45 = vsel %vm912_vm1, %v8465_v51, %v8416_v56 }
0x1444   : > { %9167 = vmatpush.bf16.xpose.msra.mxu1 %v9158_v46  ;;  %9191 = vmatpush.bf16.xpose.msra.mxu2 %v9182_v25  ;;  %v8472_v50 = vperm.slane %v8466_v45, %v14796_v9  ;;  %v8496_v39 = vperm.slane %v8490_v41, %v14796_v9  ;;  %v8540_v16 = vperm.slane %v8532_v61, %v14770_v35  ;;  %v8601_v12 = vrot.slane %v17712_v6, 4 }
0x1445   : > { %v9200_v30 = vunpack.c.l.b16 %v9138_v34  ;;  %v8544_v2 = vsel %vm912_vm1, %v17682_v42, %v8543_v8  ;;  %v8507_v3 = vrot.slane %v8464_v32, 4  ;;  %v8619_v36 = vrot.slane %v8576_v1, 4  ;;  %v14283_v34 = vld [vmem:[%s19247_s1 + $0x1] ss:$0 sm:$0xff] }
0x1446   : > { %v8509_v26 = vrot.slane %v8496_v39, 4  ;;  %v8552_v4 = vperm.slane %v8544_v2, %v14770_v35  ;;  %v8577_v52 = vrot.slane %v8540_v16, 4  ;;  %v8511_v57 = vrot.slane %v8472_v50, 4 }
0x1447   : > { %v9201_v59 = vpack.c.b16 %v9200_v30, %v9199_v0  ;;  %v8508_v54 = vsel %vm912_vm1, %v8488_v14, %v8507_v3  ;;  %v8620_v13 = vsel %vm912_vm1, %v8600_v33, %v8619_v36  ;;  %v8467_v15 = vrot.slane %v8416_v56, 4 }
0x1448   : > { %v8510_v5 = vsel %vm912_vm1, %v8509_v26, %v8472_v50  ;;  %v8578_v20 = vsel %vm912_vm1, %v8577_v52, %v8528_v23  ;;  %v8602_v53 = vsel %vm912_vm1, %v8601_v12, %v8552_v4  ;;  %v9139_v42 = vpack.c.bf16 %v8508_v54, %v8508_v54 }
0x1449   : > { %v9206_v8 = vsel %vm1663_vm2, %v9201_v59, 0  ;;  %v8584_v32 = vperm.slane %v8578_v20, %v14796_v9  ;;  %v8608_v28 = vperm.slane %v8602_v53, %v14796_v9  ;;  %v9141_v18 = vpack.c.bf16 %v8510_v5, %v8510_v5 }
0x144a   : > { %9215 = vmatpush.bf16.xpose.msra.mxu3 %v9206_v8  ;;  %v9140_v1 = vpack.c.bf16 %v8620_v13, %v8620_v13  ;;  %v9223_v14 = vunpack.c.l.b16 %v9139_v42  ;;  %v8512_v33 = vsel %vm912_vm1, %v8496_v39, %v8511_v57  ;;  %v8468_v22 = vsel %vm912_vm1, %v8428_v10, %v8467_v15 }
0x144b   : > { %v8621_v56 = vrot.slane %v8608_v28, 4  ;;  %v9247_v7 = vunpack.c.l.b16 %v9141_v18  ;;  %v8623_v48 = vrot.slane %v8584_v32, 4  ;;  %v9143_v27 = vpack.c.bf16 %v8512_v33, %v8512_v33 }
0x144c   : > { %v9224_v47 = vunpack.c.l.b16 %v9140_v1  ;;  %v8476_v63 = vperm.slane %v8468_v22, %v14796_v9  ;;  %v8491_v0 = vrot.slane %v8440_v31, 4  ;;  %v8579_v58 = vrot.slane %v8528_v23, 4 }
0x144d   : > { %v8622_v60 = vsel %vm912_vm1, %v8621_v56, %v8584_v32  ;;  %v8624_v24 = vsel %vm912_vm1, %v8608_v28, %v8623_v48  ;;  %v9271_v51 = vunpack.c.l.b16 %v9143_v27  ;;  %v8603_v55 = vrot.slane %v8552_v4, 4 }
0x144e   : > { %v9142_v43 = vpack.c.bf16 %v8622_v60, %v8622_v60  ;;  %v9225_v41 = vpack.c.b16 %v9224_v47, %v9223_v14  ;;  %v9144_v61 = vpack.c.bf16 %v8624_v24, %v8624_v24  ;;  %v8492_v10 = vsel %vm912_vm1, %v17690_v40, %v8491_v0 }
0x144f   : > { %v8500_v46 = vperm.slane %v8492_v10, %v14796_v9  ;;  %v8580_v25 = vsel %vm912_vm1, %v8540_v16, %v8579_v58  ;;  %v8604_v31 = vsel %vm912_vm1, %v17712_v6, %v8603_v55  ;;  %v8515_v23 = vrot.slane %v8476_v63, 4 }
0x1450   : > { %v9248_v45 = vunpack.c.l.b16 %v9142_v43  ;;  %v9230_v50 = vsel %vm1663_vm2, %v9225_v41, 0  ;;  %v9272_v39 = vunpack.c.l.b16 %v9144_v61  ;;  %v8588_v12 = vperm.slane %v8580_v25, %v14796_v9 }
0x1451   : > { %9239 = vmatpush.bf16.xpose.msrb.mxu0 %v9230_v50  ;;  %v8513_v40 = vrot.slane %v8500_v46, 4  ;;  %v8612_v30 = vperm.slane %v8604_v31, %v14796_v9  ;;  %v8516_v16 = vsel %vm912_vm1, %v8500_v46, %v8515_v23 }
0x1452   : > { %v9249_v2 = vpack.c.b16 %v9248_v45, %v9247_v7  ;;  %v9273_v3 = vpack.c.b16 %v9272_v39, %v9271_v51  ;;  %v8627_v6 = vrot.slane %v8588_v12, 4  ;;  %v9147_v36 = vpack.c.bf16 %v8516_v16, %v8516_v16 }
0x1453   : > { %v8514_v4 = vsel %vm912_vm1, %v8513_v40, %v8476_v63  ;;  %v8625_v52 = vrot.slane %v8612_v30, 4 }
0x1454   : > { %v9254_v59 = vsel %vm1663_vm2, %v9249_v2, 0  ;;  %v9278_v54 = vsel %vm1663_vm2, %v9273_v3, 0  ;;  %v9145_v13 = vpack.c.bf16 %v8514_v4, %v8514_v4  ;;  %v8628_v15 = vsel %vm912_vm1, %v8612_v30, %v8627_v6 }
0x1455   : > { %9263 = vmatpush.bf16.xpose.msrb.mxu1 %v9254_v59  ;;  %9287 = vmatpush.bf16.xpose.msrb.mxu2 %v9278_v54  ;;  %v8626_v5 = vsel %vm912_vm1, %v8625_v52, %v8588_v12  ;;  %v9148_v20 = vpack.c.bf16 %v8628_v15, %v8628_v15  ;;  %v9319_v53 = vunpack.c.l.b16 %v9147_v36 }
0x1456   : > { %v9146_v8 = vpack.c.bf16 %v8626_v5, %v8626_v5  ;;  %v9295_v32 = vunpack.c.l.b16 %v9145_v13 }
0x1457   : > { %v9320_v28 = vunpack.c.l.b16 %v9148_v20 }
0x1458   : > { %v9296_v18 = vunpack.c.l.b16 %v9146_v8 }
0x1459   : > { %v9321_v1 = vpack.c.b16 %v9320_v28, %v9319_v53 }
0x145a   : > { %v9297_v14 = vpack.c.b16 %v9296_v18, %v9295_v32 }
0x145b   : > { %v9326_v22 = vsel %vm1663_vm2, %v9321_v1, 0 }
0x145c   : > { %v9302_v56 = vsel %vm1663_vm2, %v9297_v14, 0  ;;  %9335 = vmatpush.bf16.xpose.msra.mxu0 %v9326_v22 }
0x145d   : > { %9311 = vmatpush.bf16.xpose.msrb.mxu3 %v9302_v56 }
0x149c   : > { %v7847_v26 = vpop.f32.mrf.mxu3 }
0x149d   : > { %v7848_v57 = vadd.f32 %v14283_v34, %v7847_v26 }
0x149f   : > { %v7890_v42 = vmul.f32 0.5, %v7848_v57 }
0x14a1   : > { %7904 = vrot.lane.b32.xlu0 %v7890_v42, %s19212_s29  ;;  %7895 = vrot.lane.b32.xlu2 %v7890_v42, %s19215_s6  ;;  %v7915_v47 = vrot.slane %v7890_v42, 4  ;;  %s19249_s29 = sld [smem:[#allocation27_spill]] }
0x14a2   : > { %7901 = vrot.lane.b32.xlu1 %v7890_v42, %s19210_s27  ;;  %s19256_s27 = sld [smem:[#allocation34_spill]] }
0x14a4   : > { %v7849_v33 = vpop.f32.mrf.mxu3 }
0x14a9   : > { %7898 = vrot.lane.b32.xlu0 %v7890_v42, %s19203_s7  ;;  %7907 = vrot.lane.b32.xlu2 %v7890_v42, %s19213_s5  ;;  %s19248_s7 = sld [smem:[#allocation14_spill]] }
0x14aa   : > { %7910 = vrot.lane.b32.xlu1 %v7890_v42, %s19211_s0  ;;  %s19257_s0 = smov %s19256_s27 }
0x14b1   : > { %14237 = vrot.lane.b32.xlu0 %v17479_v38, %s19220_s3  ;;  %7892 = vrot.lane.b32.xlu2 %v7890_v42, %s19214_s10 }
0x14b2   : > { %14227 = vrot.lane.b32.xlu1 %v17499_v19, %s19220_s3 }
0x14b9   : > { %14232 = vrot.lane.b32.xlu2 %v17504_v49, %s19220_s3  ;;  %14242 = vrot.lane.b32.xlu0 %v17521_v11, %s19220_s3 }
0x14ba   : > { %14247 = vrot.lane.b32.xlu1 %v17526_v37, %s19220_s3 }
0x14fb   : > { %v7896_v7 = vpop.permute.xlu2 %7895 }
0x14fc   : > { %v7913_v27 = vrot.slane %v7896_v7, 4  ;;  %v7916_v0 = vsel %vm912_vm1, %v7896_v7, %v7915_v47 }
0x14fd   : > { %v7924_v51 = vperm.slane %v7916_v0, %v14770_v35 }
0x14fe   : > { %v7914_v19 = vsel %vm912_vm1, %v7913_v27, %v7890_v42 }
0x14ff   : > { %v7920_v37 = vperm.slane %v7914_v19, %v14770_v35  ;;  %v7975_v46 = vrot.slane %v7924_v51, 4 }
0x1501   : > { %v7963_v34 = vrot.slane %v7920_v37, 4 }
0x1503   : > { %v7908_v48 = vpop.permute.xlu2 %7907 }
0x1504   : > { %v7937_v58 = vrot.slane %v7908_v48, 4 }
0x150b   : > { %v7893_v24 = vpop.permute.xlu2 %7892 }
0x150c   : > { %v7927_v55 = vrot.slane %v7893_v24, 4 }
0x1513   : > { %v7905_v63 = vpop.permute.xlu0 %7904 }
0x1514   : > { %v7902_v38 = vpop.permute.xlu1 %7901  ;;  %v7951_v61 = vrot.slane %v7905_v63, 4 }
0x1515   : > { %v7939_v60 = vrot.slane %v7902_v38, 4  ;;  %v7938_v49 = vsel %vm912_vm1, %v7937_v58, %v7902_v38  ;;  %v14233_v58 = vpop.permute.xlu2 %14232 }
0x1516   : > { %v7944_v43 = vperm.slane %v7938_v49, %v14770_v35 }
0x1517   : > { %v7940_v11 = vsel %vm912_vm1, %v7908_v48, %v7939_v60 }
0x1518   : > { %v7948_v41 = vperm.slane %v7940_v11, %v14770_v35  ;;  %v7987_v12 = vrot.slane %v7944_v43, 4 }
0x151a   : > { %v7999_v40 = vrot.slane %v7948_v41, 4 }
0x151b   : > { %v7899_v10 = vpop.permute.xlu0 %7898 }
0x151c   : > { %v7911_v25 = vpop.permute.xlu1 %7910  ;;  %v7925_v31 = vrot.slane %v7899_v10, 4  ;;  %v7928_v23 = vsel %vm912_vm1, %v7899_v10, %v7927_v55 }
0x151d   : > { %v7949_v45 = vrot.slane %v7911_v25, 4  ;;  %v7952_v50 = vsel %vm912_vm1, %v7911_v25, %v7951_v61  ;;  %v7936_v39 = vperm.slane %v7928_v23, %v14770_v35  ;;  %v14235_v61 = vunpack.i.h.bf16 %v14233_v58 }
0x151e   : > { %v7960_v30 = vperm.slane %v7952_v50, %v14770_v35  ;;  %v7926_v16 = vsel %vm912_vm1, %v7925_v31, %v7893_v24  ;;  %v14234_v31 = vunpack.i.l.bf16 %v14233_v58 }
0x151f   : > { %v7950_v2 = vsel %vm912_vm1, %v7949_v45, %v7905_v63  ;;  %v7932_v3 = vperm.slane %v7926_v16, %v14770_v35  ;;  %v7973_v6 = vrot.slane %v7936_v39, 4  ;;  %v7976_v36 = vsel %vm912_vm1, %v7936_v39, %v7975_v46 }
0x1520   : > { %v7956_v26 = vperm.slane %v7950_v2, %v14770_v35  ;;  %v7997_v4 = vrot.slane %v7960_v30, 4  ;;  %v8000_v52 = vsel %vm912_vm1, %v7960_v30, %v7999_v40  ;;  %v7984_v57 = vperm.slane %v7976_v36, %v14796_v9 }
0x1521   : > { %v8008_v59 = vperm.slane %v8000_v52, %v14796_v9  ;;  %v7961_v54 = vrot.slane %v7932_v3, 4  ;;  %v7964_v13 = vsel %vm912_vm1, %v7932_v3, %v7963_v34  ;;  %v7974_v15 = vsel %vm912_vm1, %v7973_v6, %v7924_v51 }
0x1522   : > { %v7985_v5 = vrot.slane %v7956_v26, 4  ;;  %v7988_v20 = vsel %vm912_vm1, %v7956_v26, %v7987_v12  ;;  %v7998_v53 = vsel %vm912_vm1, %v7997_v4, %v7948_v41  ;;  %v7972_v42 = vperm.slane %v7964_v13, %v14796_v9 }
0x1523   : > { %v7996_v8 = vperm.slane %v7988_v20, %v14796_v9  ;;  %v8004_v32 = vperm.slane %v7998_v53, %v14796_v9  ;;  %v8021_v28 = vrot.slane %v8008_v59, 4  ;;  %v7962_v18 = vsel %vm912_vm1, %v7961_v54, %v7920_v37  ;;  %v14238_v16 = vpop.permute.xlu0 %14237 }
0x1524   : > { %v7986_v1 = vsel %vm912_vm1, %v7985_v5, %v7944_v43  ;;  %v7968_v14 = vperm.slane %v7962_v18, %v14796_v9  ;;  %v7980_v33 = vperm.slane %v7974_v15, %v14796_v9  ;;  %v8015_v22 = vrot.slane %v7972_v42, 4 }
0x1525   : > { %v7992_v56 = vperm.slane %v7986_v1, %v14796_v9  ;;  %v8013_v7 = vrot.slane %v7996_v8, 4  ;;  %v8017_v48 = vrot.slane %v8004_v32, 4  ;;  %v8022_v27 = vsel %vm912_vm1, %v8021_v28, %v7984_v57 }
0x1526   : > { %v8011_v47 = vrot.slane %v7968_v14, 4  ;;  %v8016_v63 = vsel %vm912_vm1, %v7996_v8, %v8015_v22  ;;  %v8019_v38 = vrot.slane %v7980_v33, 4  ;;  %v8023_v0 = vrot.slane %v7984_v57, 4 }
0x1527   : > { %v8009_v60 = vrot.slane %v7992_v56, 4  ;;  %v8014_v19 = vsel %vm912_vm1, %v8013_v7, %v7972_v42  ;;  %v8037_v24 = vrot.slane %v8016_v63, 4  ;;  %v8018_v11 = vsel %vm912_vm1, %v8017_v48, %v7980_v33 }
0x1528   : > { %v8012_v49 = vsel %vm912_vm1, %v7992_v56, %v8011_v47  ;;  %v8024_v51 = vsel %vm912_vm1, %v8008_v59, %v8023_v0  ;;  %v8025_v37 = vrot.slane %v8014_v19, 4  ;;  %v8049_v41 = vrot.slane %v8022_v27, 4 }
0x1529   : > { %v8010_v55 = vsel %vm912_vm1, %v8009_v60, %v7968_v14  ;;  %v8038_v43 = vsel %vm912_vm1, %v8037_v24, %v8012_v49  ;;  %v8020_v10 = vsel %vm912_vm1, %v8004_v32, %v8019_v38  ;;  %v8039_v34 = vrot.slane %v8012_v49, 4 }
0x152a   : > { %v8026_v46 = vsel %vm912_vm1, %v8025_v37, %v8010_v55  ;;  %v8044_v25 = vperm.slane %v8038_v43, %v14770_v35  ;;  %v8050_v45 = vsel %vm912_vm1, %v8049_v41, %v8018_v11  ;;  %v8061_v50 = vrot.slane %v8024_v51, 4 }
0x152b   : > { %v8032_v23 = vperm.slane %v8026_v46, %v14770_v35  ;;  %v8056_v39 = vperm.slane %v8050_v45, %v14770_v35  ;;  %v8027_v12 = vrot.slane %v8010_v55, 4  ;;  %v8063_v30 = vrot.slane %v8020_v10, 4 }
0x152c   : > { %v8062_v40 = vsel %vm912_vm1, %v8061_v50, %v8020_v10  ;;  %v8051_v2 = vrot.slane %v8018_v11, 4  ;;  %v8073_v6 = vrot.slane %v8044_v25, 4  ;;  %v8789_v36 = vrot.slane %v14235_v61, 4 }
0x152d   : > { %v8068_v3 = vperm.slane %v8062_v40, %v14770_v35  ;;  %v8040_v26 = vsel %vm912_vm1, %v8016_v63, %v8039_v34  ;;  %v8064_v4 = vsel %vm912_vm1, %v8024_v51, %v8063_v30  ;;  %v8075_v52 = vrot.slane %v8032_v23, 4 }
0x152e   : > { %v8677_v57 = vrot.slane %v14234_v31, 4  ;;  %v8099_v54 = vrot.slane %v8056_v39, 4  ;;  %v14240_v13 = vunpack.i.h.bf16 %v14238_v16  ;;  %v14239_v15 = vunpack.i.l.bf16 %v14238_v16 }
0x152f   : > { %v8097_v59 = vrot.slane %v8068_v3, 4  ;;  %v8028_v5 = vsel %vm912_vm1, %v8014_v19, %v8027_v12  ;;  %v8074_v20 = vsel %vm912_vm1, %v8073_v6, %v8032_v23  ;;  %v8048_v53 = vperm.slane %v8040_v26, %v14770_v35 }
0x1530   : > { %v8052_v42 = vsel %vm912_vm1, %v8022_v27, %v8051_v2  ;;  %v17899_v32 = vsel %vm912_vm1, %v8789_v36, %v14240_v13  ;;  %v8072_v28 = vperm.slane %v8064_v4, %v14770_v35  ;;  %v8791_v1 = vrot.slane %v14240_v13, 4 }
0x1531   : > { %v8098_v8 = vsel %vm912_vm1, %v8097_v59, %v8056_v39  ;;  %v8076_v14 = vsel %vm912_vm1, %v8044_v25, %v8075_v52  ;;  %v8100_v33 = vsel %vm912_vm1, %v8068_v3, %v8099_v54  ;;  %v17906_v22 = vsel %vm912_vm1, %v8677_v57, %v14239_v15 }
0x1532   : > { %v8104_v18 = vperm.slane %v8098_v8, %v14796_v9  ;;  %v8679_v56 = vrot.slane %v14239_v15, 4  ;;  %v8080_v7 = vperm.slane %v8074_v20, %v14796_v9  ;;  %v8036_v48 = vperm.slane %v8028_v5, %v14770_v35  ;;  %v14435_v5 = vld [vmem:[%s19248_s7] sm:$0xff] }
0x1533   : > { %v17911_v27 = vsel %vm912_vm1, %v14235_v61, %v8791_v1  ;;  %v8060_v47 = vperm.slane %v8052_v42, %v14770_v35  ;;  %v8084_v0 = vperm.slane %v8076_v14, %v14796_v9  ;;  %v8109_v58 = vrot.slane %v8072_v28, 4 }
0x1534   : > { %v17915_v63 = vsel %vm912_vm1, %v14234_v31, %v8679_v56  ;;  %v8121_v38 = vrot.slane %v8104_v18, 4  ;;  %v8108_v60 = vperm.slane %v8100_v33, %v14796_v9  ;;  %v8123_v19 = vrot.slane %v8080_v7, 4 }
0x1535   : > { %v8085_v24 = vrot.slane %v8048_v53, 4  ;;  %v8127_v11 = vrot.slane %v8084_v0, 4  ;;  %v8087_v51 = vrot.slane %v8036_v48, 4  ;;  %v8111_v41 = vrot.slane %v8060_v47, 4 }
0x1536   : > { %v8122_v49 = vsel %vm912_vm1, %v8121_v38, %v8080_v7  ;;  %v8125_v55 = vrot.slane %v8108_v60, 4  ;;  %v8124_v43 = vsel %vm912_vm1, %v8104_v18, %v8123_v19  ;;  %v8110_v46 = vsel %vm912_vm1, %v8109_v58, %v8060_v47 }
0x1537   : > { %v9125_v37 = vpack.c.bf16 %v8122_v49, %v8122_v49  ;;  %v9126_v61 = vpack.c.bf16 %v8124_v43, %v8124_v43  ;;  %v8128_v10 = vsel %vm912_vm1, %v8108_v60, %v8127_v11  ;;  %v8086_v34 = vsel %vm912_vm1, %v8085_v24, %v8036_v48 }
0x1538   : > { %v8126_v25 = vsel %vm912_vm1, %v8125_v55, %v8084_v0  ;;  %v9128_v31 = vpack.c.bf16 %v8128_v10, %v8128_v10  ;;  %v8088_v45 = vsel %vm912_vm1, %v8048_v53, %v8087_v51  ;;  %v8112_v50 = vsel %vm912_vm1, %v8072_v28, %v8111_v41 }
0x1539   : > { %12651 = vmatmul.msk.bf16.vlgmr.msra.gmra.mxu1 %vm1663_vm2, %v9125_v37  ;;  %v9127_v23 = vpack.c.bf16 %v8126_v25, %v8126_v25  ;;  %12652 = vmatmul.msk.bf16.vlgmr.msra.gmra.mxu2 %vm1663_vm2, %v9126_v61  ;;  %v8116_v39 = vperm.slane %v8110_v46, %v14796_v9  ;;  %v8092_v12 = vperm.slane %v8086_v34, %v14796_v9 }
0x153a   : > { %12654 = vmatmul.msk.bf16.vlgmr.msrb.gmra.mxu0 %vm1663_vm2, %v9128_v31  ;;  %v8096_v40 = vperm.slane %v8088_v45, %v14796_v9  ;;  %v8120_v30 = vperm.slane %v8112_v50, %v14796_v9  ;;  %v17965_v50 = vpop.permute.xlu0 %14242 }
0x153b   : > { %12653 = vmatmul.msk.bf16.vlgmr.msra.gmra.mxu3 %vm1663_vm2, %v9127_v23  ;;  %v8129_v16 = vrot.slane %v8116_v39, 4  ;;  %v8131_v2 = vrot.slane %v8092_v12, 4  ;;  %v17961_v23 = vpop.permute.xlu1 %14227 }
0x153c   : > { %v8135_v3 = vrot.slane %v8096_v40, 4  ;;  %v8133_v6 = vrot.slane %v8120_v30, 4 }
0x153d   : > { %v8130_v36 = vsel %vm912_vm1, %v8129_v16, %v8092_v12  ;;  %v8132_v26 = vsel %vm912_vm1, %v8116_v39, %v8131_v2 }
0x153e   : > { %v8136_v4 = vsel %vm912_vm1, %v8120_v30, %v8135_v3  ;;  %v9129_v52 = vpack.c.bf16 %v8130_v36, %v8130_v36  ;;  %v8134_v57 = vsel %vm912_vm1, %v8133_v6, %v8096_v40  ;;  %v9130_v59 = vpack.c.bf16 %v8132_v26, %v8132_v26 }
0x153f   : > { %v9132_v54 = vpack.c.bf16 %v8136_v4, %v8136_v4  ;;  %v9131_v13 = vpack.c.bf16 %v8134_v57, %v8134_v57 }
0x1543   : > { %v17963_v34 = vpop.permute.xlu1 %14247 }
0x1549   : > { %12655 = vmatmul.msk.bf16.vlgmr.msrb.gmra.mxu1 %vm1663_vm2, %v9129_v52  ;;  %12656 = vmatmul.msk.bf16.vlgmr.msrb.gmra.mxu2 %vm1663_vm2, %v9130_v59 }
0x154a   : > { %12658 = vmatmul.msk.bf16.vlgmr.msra.gmra.mxu0 %vm1663_vm2, %v9132_v54 }
0x154b   : > { %12657 = vmatmul.msk.bf16.vlgmr.msrb.gmra.mxu3 %vm1663_vm2, %v9131_v13 }
0x15b6   : > { %v9169_v15 = vpop.f32.mrf.mxu1 }
0x15b7   : > { %v9170_v20 = vadd.f32 %v14435_v5, %v9169_v15  ;;  %v9241_v53 = vpop.f32.mrf.mxu0 }
0x15b8   : > { %v9242_v42 = vadd.f32 %v14435_v5, %v9241_v53 }
0x15b9   : > { %v9341_v8 = vsel %vm2330_vm6, %v9170_v20, -inf }
0x15ba   : > { %9342 = vmax.xlane.f32.xlu1 %v9341_v8  ;;  %v9350_v28 = vsel %vm2330_vm6, %v9242_v42, -inf }
0x15bb   : > { %9351 = vmax.xlane.f32.xlu2 %v9350_v28 }
0x15bc   : > { %v9193_v18 = vpop.f32.mrf.mxu2 }
0x15bd   : > { %v9194_v33 = vadd.f32 %v14435_v5, %v9193_v18 }
0x15be   : > { %v9171_v1 = vpop.f32.mrf.mxu1  ;;  %v9217_v14 = vpop.f32.mrf.mxu3 }
0x15bf   : > { %v9218_v56 = vadd.f32 %v14435_v5, %v9217_v14  ;;  %v9243_v7 = vpop.f32.mrf.mxu0  ;;  %v9344_v47 = vsel %vm2330_vm6, %v9194_v33, -inf }
0x15c1   : > { %v9347_v48 = vsel %vm2330_vm6, %v9218_v56, -inf }
0x15c2   : > { %9348 = vmax.xlane.f32.xlu0 %v9347_v48 }
0x15c3   : > { %9345 = vmax.xlane.f32.xlu2 %v9344_v47 }
0x15c4   : > { %v9195_v38 = vpop.f32.mrf.mxu2 }
0x15c5   : > { %v14230_v38 = vunpack.i.h.bf16 %v17961_v23 }
0x15c6   : > { %v9265_v0 = vpop.f32.mrf.mxu1  ;;  %v9219_v58 = vpop.f32.mrf.mxu3 }
0x15c7   : > { %v9266_v60 = vadd.f32 %v14435_v5, %v9265_v0  ;;  %v9337_v19 = vpop.f32.mrf.mxu0  ;;  %v14250_v0 = vunpack.i.h.bf16 %v17963_v34 }
0x15c8   : > { %v17948_v24 = vadd.f32 %v14435_v5, %v9337_v19  ;;  %v14249_v19 = vunpack.i.l.bf16 %v17963_v34 }
0x15c9   : > { %v9353_v11 = vsel %vm2330_vm6, %v9266_v60, -inf }
0x15ca   : > { %v9362_v49 = vsel %vm2330_vm6, %v17948_v24, -inf }
0x15cb   : > { %9363 = vmax.xlane.f32.xlu0 %v9362_v49  ;;  %9354 = vmax.xlane.f32.xlu2 %v9353_v11  ;;  %v8815_v11 = vrot.slane %v14230_v38, 4 }
0x15cc   : > { %v9289_v51 = vpop.f32.mrf.mxu2 }
0x15cd   : > { %v9290_v55 = vadd.f32 %v14435_v5, %v9289_v51  ;;  %v8813_v51 = vrot.slane %v14250_v0, 4 }
0x15ce   : > { %v9267_v37 = vpop.f32.mrf.mxu1  ;;  %v9313_v43 = vpop.f32.mrf.mxu3 }
0x15cf   : > { %v9314_v41 = vadd.f32 %v14435_v5, %v9313_v43  ;;  %v9339_v61 = vpop.f32.mrf.mxu0  ;;  %v9356_v10 = vsel %vm2330_vm6, %v9290_v55, -inf  ;;  %v8796_v43 = vperm.slane %v17899_v32, %v14770_v35  ;;  %v8688_v32 = vperm.slane %v17915_v63, %v14770_v35 }
0x15d0   : > { %9357 = vmax.xlane.f32.xlu1 %v9356_v10  ;;  %v8684_v61 = vperm.slane %v17906_v22, %v14770_v35  ;;  %v8701_v10 = vrot.slane %v14249_v19, 4 }
0x15d1   : > { %v9359_v46 = vsel %vm2330_vm6, %v9314_v41, -inf  ;;  %v8839_v22 = vrot.slane %v8796_v43, 4 }
0x15d3   : > { %9360 = vmax.xlane.f32.xlu0 %v9359_v46 }
0x15d4   : > { %v9291_v25 = vpop.f32.mrf.mxu2 }
0x15d6   : > { %v9315_v31 = vpop.f32.mrf.mxu3 }
0x15d7   : > { %v8814_v31 = vsel %vm912_vm1, %v8813_v51, %v14230_v38 }
0x15e3   : > { %14252 = vrot.lane.b32.xlu2 %v17542_v62, %s19220_s3 }
0x15e7   : > { %14257 = vrot.lane.b32.xlu0 %v17551_v44, %s19220_s3 }
0x15e9   : > { %14262 = vrot.lane.b32.xlu1 %v17574_v29, %s19220_s3  ;;  %s19252_s3 = sld [smem:[#allocation32_spill]] }
0x162d   : > { %v9343_v45 = vpop.xlane.xlu1 %9342 }
0x162e   : > { %v9365_v39 = vsub.f32 %v9170_v20, %v9343_v45  ;;  %v9352_v12 = vpop.xlane.xlu2 %9351 }
0x162f   : > { %v9368_v3 = vsub.f32 %v9242_v42, %v9352_v12 }
0x1630   : > { %v9373_v40 = vmul.f32 1.442695, %v9365_v39 }
0x1631   : > { %v9379_v26 = vmul.f32 1.442695, %v9368_v3 }
0x1632   : > { %14397 = vpow2.f32 %v9373_v40  ;;  %v8727_v40 = vrot.slane %v8684_v61, 4 }
0x1635   : > { %v9349_v30 = vpop.xlane.xlu0 %9348 }
0x1636   : > { %v9367_v16 = vsub.f32 %v9218_v56, %v9349_v30  ;;  %v9346_v62 = vpop.xlane.xlu2 %9345  ;;  %v14229_v56 = vunpack.i.l.bf16 %v17961_v23  ;;  %v8816_v23 = vsel %vm912_vm1, %v14250_v0, %v8815_v11 }
0x1637   : > { %v9366_v44 = vsub.f32 %v9194_v33, %v9346_v62  ;;  %v18022_v62 = vperm.slane %v8816_v23, %v14770_v35 }
0x1638   : > { %v17967_v2 = vpop.eup %14397  ;;  %v9377_v6 = vmul.f32 1.442695, %v9367_v16  ;;  %v8702_v30 = vsel %vm912_vm1, %v8701_v10, %v14229_v56  ;;  %v18019_v16 = vperm.slane %v8814_v31, %v14770_v35 }
0x1639   : > { %v9389_v29 = vsel %vm2330_vm6, %v17967_v2, 0.0  ;;  %v9375_v36 = vmul.f32 1.442695, %v9366_v44  ;;  %v14244_v44 = vunpack.i.l.bf16 %v17965_v50 }
0x163a   : > { %9390 = vadd.xlane.f32.xlu1 %v9389_v29  ;;  %14399 = vpow2.f32 %v9377_v6 }
0x163b   : > { %14401 = vpow2.f32 %v9375_v36 }
0x163c   : > { %14403 = vpow2.f32 %v9379_v26 }
0x163e   : > { %v9364_v4 = vpop.xlane.xlu0 %9363  ;;  %v9355_v52 = vpop.xlane.xlu2 %9354 }
0x163f   : > { %v9369_v57 = vsub.f32 %v9266_v60, %v9355_v52  ;;  %v9372_v1 = vsub.f32 %v17948_v24, %v9364_v4  ;;  %v8703_v60 = vrot.slane %v14229_v56, 4  ;;  %v8739_v4 = vrot.slane %v8688_v32, 4 }
0x1640   : > { %v17971_v59 = vpop.eup %14399  ;;  %v18028_v52 = vperm.slane %v8702_v30, %v14770_v35  ;;  %v8875_v56 = vrot.slane %v18022_v62, 4 }
0x1641   : > { %v17973_v54 = vpop.eup %14401  ;;  %v9395_v13 = vsel %vm2330_vm6, %v17971_v59, 0.0  ;;  %v9381_v5 = vmul.f32 1.442695, %v9369_v57  ;;  %v9387_v48 = vmul.f32 1.442695, %v9372_v1  ;;  %v8704_v46 = vsel %vm912_vm1, %v14249_v19, %v8703_v60 }
0x1642   : > { %9396 = vadd.xlane.f32.xlu2 %v9395_v13  ;;  %v9392_v15 = vsel %vm2330_vm6, %v17973_v54, 0.0  ;;  %v17979_v42 = vpop.eup %14403  ;;  %v18014_v39 = vperm.slane %v8704_v46, %v14770_v35 }
0x1643   : > { %9393 = vadd.xlane.f32.xlu0 %v9392_v15  ;;  %v9358_v20 = vpop.xlane.xlu1 %9357  ;;  %14405 = vpow2.f32 %v9381_v5  ;;  %v9398_v33 = vsel %vm2330_vm6, %v17979_v42, 0.0 }
0x1644   : > { %v9370_v53 = vsub.f32 %v9290_v55, %v9358_v20  ;;  %v8763_v57 = vrot.slane %v18014_v39, 4 }
0x1646   : > { %v9383_v8 = vmul.f32 1.442695, %v9370_v53  ;;  %v9361_v28 = vpop.xlane.xlu0 %9360  ;;  %v14253_v37 = vpop.permute.xlu2 %14252 }
0x1647   : > { %v9371_v18 = vsub.f32 %v9314_v41, %v9361_v28  ;;  %v8800_v41 = vperm.slane %v17911_v27, %v14770_v35  ;;  %v14255_v25 = vunpack.i.h.bf16 %v14253_v37  ;;  %v14254_v34 = vunpack.i.l.bf16 %v14253_v37 }
0x1648   : > { %14407 = vpow2.f32 %v9383_v8  ;;  %v14245_v27 = vunpack.i.h.bf16 %v17965_v50  ;;  %v8715_v28 = vrot.slane %v14244_v44, 4 }
0x1649   : > { %v9385_v14 = vmul.f32 1.442695, %v9371_v18  ;;  %v17985_v7 = vpop.eup %14405  ;;  %v8851_v12 = vrot.slane %v8800_v41, 4  ;;  %v8801_v3 = vrot.slane %v14255_v25, 4  ;;  %v8689_v6 = vrot.slane %v14254_v34, 4 }
0x164a   : > { %9399 = vadd.xlane.f32.xlu2 %v9398_v33  ;;  %v9401_v49 = vsel %vm2330_vm6, %v17985_v7, 0.0  ;;  %v8827_v13 = vrot.slane %v14245_v27, 4  ;;  %v8863_v33 = vrot.slane %v18019_v16, 4 }
0x164b   : > { %14409 = vpow2.f32 %v9385_v14 }
0x164c   : > { %14411 = vpow2.f32 %v9387_v48 }
0x164e   : > { %v17987_v47 = vpop.eup %14407 }
0x164f   : > { %v9404_v58 = vsel %vm2330_vm6, %v17987_v47, 0.0 }
0x1650   : > { %9405 = vadd.xlane.f32.xlu1 %v9404_v58 }
0x1651   : > { %v17994_v24 = vpop.eup %14409 }
0x1652   : > { %9402 = vadd.xlane.f32.xlu2 %v9401_v49  ;;  %v9407_v55 = vsel %vm2330_vm6, %v17994_v24, 0.0  ;;  %v18009_v45 = vpop.eup %14411 }
0x1653   : > { %9408 = vadd.xlane.f32.xlu0 %v9407_v55  ;;  %v9410_v26 = vsel %vm2330_vm6, %v18009_v45, 0.0 }
0x1659   : > { %v14258_v63 = vpop.permute.xlu0 %14257 }
0x165a   : > { %v14260_v29 = vunpack.i.h.bf16 %v14258_v63  ;;  %v14259_v36 = vunpack.i.l.bf16 %v14258_v63 }
0x165b   : > { %9411 = vadd.xlane.f32.xlu0 %v9410_v26  ;;  %v14263_v15 = vpop.permute.xlu1 %14262 }
0x165c   : > { %v8802_v5 = vsel %vm912_vm1, %v8801_v3, %v14260_v29  ;;  %v8803_v20 = vrot.slane %v14260_v29, 4  ;;  %v8690_v53 = vsel %vm912_vm1, %v8689_v6, %v14259_v36  ;;  %v8691_v8 = vrot.slane %v14259_v36, 4 }
0x165d   : > { %v8808_v18 = vperm.slane %v8802_v5, %v14770_v35  ;;  %v8696_v1 = vperm.slane %v8690_v53, %v14770_v35  ;;  %v14265_v14 = vunpack.i.h.bf16 %v14263_v15  ;;  %v14264_v37 = vunpack.i.l.bf16 %v14263_v15 }
0x165e   : > { %v8804_v48 = vsel %vm912_vm1, %v14255_v25, %v8803_v20  ;;  %v8692_v38 = vsel %vm912_vm1, %v14254_v34, %v8691_v8  ;;  %v8751_v3 = vrot.slane %v18028_v52, 4 }
0x165f   : > { %v8812_v0 = vperm.slane %v8804_v48, %v14770_v35  ;;  %v8837_v58 = vrot.slane %v8808_v18, 4  ;;  %v8840_v60 = vsel %vm912_vm1, %v8808_v18, %v8839_v22  ;;  %v8700_v19 = vperm.slane %v8692_v38, %v14770_v35 }
0x1660   : > { %v18045_v49 = vperm.slane %v8840_v60, %v14796_v9  ;;  %v8725_v11 = vrot.slane %v8696_v1, 4  ;;  %v8728_v51 = vsel %vm912_vm1, %v8696_v1, %v8727_v40  ;;  %v8825_v25 = vrot.slane %v14265_v14, 4 }
0x1661   : > { %v8838_v55 = vsel %vm912_vm1, %v8837_v58, %v8796_v43  ;;  %v8849_v10 = vrot.slane %v8812_v0, 4  ;;  %v8852_v46 = vsel %vm912_vm1, %v8812_v0, %v8851_v12  ;;  %v18058_v22 = vperm.slane %v8728_v51, %v14796_v9 }
0x1662   : > { %v18051_v31 = vperm.slane %v8838_v55, %v14796_v9  ;;  %v18054_v23 = vperm.slane %v8852_v46, %v14796_v9  ;;  %v8726_v34 = vsel %vm912_vm1, %v8725_v11, %v8684_v61  ;;  %v8737_v43 = vrot.slane %v8700_v19, 4 }
0x1663   : > { %v8850_v40 = vsel %vm912_vm1, %v8849_v10, %v8800_v41  ;;  %v18062_v30 = vperm.slane %v8726_v34, %v14796_v9  ;;  %v8740_v12 = vsel %vm912_vm1, %v8700_v19, %v8739_v4  ;;  %v8891_v6 = vrot.slane %v18045_v49, 4 }
0x1664   : > { %v18067_v63 = vperm.slane %v8850_v40, %v14796_v9  ;;  %v8748_v61 = vperm.slane %v8740_v12, %v14796_v9  ;;  %v8887_v29 = vrot.slane %v18051_v31, 4  ;;  %v8899_v36 = vrot.slane %v18054_v23, 4 }
0x1665   : > { %v8738_v41 = vsel %vm912_vm1, %v8737_v43, %v8688_v32  ;;  %v8826_v26 = vsel %vm912_vm1, %v8825_v25, %v14245_v27  ;;  %v8775_v4 = vrot.slane %v18062_v30, 4  ;;  %v8779_v5 = vrot.slane %v18058_v22, 4 }
0x1666   : > { %v8744_v15 = vperm.slane %v8738_v41, %v14796_v9  ;;  %v8828_v20 = vsel %vm912_vm1, %v14265_v14, %v8827_v13  ;;  %v8832_v53 = vperm.slane %v8826_v26, %v14770_v35  ;;  %v8713_v18 = vrot.slane %v14264_v37, 4 }
0x1667   : > { %v8836_v8 = vperm.slane %v8828_v20, %v14770_v35  ;;  %v8716_v1 = vsel %vm912_vm1, %v14264_v37, %v8715_v28  ;;  %v8895_v48 = vrot.slane %v18067_v63, 4  ;;  %v8787_v38 = vrot.slane %v8748_v61, 4 }
0x1668   : > { %v8783_v32 = vrot.slane %v8744_v15, 4  ;;  %v8724_v27 = vperm.slane %v8716_v1, %v14770_v35  ;;  %v8861_v0 = vrot.slane %v8832_v53, 4  ;;  %v8864_v58 = vsel %vm912_vm1, %v8832_v53, %v8863_v33 }
0x1669   : > { %v8873_v60 = vrot.slane %v8836_v8, 4  ;;  %v8876_v19 = vsel %vm912_vm1, %v8836_v8, %v8875_v56  ;;  %v8872_v13 = vperm.slane %v8864_v58, %v14796_v9  ;;  %v8714_v28 = vsel %vm912_vm1, %v8713_v18, %v14244_v44 }
0x166a   : > { %v8884_v14 = vperm.slane %v8876_v19, %v14796_v9  ;;  %v8761_v11 = vrot.slane %v8724_v27, 4  ;;  %v8862_v51 = vsel %vm912_vm1, %v8861_v0, %v18019_v16  ;;  %v8720_v33 = vperm.slane %v8714_v28, %v14770_v35 }
0x166b   : > { %v8874_v37 = vsel %vm912_vm1, %v8873_v60, %v18022_v62  ;;  %v8764_v56 = vsel %vm912_vm1, %v8724_v27, %v8763_v57  ;;  %v8868_v55 = vperm.slane %v8862_v51, %v14796_v9  ;;  %v8889_v50 = vrot.slane %v8872_v13, 4 }
0x166c   : > { %v8880_v10 = vperm.slane %v8874_v37, %v14796_v9  ;;  %v8897_v46 = vrot.slane %v8884_v14, 4  ;;  %v8749_v44 = vrot.slane %v8720_v33, 4  ;;  %v8752_v25 = vsel %vm912_vm1, %v8720_v33, %v8751_v3 }
0x166d   : > { %v8762_v16 = vsel %vm912_vm1, %v8761_v11, %v18014_v39  ;;  %v8772_v62 = vperm.slane %v8764_v56, %v14796_v9  ;;  %v8885_v34 = vrot.slane %v8868_v55, 4  ;;  %v8760_v43 = vperm.slane %v8752_v25, %v14796_v9 }
0x166e   : > { %v8893_v40 = vrot.slane %v8880_v10, 4  ;;  %v8768_v57 = vperm.slane %v8762_v16, %v14796_v9  ;;  %v8750_v12 = vsel %vm912_vm1, %v8749_v44, %v18028_v52  ;;  %v8888_v20 = vsel %vm912_vm1, %v8868_v55, %v8887_v29 }
0x166f   : > { %v8785_v41 = vrot.slane %v8772_v62, 4  ;;  %v8788_v26 = vsel %vm912_vm1, %v8772_v62, %v8787_v38  ;;  %v8756_v3 = vperm.slane %v8750_v12, %v14796_v9  ;;  %v8777_v53 = vrot.slane %v8760_v43, 4 }
0x1670   : > { %v8780_v39 = vsel %vm912_vm1, %v8760_v43, %v8779_v5  ;;  %v8781_v8 = vrot.slane %v8768_v57, 4  ;;  %v8784_v18 = vsel %vm912_vm1, %v8768_v57, %v8783_v32  ;;  %v18117_v27 = vsel %vm912_vm1, %v8885_v34, %v18051_v31 }
0x1671   : > { %v8786_v1 = vsel %vm912_vm1, %v8785_v41, %v8748_v61  ;;  %v18121_v52 = vsel %vm912_vm1, %v8889_v50, %v18045_v49  ;;  %v8773_v38 = vrot.slane %v8756_v3, 4  ;;  %v8776_v29 = vsel %vm912_vm1, %v8756_v3, %v8775_v4 }
0x1672   : > { %v18126_v0 = vsel %vm912_vm1, %v8777_v53, %v18058_v22  ;;  %v8782_v5 = vsel %vm912_vm1, %v8781_v8, %v8744_v15  ;;  %v8892_v32 = vsel %vm912_vm1, %v8872_v13, %v8891_v6  ;;  %v8894_v61 = vsel %vm912_vm1, %v8893_v40, %v18067_v63 }
0x1673   : > { %v8896_v31 = vsel %vm912_vm1, %v8880_v10, %v8895_v48  ;;  %v8898_v49 = vsel %vm912_vm1, %v8897_v46, %v18054_v23  ;;  %v18137_v58 = vsel %vm912_vm1, %v8773_v38, %v18062_v30  ;;  %v8900_v4 = vsel %vm912_vm1, %v8884_v14, %v8899_v36 }
0x1674   : > { %v8901_v22 = vrot.slane %v18126_v0, 4  ;;  %v8913_v60 = vrot.slane %v8780_v39, 4  ;;  %v8903_v15 = vrot.slane %v18137_v58, 4  ;;  %v8915_v6 = vrot.slane %v8776_v29, 4 }
0x1675   : > { %v8925_v19 = vrot.slane %v8786_v1, 4  ;;  %v8927_v13 = vrot.slane %v8782_v5, 4  ;;  %v8937_v63 = vrot.slane %v8788_v26, 4  ;;  %v8939_v28 = vrot.slane %v8784_v18, 4 }
0x1676   : > { %v9013_v48 = vrot.slane %v18121_v52, 4  ;;  %v9015_v23 = vrot.slane %v18117_v27, 4  ;;  %v18145_v11 = vsel %vm912_vm1, %v8780_v39, %v8915_v6  ;;  %v9025_v36 = vrot.slane %v8892_v32, 4 }
0x1677   : > { %v18148_v30 = vsel %vm912_vm1, %v8786_v1, %v8927_v13  ;;  %v9027_v14 = vrot.slane %v8888_v20, 4  ;;  %v8938_v51 = vsel %vm912_vm1, %v8937_v63, %v8784_v18  ;;  %v8940_v37 = vsel %vm912_vm1, %v8788_v26, %v8939_v28 }
0x1678   : > { %v9037_v33 = vrot.slane %v8898_v49, 4  ;;  %v9039_v56 = vrot.slane %v8894_v61, 4  ;;  %v8944_v55 = vperm.slane %v8938_v51, %v14770_v35  ;;  %v18154_v10 = vperm.slane %v8940_v37, %v14770_v35 }
0x1679   : > { %v18157_v50 = vsel %vm912_vm1, %v8892_v32, %v9027_v14  ;;  %v9049_v46 = vrot.slane %v8900_v4, 4  ;;  %v9051_v25 = vrot.slane %v8896_v31, 4  ;;  %v8902_v16 = vsel %vm912_vm1, %v8901_v22, %v18137_v58 }
0x167a   : > { %v18160_v44 = vsel %vm912_vm1, %v8898_v49, %v9039_v56  ;;  %v8914_v62 = vsel %vm912_vm1, %v8913_v60, %v8776_v29  ;;  %v8908_v40 = vperm.slane %v8902_v16, %v14770_v35  ;;  %v8926_v57 = vsel %vm912_vm1, %v8925_v19, %v8782_v5 }
0x167b   : > { %v9050_v34 = vsel %vm912_vm1, %v9049_v46, %v8896_v31  ;;  %v8920_v43 = vperm.slane %v8914_v62, %v14770_v35  ;;  %v9052_v12 = vsel %vm912_vm1, %v8900_v4, %v9051_v25  ;;  %v8932_v26 = vperm.slane %v8926_v57, %v14770_v35 }
0x167c   : > { %v9056_v41 = vperm.slane %v9050_v34, %v14770_v35  ;;  %v8973_v3 = vrot.slane %v8944_v55, 4  ;;  %v18173_v53 = vperm.slane %v9052_v12, %v14770_v35  ;;  %v9014_v8 = vsel %vm912_vm1, %v9013_v48, %v18117_v27 }
0x167d   : > { %v8949_v39 = vrot.slane %v8920_v43, 4  ;;  %v9026_v18 = vsel %vm912_vm1, %v9025_v36, %v8888_v20  ;;  %v9020_v38 = vperm.slane %v9014_v8, %v14770_v35  ;;  %v9038_v5 = vsel %vm912_vm1, %v9037_v33, %v8894_v61 }
0x167e   : > { %v8974_v1 = vsel %vm912_vm1, %v8973_v3, %v8932_v26  ;;  %v9032_v29 = vperm.slane %v9026_v18, %v14770_v35  ;;  %v9044_v49 = vperm.slane %v9038_v5, %v14770_v35  ;;  %v9085_v4 = vrot.slane %v9056_v41, 4 }
0x167f   : > { %v8950_v32 = vsel %vm912_vm1, %v8949_v39, %v8908_v40  ;;  %v8980_v31 = vperm.slane %v8974_v1, %v14796_v9  ;;  %v8951_v6 = vrot.slane %v8908_v40, 4  ;;  %v8975_v20 = vrot.slane %v8932_v26, 4 }
0x1680   : > { %v8956_v22 = vperm.slane %v8950_v32, %v14796_v9  ;;  %v9061_v60 = vrot.slane %v9032_v29, 4  ;;  %v9086_v13 = vsel %vm912_vm1, %v9085_v4, %v9044_v49  ;;  %v9063_v63 = vrot.slane %v9020_v38, 4 }
0x1681   : > { %v8997_v19 = vrot.slane %v8980_v31, 4  ;;  %v9087_v28 = vrot.slane %v9044_v49, 4  ;;  %v9092_v61 = vperm.slane %v9086_v13, %v14796_v9  ;;  %v8952_v14 = vsel %vm912_vm1, %v8920_v43, %v8951_v6 }
0x1682   : > { %v9062_v48 = vsel %vm912_vm1, %v9061_v60, %v9020_v38  ;;  %v8999_v36 = vrot.slane %v8956_v22, 4  ;;  %v8960_v33 = vperm.slane %v8952_v14, %v14796_v9  ;;  %v8976_v56 = vsel %vm912_vm1, %v8944_v55, %v8975_v20 }
0x1683   : > { %v8998_v51 = vsel %vm912_vm1, %v8997_v19, %v8956_v22  ;;  %v9068_v37 = vperm.slane %v9062_v48, %v14796_v9  ;;  %v9109_v46 = vrot.slane %v9092_v61, 4  ;;  %v8984_v62 = vperm.slane %v8976_v56, %v14796_v9 }
0x1684   : > { %v9437_v25 = vpack.c.bf16 %v8998_v51, %v8998_v51  ;;  %v9000_v16 = vsel %vm912_vm1, %v8980_v31, %v8999_v36  ;;  %v9064_v57 = vsel %vm912_vm1, %v9032_v29, %v9063_v63  ;;  %v9088_v43 = vsel %vm912_vm1, %v9056_v41, %v9087_v28 }
0x1685   : > { %v9111_v34 = vrot.slane %v9068_v37, 4  ;;  %v9439_v40 = vpack.c.bf16 %v9000_v16, %v9000_v16  ;;  %v9110_v12 = vsel %vm912_vm1, %v9109_v46, %v9068_v37  ;;  %v9001_v3 = vrot.slane %v8984_v62, 4 }
0x1686   : > { %v9455_v26 = vunpack.c.l.b16 %v9437_v25  ;;  %v9072_v39 = vperm.slane %v9064_v57, %v14796_v9  ;;  %v9438_v8 = vpack.c.bf16 %v9110_v12, %v9110_v12  ;;  %v9096_v1 = vperm.slane %v9088_v43, %v14796_v9 }
0x1687   : > { %v9112_v55 = vsel %vm912_vm1, %v9092_v61, %v9111_v34  ;;  %v9477_v18 = vunpack.c.l.b16 %v9439_v40  ;;  %v9002_v5 = vsel %vm912_vm1, %v9001_v3, %v8960_v33  ;;  %v8904_v41 = vsel %vm912_vm1, %v18126_v0, %v8903_v15 }
0x1688   : > { %v9440_v38 = vpack.c.bf16 %v9112_v55, %v9112_v55  ;;  %v8924_v29 = vperm.slane %v18145_v11, %v14770_v35  ;;  %v9456_v32 = vunpack.c.l.b16 %v9438_v8  ;;  %v9113_v31 = vrot.slane %v9096_v1, 4 }
0x1689   : > { %v9441_v49 = vpack.c.bf16 %v9002_v5, %v9002_v5  ;;  %v8912_v4 = vperm.slane %v8904_v41, %v14770_v35  ;;  %v8936_v60 = vperm.slane %v18148_v30, %v14770_v35  ;;  %v8985_v20 = vrot.slane %v18154_v10, 4 }
0x168a   : > { %v9478_v22 = vunpack.c.l.b16 %v9440_v38  ;;  %v8961_v6 = vrot.slane %v8924_v29, 4  ;;  %v9457_v19 = vpack.c.b16 %v9456_v32, %v9455_v26  ;;  %v9114_v58 = vsel %vm912_vm1, %v9113_v31, %v9072_v39 }
0x168b   : > { %v9499_v13 = vunpack.c.l.b16 %v9441_v49  ;;  %v9016_v0 = vsel %vm912_vm1, %v18121_v52, %v9015_v23  ;;  %v9442_v11 = vpack.c.bf16 %v9114_v58, %v9114_v58  ;;  %v8986_v28 = vsel %vm912_vm1, %v8985_v20, %v8936_v60 }
0x168c   : > { %v9479_v15 = vpack.c.b16 %v9478_v22, %v9477_v18  ;;  %v8962_v63 = vsel %vm912_vm1, %v8961_v6, %v8912_v4  ;;  %9469 = vmatpush.bf16.msra.mxu1 %v9457_v19  ;;  %v8992_v48 = vperm.slane %v8986_v28, %v14796_v9  ;;  %v9024_v61 = vperm.slane %v9016_v0, %v14770_v35 }
0x168d   : > { %v8968_v30 = vperm.slane %v8962_v63, %v14796_v9  ;;  %v9036_v36 = vperm.slane %v18157_v50, %v14770_v35  ;;  %v9500_v27 = vunpack.c.l.b16 %v9442_v11  ;;  %v9048_v52 = vperm.slane %v18160_v44, %v14770_v35 }
0x168e   : > { %9491 = vmatpush.bf16.msra.mxu2 %v9479_v15  ;;  %v9097_v23 = vrot.slane %v18173_v53, 4  ;;  %v9003_v14 = vrot.slane %v8960_v33, 4  ;;  %v9005_v51 = vrot.slane %v8992_v48, 4  ;;  %v9115_v56 = vrot.slane %v9072_v39, 4 }
0x168f   : > { %v9073_v37 = vrot.slane %v9036_v36, 4  ;;  %v9007_v46 = vrot.slane %v8968_v30, 4  ;;  %v9501_v25 = vpack.c.b16 %v9500_v27, %v9499_v13  ;;  %v8963_v40 = vrot.slane %v8912_v4, 4 }
0x1690   : > { %v9098_v16 = vsel %vm912_vm1, %v9097_v23, %v9048_v52  ;;  %v9004_v34 = vsel %vm912_vm1, %v8984_v62, %v9003_v14  ;;  %v9006_v50 = vsel %vm912_vm1, %v9005_v51, %v8968_v30  ;;  %v9116_v44 = vsel %vm912_vm1, %v9096_v1, %v9115_v56 }
0x1691   : > { %v9074_v57 = vsel %vm912_vm1, %v9073_v37, %v9024_v61  ;;  %v9104_v43 = vperm.slane %v9098_v16, %v14796_v9  ;;  %9513 = vmatpush.bf16.msra.mxu3 %v9501_v25  ;;  %v9445_v12 = vpack.c.bf16 %v9006_v50, %v9006_v50  ;;  %v9443_v26 = vpack.c.bf16 %v9004_v34, %v9004_v34 }
0x1692   : > { %v9080_v33 = vperm.slane %v9074_v57, %v14796_v9  ;;  %v9444_v3 = vpack.c.bf16 %v9116_v44, %v9116_v44  ;;  %v9008_v8 = vsel %vm912_vm1, %v8992_v48, %v9007_v46  ;;  %v8964_v62 = vsel %vm912_vm1, %v8924_v29, %v8963_v40 }
0x1693   : > { %v9117_v39 = vrot.slane %v9104_v43, 4  ;;  %v8987_v55 = vrot.slane %v8936_v60, 4  ;;  %v9543_v18 = vunpack.c.l.b16 %v9445_v12  ;;  %v9521_v38 = vunpack.c.l.b16 %v9443_v26 }
0x1694   : > { %v9522_v5 = vunpack.c.l.b16 %v9444_v3  ;;  %v9119_v41 = vrot.slane %v9080_v33, 4  ;;  %v9447_v31 = vpack.c.bf16 %v9008_v8, %v9008_v8  ;;  %v8972_v1 = vperm.slane %v8964_v62, %v14796_v9 }
0x1695   : > { %v9118_v32 = vsel %vm912_vm1, %v9117_v39, %v9080_v33  ;;  %v8988_v49 = vsel %vm912_vm1, %v18154_v10, %v8987_v55  ;;  %v9075_v19 = vrot.slane %v9024_v61, 4  ;;  %v9099_v58 = vrot.slane %v9048_v52, 4 }
0x1696   : > { %v9446_v4 = vpack.c.bf16 %v9118_v32, %v9118_v32  ;;  %v9523_v22 = vpack.c.b16 %v9522_v5, %v9521_v38  ;;  %v9120_v6 = vsel %vm912_vm1, %v9104_v43, %v9119_v41  ;;  %v8996_v20 = vperm.slane %v8988_v49, %v14796_v9 }
0x1697   : > { %v9448_v29 = vpack.c.bf16 %v9120_v6, %v9120_v6  ;;  %v9565_v60 = vunpack.c.l.b16 %v9447_v31  ;;  %v9011_v15 = vrot.slane %v8972_v1, 4  ;;  %v9076_v63 = vsel %vm912_vm1, %v9036_v36, %v9075_v19 }
0x1698   : > { %v9544_v13 = vunpack.c.l.b16 %v9446_v4  ;;  %9535 = vmatpush.bf16.msrb.mxu0 %v9523_v22  ;;  %v9009_v0 = vrot.slane %v8996_v20, 4  ;;  %v9100_v10 = vsel %vm912_vm1, %v18173_v53, %v9099_v58  ;;  %v9084_v48 = vperm.slane %v9076_v63, %v14796_v9 }
0x1699   : > { %v9566_v11 = vunpack.c.l.b16 %v9448_v29  ;;  %v9108_v27 = vperm.slane %v9100_v10, %v14796_v9  ;;  %v9012_v52 = vsel %vm912_vm1, %v8996_v20, %v9011_v15 }
0x169a   : > { %v9545_v28 = vpack.c.b16 %v9544_v13, %v9543_v18  ;;  %v9010_v30 = vsel %vm912_vm1, %v9009_v0, %v8972_v1  ;;  %v9123_v51 = vrot.slane %v9084_v48, 4  ;;  %v9451_v37 = vpack.c.bf16 %v9012_v52, %v9012_v52 }
0x169b   : > { %v9567_v23 = vpack.c.b16 %v9566_v11, %v9565_v60  ;;  %v9449_v61 = vpack.c.bf16 %v9010_v30, %v9010_v30  ;;  %v9121_v14 = vrot.slane %v9108_v27, 4 }
0x169c   : > { %9557 = vmatpush.bf16.msrb.mxu1 %v9545_v28  ;;  %v9124_v53 = vsel %vm912_vm1, %v9108_v27, %v9123_v51  ;;  %v9609_v16 = vunpack.c.l.b16 %v9451_v37 }
0x169d   : > { %9579 = vmatpush.bf16.msrb.mxu2 %v9567_v23  ;;  %v9122_v36 = vsel %vm912_vm1, %v9121_v14, %v9084_v48  ;;  %v9587_v46 = vunpack.c.l.b16 %v9449_v61  ;;  %v9452_v25 = vpack.c.bf16 %v9124_v53, %v9124_v53 }
0x169e   : > { %v9450_v56 = vpack.c.bf16 %v9122_v36, %v9122_v36 }
0x169f   : > { %v9610_v40 = vunpack.c.l.b16 %v9452_v25 }
0x16a0   : > { %v9588_v34 = vunpack.c.l.b16 %v9450_v56 }
0x16a1   : > { %v9611_v57 = vpack.c.b16 %v9610_v40, %v9609_v16 }
0x16a2   : > { %v9589_v50 = vpack.c.b16 %v9588_v34, %v9587_v46 }
0x16a3   : > { %9623 = vmatpush.bf16.msra.mxu0 %v9611_v57 }
0x16a4   : > { %9601 = vmatpush.bf16.msrb.mxu3 %v9589_v50 }
0x16ad   : > { %v9391_v43 = vpop.xlane.xlu1 %9390 }
0x16ae   : > { %14413 = vrcp.f32 %v9391_v43 }
0x16b4   : > { %v14414_v44 = vpop.eup %14413 }
0x16b5   : > { %v9421_v33 = vmul.f32 %v14414_v44, %v17967_v2  ;;  %v9397_v12 = vpop.xlane.xlu2 %9396 }
0x16b6   : > { %14415 = vrcp.f32 %v9397_v12  ;;  %v9394_v3 = vpop.xlane.xlu0 %9393 }
0x16b7   : > { %v9429_v26 = vpack.c.bf16 %v9421_v33, %v9421_v33  ;;  %14417 = vrcp.f32 %v9394_v3 }
0x16b9   : > { %12659 = vmatmul.msk.bf16.vlgmr.msra.gmra.mxu1 %vm2330_vm6, %v9429_v26 }
0x16bc   : > { %v14416_v39 = vpop.eup %14415 }
0x16bd   : > { %v14418_v8 = vpop.eup %14417  ;;  %v9423_v62 = vmul.f32 %v14416_v39, %v17971_v59  ;;  %v9400_v55 = vpop.xlane.xlu2 %9399 }
0x16be   : > { %v9422_v18 = vmul.f32 %v14418_v8, %v17973_v54  ;;  %14419 = vrcp.f32 %v9400_v55 }
0x16bf   : > { %v9431_v38 = vpack.c.bf16 %v9423_v62, %v9423_v62 }
0x16c0   : > { %v9430_v5 = vpack.c.bf16 %v9422_v18, %v9422_v18 }
0x16c1   : > { %12661 = vmatmul.msk.bf16.vlgmr.msra.gmra.mxu3 %vm2330_vm6, %v9431_v38 }
0x16c2   : > { %12660 = vmatmul.msk.bf16.vlgmr.msra.gmra.mxu2 %vm2330_vm6, %v9430_v5 }
0x16c3   : > { %v9406_v2 = vpop.xlane.xlu1 %9405 }
0x16c4   : > { %v14420_v41 = vpop.eup %14419  ;;  %14421 = vrcp.f32 %v9406_v2 }
0x16c5   : > { %v9424_v32 = vmul.f32 %v14420_v41, %v17979_v42  ;;  %v9403_v31 = vpop.xlane.xlu2 %9402 }
0x16c6   : > { %14423 = vrcp.f32 %v9403_v31  ;;  %v9409_v1 = vpop.xlane.xlu0 %9408 }
0x16c7   : > { %v9432_v49 = vpack.c.bf16 %v9424_v32, %v9424_v32  ;;  %14425 = vrcp.f32 %v9409_v1 }
0x16c9   : > { %12662 = vmatmul.msk.bf16.vlgmr.msrb.gmra.mxu0 %vm2330_vm6, %v9432_v49 }
0x16ca   : > { %v14422_v59 = vpop.eup %14421 }
0x16cb   : > { %v9426_v4 = vmul.f32 %v14422_v59, %v17987_v47 }
0x16cc   : > { %v14424_v54 = vpop.eup %14423 }
0x16cd   : > { %v14426_v22 = vpop.eup %14425  ;;  %v9425_v6 = vmul.f32 %v14424_v54, %v17985_v7  ;;  %v9434_v42 = vpack.c.bf16 %v9426_v4, %v9426_v4 }
0x16ce   : > { %v9427_v20 = vmul.f32 %v14426_v22, %v17994_v24  ;;  %v9412_v29 = vpop.xlane.xlu0 %9411 }
0x16cf   : > { %v9433_v60 = vpack.c.bf16 %v9425_v6, %v9425_v6  ;;  %14427 = vrcp.f32 %v9412_v29 }
0x16d0   : > { %v9435_v19 = vpack.c.bf16 %v9427_v20, %v9427_v20 }
0x16d1   : > { %12663 = vmatmul.msk.bf16.vlgmr.msrb.gmra.mxu1 %vm2330_vm6, %v9433_v60 }
0x16d2   : > { %12664 = vmatmul.msk.bf16.vlgmr.msrb.gmra.mxu2 %vm2330_vm6, %v9434_v42  ;;  %12665 = vmatmul.msk.bf16.vlgmr.msrb.gmra.mxu3 %vm2330_vm6, %v9435_v19 }
0x16d5   : > { %v14428_v58 = vpop.eup %14427 }
0x16d6   : > { %v9428_v13 = vmul.f32 %v14428_v58, %v18009_v45 }
0x16d8   : > { %v9436_v47 = vpack.c.bf16 %v9428_v13, %v9428_v13 }
0x16da   : > { %12666 = vmatmul.msk.bf16.vlgmr.msra.gmra.mxu0 %vm2330_vm6, %v9436_v47 }
0x1736   : > { %v9471_v7 = vpop.f32.mrf.mxu1 }
0x1737   : > { %v9631_v30 = vrot.slane %v9471_v7, 4 }
0x173e   : > { %v9473_v0 = vpop.f32.mrf.mxu1 }
0x1744   : > { %v9515_v24 = vpop.f32.mrf.mxu3 }
0x1745   : > { %v9493_v15 = vpop.f32.mrf.mxu2  ;;  %v9629_v63 = vrot.slane %v9515_v24, 4  ;;  %v9632_v27 = vsel %vm912_vm1, %v9515_v24, %v9631_v30 }
0x1746   : > { %v9537_v11 = vpop.f32.mrf.mxu0  ;;  %v9643_v28 = vrot.slane %v9493_v15, 4  ;;  %v9640_v36 = vperm.slane %v9632_v27, %v14770_v35 }
0x1747   : > { %v9641_v10 = vrot.slane %v9537_v11, 4  ;;  %v9630_v48 = vsel %vm912_vm1, %v9629_v63, %v9471_v7 }
0x1748   : > { %v9644_v45 = vsel %vm912_vm1, %v9537_v11, %v9643_v28  ;;  %v9636_v14 = vperm.slane %v9630_v48, %v14770_v35  ;;  %v9691_v25 = vrot.slane %v9640_v36, 4 }
0x1749   : > { %v9642_v23 = vsel %vm912_vm1, %v9641_v10, %v9493_v15  ;;  %v9652_v56 = vperm.slane %v9644_v45, %v14770_v35 }
0x174a   : > { %v9648_v53 = vperm.slane %v9642_v23, %v14770_v35  ;;  %v9679_v46 = vrot.slane %v9636_v14, 4 }
0x174b   : > { %v9689_v34 = vrot.slane %v9652_v56, 4  ;;  %v9692_v50 = vsel %vm912_vm1, %v9652_v56, %v9691_v25 }
0x174c   : > { %v9517_v61 = vpop.f32.mrf.mxu3  ;;  %v9677_v16 = vrot.slane %v9648_v53, 4  ;;  %v9680_v44 = vsel %vm912_vm1, %v9648_v53, %v9679_v46  ;;  %v9700_v18 = vperm.slane %v9692_v50, %v14796_v9 }
0x174d   : > { %v9495_v52 = vpop.f32.mrf.mxu2  ;;  %v9690_v8 = vsel %vm912_vm1, %v9689_v34, %v9640_v36  ;;  %v9688_v41 = vperm.slane %v9680_v44, %v14796_v9 }
0x174e   : > { %v9539_v51 = vpop.f32.mrf.mxu0  ;;  %v9559_v37 = vpop.f32.mrf.mxu1  ;;  %v9678_v39 = vsel %vm912_vm1, %v9677_v16, %v9636_v14  ;;  %v9696_v59 = vperm.slane %v9690_v8, %v14796_v9  ;;  %v9739_v29 = vrot.slane %v9700_v18, 4 }
0x174f   : > { %v9655_v40 = vrot.slane %v9559_v37, 4  ;;  %v9684_v49 = vperm.slane %v9678_v39, %v14796_v9  ;;  %v9731_v42 = vrot.slane %v9688_v41, 4 }
0x1750   : > { %v9735_v10 = vrot.slane %v9696_v59, 4 }
0x1751   : > { %v9727_v63 = vrot.slane %v9684_v49, 4 }
0x1755   : > { %v9581_v57 = vpop.f32.mrf.mxu2  ;;  %v9603_v43 = vpop.f32.mrf.mxu3 }
0x1756   : > { %v9561_v33 = vpop.f32.mrf.mxu1  ;;  %v9667_v12 = vrot.slane %v9581_v57, 4  ;;  %v9653_v26 = vrot.slane %v9603_v43, 4  ;;  %v9656_v3 = vsel %vm912_vm1, %v9603_v43, %v9655_v40 }
0x1757   : > { %v9664_v62 = vperm.slane %v9656_v3, %v14770_v35  ;;  %v9625_v55 = vpop.f32.mrf.mxu0 }
0x1758   : > { %v9654_v38 = vsel %vm912_vm1, %v9653_v26, %v9559_v37  ;;  %v9665_v5 = vrot.slane %v9625_v55, 4  ;;  %v9668_v2 = vsel %vm912_vm1, %v9625_v55, %v9667_v12 }
0x1759   : > { %v9660_v32 = vperm.slane %v9654_v38, %v14770_v35  ;;  %v9715_v31 = vrot.slane %v9664_v62, 4  ;;  %v9676_v1 = vperm.slane %v9668_v2, %v14770_v35 }
0x175a   : > { %v9666_v54 = vsel %vm912_vm1, %v9665_v5, %v9581_v57 }
0x175b   : > { %v9703_v4 = vrot.slane %v9660_v32, 4  ;;  %v9672_v22 = vperm.slane %v9666_v54, %v14770_v35  ;;  %v9713_v6 = vrot.slane %v9676_v1, 4  ;;  %v9716_v20 = vsel %vm912_vm1, %v9676_v1, %v9715_v31 }
0x175c   : > { %v9724_v60 = vperm.slane %v9716_v20, %v14796_v9 }
0x175d   : > { %v9701_v19 = vrot.slane %v9672_v22, 4  ;;  %v9704_v58 = vsel %vm912_vm1, %v9672_v22, %v9703_v4  ;;  %v9714_v13 = vsel %vm912_vm1, %v9713_v6, %v9664_v62  ;;  %v9583_v47 = vpop.f32.mrf.mxu2  ;;  %v9605_v7 = vpop.f32.mrf.mxu3 }
0x175e   : > { %v9712_v0 = vperm.slane %v9704_v58, %v14796_v9  ;;  %v9720_v24 = vperm.slane %v9714_v13, %v14796_v9  ;;  %v9737_v15 = vrot.slane %v9724_v60, 4  ;;  %v9740_v11 = vsel %vm912_vm1, %v9724_v60, %v9739_v29 }
0x175f   : > { %v9702_v28 = vsel %vm912_vm1, %v9701_v19, %v9660_v32  ;;  %v9627_v30 = vpop.f32.mrf.mxu0  ;;  %v9777_v51 = vrot.slane %v9740_v11, 4 }
0x1760   : > { %v9708_v48 = vperm.slane %v9702_v28, %v14796_v9  ;;  %v9729_v27 = vrot.slane %v9712_v0, 4  ;;  %v9732_v23 = vsel %vm912_vm1, %v9712_v0, %v9731_v42  ;;  %v9733_v45 = vrot.slane %v9720_v24, 4 }
0x1761   : > { %v9736_v61 = vsel %vm912_vm1, %v9720_v24, %v9735_v10  ;;  %v9738_v52 = vsel %vm912_vm1, %v9737_v15, %v9700_v18  ;;  %v9753_v14 = vrot.slane %v9732_v23, 4 }
0x1762   : > { %v9725_v37 = vrot.slane %v9708_v48, 4  ;;  %v9730_v36 = vsel %vm912_vm1, %v9729_v27, %v9688_v41  ;;  %v9734_v53 = vsel %vm912_vm1, %v9733_v45, %v9696_v59  ;;  %v9765_v56 = vrot.slane %v9738_v52, 4 }
0x1763   : > { %v9741_v46 = vrot.slane %v9730_v36, 4  ;;  %v9767_v25 = vrot.slane %v9734_v53, 4  ;;  %v9779_v16 = vrot.slane %v9736_v61, 4  ;;  %v9728_v34 = vsel %vm912_vm1, %v9708_v48, %v9727_v63 }
0x1764   : > { %v9726_v40 = vsel %vm912_vm1, %v9725_v37, %v9684_v49  ;;  %v9754_v50 = vsel %vm912_vm1, %v9753_v14, %v9728_v34  ;;  %v9755_v57 = vrot.slane %v9728_v34, 4  ;;  %v9766_v43 = vsel %vm912_vm1, %v9765_v56, %v9734_v53 }
0x1765   : > { %v9780_v44 = vsel %vm912_vm1, %v9740_v11, %v9779_v16  ;;  %v9742_v33 = vsel %vm912_vm1, %v9741_v46, %v9726_v40  ;;  %v9743_v12 = vrot.slane %v9726_v40, 4  ;;  %v9760_v26 = vperm.slane %v9754_v50, %v14770_v35  ;;  %v13814_v16 = vld [vmem:[%s19249_s29 + $0x10] sm:$0xff] }
0x1766   : > { %v9748_v3 = vperm.slane %v9742_v33, %v14770_v35  ;;  %v9772_v39 = vperm.slane %v9766_v43, %v14770_v35  ;;  %v9778_v8 = vsel %vm912_vm1, %v9777_v51, %v9736_v61  ;;  %v9756_v62 = vsel %vm912_vm1, %v9732_v23, %v9755_v57 }
0x1767   : > { %v9784_v55 = vperm.slane %v9778_v8, %v14770_v35  ;;  %v9789_v18 = vrot.slane %v9760_v26, 4  ;;  %v9744_v38 = vsel %vm912_vm1, %v9730_v36, %v9743_v12  ;;  %v9764_v5 = vperm.slane %v9756_v62, %v14770_v35 }
0x1768   : > { %v9791_v2 = vrot.slane %v9748_v3, 4  ;;  %v9815_v41 = vrot.slane %v9772_v39, 4  ;;  %v9752_v32 = vperm.slane %v9744_v38, %v14770_v35  ;;  %v9768_v31 = vsel %vm912_vm1, %v9738_v52, %v9767_v25 }
0x1769   : > { %v9790_v1 = vsel %vm912_vm1, %v9789_v18, %v9748_v3  ;;  %v9813_v49 = vrot.slane %v9784_v55, 4  ;;  %v9776_v59 = vperm.slane %v9768_v31, %v14770_v35  ;;  %v9788_v54 = vperm.slane %v9780_v44, %v14770_v35 }
0x176a   : > { %v9792_v4 = vsel %vm912_vm1, %v9760_v26, %v9791_v2  ;;  %v9816_v22 = vsel %vm912_vm1, %v9784_v55, %v9815_v41  ;;  %v9796_v6 = vperm.slane %v9790_v1, %v14796_v9  ;;  %v9801_v20 = vrot.slane %v9764_v5, 4 }
0x176b   : > { %v9800_v29 = vperm.slane %v9792_v4, %v14796_v9  ;;  %v9824_v60 = vperm.slane %v9816_v22, %v14796_v9  ;;  %v9814_v42 = vsel %vm912_vm1, %v9813_v49, %v9772_v39  ;;  %v9825_v19 = vrot.slane %v9788_v54, 4  ;;  %v12776_v22 = vld [vmem:[%s19098_s14 + $0x180] sm:$0xf] }
0x176c   : > { %v9820_v58 = vperm.slane %v9814_v42, %v14796_v9  ;;  %v9839_v13 = vrot.slane %v9796_v6, 4  ;;  %v9802_v47 = vsel %vm912_vm1, %v9801_v20, %v9752_v32  ;;  %v9803_v35 = vrot.slane %v9752_v32, 4  ;;  %v13841_v42 = vld [vmem:[%s19098_s14 + $0x1c4] sm:$0xf0] }
0x176d   : > { %v9841_v7 = vrot.slane %v9824_v60, 4  ;;  %v9843_v0 = vrot.slane %v9800_v29, 4  ;;  %v9826_v24 = vsel %vm912_vm1, %v9825_v19, %v9776_v59  ;;  %v9827_v63 = vrot.slane %v9776_v59, 4 }
0x176e   : > { %v9840_v15 = vsel %vm912_vm1, %v9820_v58, %v9839_v13  ;;  %v9832_v11 = vperm.slane %v9826_v24, %v14796_v9  ;;  %v9808_v30 = vperm.slane %v9802_v47, %v14796_v9  ;;  %v9804_v48 = vsel %vm912_vm1, %v9764_v5, %v9803_v35  ;;  %v13833_v13 = vld [vmem:[%s19098_s14 + $0x18c] sm:$0xf]  ;;  %v12712_v35 = vld [vmem:[%s19098_s14 + $0x100] sm:$0xf] }
0x176f   : > { %v9842_v10 = vsel %vm912_vm1, %v9841_v7, %v9800_v29  ;;  %9854 = vrot.lane.b32.xlu1 %v9840_v15, %s19226_s26  ;;  %v9844_v28 = vsel %vm912_vm1, %v9824_v60, %v9843_v0  ;;  %v9828_v27 = vsel %vm912_vm1, %v9788_v54, %v9827_v63  ;;  %v9837_v45 = vrot.slane %v9820_v58, 4  ;;  %s19250_s26 = sld [smem:[#allocation28_spill]]  ;;  %v12778_v29 = vld [vmem:[%s19098_s14 + $0x1c0] sm:$0xf0]  ;;  %v12784_v60 = vld [vmem:[%s19098_s14 + $0x188] sm:$0xf] }
0x1770   : > { %9858 = vrot.lane.b32.xlu2 %v9842_v10, %s19235_s24  ;;  %9862 = vrot.lane.b32.xlu0 %v9844_v28, %s19234_s28  ;;  %v9836_v23 = vperm.slane %v9828_v27, %v14796_v9  ;;  %v9845_v61 = vrot.slane %v9832_v11, 4  ;;  %v9847_v52 = vrot.slane %v9808_v30, 4  ;;  %v9812_v14 = vperm.slane %v9804_v48, %v14796_v9  ;;  %v13815_v9 = vld [vmem:[%s19249_s29 + $0x18] sm:$0xff]  ;;  %v12786_v47 = vld [vmem:[%s19098_s14 + $0x1c8] sm:$0xf0] }
0x1771   : > { %v9838_v37 = vsel %vm912_vm1, %v9837_v45, %v9796_v6  ;;  %9911 = vmatpush.bf16.msra.mxu1 %v13815_v9  ;;  %v13832_v6 = vld [vmem:[%s19098_s14 + $0x184] sm:$0xf]  ;;  %v12785_v58 = vor.u32 %v13841_v42, %v12784_v60  ;;  %v12789_v0 = vor.u32 %v13833_v13, %v12786_v47  ;;  %v13824_v24 = vld [vmem:[%s19098_s14 + $0x13c] sm:$0xf0]  ;;  %v13825_v48 = vld [vmem:[%s19098_s14 + $0x144] sm:$0xf0] }
0x1772   : > { %v9849_v51 = vrot.slane %v9836_v23, 4  ;;  %v9846_v36 = vsel %vm912_vm1, %v9845_v61, %v9808_v30  ;;  %v9848_v53 = vsel %vm912_vm1, %v9832_v11, %v9847_v52  ;;  %v9851_v46 = vrot.slane %v9812_v14, 4  ;;  %v13816_v15 = vld [vmem:[%s19098_s14 + $0x104] sm:$0xf]  ;;  %v12720_v30 = vld [vmem:[%s19098_s14 + $0x108] sm:$0xf] }
0x1773   : > { %v12781_v19 = vor.u32 %v13832_v6, %v12778_v29  ;;  %v12714_v11 = vld [vmem:[%s19098_s14 + $0x140] sm:$0xf0]  ;;  %10214 = vmatpush.bf16.msrb.mxu0 %v12785_v58  ;;  %v12713_v10 = vor.u32 %v13824_v24, %v12712_v35  ;;  %v13817_v27 = vld [vmem:[%s19098_s14 + $0x10c] sm:$0xf]  ;;  %v12792_v61 = vld [vmem:[%s19098_s14 + $0x190] sm:$0xf] }
0x1774   : > { %v9850_v56 = vsel %vm912_vm1, %v9849_v51, %v9812_v14  ;;  %v9852_v25 = vsel %vm912_vm1, %v9836_v23, %v9851_v46  ;;  %v12717_v28 = vor.u32 %v13816_v15, %v12714_v11  ;;  %v12721_v23 = vor.u32 %v13825_v48, %v12720_v30  ;;  %v12722_v45 = vld [vmem:[%s19098_s14 + $0x148] sm:$0xf0]  ;;  %v13842_v52 = vld [vmem:[%s19098_s14 + $0x1cc] sm:$0xf0]  ;;  %v12800_v46 = vld [vmem:[%s19098_s14 + $0x198] sm:$0xf] }
0x1775   : > { %9912 = vmatpush.bf16.msra.mxu1 %v13814_v16  ;;  %v14284_v38 = vld [vmem:[%s19250_s26 + $0x1] ss:$0 sm:$0xff]  ;;  %10201 = vmatpush.bf16.msra.mxu3 %v12781_v19  ;;  %v12725_v51 = vor.u32 %v13817_v27, %v12722_v45  ;;  %v13835_v9 = vld [vmem:[%s19098_s14 + $0x19c] sm:$0xf]  ;;  %v13836_v6 = vld [vmem:[%s19098_s14 + $0x1a4] sm:$0xf]  ;;  %s19253_s26 = smov %s19252_s3 }
0x1776   : > { %v13845_v60 = vld [vmem:[%s19098_s14 + $0x1e4] sm:$0xf0]  ;;  %v13837_v42 = vld [vmem:[%s19098_s14 + $0x1ac] sm:$0xf]  ;;  %v12744_v35 = vld [vmem:[%s19098_s14 + $0x120] sm:$0xf] }
0x1777   : > { %9866 = vrot.lane.b32.xlu1 %v9846_v36, %s19236_s19  ;;  %v13834_v36 = vld [vmem:[%s19098_s14 + $0x194] sm:$0xf]  ;;  %10215 = vmatpush.bf16.msrb.mxu0 %v12721_v23  ;;  %v12818_v19 = vld [vmem:[%s19098_s14 + $0x1e8] sm:$0xf0]  ;;  %v13820_v15 = vld [vmem:[%s19098_s14 + $0x124] sm:$0xf] }
0x1778   : > { %9870 = vrot.lane.b32.xlu2 %v9848_v53, %s19238_s21  ;;  %9874 = vrot.lane.b32.xlu0 %v9850_v56, %s19237_s11  ;;  %v12794_v53 = vld [vmem:[%s19098_s14 + $0x1d0] sm:$0xf0]  ;;  %v12821_v24 = vor.u32 %v13837_v42, %v12818_v19  ;;  %v12746_v11 = vld [vmem:[%s19098_s14 + $0x160] sm:$0xf0]  ;;  %s19254_s19 = sld [smem:[#allocation6_spill]] }
0x1779   : > { %10227 = vmatpush.bf16.msrb.mxu1 %v12789_v0  ;;  %v12797_v56 = vor.u32 %v13834_v36, %v12794_v53  ;;  %10202 = vmatpush.bf16.msra.mxu3 %v12717_v28  ;;  %v13821_v28 = vld [vmem:[%s19098_s14 + $0x12c] sm:$0xf]  ;;  %v12749_v27 = vor.u32 %v13820_v15, %v12746_v11  ;;  %v13847_v36 = vld [vmem:[%s19098_s14 + $0x1f4] sm:$0xf0]  ;;  %v13839_v53 = vld [vmem:[%s19098_s14 + $0x1bc] sm:$0xf] }
0x177a   : > { %v12754_v30 = vld [vmem:[%s19098_s14 + $0x168] sm:$0xf0]  ;;  %v13859_v42 = vld [vmem:[%s19100_s16 + $0x458] sm:$0xff]  ;;  %v13866_v19 = vld [vmem:[%s19100_s16 + $0x490] sm:$0xff]  ;;  %s19255_s11 = sld [smem:[#allocation9_spill]] }
0x177b   : > { %v12757_v45 = vor.u32 %v13821_v28, %v12754_v30  ;;  %v13864_v15 = vld [vmem:[%s19100_s16 + $0x480] sm:$0xff] }
0x177c   : > { %v13872_v11 = vld [vmem:[%s19100_s16 + $0x4c0] sm:$0xff] }
0x177d   : > { %10228 = vmatpush.bf16.msrb.mxu1 %v12725_v51  ;;  %10253 = vmatpush.bf16.msrb.mxu3 %v12797_v56  ;;  %v12826_v51 = vld [vmem:[%s19098_s14 + $0x1f0] sm:$0xf0]  ;;  %v12834_v56 = vld [vmem:[%s19098_s14 + $0x1f8] sm:$0xf0]  ;;  %v13848_v28 = vld [vmem:[%s19100_s16 + $0x400] sm:$0xff] }
0x177e   : > { %v13856_v30 = vld [vmem:[%s19100_s16 + $0x440] sm:$0xff]  ;;  %s821_s13 = sand.u32 1, %s19254_s19  }
0x177f   : > { %9878 = vrot.lane.b32.xlu1 %v9852_v25, %s19239_s9  ;;  %v13843_v25 = vld [vmem:[%s19098_s14 + $0x1d4] sm:$0xf0]  ;;  %s19251_s9 = sld [smem:[#allocation31_spill]]  ;;  %s11839_s25 = sshll.u32 %s821_s13, 3 }
0x1780   : > { %v12801_v16 = vor.u32 %v13843_v25, %v12800_v46  ;;  %s13632_s18 = sshll.u32 %s19255_s11, 3  ;;  %s823_s28 = scalar_lea.vmem [#allocation2], %s11839_s25 }
0x1781   : > { %s11735_s5 = scalar_lea.hbm %s19256_s27, %s13632_s18  ;;  %s11737_s24 = sshll.u32 %s823_s28, 4  ;;  %s11738_s24 = int_to_ptr.vmem [resolvable:$true] %s11737_s24 }
0x1782   : > { %10266 = vmatpush.bf16.msra.mxu0 %v12801_v16  ;;  %v13830_v16 = vld [vmem:[%s19098_s14 + $0x16c] sm:$0xf0]  ;;  %s11739_s21 = sshll.u32 %s11735_s5, 4  ;;  %s11725_s19 = scalar_lea.sflag [#allocation3], %s821_s13  ;;  %s11740_s21 = int_to_ptr.hbm [resolvable:$true] %s11739_s21 }
0x1783   : > { %s14450_s11 = sshra.s32 %s11740_s21, 4  ;;  %s14456_s18 = scalar_lea.hbm %s19257_s0, 16  ;;  %s14451_s11 = int_to_ptr.hbm [resolvable:$true] %s14450_s11 }
0x1784   : > { %p14457_p0 = scmp.lt.s32.totalorder %s14451_s11, %s19257_s0 }
0x17ca   : > { %v9859_v40 = vpop.permute.xlu2 %9858 }
0x17d2   : > { %v9871_v26 = vpop.permute.xlu2 %9870 }
0x17e1   : > { %v9855_v34 = vpop.permute.xlu1 %9854 }
0x17e2   : > { %v9881_v50 = vsel %vm1663_vm2, %v9838_v37, %v9855_v34  ;;  %v9863_v57 = vpop.permute.xlu0 %9862  ;;  %v12793_v37 = vor.u32 %v13842_v52, %v12792_v61  ;;  %v12802_v34 = vld [vmem:[%s19098_s14 + $0x1d8] sm:$0xf0]  ;;  %v12824_v61 = vld [vmem:[%s19098_s14 + $0x1b0] sm:$0xf] }
0x17e3   : > { %v9882_v43 = vsel %vm1816_vm3, %v9881_v50, %v9859_v40  ;;  %v12728_v40 = vld [vmem:[%s19098_s14 + $0x110] sm:$0xf] }
0x17e4   : > { %v9883_v33 = vsel %vm2328_vm5, %v9882_v43, %v9863_v57  ;;  %v13826_v50 = vld [vmem:[%s19098_s14 + $0x14c] sm:$0xf0]  ;;  %v12805_v57 = vor.u32 %v13835_v9, %v12802_v34 }
0x17e5   : > { %v12729_v43 = vor.u32 %v13826_v50, %v12728_v40  ;;  %v13846_v52 = vld [vmem:[%s19098_s14 + $0x1ec] sm:$0xf0]  ;;  %v12837_v40 = vor.u32 %v13839_v53, %v12834_v56  ;;  %v13822_v50 = vld [vmem:[%s19098_s14 + $0x134] sm:$0xf]  ;;  %v13900_v53 = vld [vmem:[%s19100_s16 + $0x5a0] sm:$0xff] }
0x17e6   : > { %v12825_v46 = vor.u32 %v13846_v52, %v12824_v61  ;;  %v12760_v9 = vld [vmem:[%s19098_s14 + $0x130] sm:$0xf]  ;;  %v13908_v56 = vld [vmem:[%s19100_s16 + $0x5e0] sm:$0xff] }
0x17e7   : > { %v13886_v61 = vld [vmem:[%s19100_s16 + $0x530] sm:$0xff] }
0x17e8   : > { %v13894_v52 = vld [vmem:[%s19100_s16 + $0x570] sm:$0xff] }
0x17e9   : > { %v9867_v44 = vpop.permute.xlu1 %9866 }
0x17ea   : > { %v9884_v12 = vsel %vm2330_vm6, %v9883_v33, %v9867_v44  ;;  %v9875_v3 = vpop.permute.xlu0 %9874  ;;  %v13818_v44 = vld [vmem:[%s19098_s14 + $0x114] sm:$0xf] }
0x17eb   : > { %v9885_v39 = vsel %vm2332_vm7, %v9884_v12, %v9871_v26  ;;  %v12730_v33 = vld [vmem:[%s19098_s14 + $0x150] sm:$0xf0]  ;;  %v12736_v12 = vld [vmem:[%s19098_s14 + $0x118] sm:$0xf] }
0x17ec   : > { %v9886_v8 = vsel %vm2334_vm8, %v9885_v39, %v9875_v3  ;;  %v12733_v26 = vor.u32 %v13818_v44, %v12730_v33  ;;  %v13827_v3 = vld [vmem:[%s19098_s14 + $0x154] sm:$0xf0]  ;;  %v13819_v39 = vld [vmem:[%s19098_s14 + $0x11c] sm:$0xf] }
0x17ed   : > { %v13831_v44 = vld [vmem:[%s19098_s14 + $0x174] sm:$0xf0]  ;;  %v13823_v33 = vld [vmem:[%s19098_s14 + $0x13c] sm:$0xf] }
0x17ee   : > { %10254 = vmatpush.bf16.msrb.mxu3 %v12733_v26  ;;  %v12761_v26 = vor.u32 %v13830_v16, %v12760_v9  ;;  %v13899_v9 = vld [vmem:[%s19100_s16 + $0x598] sm:$0xff] }
0x17ef   : > { %v13907_v16 = vld [vmem:[%s19100_s16 + $0x5d8] sm:$0xff] }
0x17f1   : > { %v9879_v62 = vpop.permute.xlu1 %9878 }
0x17f2   : > { %v9887_v55 = vsel %vm2336_vm9, %v9886_v8, %v9879_v62  ;;  %v12738_v8 = vld [vmem:[%s19098_s14 + $0x158] sm:$0xf0]  ;;  %v12737_v62 = vor.u32 %v13827_v3, %v12736_v12 }
0x17f3   : > { %v9888_v18 = vpack.c.bf16 %v9887_v55, %v9887_v55  ;;  %v12741_v55 = vor.u32 %v13819_v39, %v12738_v8  ;;  %v12770_v12 = vld [vmem:[%s19098_s14 + $0x178] sm:$0xf0] }
0x17f4   : > { %10267 = vmatpush.bf16.msra.mxu0 %v12737_v62  ;;  %v12773_v8 = vor.u32 %v13823_v33, %v12770_v12  ;;  %v13871_v62 = vld [vmem:[%s19100_s16 + $0x4b8] sm:$0xff]  ;;  %v13882_v33 = vld [vmem:[%s19100_s16 + $0x510] sm:$0xff] }
0x17f5   : > { %12675 = vmatmul.msk.bf16.vlgmr.msra.gmra.mxu1 %vm866_vm0, %v9888_v18  ;;  %v13890_v12 = vld [vmem:[%s19100_s16 + $0x550] sm:$0xff] }
0x17f6   : > { %10279 = vmatpush.bf16.msra.mxu1 %v12805_v57  ;;  %v12762_v57 = vld [vmem:[%s19098_s14 + $0x170] sm:$0xf0] }
0x17f7   : > { %v12765_v3 = vor.u32 %v13822_v50, %v12762_v57  ;;  %v13883_v50 = vld [vmem:[%s19100_s16 + $0x518] sm:$0xff] }
0x17f8   : > { %v13891_v57 = vld [vmem:[%s19100_s16 + $0x558] sm:$0xff] }
0x17fa   : > { %10280 = vmatpush.bf16.msra.mxu1 %v12741_v55  ;;  %v13879_v55 = vld [vmem:[%s19100_s16 + $0x4f8] sm:$0xff] }
0x1872   : > { %v9914_v5 = vpop.f32.mrf.mxu1 }
0x1873   : > { %v9915_v2 = vadd.f32 %v14284_v38, %v9914_v5 }
0x1875   : > { %v9918_v41 = vadd.f32 %v9915_v2, %v17516_v21  ;;  %v13840_v21 = vld [vmem:[%s19098_s14 + $0x1bc] sm:$0xf0] }
0x1876   : > { %v12777_v20 = vor.u32 %v13840_v21, %v12776_v22  ;;  %v12808_v22 = vld [vmem:[%s19098_s14 + $0x1a0] sm:$0xf] }
0x1877   : > { %v9921_v32 = vsel %vm866_vm0, %v9918_v41, 0.0  ;;  %v13844_v21 = vld [vmem:[%s19098_s14 + $0x1dc] sm:$0xf0] }
0x1878   : > { %9922 = vadd.xlane.f32.xlu2 %v9921_v32  ;;  %10188 = vmatpush.bf16.msra.mxu2 %v12777_v20  ;;  %v12810_v20 = vld [vmem:[%s19098_s14 + $0x1e0] sm:$0xf0]  ;;  %v12809_v13 = vor.u32 %v13844_v21, %v12808_v22 }
0x1879   : > { %v12813_v47 = vor.u32 %v13836_v6, %v12810_v20  ;;  %v13876_v22 = vld [vmem:[%s19100_s16 + $0x4e0] sm:$0xff]  ;;  %v13867_v20 = vld [vmem:[%s19100_s16 + $0x498] sm:$0xff] }
0x187a   : > { %v9916_v31 = vpop.f32.mrf.mxu1  ;;  %v13852_v21 = vld [vmem:[%s19100_s16 + $0x420] sm:$0xff] }
0x187b   : > { %v14285_v31 = vld [vmem:[%s19104_s20 + $0x1] ss:$0 sm:$0xff] }
0x187c   : > { %10189 = vmatpush.bf16.msra.mxu2 %v12713_v10  ;;  %v13829_v10 = vld [vmem:[%s19098_s14 + $0x164] sm:$0xf0]  ;;  %v13860_v6 = vld [vmem:[%s19100_s16 + $0x460] sm:$0xff] }
0x1880   : > { %10240 = vmatpush.bf16.msrb.mxu2 %v12793_v37  ;;  %v12832_v37 = vld [vmem:[%s19098_s14 + $0x1b8] sm:$0xf] }
0x1881   : > { %v12833_v34 = vor.u32 %v13847_v36, %v12832_v37  ;;  %v13885_v37 = vld [vmem:[%s19100_s16 + $0x528] sm:$0xff] }
0x1882   : > { %v13893_v36 = vld [vmem:[%s19100_s16 + $0x568] sm:$0xff] }
0x1884   : > { %10241 = vmatpush.bf16.msrb.mxu2 %v12729_v43  ;;  %v12768_v43 = vld [vmem:[%s19098_s14 + $0x138] sm:$0xf] }
0x1885   : > { %v12769_v39 = vor.u32 %v13831_v44, %v12768_v43  ;;  %v13897_v43 = vld [vmem:[%s19100_s16 + $0x588] sm:$0xff] }
0x1886   : > { %v13905_v44 = vld [vmem:[%s19100_s16 + $0x5c8] sm:$0xff] }
0x18eb   : > { %v9923_v1 = vpop.xlane.xlu2 %9922 }
0x18ec   : > { %v9924_v49 = vmul.f32 %v9923_v1, %v15310_v17 }
0x18ee   : > { %v18375_v59 = vsub.f32 %v9918_v41, %v9924_v49  ;;  %v14286_v49 = vld [vmem:[%s19251_s9 + $0x1] ss:$0 sm:$0xff]  ;;  %s14452_s9 = scalar_lea.hbm %s14451_s11, 8 }
0x18ef   : > { %p14453_p11 = scmp.ne.s32.totalorder %s14451_s11, %s14452_s9  ;;  %p14458_p1 = scmp.lt.s32.totalorder %s14456_s18, %s14452_s9 }
0x18f0   : > { %v9926_v54 = vmul.f32 %v18375_v59, %v18375_v59 }
0x18f1   : > { %p14454_p12 = pnand %p14453_p11, %p14692_p5  ;;  %p14459_p2 = por %p14458_p1, %p14457_p0 }
0x18f2   : > { %v9927_v4 = vsel %vm866_vm0, %v9926_v54, 0.0 }
0x18f3   : > { %9928 = vadd.xlane.f32.xlu0 %v9927_v4  ;;  %p14455_p13 = pneg %p14454_p12 }
0x18f5   : > { %p14460_p3 = pnand %p14459_p2, %p14455_p13 }
0x1966   : > { %v9929_v7 = vpop.xlane.xlu0 %9928 }
0x1967   : > { %v9930_v63 = vmul.f32 %v9929_v7, %v15310_v17  ;;  %v13828_v7 = vld [vmem:[%s19098_s14 + $0x15c] sm:$0xf0] }
0x1968   : > { %v12745_v48 = vor.u32 %v13828_v7, %v12744_v35  ;;  %v13865_v35 = vld [vmem:[%s19100_s16 + $0x488] sm:$0xff] }
0x1969   : > { %v9931_v14 = vadd.f32 1e-05, %v9930_v63  ;;  %v12752_v63 = vld [vmem:[%s19098_s14 + $0x128] sm:$0xf] }
0x196a   : > { %v12753_v23 = vor.u32 %v13829_v10, %v12752_v63  ;;  %v13873_v7 = vld [vmem:[%s19100_s16 + $0x4c8] sm:$0xff]  ;;  %v13903_v63 = vld [vmem:[%s19100_s16 + $0x5b8] sm:$0xff] }
0x196b   : > { %14429 = vrsqrt.f32 %v9931_v14  ;;  %vm9938_vm2 = vweird.f32 %v9931_v14  ;;  %v13911_v10 = vld [vmem:[%s19100_s16 + $0x5f8] sm:$0xff] }
0x1971   : > { %v14430_v18 = vpop.eup %14429 }
0x1972   : > { %v9933_v38 = vmul.f32 %v14430_v18, %v9931_v14  ;;  %vm9939_vm1 = vweird.f32 %v14430_v18  ;;  %v13838_v14 = vld [vmem:[%s19098_s14 + $0x1b4] sm:$0xf] }
0x1973   : > { %vm9940_vm3 = vmor %vm9938_vm2, %vm9939_vm1  ;;  %v12829_v25 = vor.u32 %v13838_v14, %v12826_v51  ;;  %v13901_v14 = vld [vmem:[%s19100_s16 + $0x5a8] sm:$0xff] }
0x1974   : > { %v9934_v5 = vmul.f32 %v14430_v18, %v9933_v38  ;;  %v13863_v38 = vld [vmem:[%s19100_s16 + $0x478] sm:$0xff]  ;;  %v13909_v51 = vld [vmem:[%s19100_s16 + $0x5e8] sm:$0xff] }
0x1976   : > { %v9935_v2 = vmul.f32 0.5, %v9934_v5  ;;  %v13870_v5 = vld [vmem:[%s19100_s16 + $0x4b0] sm:$0xff] }
0x1978   : > { %v9936_v41 = vsub.f32 1.5, %v9935_v2  ;;  %v13878_v2 = vld [vmem:[%s19100_s16 + $0x4f0] sm:$0xff] }
0x197a   : > { %v9937_v32 = vmul.f32 %v14430_v18, %v9936_v41  ;;  %v13854_v41 = vld [vmem:[%s19100_s16 + $0x430] sm:$0xff] }
0x197c   : > { %v9941_v1 = vsel %vm9940_vm3, %v14430_v18, %v9937_v32  ;;  %v13855_v18 = vld [vmem:[%s19100_s16 + $0x438] sm:$0xff]  ;;  %v13862_v32 = vld [vmem:[%s19100_s16 + $0x470] sm:$0xff] }
0x197d   : > { %v9942_v54 = vmul.f32 %v9941_v1, %v18375_v59  ;;  %v12816_v59 = vld [vmem:[%s19098_s14 + $0x1a8] sm:$0xf] }
0x197e   : > { %v12817_v0 = vor.u32 %v13845_v60, %v12816_v59  ;;  %v13877_v1 = vld [vmem:[%s19100_s16 + $0x4e8] sm:$0xff]  ;;  %v13875_v59 = vld [vmem:[%s19100_s16 + $0x4d8] sm:$0xff] }
0x197f   : > { %v9944_v4 = vmul.f32 %v14285_v31, %v9942_v54  ;;  %v13869_v31 = vld [vmem:[%s19100_s16 + $0x4a8] sm:$0xff]  ;;  %v13851_v60 = vld [vmem:[%s19100_s16 + $0x418] sm:$0xff] }
0x1980   : > { %v13861_v54 = vld [vmem:[%s19100_s16 + $0x468] sm:$0xff] }
0x1981   : > { %v18499_v29 = vadd.f32 %v14286_v49, %v9944_v4  ;;  %v13853_v49 = vld [vmem:[%s19100_s16 + $0x428] sm:$0xff]  ;;  %v13868_v4 = vld [vmem:[%s19100_s16 + $0x4a0] sm:$0xff] }
0x1983   : > { %v18512_v58 = vpack.c.bf16 %v18499_v29, %v18499_v29 }
0x1985   : > { %12838 = vmatmul.msk.bf16.vlgmr.msra.gmra.mxu2 %vm866_vm0, %v18512_v58  ;;  %12839 = vmatmul.msk.bf16.vlgmr.msra.gmra.mxu3 %vm866_vm0, %v18512_v58 }
0x1986   : > { %12840 = vmatmul.msk.bf16.vlgmr.msrb.gmra.mxu0 %vm866_vm0, %v18512_v58  ;;  %12841 = vmatmul.msk.bf16.vlgmr.msrb.gmra.mxu1 %vm866_vm0, %v18512_v58 }
0x1987   : > { %10292 = vmatpush.bf16.msra.mxu2 %v12809_v13  ;;  %10305 = vmatpush.bf16.msra.mxu3 %v12813_v47  ;;  %v13874_v13 = vld [vmem:[%s19100_s16 + $0x4d0] sm:$0xff] }
0x1988   : > { %10318 = vmatpush.bf16.msrb.mxu0 %v12817_v0  ;;  %10331 = vmatpush.bf16.msrb.mxu1 %v12821_v24  ;;  %v13850_v47 = vld [vmem:[%s19100_s16 + $0x410] sm:$0xff]  ;;  %v13849_v0 = vld [vmem:[%s19100_s16 + $0x408] sm:$0xff] }
0x1989   : > { %v13857_v24 = vld [vmem:[%s19100_s16 + $0x448] sm:$0xff] }
0x198b   : > { %10293 = vmatpush.bf16.msra.mxu2 %v12745_v48  ;;  %10306 = vmatpush.bf16.msra.mxu3 %v12749_v27  ;;  %v13887_v48 = vld [vmem:[%s19100_s16 + $0x538] sm:$0xff] }
0x198c   : > { %10319 = vmatpush.bf16.msrb.mxu0 %v12753_v23  ;;  %10332 = vmatpush.bf16.msrb.mxu1 %v12757_v45  ;;  %v13895_v27 = vld [vmem:[%s19100_s16 + $0x578] sm:$0xff]  ;;  %v13902_v23 = vld [vmem:[%s19100_s16 + $0x5b0] sm:$0xff] }
0x198d   : > { %v13910_v45 = vld [vmem:[%s19100_s16 + $0x5f0] sm:$0xff] }
0x1995   : > { %12842 = vmatmul.msk.bf16.vlgmr.msrb.gmra.mxu2 %vm866_vm0, %v18512_v58  ;;  %12843 = vmatmul.msk.bf16.vlgmr.msrb.gmra.mxu3 %vm866_vm0, %v18512_v58 }
0x1996   : > { %12844 = vmatmul.msk.bf16.vlgmr.msra.gmra.mxu0 %vm866_vm0, %v18512_v58  ;;  %12845 = vmatmul.msk.bf16.vlgmr.msra.gmra.mxu1 %vm866_vm0, %v18512_v58 }
0x1997   : > { %10344 = vmatpush.bf16.msrb.mxu2 %v12825_v46  ;;  %10357 = vmatpush.bf16.msrb.mxu3 %v12829_v25  ;;  %v13884_v46 = vld [vmem:[%s19100_s16 + $0x520] sm:$0xff] }
0x1998   : > { %10370 = vmatpush.bf16.msra.mxu0 %v12833_v34  ;;  %10383 = vmatpush.bf16.msra.mxu1 %v12837_v40  ;;  %v13892_v25 = vld [vmem:[%s19100_s16 + $0x560] sm:$0xff]  ;;  %v13898_v34 = vld [vmem:[%s19100_s16 + $0x590] sm:$0xff] }
0x1999   : > { %v13906_v40 = vld [vmem:[%s19100_s16 + $0x5d0] sm:$0xff] }
0x199b   : > { %10345 = vmatpush.bf16.msrb.mxu2 %v12761_v26  ;;  %10358 = vmatpush.bf16.msrb.mxu3 %v12765_v3  ;;  %v13896_v26 = vld [vmem:[%s19100_s16 + $0x580] sm:$0xff] }
0x199c   : > { %10371 = vmatpush.bf16.msra.mxu0 %v12769_v39  ;;  %10384 = vmatpush.bf16.msra.mxu1 %v12773_v8  ;;  %v13904_v3 = vld [vmem:[%s19100_s16 + $0x5c0] sm:$0xff]  ;;  %v13881_v39 = vld [vmem:[%s19100_s16 + $0x508] sm:$0xff] }
0x199d   : > { %v13889_v8 = vld [vmem:[%s19100_s16 + $0x548] sm:$0xff] }
0x19a5   : > { %12846 = vmatmul.msk.bf16.vlgmr.msra.gmra.mxu2 %vm866_vm0, %v18512_v58  ;;  %12847 = vmatmul.msk.bf16.vlgmr.msra.gmra.mxu3 %vm866_vm0, %v18512_v58 }
0x19a6   : > { %12848 = vmatmul.msk.bf16.vlgmr.msrb.gmra.mxu0 %vm866_vm0, %v18512_v58  ;;  %12849 = vmatmul.msk.bf16.vlgmr.msrb.gmra.mxu1 %vm866_vm0, %v18512_v58 }
0x19a7   : > { %11475 = vmatpush.bf16.msrb.mxu0 %v13871_v62  ;;  %11488 = vmatpush.bf16.msrb.mxu1 %v13879_v55  ;;  %v13880_v62 = vld [vmem:[%s19100_s16 + $0x500] sm:$0xff] }
0x19a8   : > { %11449 = vmatpush.bf16.msra.mxu2 %v13855_v18  ;;  %11462 = vmatpush.bf16.msra.mxu3 %v13863_v38  ;;  %v13888_v55 = vld [vmem:[%s19100_s16 + $0x540] sm:$0xff] }
0x19a9   : > { %v18813_v18 = vld [vmem:[%s19099_s15 + $0x1] ss:$2 sm:$0xff] }
0x19aa   : > { %v9989_v38 = vperm.slane %v18813_v18, 2 }
0x19ab   : > { %11476 = vmatpush.bf16.msrb.mxu0 %v13870_v5  ;;  %11489 = vmatpush.bf16.msrb.mxu1 %v13878_v2  ;;  %v9990_v5 = vperm.slane %v18813_v18, 3 }
0x19ac   : > { %11450 = vmatpush.bf16.msra.mxu2 %v13854_v41  ;;  %11463 = vmatpush.bf16.msra.mxu3 %v13862_v32 }
0x19af   : > { %11477 = vmatpush.bf16.msrb.mxu0 %v13869_v31  ;;  %11490 = vmatpush.bf16.msrb.mxu1 %v13877_v1  ;;  %v9987_v1 = vperm.slane %v18813_v18, 0 }
0x19b0   : > { %11451 = vmatpush.bf16.msra.mxu2 %v13853_v49  ;;  %11464 = vmatpush.bf16.msra.mxu3 %v13861_v54  ;;  %v9988_v49 = vperm.slane %v18813_v18, 1 }
0x19b3   : > { %11478 = vmatpush.bf16.msrb.mxu0 %v13868_v4  ;;  %11491 = vmatpush.bf16.msrb.mxu1 %v13876_v22  ;;  %v13935_v22 = vld [vmem:[%s19100_s16 + $0x6b8] sm:$0xff] }
0x19b4   : > { %11452 = vmatpush.bf16.msra.mxu2 %v13852_v21  ;;  %11465 = vmatpush.bf16.msra.mxu3 %v13860_v6  ;;  %v13943_v21 = vld [vmem:[%s19100_s16 + $0x6f8] sm:$0xff] }
0x19b5   : > { %12850 = vmatmul.msk.bf16.vlgmr.msrb.gmra.mxu2 %vm866_vm0, %v18512_v58  ;;  %12851 = vmatmul.msk.bf16.vlgmr.msrb.gmra.mxu3 %vm866_vm0, %v18512_v58 }
0x19b6   : > { %12852 = vmatmul.msk.bf16.vlgmr.msra.gmra.mxu0 %vm866_vm0, %v18512_v58  ;;  %12853 = vmatmul.msk.bf16.vlgmr.msra.gmra.mxu1 %vm866_vm0, %v18512_v58  ;;  %v13858_v58 = vld [vmem:[%s19100_s16 + $0x450] sm:$0xff] }
0x19b7   : > { %11479 = vmatpush.bf16.msrb.mxu0 %v13867_v20  ;;  %11492 = vmatpush.bf16.msrb.mxu1 %v13875_v59 }
0x19b8   : > { %11453 = vmatpush.bf16.msra.mxu2 %v13851_v60  ;;  %11466 = vmatpush.bf16.msra.mxu3 %v13859_v42 }
0x19bb   : > { %11480 = vmatpush.bf16.msrb.mxu0 %v13866_v19  ;;  %11493 = vmatpush.bf16.msrb.mxu1 %v13874_v13 }
0x19bc   : > { %11454 = vmatpush.bf16.msra.mxu2 %v13850_v47  ;;  %11467 = vmatpush.bf16.msra.mxu3 %v13858_v58 }
0x19bf   : > { %11481 = vmatpush.bf16.msrb.mxu0 %v13865_v35  ;;  %11494 = vmatpush.bf16.msrb.mxu1 %v13873_v7  ;;  %v13934_v7 = vld [vmem:[%s19100_s16 + $0x6b0] sm:$0xff] }
0x19c0   : > { %11455 = vmatpush.bf16.msra.mxu2 %v13849_v0  ;;  %11468 = vmatpush.bf16.msra.mxu3 %v13857_v24  ;;  %v13942_v0 = vld [vmem:[%s19100_s16 + $0x6f0] sm:$0xff] }
0x19c3   : > { %11482 = vmatpush.bf16.msrb.mxu0 %v13864_v15  ;;  %11495 = vmatpush.bf16.msrb.mxu1 %v13872_v11  ;;  %v13919_v11 = vld [vmem:[%s19100_s16 + $0x638] sm:$0xff] }
0x19c4   : > { %11456 = vmatpush.bf16.msra.mxu2 %v13848_v28  ;;  %11469 = vmatpush.bf16.msra.mxu3 %v13856_v30  ;;  %v13941_v28 = vld [vmem:[%s19100_s16 + $0x6e8] sm:$0xff] }
0x19c7   : > { %11527 = vmatpush.bf16.msra.mxu0 %v13903_v63  ;;  %11540 = vmatpush.bf16.msra.mxu1 %v13911_v10  ;;  %v13927_v63 = vld [vmem:[%s19100_s16 + $0x678] sm:$0xff]  ;;  %v13933_v10 = vld [vmem:[%s19100_s16 + $0x6a8] sm:$0xff] }
0x19c8   : > { %11501 = vmatpush.bf16.msrb.mxu2 %v13887_v48  ;;  %11514 = vmatpush.bf16.msrb.mxu3 %v13895_v27  ;;  %v9993_v27 = vperm.slane %v18813_v18, 6 }
0x19cb   : > { %11528 = vmatpush.bf16.msra.mxu0 %v13902_v23  ;;  %11541 = vmatpush.bf16.msra.mxu1 %v13910_v45  ;;  %v9994_v23 = vperm.slane %v18813_v18, 7  ;;  %v13918_v45 = vld [vmem:[%s19100_s16 + $0x630] sm:$0xff] }
0x19cc   : > { %11502 = vmatpush.bf16.msrb.mxu2 %v13886_v61  ;;  %11515 = vmatpush.bf16.msrb.mxu3 %v13894_v52  ;;  %v13926_v61 = vld [vmem:[%s19100_s16 + $0x670] sm:$0xff] }
0x19cf   : > { %11529 = vmatpush.bf16.msra.mxu0 %v13901_v14  ;;  %11542 = vmatpush.bf16.msra.mxu1 %v13909_v51  ;;  %v13932_v51 = vld [vmem:[%s19100_s16 + $0x6a0] sm:$0xff] }
0x19d0   : > { %11503 = vmatpush.bf16.msrb.mxu2 %v13885_v37  ;;  %11516 = vmatpush.bf16.msrb.mxu3 %v13893_v36  ;;  %v13940_v37 = vld [vmem:[%s19100_s16 + $0x6e0] sm:$0xff] }
0x19d3   : > { %11530 = vmatpush.bf16.msra.mxu0 %v13900_v53  ;;  %11543 = vmatpush.bf16.msra.mxu1 %v13908_v56  ;;  %v13917_v56 = vld [vmem:[%s19100_s16 + $0x628] sm:$0xff] }
0x19d4   : > { %11504 = vmatpush.bf16.msrb.mxu2 %v13884_v46  ;;  %11517 = vmatpush.bf16.msrb.mxu3 %v13892_v25  ;;  %v13925_v46 = vld [vmem:[%s19100_s16 + $0x668] sm:$0xff]  ;;  %v9991_v25 = vperm.slane %v18813_v18, 4 }
0x19d7   : > { %11531 = vmatpush.bf16.msra.mxu0 %v13899_v9  ;;  %11544 = vmatpush.bf16.msra.mxu1 %v13907_v16  ;;  %v9992_v9 = vperm.slane %v18813_v18, 5 }
0x19d8   : > { %11505 = vmatpush.bf16.msrb.mxu2 %v13883_v50  ;;  %11518 = vmatpush.bf16.msrb.mxu3 %v13891_v57  ;;  %v13939_v50 = vld [vmem:[%s19100_s16 + $0x6d8] sm:$0xff] }
0x19db   : > { %11532 = vmatpush.bf16.msra.mxu0 %v13898_v34  ;;  %11545 = vmatpush.bf16.msra.mxu1 %v13906_v40  ;;  %v13931_v40 = vld [vmem:[%s19100_s16 + $0x698] sm:$0xff] }
0x19dc   : > { %11506 = vmatpush.bf16.msrb.mxu2 %v13882_v33  ;;  %11519 = vmatpush.bf16.msrb.mxu3 %v13890_v12 }
0x19df   : > { %11533 = vmatpush.bf16.msra.mxu0 %v13897_v43  ;;  %11546 = vmatpush.bf16.msra.mxu1 %v13905_v44 }
0x19e0   : > { %11507 = vmatpush.bf16.msrb.mxu2 %v13881_v39  ;;  %11520 = vmatpush.bf16.msrb.mxu3 %v13889_v8  ;;  %v13924_v39 = vld [vmem:[%s19100_s16 + $0x660] sm:$0xff] }
0x19e3   : > { %11534 = vmatpush.bf16.msra.mxu0 %v13896_v26  ;;  %11547 = vmatpush.bf16.msra.mxu1 %v13904_v3  ;;  %v13916_v3 = vld [vmem:[%s19100_s16 + $0x620] sm:$0xff] }
0x19e4   : > { %11508 = vmatpush.bf16.msrb.mxu2 %v13880_v62  ;;  %11521 = vmatpush.bf16.msrb.mxu3 %v13888_v55 }
0x1a03   : > { %v10217_v2 = vpop.f32.mrf.mxu0  ;;  %v10230_v41 = vpop.f32.mrf.mxu1 }
0x1a04   : > { %v10218_v32 = vadd.f32 %v10217_v2, %v9989_v38  ;;  %v10231_v31 = vadd.f32 %v10230_v41, %v9990_v5  ;;  %v13930_v38 = vld [vmem:[%s19100_s16 + $0x690] sm:$0xff] }
0x1a05   : > { %v13938_v5 = vld [vmem:[%s19100_s16 + $0x6d0] sm:$0xff] }
0x1a06   : > { %v10392_v54 = vmax.f32 %v10218_v32, 0.0  ;;  %v10393_v4 = vmax.f32 %v10231_v31, 0.0  ;;  %v13915_v32 = vld [vmem:[%s19100_s16 + $0x618] sm:$0xff] }
0x1a07   : > { %v13923_v31 = vld [vmem:[%s19100_s16 + $0x658] sm:$0xff] }
0x1a08   : > { %v10665_v6 = vpack.c.bf16 %v10392_v54, %v10392_v54  ;;  %v10666_v20 = vpack.c.bf16 %v10393_v4, %v10393_v4  ;;  %v10191_v59 = vpop.f32.mrf.mxu2  ;;  %v10204_v60 = vpop.f32.mrf.mxu3  ;;  %v13937_v54 = vld [vmem:[%s19100_s16 + $0x6c8] sm:$0xff] }
0x1a09   : > { %v10192_v42 = vadd.f32 %v10191_v59, %v9987_v1  ;;  %v10205_v19 = vadd.f32 %v10204_v60, %v9988_v49  ;;  %v18892_v1 = vld [vmem:[%s19099_s15 + $0x11] ss:$2 sm:$0xff]  ;;  %v13929_v49 = vld [vmem:[%s19100_s16 + $0x688] sm:$0xff] }
0x1a0a   : > { %11483 = vmatmul.bf16.vlgmr.msrb.gmra.mxu0 %v10665_v6  ;;  %11496 = vmatmul.bf16.vlgmr.msrb.gmra.mxu1 %v10666_v20  ;;  %v9998_v6 = vperm.slane %v18892_v1, 3  ;;  %v13914_v20 = vld [vmem:[%s19100_s16 + $0x610] sm:$0xff] }
0x1a0b   : > { %v10390_v13 = vmax.f32 %v10192_v42, 0.0  ;;  %v10391_v47 = vmax.f32 %v10205_v19, 0.0  ;;  %11579 = vmatpush.bf16.msrb.mxu0 %v13935_v22  ;;  %11592 = vmatpush.bf16.msrb.mxu1 %v13943_v21  ;;  %v10219_v58 = vpop.f32.mrf.mxu0  ;;  %v10232_v35 = vpop.f32.mrf.mxu1  ;;  %v9997_v21 = vperm.slane %v18892_v1, 2  ;;  %v13922_v59 = vld [vmem:[%s19100_s16 + $0x650] sm:$0xff]  ;;  %v13928_v19 = vld [vmem:[%s19100_s16 + $0x680] sm:$0xff] }
0x1a0c   : > { %v13967_v35 = vld [vmem:[%s19100_s16 + $0x7b8] sm:$0xff] }
0x1a0d   : > { %v10663_v24 = vpack.c.bf16 %v10390_v13, %v10390_v13  ;;  %v10664_v15 = vpack.c.bf16 %v10391_v47, %v10391_v47  ;;  %v13936_v13 = vld [vmem:[%s19100_s16 + $0x6c0] sm:$0xff] }
0x1a0f   : > { %11580 = vmatpush.bf16.msrb.mxu0 %v13934_v7  ;;  %11593 = vmatpush.bf16.msrb.mxu1 %v13942_v0  ;;  %v13975_v7 = vld [vmem:[%s19100_s16 + $0x7f8] sm:$0xff]  ;;  %v13913_v0 = vld [vmem:[%s19100_s16 + $0x608] sm:$0xff] }
0x1a10   : > { %11457 = vmatmul.bf16.vlgmr.msra.gmra.mxu2 %v10663_v24  ;;  %11470 = vmatmul.bf16.vlgmr.msra.gmra.mxu3 %v10664_v15  ;;  %v10193_v30 = vpop.f32.mrf.mxu2  ;;  %v10206_v48 = vpop.f32.mrf.mxu3  ;;  %v13921_v24 = vld [vmem:[%s19100_s16 + $0x648] sm:$0xff]  ;;  %v9995_v15 = vperm.slane %v18892_v1, 0 }
0x1a11   : > { %11553 = vmatpush.bf16.msra.mxu2 %v13919_v11  ;;  %11566 = vmatpush.bf16.msra.mxu3 %v13927_v63  ;;  %v9996_v11 = vperm.slane %v18892_v1, 1 }
0x1a13   : > { %11581 = vmatpush.bf16.msrb.mxu0 %v13933_v10  ;;  %11594 = vmatpush.bf16.msrb.mxu1 %v13941_v28  ;;  %v10269_v52 = vpop.f32.mrf.mxu0  ;;  %v10282_v14 = vpop.f32.mrf.mxu1 }
0x1a14   : > { %v10270_v36 = vadd.f32 %v10269_v52, %v9993_v27  ;;  %v10283_v53 = vadd.f32 %v10282_v14, %v9994_v23  ;;  %v13966_v23 = vld [vmem:[%s19100_s16 + $0x7b0] sm:$0xff]  ;;  %v13912_v14 = vld [vmem:[%s19100_s16 + $0x600] sm:$0xff] }
0x1a15   : > { %11554 = vmatpush.bf16.msra.mxu2 %v13918_v45  ;;  %11567 = vmatpush.bf16.msra.mxu3 %v13926_v61  ;;  %v13974_v45 = vld [vmem:[%s19100_s16 + $0x7f0] sm:$0xff] }
0x1a16   : > { %v10396_v16 = vmax.f32 %v10270_v36, 0.0  ;;  %v10397_v34 = vmax.f32 %v10283_v53, 0.0  ;;  %v13959_v36 = vld [vmem:[%s19100_s16 + $0x778] sm:$0xff] }
0x1a17   : > { %11582 = vmatpush.bf16.msrb.mxu0 %v13932_v51  ;;  %11595 = vmatpush.bf16.msrb.mxu1 %v13940_v37  ;;  %v13920_v51 = vld [vmem:[%s19100_s16 + $0x640] sm:$0xff]  ;;  %v13951_v37 = vld [vmem:[%s19100_s16 + $0x738] sm:$0xff] }
0x1a18   : > { %v10669_v57 = vpack.c.bf16 %v10396_v16, %v10396_v16  ;;  %v10670_v43 = vpack.c.bf16 %v10397_v34, %v10397_v34  ;;  %v10243_v44 = vpop.f32.mrf.mxu2  ;;  %v10256_v33 = vpop.f32.mrf.mxu3  ;;  %v13973_v16 = vld [vmem:[%s19100_s16 + $0x7e8] sm:$0xff] }
0x1a19   : > { %11555 = vmatpush.bf16.msra.mxu2 %v13917_v56  ;;  %11568 = vmatpush.bf16.msra.mxu3 %v13925_v46  ;;  %v10244_v12 = vadd.f32 %v10243_v44, %v9991_v25  ;;  %v10257_v26 = vadd.f32 %v10256_v33, %v9992_v9  ;;  %v13965_v9 = vld [vmem:[%s19100_s16 + $0x7a8] sm:$0xff]  ;;  %v13964_v33 = vld [vmem:[%s19100_s16 + $0x7a0] sm:$0xff] }
0x1a1a   : > { %11535 = vmatmul.bf16.vlgmr.msra.gmra.mxu0 %v10669_v57  ;;  %11548 = vmatmul.bf16.vlgmr.msra.gmra.mxu1 %v10670_v43  ;;  %v13958_v57 = vld [vmem:[%s19100_s16 + $0x770] sm:$0xff] }
0x1a1b   : > { %v10394_v8 = vmax.f32 %v10244_v12, 0.0  ;;  %v10395_v62 = vmax.f32 %v10257_v26, 0.0  ;;  %11583 = vmatpush.bf16.msrb.mxu0 %v13931_v40  ;;  %11596 = vmatpush.bf16.msrb.mxu1 %v13939_v50  ;;  %v10271_v55 = vpop.f32.mrf.mxu0  ;;  %v10284_v18 = vpop.f32.mrf.mxu1  ;;  %v13950_v50 = vld [vmem:[%s19100_s16 + $0x730] sm:$0xff]  ;;  %v13972_v12 = vld [vmem:[%s19100_s16 + $0x7e0] sm:$0xff]  ;;  %v13949_v26 = vld [vmem:[%s19100_s16 + $0x728] sm:$0xff] }
0x1a1c   : > { %v13971_v55 = vld [vmem:[%s19100_s16 + $0x7d8] sm:$0xff]  ;;  %v13948_v18 = vld [vmem:[%s19100_s16 + $0x720] sm:$0xff] }
0x1a1d   : > { %v10667_v2 = vpack.c.bf16 %v10394_v8, %v10394_v8  ;;  %v10668_v41 = vpack.c.bf16 %v10395_v62, %v10395_v62  ;;  %11556 = vmatpush.bf16.msra.mxu2 %v13916_v3  ;;  %11569 = vmatpush.bf16.msra.mxu3 %v13924_v39  ;;  %v13957_v3 = vld [vmem:[%s19100_s16 + $0x768] sm:$0xff]  ;;  %v13963_v62 = vld [vmem:[%s19100_s16 + $0x798] sm:$0xff] }
0x1a1f   : > { %11584 = vmatpush.bf16.msrb.mxu0 %v13930_v38  ;;  %11597 = vmatpush.bf16.msrb.mxu1 %v13938_v5  ;;  %v13956_v38 = vld [vmem:[%s19100_s16 + $0x760] sm:$0xff] }
0x1a20   : > { %11509 = vmatmul.bf16.vlgmr.msrb.gmra.mxu2 %v10667_v2  ;;  %11522 = vmatmul.bf16.vlgmr.msrb.gmra.mxu3 %v10668_v41  ;;  %v10245_v4 = vpop.f32.mrf.mxu2  ;;  %v10258_v22 = vpop.f32.mrf.mxu3  ;;  %v13962_v41 = vld [vmem:[%s19100_s16 + $0x790] sm:$0xff] }
0x1a21   : > { %11557 = vmatpush.bf16.msra.mxu2 %v13915_v32  ;;  %11570 = vmatpush.bf16.msra.mxu3 %v13923_v31  ;;  %v13970_v32 = vld [vmem:[%s19100_s16 + $0x7d0] sm:$0xff]  ;;  %v10001_v31 = vperm.slane %v18892_v1, 6  ;;  %v13955_v4 = vld [vmem:[%s19100_s16 + $0x758] sm:$0xff] }
0x1a23   : > { %11585 = vmatpush.bf16.msrb.mxu0 %v13929_v49  ;;  %11598 = vmatpush.bf16.msrb.mxu1 %v13937_v54  ;;  %v10321_v60 = vpop.f32.mrf.mxu0  ;;  %v10334_v42 = vpop.f32.mrf.mxu1  ;;  %v10002_v49 = vperm.slane %v18892_v1, 7  ;;  %v13947_v54 = vld [vmem:[%s19100_s16 + $0x718] sm:$0xff] }
0x1a24   : > { %v10322_v47 = vadd.f32 %v10321_v60, %v9997_v21  ;;  %v10335_v58 = vadd.f32 %v10334_v42, %v9998_v6  ;;  %v13961_v6 = vld [vmem:[%s19100_s16 + $0x788] sm:$0xff]  ;;  %v13946_v42 = vld [vmem:[%s19100_s16 + $0x710] sm:$0xff] }
0x1a25   : > { %11558 = vmatpush.bf16.msra.mxu2 %v13914_v20  ;;  %11571 = vmatpush.bf16.msra.mxu3 %v13922_v59  ;;  %v13969_v20 = vld [vmem:[%s19100_s16 + $0x7c8] sm:$0xff] }
0x1a26   : > { %v10400_v63 = vmax.f32 %v10322_v47, 0.0  ;;  %v10401_v10 = vmax.f32 %v10335_v58, 0.0  ;;  %v10000_v47 = vperm.slane %v18892_v1, 5 }
0x1a27   : > { %11586 = vmatpush.bf16.msrb.mxu0 %v13928_v19  ;;  %11599 = vmatpush.bf16.msrb.mxu1 %v13936_v13  ;;  %v13954_v19 = vld [vmem:[%s19100_s16 + $0x750] sm:$0xff]  ;;  %v9999_v13 = vperm.slane %v18892_v1, 4  ;;  %v13945_v1 = vld [vmem:[%s19100_s16 + $0x708] sm:$0xff] }
0x1a28   : > { %v10673_v28 = vpack.c.bf16 %v10400_v63, %v10400_v63  ;;  %v10674_v30 = vpack.c.bf16 %v10401_v10, %v10401_v10  ;;  %v10295_v48 = vpop.f32.mrf.mxu2  ;;  %v10308_v27 = vpop.f32.mrf.mxu3 }
0x1a29   : > { %11559 = vmatpush.bf16.msra.mxu2 %v13913_v0  ;;  %11572 = vmatpush.bf16.msra.mxu3 %v13921_v24  ;;  %v10296_v61 = vadd.f32 %v10295_v48, %v9995_v15  ;;  %v10309_v52 = vadd.f32 %v10308_v27, %v9996_v11  ;;  %v13968_v0 = vld [vmem:[%s19100_s16 + $0x7c0] sm:$0xff]  ;;  %v13953_v11 = vld [vmem:[%s19100_s16 + $0x748] sm:$0xff] }
0x1a2a   : > { %11587 = vmatmul.bf16.vlgmr.msrb.gmra.mxu0 %v10673_v28  ;;  %11600 = vmatmul.bf16.vlgmr.msrb.gmra.mxu1 %v10674_v30  ;;  %v13944_v48 = vld [vmem:[%s19100_s16 + $0x700] sm:$0xff] }
0x1a2b   : > { %11631 = vmatpush.bf16.msra.mxu0 %v13967_v35  ;;  %11644 = vmatpush.bf16.msra.mxu1 %v13975_v7  ;;  %v10398_v53 = vmax.f32 %v10296_v61, 0.0  ;;  %v10399_v56 = vmax.f32 %v10309_v52, 0.0  ;;  %v10323_v46 = vpop.f32.mrf.mxu0  ;;  %v10336_v25 = vpop.f32.mrf.mxu1  ;;  %v13960_v7 = vld [vmem:[%s19100_s16 + $0x780] sm:$0xff] }
0x1a2c   : > { %v13952_v27 = vld [vmem:[%s19100_s16 + $0x740] sm:$0xff] }
0x1a2d   : > { %v10671_v34 = vpack.c.bf16 %v10398_v53, %v10398_v53  ;;  %v10672_v40 = vpack.c.bf16 %v10399_v56, %v10399_v56  ;;  %11560 = vmatpush.bf16.msra.mxu2 %v13912_v14  ;;  %11573 = vmatpush.bf16.msra.mxu3 %v13920_v51 }
0x1a2f   : > { %11632 = vmatpush.bf16.msra.mxu0 %v13966_v23  ;;  %11645 = vmatpush.bf16.msra.mxu1 %v13974_v45 }
0x1a30   : > { %v10297_v43 = vpop.f32.mrf.mxu2  ;;  %v10310_v44 = vpop.f32.mrf.mxu3  ;;  %11561 = vmatmul.bf16.vlgmr.msra.gmra.mxu2 %v10671_v34  ;;  %11574 = vmatmul.bf16.vlgmr.msra.gmra.mxu3 %v10672_v40 }
0x1a31   : > { %11605 = vmatpush.bf16.msrb.mxu2 %v13951_v37  ;;  %11618 = vmatpush.bf16.msrb.mxu3 %v13959_v36 }
0x1a33   : > { %11633 = vmatpush.bf16.msra.mxu0 %v13965_v9  ;;  %11646 = vmatpush.bf16.msra.mxu1 %v13973_v16  ;;  %v10373_v39 = vpop.f32.mrf.mxu0  ;;  %v10386_v8 = vpop.f32.mrf.mxu1 }
0x1a34   : > { %v10374_v59 = vadd.f32 %v10373_v39, %v10001_v31  ;;  %v10387_v60 = vadd.f32 %v10386_v8, %v10002_v49 }
0x1a35   : > { %11606 = vmatpush.bf16.msrb.mxu2 %v13950_v50  ;;  %11619 = vmatpush.bf16.msrb.mxu3 %v13958_v57  ;;  %v14287_v50 = vld [vmem:[%s19101_s17 + $0x1] ss:$0 sm:$0xff] }
0x1a36   : > { %v10404_v24 = vmax.f32 %v10374_v59, 0.0  ;;  %v10405_v15 = vmax.f32 %v10387_v60, 0.0 }
0x1a37   : > { %11634 = vmatpush.bf16.msra.mxu0 %v13964_v33  ;;  %11647 = vmatpush.bf16.msra.mxu1 %v13972_v12 }
0x1a38   : > { %v10347_v5 = vpop.f32.mrf.mxu2  ;;  %v10360_v2 = vpop.f32.mrf.mxu3  ;;  %v10677_v28 = vpack.c.bf16 %v10404_v24, %v10404_v24  ;;  %v10678_v30 = vpack.c.bf16 %v10405_v15, %v10405_v15 }
0x1a39   : > { %11607 = vmatpush.bf16.msrb.mxu2 %v13949_v26  ;;  %11620 = vmatpush.bf16.msrb.mxu3 %v13957_v3  ;;  %v10348_v63 = vadd.f32 %v10347_v5, %v9999_v13  ;;  %v10361_v10 = vadd.f32 %v10360_v2, %v10000_v47 }
0x1a3b   : > { %11635 = vmatpush.bf16.msra.mxu0 %v13963_v62  ;;  %11648 = vmatpush.bf16.msra.mxu1 %v13971_v55  ;;  %v10375_v22 = vpop.f32.mrf.mxu0  ;;  %v10388_v21 = vpop.f32.mrf.mxu1  ;;  %v10402_v23 = vmax.f32 %v10348_v63, 0.0  ;;  %v10403_v45 = vmax.f32 %v10361_v10, 0.0 }
0x1a3d   : > { %11608 = vmatpush.bf16.msrb.mxu2 %v13948_v18  ;;  %11621 = vmatpush.bf16.msrb.mxu3 %v13956_v38  ;;  %v10675_v61 = vpack.c.bf16 %v10402_v23, %v10402_v23  ;;  %v10676_v52 = vpack.c.bf16 %v10403_v45, %v10403_v45 }
0x1a3f   : > { %11636 = vmatpush.bf16.msra.mxu0 %v13962_v41  ;;  %11649 = vmatpush.bf16.msra.mxu1 %v13970_v32 }
0x1a40   : > { %v10349_v58 = vpop.f32.mrf.mxu2  ;;  %v10362_v35 = vpop.f32.mrf.mxu3 }
0x1a41   : > { %11609 = vmatpush.bf16.msrb.mxu2 %v13947_v54  ;;  %11622 = vmatpush.bf16.msrb.mxu3 %v13955_v4 }
0x1a43   : > { %11637 = vmatpush.bf16.msra.mxu0 %v13961_v6  ;;  %11650 = vmatpush.bf16.msra.mxu1 %v13969_v20 }
0x1a45   : > { %11610 = vmatpush.bf16.msrb.mxu2 %v13946_v42  ;;  %11623 = vmatpush.bf16.msrb.mxu3 %v13954_v19 }
0x1a47   : > { %11638 = vmatpush.bf16.msra.mxu0 %v13960_v7  ;;  %11651 = vmatpush.bf16.msra.mxu1 %v13968_v0 }
0x1a49   : > { %11611 = vmatpush.bf16.msrb.mxu2 %v13945_v1  ;;  %11624 = vmatpush.bf16.msrb.mxu3 %v13953_v11 }
0x1a4a   : > { %11639 = vmatmul.bf16.vlgmr.msra.gmra.mxu0 %v10677_v28  ;;  %11652 = vmatmul.bf16.vlgmr.msra.gmra.mxu1 %v10678_v30 }
0x1a4d   : > { %11612 = vmatpush.bf16.msrb.mxu2 %v13944_v48  ;;  %11625 = vmatpush.bf16.msrb.mxu3 %v13952_v27  ;;  %v13977_v48 = vld [vmem:[%s19252_s3 + $0x8] sm:$0xff]  ;;  %s19259_s3 = sld [smem:[#allocation33_spill]] }
0x1a50   : > { %11613 = vmatmul.bf16.vlgmr.msrb.gmra.mxu2 %v10675_v61  ;;  %11626 = vmatmul.bf16.vlgmr.msrb.gmra.mxu3 %v10676_v52 }
0x1a51   : > { %11716 = vmatpush.bf16.msra.mxu2 %v13977_v48 }
0x1a87   : > { %v11484_v14 = vpop.f32.mrf.mxu0  ;;  %v11497_v51 = vpop.f32.mrf.mxu1 }
0x1a8f   : > { %v11486_v37 = vpop.f32.mrf.mxu0  ;;  %v11499_v36 = vpop.f32.mrf.mxu1 }
0x1a93   : > { %v11458_v53 = vpop.f32.mrf.mxu2  ;;  %v11471_v56 = vpop.f32.mrf.mxu3 }
0x1a94   : > { %v11459_v44 = vadd.f32 %v14287_v50, %v11458_v53  ;;  %v14288_v53 = vld [vmem:[%s19106_s22 + $0x1] ss:$0 sm:$0xff] }
0x1a96   : > { %v11472_v26 = vadd.f32 %v11471_v56, %v11459_v44 }
0x1a97   : > { %v11536_v46 = vpop.f32.mrf.mxu0  ;;  %v11549_v25 = vpop.f32.mrf.mxu1 }
0x1a98   : > { %v11485_v8 = vadd.f32 %v11484_v14, %v11472_v26 }
0x1a9a   : > { %v11498_v18 = vadd.f32 %v11497_v51, %v11485_v8 }
0x1a9b   : > { %v11460_v9 = vpop.f32.mrf.mxu2  ;;  %v11473_v16 = vpop.f32.mrf.mxu3 }
0x1a9f   : > { %v11538_v34 = vpop.f32.mrf.mxu0  ;;  %v11551_v40 = vpop.f32.mrf.mxu1 }
0x1aa0   : > { %v14290_v34 = vld [vmem:[%s19259_s3] ss:$0 sm:$0xff] }
0x1aa3   : > { %v11510_v57 = vpop.f32.mrf.mxu2  ;;  %v11523_v43 = vpop.f32.mrf.mxu3 }
0x1aa4   : > { %v11511_v2 = vadd.f32 %v11510_v57, %v11498_v18 }
0x1aa6   : > { %v11524_v41 = vadd.f32 %v11523_v43, %v11511_v2 }
0x1aa7   : > { %v11588_v33 = vpop.f32.mrf.mxu0  ;;  %v11601_v12 = vpop.f32.mrf.mxu1 }
0x1aa8   : > { %v11537_v49 = vadd.f32 %v11536_v46, %v11524_v41 }
0x1aaa   : > { %v11550_v54 = vadd.f32 %v11549_v25, %v11537_v49 }
0x1aab   : > { %v11512_v3 = vpop.f32.mrf.mxu2  ;;  %v11525_v39 = vpop.f32.mrf.mxu3 }
0x1aaf   : > { %v11590_v62 = vpop.f32.mrf.mxu0  ;;  %v11603_v55 = vpop.f32.mrf.mxu1 }
0x1ab3   : > { %v11562_v38 = vpop.f32.mrf.mxu2  ;;  %v11575_v5 = vpop.f32.mrf.mxu3 }
0x1ab4   : > { %v11563_v4 = vadd.f32 %v11562_v38, %v11550_v54 }
0x1ab6   : > { %v11576_v6 = vadd.f32 %v11575_v5, %v11563_v4 }
0x1ab8   : > { %v11589_v20 = vadd.f32 %v11588_v33, %v11576_v6 }
0x1aba   : > { %v11602_v42 = vadd.f32 %v11601_v12, %v11589_v20 }
0x1abb   : > { %v11564_v32 = vpop.f32.mrf.mxu2  ;;  %v11577_v31 = vpop.f32.mrf.mxu3 }
0x1ac7   : > { %v11640_v22 = vpop.f32.mrf.mxu0  ;;  %v11653_v21 = vpop.f32.mrf.mxu1 }
0x1acf   : > { %v11642_v59 = vpop.f32.mrf.mxu0  ;;  %v11655_v60 = vpop.f32.mrf.mxu1 }
0x1ad3   : > { %v11614_v19 = vpop.f32.mrf.mxu2  ;;  %v11627_v13 = vpop.f32.mrf.mxu3 }
0x1ad4   : > { %v11615_v47 = vadd.f32 %v11614_v19, %v11602_v42 }
0x1ad6   : > { %v11628_v58 = vadd.f32 %v11627_v13, %v11615_v47 }
0x1ad8   : > { %v11641_v35 = vadd.f32 %v11640_v22, %v11628_v58 }
0x1ada   : > { %v11654_v7 = vadd.f32 %v11653_v21, %v11641_v35 }
0x1adb   : > { %v11616_v0 = vpop.f32.mrf.mxu2  ;;  %v11629_v24 = vpop.f32.mrf.mxu3 }
0x1adc   : > { %v11657_v15 = vadd.f32 %v11654_v7, %v18499_v29  ;;  %v13976_v29 = vld [vmem:[%s19253_s26] sm:$0xff] }
0x1add   : > { %11717 = vmatpush.bf16.msra.mxu2 %v13976_v29 }
0x1ade   : > { %v11660_v1 = vsel %vm866_vm0, %v11657_v15, 0.0 }
0x1adf   : > { %11661 = vadd.xlane.f32.xlu1 %v11660_v1 }
0x1b52   : > { %v11662_v11 = vpop.xlane.xlu1 %11661 }
0x1b53   : > { %v11663_v63 = vmul.f32 %v11662_v11, %v15310_v17 }
0x1b55   : > { %v11664_v10 = vsub.f32 %v11657_v15, %v11663_v63 }
0x1b57   : > { %v11665_v28 = vmul.f32 %v11664_v10, %v11664_v10 }
0x1b59   : > { %v11666_v30 = vsel %vm866_vm0, %v11665_v28, 0.0 }
0x1b5a   : > { %11667 = vadd.xlane.f32.xlu2 %v11666_v30 }
0x1bcd   : > { %v11668_v27 = vpop.xlane.xlu2 %11667 }
0x1bce   : > { %v11669_v23 = vmul.f32 %v11668_v27, %v15310_v17  ;;  %v14289_v17 = vld [vmem:[%s19107_s23 + $0x1] ss:$0 sm:$0xff] }
0x1bd0   : > { %v11670_v45 = vadd.f32 1e-05, %v11669_v23 }
0x1bd2   : > { %14431 = vrsqrt.f32 %v11670_v45  ;;  %vm11677_vm6 = vweird.f32 %v11670_v45 }
0x1bd8   : > { %v14432_v61 = vpop.eup %14431 }
0x1bd9   : > { %v11672_v52 = vmul.f32 %v14432_v61, %v11670_v45  ;;  %vm11678_vm5 = vweird.f32 %v14432_v61 }
0x1bda   : > { %vm11679_vm7 = vmor %vm11677_vm6, %vm11678_vm5 }
0x1bdb   : > { %v11673_v14 = vmul.f32 %v14432_v61, %v11672_v52 }
0x1bdd   : > { %v11674_v51 = vmul.f32 0.5, %v11673_v14 }
0x1bdf   : > { %v11675_v37 = vsub.f32 1.5, %v11674_v51 }
0x1be1   : > { %v11676_v36 = vmul.f32 %v14432_v61, %v11675_v37 }
0x1be3   : > { %v11680_v56 = vsel %vm11679_vm7, %v14432_v61, %v11676_v36 }
0x1be4   : > { %v11681_v46 = vmul.f32 %v11680_v56, %v11664_v10 }
0x1be6   : > { %v11683_v25 = vmul.f32 %v14288_v53, %v11681_v46 }
0x1be8   : > { %v11685_v9 = vadd.f32 %v14289_v17, %v11683_v25 }
0x1bea   : > { %v11690_v16 = vpack.c.bf16 %v11685_v9, %v11685_v9 }
0x1bec   : > { %13630 = vmatmul.msk.bf16.vlgmr.msra.gmra.mxu2 %vm866_vm0, %v11690_v16 }
0x1c6f   : > { %v11719_v40 = vpop.f32.mrf.mxu2 }
0x1c70   : > { %v11720_v50 = vadd.f32 %v14290_v34, %v11719_v40 }
0x1c72   : > { %11723 = vst [vmem:[%s823_s28] sm:$0xff] %v11720_v50 }
0x1c73   : > { %14463 = shalt.err (!%p14460_p3)
}
0x1c74   : > { %13978 = dma.vmem_to_hbm [thread:$0]  (%p14692_p5), %s11738_s24, 128, %s11740_s21, %s11725_s19  }
0x1c77   : > { %v11721_v57 = vpop.f32.mrf.mxu2 }
0x1c78 PF: > { %s19260_s13 = sld [smem:[#allocation8_spill]] }
0x1c79   : > { %s19261_s7 = sld [smem:[#allocation5_spill]] }
0x1c7e   : > { %p13984_p4 = scmp.ge.s32.totalorder %s19260_s13, 2 }
0x1c7f   : > { %s11751_s5 = sand.u32 1, %s19261_s7  }
0x1c80   : > { %p13981_p7 = pnand %p13984_p4, %p14696_p6  ;;  %s11752_s10 = scalar_lea.sflag [#allocation3], %s11751_s5 }
0x1c82   : > { %p13982_p8 = pneg %p13981_p7 }
0x1c84   : > { %14481 = dma.done.wait (%p13982_p8), %s11752_s10, 128  }
0x1c85   : > { %14483 = vsyncadd (%p13982_p8), %s11752_s10, 4294967168  ;;  %s19263_s28 = sld [smem:[#allocation10_spill]] }
0x1c86   : > { %s19264_s27 = sld [smem:[#allocation6_spill]] }
0x1c87   : > { %s19265_s3 = sld [smem:[#allocation7_spill]] }
0x1c88   : > { %s19266_s7 = sld [smem:[#allocation11_spill]] }
0x1c8b   : > { %p36_p9 = scmp.ge.s32.totalorder %s19263_s28, 4  }
0x1c8d   :  { %38 = sbr.rel (!%p36_p9) target bundleno = 24 (0x18), region = 178 }
0x1c92   :  { %11758 = vsyncpa [#allocation3], 1 }
0x1c93   :  { %11760 = vsyncpa [#allocation3 + $0x1], 1 }

</bundles_post_ra>
